<compile_context>
chip_gen: v7x
topology: tpu7x:2x2x1
jax: 0.10.0
libtpu: 0.0.40
codegen_flags: <defaults>
</compile_context>

<pallas_src>
import functools

import jax
import jax.numpy as jnp
from jax.experimental import pallas as pl
from jax.experimental.pallas import tpu as pltpu


# =============================================================================
# Wrapper-side weight repacking (plain JAX, runs once under jit)
# =============================================================================
def _conv_row_weights(w, b, *, w_in, pad_in, conv_pad, stride, pad_out):
    """Repack a PyTorch Conv2d weight (C_out, C_in, k, k).

    Activations are stored as 2D tiles: rows = padded image rows,
    lanes = padded_width * channels.  The conv becomes, per kernel row kh:
        out_row(oh) += in_row((pad_in-conv_pad) + stride*oh + kh) @ W[kh]
    with kernel columns / stride / output column padding folded into W[kh].
    Returns taps (k, Wp_in*C_in, Wo_p*C_out) and a (1, Wo_p*C_out) bias row
    (zero in the pad-column blocks so padding stays exactly zero downstream).
    """
    c_out, c_in, k, _ = w.shape
    wp_in = w_in + 2 * pad_in
    wo = (w_in + 2 * conv_pad - k) // stride + 1
    wo_p = wo + 2 * pad_out
    base = pad_in - conv_pad
    ows = jnp.arange(wo)
    taps = []
    for kh in range(k):
        wk = jnp.zeros((wp_in * c_in, wo_p * c_out), jnp.float32)
        for kw in range(k):
            p = jnp.zeros((wp_in, wo_p), jnp.float32)
            p = p.at[base + stride * ows + kw, pad_out + ows].set(1.0)
            wk = wk + jnp.kron(p, w[:, :, kh, kw].T.astype(jnp.float32))
        taps.append(wk)
    ind = jnp.zeros((1, wo_p), jnp.float32).at[0, pad_out:pad_out + wo].set(1.0)
    bias_row = jnp.kron(ind, b[None, :].astype(jnp.float32))
    return jnp.stack(taps), bias_row


# (output phase, tap) -> transposed-conv kernel index, for k=4, s=2, p=1.
_KTAP = {(0, 0): 3, (0, 1): 1, (1, 0): 2, (1, 1): 0}


def _deconv_row_weights(w, b, *, w_in, pad_out):
    """Polyphase repack of ConvTranspose2d(k=4, s=2, p=1) weight (C_in,C_out,4,4).

    Output row phase a in {0,1} (oh = 2m + a) is computed as
        out_a(m) = sum_dh in_row(m + a + dh) @ W[2a + dh]
    over the 1-padded input; both width phases are folded into W.
    """
    c_in, c_out, _, _ = w.shape
    wp_in = w_in + 2
    wo = 2 * w_in
    wo_p = wo + 2 * pad_out
    qs = jnp.arange(w_in)
    taps = []
    for a in range(2):
        for dh in range(2):
            kh = _KTAP[(a, dh)]
            wm = jnp.zeros((wp_in * c_in, wo_p * c_out), jnp.float32)
            for bp in range(2):
                for dw in range(2):
                    kw = _KTAP[(bp, dw)]
                    p = jnp.zeros((wp_in, wo_p), jnp.float32)
                    p = p.at[qs + bp + dw, pad_out + 2 * qs + bp].set(1.0)
                    wm = wm + jnp.kron(p, w[:, :, kh, kw].astype(jnp.float32))
            taps.append(wm)
    ind = jnp.zeros((1, wo_p), jnp.float32).at[0, pad_out:pad_out + wo].set(1.0)
    bias_row = jnp.kron(ind, b[None, :].astype(jnp.float32))
    return jnp.stack(taps), bias_row


def _vq_mats(codebook, *, w_lat, pad_out):
    """Matrices that let the VQ run on the (rows, (W+2p)*D) latent layout with
    only matmuls (no lane reshapes): per latent column w we get distance helpers
    A_w (selects the w-th D-block against E^T), B_w (block row-sum) and C_w
    (places the gathered codebook vector back into the padded lane layout)."""
    k, d = codebook.shape
    wp = w_lat + 2 * pad_out
    a_l, b_l, c_l = [], [], []
    for w in range(w_lat):
        lo = (pad_out + w) * d
        a_l.append(jnp.zeros((wp * d, k), jnp.float32).at[lo:lo + d, :].set(codebook.T))
        b_l.append(jnp.zeros((wp * d, k), jnp.float32).at[lo:lo + d, :].set(1.0))
        c_l.append(jnp.zeros((k, wp * d), jnp.float32).at[:, lo:lo + d].set(codebook))
    e2 = jnp.sum(codebook * codebook, axis=1)[None, :]
    return jnp.stack(a_l), jnp.stack(b_l), jnp.stack(c_l), e2


# =============================================================================
# The fused kernel
# =============================================================================
def _make_kernel(cfg):
    H = cfg["spatial"]
    Hc1 = H // 2
    Hl = H // 4
    D = cfg["embedding_dim"]
    K = cfg["num_embeddings"]
    NR = cfg["num_res_layers"]
    NB = cfg["batch"]
    CC = cfg["commitment_cost"]

    def kernel(*refs):
        it = iter(refs)
        xe_ref, xo_ref = next(it), next(it)
        w1, b1 = next(it), next(it)
        w2, b2 = next(it), next(it)
        w3, b3 = next(it), next(it)
        enc_res = [tuple(next(it) for _ in range(4)) for _ in range(NR)]
        wz, bz = next(it), next(it)
        vq_a, vq_b, vq_c, vq_e2 = next(it), next(it), next(it), next(it)
        wd, bd = next(it), next(it)
        dec_res = [tuple(next(it) for _ in range(4)) for _ in range(NR)]
        wt1, bt1 = next(it), next(it)
        wt2, bt2 = next(it), next(it)
        out_ref, loss_ref = next(it), next(it)
        s2e, s2o, s3, s_he, s_q, s_hd, s_d2 = (next(it) for _ in range(7))

        f32 = jnp.float32
        dot = functools.partial(jnp.dot, preferred_element_type=f32)

        # ----------------- encoder conv1: k4 s2 p1 + ReLU --------------------
        xe = xe_ref[0]                                    # even padded rows
        xo = xo_ref[0]                                    # odd padded rows
        acc1 = (dot(xe[0:Hc1, :], w1[0]) + dot(xo[0:Hc1, :], w1[1]) +
                dot(xe[1:Hc1 + 1, :], w1[2]) + dot(xo[1:Hc1 + 1, :], w1[3]))
        acc1 = jnp.maximum(acc1 + b1[...], 0.0)           # (Hc1, (Hc1+2)*HC/2)

        # re-pack rows into the zero-padded even/odd row-phase scratches that
        # feed the second stride-2 conv (activation never leaves VMEM).
        s2e[...] = jnp.zeros_like(s2e)
        s2o[...] = jnp.zeros_like(s2o)
        for t in range(Hc1 // 2):
            s2e[1 + t:2 + t, :] = acc1[2 * t + 1:2 * t + 2, :]
            s2o[t:t + 1, :] = acc1[2 * t:2 * t + 1, :]

        # ----------------- encoder conv2: k4 s2 p1 + ReLU --------------------
        e2v, o2v = s2e[...], s2o[...]
        acc2 = (dot(e2v[0:Hl, :], w2[0]) + dot(o2v[0:Hl, :], w2[1]) +
                dot(e2v[1:Hl + 1, :], w2[2]) + dot(o2v[1:Hl + 1, :], w2[3]))
        acc2 = jnp.maximum(acc2 + b2[...], 0.0)           # (Hl, (Hl+2)*HC)

        # ----------------- encoder conv3: k3 s1 p1 (no act) ------------------
        s3[...] = jnp.zeros_like(s3)
        s3[1:1 + Hl, :] = acc2
        s3v = s3[...]
        acc3 = b3[...]
        for kh in range(3):
            acc3 = acc3 + dot(s3v[kh:kh + Hl, :], w3[kh])  # (Hl, (Hl+2)*HC)

        # ----------------- residual stack (fused per layer) ------------------
        def run_res_stack(h_ref, layers, seed):
            h_ref[...] = jnp.zeros_like(h_ref)
            h_ref[1:1 + Hl, :] = seed
            for (w3x3, b3x3, w1x1, b1x1) in layers:
                hv = jnp.maximum(h_ref[...], 0.0)          # ReLU(x); pads stay 0
                t = b3x3[...]
                for kh in range(3):
                    t = t + dot(hv[kh:kh + Hl, :], w3x3[kh])
                t = jnp.maximum(t, 0.0)                    # (Hl, Hl*RH)
                o = dot(t, w1x1[0]) + b1x1[...]            # (Hl, (Hl+2)*HC)
                h_ref[1:1 + Hl, :] = h_ref[1:1 + Hl, :] + o   # residual add
            return jnp.maximum(h_ref[...], 0.0)            # trailing F.relu

        h_enc = run_res_stack(s_he, enc_res, acc3)          # (Hl+2, (Hl+2)*HC)

        # ----------------- pre-VQ 1x1 conv ------------------------------------
        z = dot(h_enc[1:1 + Hl, :], wz[0]) + bz[...]        # (Hl, (Hl+2)*D)

        # ----------------- vector quantizer -----------------------------------
        z_sq = z * z
        quant = jnp.zeros_like(z)
        for w in range(Hl):
            ze = dot(z, vq_a[w])                            # (Hl, K) = z . e_k
            zn = dot(z_sq, vq_b[w])                         # (Hl, K) = ||z||^2
            dist = zn - 2.0 * ze + vq_e2[...]
            dmin = jnp.min(dist, axis=1, keepdims=True)
            lane = jax.lax.broadcasted_iota(jnp.int32, dist.shape, 1)
            idx = jnp.min(jnp.where(dist <= dmin, lane, K), axis=1, keepdims=True)
            onehot = (lane == idx).astype(f32)
            quant = quant + dot(onehot, vq_c[w])            # codebook gather
        diff = quant - z
        # q_latent_loss + commitment * e_latent_loss (identical forward value);
        # this step's partial of the batch mean, summed in the wrapper.
        loss_ref[0] = ((1.0 + CC) / float(NB * Hl * Hl * D)) * jnp.sum(
            diff * diff, keepdims=True)

        # ----------------- decoder conv: k3 s1 p1 (no act) --------------------
        s_q[...] = jnp.zeros_like(s_q)
        s_q[1:1 + Hl, :] = quant                            # straight-through fwd
        sqv = s_q[...]
        accd = bd[...]
        for kh in range(3):
            accd = accd + dot(sqv[kh:kh + Hl, :], wd[kh])

        h_dec = run_res_stack(s_hd, dec_res, accd)           # (Hl+2, (Hl+2)*HC)

        # ----------------- deconv1: k4 s2 p1 + ReLU (polyphase) ---------------
        s_d2[...] = jnp.zeros_like(s_d2)
        for a in range(2):
            cand = bt1[...]
            for dh in range(2):
                cand = cand + dot(h_dec[a + dh:a + dh + Hl, :], wt1[2 * a + dh])
            cand = jnp.maximum(cand, 0.0)                    # (Hl, (Hc1+2)*HC/2)
            for m in range(Hl):                              # interleave row phases
                s_d2[1 + 2 * m + a:2 + 2 * m + a, :] = cand[m:m + 1, :]

        # ----------------- deconv2: k4 s2 p1 + tanh (polyphase) ---------------
        d2v = s_d2[...]
        for a in range(2):
            cand = bt2[...]
            for dh in range(2):
                cand = cand + dot(d2v[a + dh:a + dh + Hc1, :], wt2[2 * a + dh])
            out_ref[0, a, :, :] = jnp.tanh(cand)             # (Hc1, H*3)

    return kernel


# =============================================================================
# Public forward (NCHW in / NCHW out, like the PyTorch module)
# =============================================================================
@functools.partial(jax.jit, static_argnames=("commitment_cost",))
def vqvae_forward(x_nchw, params, commitment_cost=0.25):
    n, c_in, h, w = x_nchw.shape
    assert h == w and h % 4 == 0
    hc = params["enc_conv3"][0].shape[0]
    emb_k, emb_d = params["codebook"].shape
    nr = len(params["enc_res"])
    hl, hc1 = h // 4, h // 2

    cfg = dict(spatial=h, embedding_dim=emb_d, num_embeddings=emb_k,
               num_res_layers=nr, batch=n, commitment_cost=commitment_cost)

    # --- input: NCHW -> NHWC, zero-pad by 1, split row parity, flatten W*C ---
    x = jnp.transpose(x_nchw, (0, 2, 3, 1)).astype(jnp.float32)
    xp = jnp.pad(x, ((0, 0), (1, 1), (1, 1), (0, 0)))
    xe = xp[:, 0::2].reshape(n, hc1 + 1, (h + 2) * c_in)
    xo = xp[:, 1::2].reshape(n, hc1 + 1, (h + 2) * c_in)

    # --- repack all weights into the row-matmul form -------------------------
    ops = []
    ops += _conv_row_weights(*params["enc_conv1"], w_in=h, pad_in=1, conv_pad=1,
                             stride=2, pad_out=1)
    ops += _conv_row_weights(*params["enc_conv2"], w_in=hc1, pad_in=1, conv_pad=1,
                             stride=2, pad_out=1)
    ops += _conv_row_weights(*params["enc_conv3"], w_in=hl, pad_in=1, conv_pad=1,
                             stride=1, pad_out=1)
    for (w3, b3), (w1, b1) in params["enc_res"]:
        ops += _conv_row_weights(w3, b3, w_in=hl, pad_in=1, conv_pad=1, stride=1,
                                 pad_out=0)
        ops += _conv_row_weights(w1, b1, w_in=hl, pad_in=0, conv_pad=0, stride=1,
                                 pad_out=1)
    ops += _conv_row_weights(*params["pre_vq"], w_in=hl, pad_in=1, conv_pad=0,
                             stride=1, pad_out=1)
    ops += _vq_mats(params["codebook"], w_lat=hl, pad_out=1)
    ops += _conv_row_weights(*params["dec_conv"], w_in=hl, pad_in=1, conv_pad=1,
                             stride=1, pad_out=1)
    for (w3, b3), (w1, b1) in params["dec_res"]:
        ops += _conv_row_weights(w3, b3, w_in=hl, pad_in=1, conv_pad=1, stride=1,
                                 pad_out=0)
        ops += _conv_row_weights(w1, b1, w_in=hl, pad_in=0, conv_pad=0, stride=1,
                                 pad_out=1)
    ops += _deconv_row_weights(*params["deconv1"], w_in=hl, pad_out=1)
    ops += _deconv_row_weights(*params["deconv2"], w_in=hc1, pad_out=0)
    operands = [xe, xo] + list(ops)

    # --- specs: grid over batch; full-array blocks for all weights -----------
    def batch_spec(arr):
        nd = arr.ndim
        return pl.BlockSpec((1,) + arr.shape[1:],
                            lambda i, _nd=nd: (i,) + (0,) * (_nd - 1))

    def full_spec(arr):
        nd = arr.ndim
        return pl.BlockSpec(arr.shape, lambda i, _nd=nd: (0,) * _nd)

    in_specs = [batch_spec(xe), batch_spec(xo)] + [full_spec(a) for a in ops]

    out_shape = (
        jax.ShapeDtypeStruct((n, 2, hc1, h * 3), jnp.float32),  # per-row-phase recon
        jax.ShapeDtypeStruct((n, 1, 1), jnp.float32),           # per-image loss part
    )
    out_specs = (
        pl.BlockSpec((1, 2, hc1, h * 3), lambda i: (i, 0, 0, 0)),
        pl.BlockSpec((1, 1, 1), lambda i: (i, 0, 0)),
    )

    l_c1 = (hc1 + 2) * (hc // 2)
    l_h = (hl + 2) * hc
    l_z = (hl + 2) * emb_d
    l_d1 = (hc1 + 2) * (hc // 2)
    scratch_shapes = [
        pltpu.VMEM((hc1 // 2 + 1, l_c1), jnp.float32),  # s2e: conv2 even-row phase
        pltpu.VMEM((hc1 // 2 + 1, l_c1), jnp.float32),  # s2o: conv2 odd-row phase
        pltpu.VMEM((hl + 2, l_h), jnp.float32),         # s3 : padded conv2 output
        pltpu.VMEM((hl + 2, l_h), jnp.float32),         # s_he: encoder residual h
        pltpu.VMEM((hl + 2, l_z), jnp.float32),         # s_q : padded quantized z
        pltpu.VMEM((hl + 2, l_h), jnp.float32),         # s_hd: decoder residual h
        pltpu.VMEM((hc1 + 2, l_d1), jnp.float32),       # s_d2: padded deconv1 out
    ]

    out, loss_parts = pl.pallas_call(
        _make_kernel(cfg),
        out_shape=out_shape,
        grid_spec=pltpu.PrefetchScalarGridSpec(
            num_scalar_prefetch=0,
            grid=(n,),
            in_specs=in_specs,
            out_specs=out_specs,
            scratch_shapes=scratch_shapes,
        ),
        compiler_params=pltpu.CompilerParams(
            dimension_semantics=("parallel",)),
    )(*operands)

    # --- interleave the two output row phases and convert back to NCHW -------
    o = out.reshape(n, 2, hc1, h, 3)
    o = jnp.transpose(o, (0, 2, 1, 3, 4)).reshape(n, h, h, 3)
    x_recon = jnp.transpose(o, (0, 3, 1, 2))
    return x_recon, jnp.sum(loss_parts)


# =============================================================================
# Deterministic synthetic parameter initialization (shapes from __init__)
# =============================================================================
def _init_conv(key, c_out, c_in, k):
    kw, kb = jax.random.split(key)
    bound = (c_in * k * k) ** -0.5
    w = jax.random.uniform(kw, (c_out, c_in, k, k), jnp.float32, -bound, bound)
    b = jax.random.uniform(kb, (c_out,), jnp.float32, -bound, bound)
    return w, b


def _init_convT(key, c_in, c_out, k):
    kw, kb = jax.random.split(key)
    bound = (c_in * k * k) ** -0.5
    w = jax.random.uniform(kw, (c_in, c_out, k, k), jnp.float32, -bound, bound)
    b = jax.random.uniform(kb, (c_out,), jnp.float32, -bound, bound)
    return w, b


def init_params(key, in_channels, embedding_dim, num_embeddings,
                hidden_channels, res_hidden_channels, num_res_layers):
    keys = iter(jax.random.split(key, 64))
    hc, rh = hidden_channels, res_hidden_channels
    p = {}
    p["enc_conv1"] = _init_conv(next(keys), hc // 2, in_channels, 4)
    p["enc_conv2"] = _init_conv(next(keys), hc, hc // 2, 4)
    p["enc_conv3"] = _init_conv(next(keys), hc, hc, 3)
    p["enc_res"] = [(_init_conv(next(keys), rh, hc, 3),
                     _init_conv(next(keys), hc, rh, 1))
                    for _ in range(num_res_layers)]
    p["pre_vq"] = _init_conv(next(keys), embedding_dim, hc, 1)
    p["codebook"] = jax.random.uniform(
        next(keys), (num_embeddings, embedding_dim), jnp.float32,
        -1.0 / num_embeddings, 1.0 / num_embeddings)
    p["dec_conv"] = _init_conv(next(keys), hc, embedding_dim, 3)
    p["dec_res"] = [(_init_conv(next(keys), rh, hc, 3),
                     _init_conv(next(keys), hc, rh, 1))
                    for _ in range(num_res_layers)]
    p["deconv1"] = _init_convT(next(keys), hc, hc // 2, 4)
    p["deconv2"] = _init_convT(next(keys), hc // 2, 3, 4)
    return p


if __name__ == "__main__":
    root = jax.random.PRNGKey(0)
    pkey, xkey = jax.random.split(root)

    model_cfg = dict(in_channels=3, embedding_dim=16, num_embeddings=32,
                     hidden_channels=32, res_hidden_channels=8, num_res_layers=2)
    params = init_params(pkey, **model_cfg)

    x = jax.random.normal(xkey, (2, 3, 16, 16), jnp.float32)

    x_recon, vq_loss = vqvae_forward(x, params, commitment_cost=0.25)
    jax.block_until_ready((x_recon, vq_loss))

    assert x_recon.shape == (2, 3, 16, 16)
    assert x_recon.dtype == jnp.float32
    assert vq_loss.shape == ()
    print("KERNEL_OK")
</pallas_src>

<mosaic_0001>
module attributes {stable_mosaic.version = 11 : i64} {
  func.func @kernel(%arg0: i32, %arg1: memref<1x9x54xf32, #tpu.memory_space<vmem>>, %arg2: memref<1x9x54xf32, #tpu.memory_space<vmem>>, %arg3: memref<4x54x160xf32, #tpu.memory_space<vmem>>, %arg4: memref<1x160xf32, #tpu.memory_space<vmem>>, %arg5: memref<4x160x192xf32, #tpu.memory_space<vmem>>, %arg6: memref<1x192xf32, #tpu.memory_space<vmem>>, %arg7: memref<3x192x192xf32, #tpu.memory_space<vmem>>, %arg8: memref<1x192xf32, #tpu.memory_space<vmem>>, %arg9: memref<3x192x32xf32, #tpu.memory_space<vmem>>, %arg10: memref<1x32xf32, #tpu.memory_space<vmem>>, %arg11: memref<1x32x192xf32, #tpu.memory_space<vmem>>, %arg12: memref<1x192xf32, #tpu.memory_space<vmem>>, %arg13: memref<3x192x32xf32, #tpu.memory_space<vmem>>, %arg14: memref<1x32xf32, #tpu.memory_space<vmem>>, %arg15: memref<1x32x192xf32, #tpu.memory_space<vmem>>, %arg16: memref<1x192xf32, #tpu.memory_space<vmem>>, %arg17: memref<1x192x96xf32, #tpu.memory_space<vmem>>, %arg18: memref<1x96xf32, #tpu.memory_space<vmem>>, %arg19: memref<4x96x32xf32, #tpu.memory_space<vmem>>, %arg20: memref<4x96x32xf32, #tpu.memory_space<vmem>>, %arg21: memref<4x32x96xf32, #tpu.memory_space<vmem>>, %arg22: memref<1x32xf32, #tpu.memory_space<vmem>>, %arg23: memref<3x96x192xf32, #tpu.memory_space<vmem>>, %arg24: memref<1x192xf32, #tpu.memory_space<vmem>>, %arg25: memref<3x192x32xf32, #tpu.memory_space<vmem>>, %arg26: memref<1x32xf32, #tpu.memory_space<vmem>>, %arg27: memref<1x32x192xf32, #tpu.memory_space<vmem>>, %arg28: memref<1x192xf32, #tpu.memory_space<vmem>>, %arg29: memref<3x192x32xf32, #tpu.memory_space<vmem>>, %arg30: memref<1x32xf32, #tpu.memory_space<vmem>>, %arg31: memref<1x32x192xf32, #tpu.memory_space<vmem>>, %arg32: memref<1x192xf32, #tpu.memory_space<vmem>>, %arg33: memref<4x192x160xf32, #tpu.memory_space<vmem>>, %arg34: memref<1x160xf32, #tpu.memory_space<vmem>>, %arg35: memref<4x160x48xf32, #tpu.memory_space<vmem>>, %arg36: memref<1x48xf32, #tpu.memory_space<vmem>>, %arg37: memref<1x2x8x48xf32, #tpu.memory_space<vmem>>, %arg38: memref<1x1x1xf32, #tpu.memory_space<vmem>>, %arg39: memref<5x160xf32, #tpu.memory_space<vmem>>, %arg40: memref<5x160xf32, #tpu.memory_space<vmem>>, %arg41: memref<6x192xf32, #tpu.memory_space<vmem>>, %arg42: memref<6x192xf32, #tpu.memory_space<vmem>>, %arg43: memref<6x96xf32, #tpu.memory_space<vmem>>, %arg44: memref<6x192xf32, #tpu.memory_space<vmem>>, %arg45: memref<10x160xf32, #tpu.memory_space<vmem>>) attributes {dimension_semantics = [#tpu.dimension_semantics<parallel>], iteration_bounds = array<i64: 2>, scalar_prefetch = 0 : i64, scratch_operands = 7 : i64, tpu.core_type = #tpu.core_type<tc>, window_params = [{transform_indices = @transform_0, window_bounds = array<i64: 1, 9, 54>}, {transform_indices = @transform_1, window_bounds = array<i64: 1, 9, 54>}, {pipeline_mode = #tpu.pipeline_mode<synchronous>, transform_indices = @transform_2, window_bounds = array<i64: 4, 54, 160>}, {pipeline_mode = #tpu.pipeline_mode<synchronous>, transform_indices = @transform_3, window_bounds = array<i64: 1, 160>}, {pipeline_mode = #tpu.pipeline_mode<synchronous>, transform_indices = @transform_4, window_bounds = array<i64: 4, 160, 192>}, {pipeline_mode = #tpu.pipeline_mode<synchronous>, transform_indices = @transform_5, window_bounds = array<i64: 1, 192>}, {pipeline_mode = #tpu.pipeline_mode<synchronous>, transform_indices = @transform_6, window_bounds = array<i64: 3, 192, 192>}, {pipeline_mode = #tpu.pipeline_mode<synchronous>, transform_indices = @transform_7, window_bounds = array<i64: 1, 192>}, {pipeline_mode = #tpu.pipeline_mode<synchronous>, transform_indices = @transform_8, window_bounds = array<i64: 3, 192, 32>}, {pipeline_mode = #tpu.pipeline_mode<synchronous>, transform_indices = @transform_9, window_bounds = array<i64: 1, 32>}, {pipeline_mode = #tpu.pipeline_mode<synchronous>, transform_indices = @transform_10, window_bounds = array<i64: 1, 32, 192>}, {pipeline_mode = #tpu.pipeline_mode<synchronous>, transform_indices = @transform_11, window_bounds = array<i64: 1, 192>}, {pipeline_mode = #tpu.pipeline_mode<synchronous>, transform_indices = @transform_12, window_bounds = array<i64: 3, 192, 32>}, {pipeline_mode = #tpu.pipeline_mode<synchronous>, transform_indices = @transform_13, window_bounds = array<i64: 1, 32>}, {pipeline_mode = #tpu.pipeline_mode<synchronous>, transform_indices = @transform_14, window_bounds = array<i64: 1, 32, 192>}, {pipeline_mode = #tpu.pipeline_mode<synchronous>, transform_indices = @transform_15, window_bounds = array<i64: 1, 192>}, {pipeline_mode = #tpu.pipeline_mode<synchronous>, transform_indices = @transform_16, window_bounds = array<i64: 1, 192, 96>}, {pipeline_mode = #tpu.pipeline_mode<synchronous>, transform_indices = @transform_17, window_bounds = array<i64: 1, 96>}, {pipeline_mode = #tpu.pipeline_mode<synchronous>, transform_indices = @transform_18, window_bounds = array<i64: 4, 96, 32>}, {pipeline_mode = #tpu.pipeline_mode<synchronous>, transform_indices = @transform_19, window_bounds = array<i64: 4, 96, 32>}, {pipeline_mode = #tpu.pipeline_mode<synchronous>, transform_indices = @transform_20, window_bounds = array<i64: 4, 32, 96>}, {pipeline_mode = #tpu.pipeline_mode<synchronous>, transform_indices = @transform_21, window_bounds = array<i64: 1, 32>}, {pipeline_mode = #tpu.pipeline_mode<synchronous>, transform_indices = @transform_22, window_bounds = array<i64: 3, 96, 192>}, {pipeline_mode = #tpu.pipeline_mode<synchronous>, transform_indices = @transform_23, window_bounds = array<i64: 1, 192>}, {pipeline_mode = #tpu.pipeline_mode<synchronous>, transform_indices = @transform_24, window_bounds = array<i64: 3, 192, 32>}, {pipeline_mode = #tpu.pipeline_mode<synchronous>, transform_indices = @transform_25, window_bounds = array<i64: 1, 32>}, {pipeline_mode = #tpu.pipeline_mode<synchronous>, transform_indices = @transform_26, window_bounds = array<i64: 1, 32, 192>}, {pipeline_mode = #tpu.pipeline_mode<synchronous>, transform_indices = @transform_27, window_bounds = array<i64: 1, 192>}, {pipeline_mode = #tpu.pipeline_mode<synchronous>, transform_indices = @transform_28, window_bounds = array<i64: 3, 192, 32>}, {pipeline_mode = #tpu.pipeline_mode<synchronous>, transform_indices = @transform_29, window_bounds = array<i64: 1, 32>}, {pipeline_mode = #tpu.pipeline_mode<synchronous>, transform_indices = @transform_30, window_bounds = array<i64: 1, 32, 192>}, {pipeline_mode = #tpu.pipeline_mode<synchronous>, transform_indices = @transform_31, window_bounds = array<i64: 1, 192>}, {pipeline_mode = #tpu.pipeline_mode<synchronous>, transform_indices = @transform_32, window_bounds = array<i64: 4, 192, 160>}, {pipeline_mode = #tpu.pipeline_mode<synchronous>, transform_indices = @transform_33, window_bounds = array<i64: 1, 160>}, {pipeline_mode = #tpu.pipeline_mode<synchronous>, transform_indices = @transform_34, window_bounds = array<i64: 4, 160, 48>}, {pipeline_mode = #tpu.pipeline_mode<synchronous>, transform_indices = @transform_35, window_bounds = array<i64: 1, 48>}, {transform_indices = @transform_36, window_bounds = array<i64: 1, 2, 8, 48>}, {transform_indices = @transform_37, window_bounds = array<i64: 1, 1, 1>}]} {
    %c0 = arith.constant 0 : index
    %c0_0 = arith.constant 0 : index
    %c0_1 = arith.constant 0 : index
    %0 = vector.load %arg1[%c0, %c0_0, %c0_1] : memref<1x9x54xf32, #tpu.memory_space<vmem>>, vector<1x9x54xf32>
    %1 = vector.shape_cast %0 : vector<1x9x54xf32> to vector<9x54xf32>
    %c0_2 = arith.constant 0 : index
    %c0_3 = arith.constant 0 : index
    %c0_4 = arith.constant 0 : index
    %2 = vector.load %arg2[%c0_2, %c0_3, %c0_4] : memref<1x9x54xf32, #tpu.memory_space<vmem>>, vector<1x9x54xf32>
    %3 = vector.shape_cast %2 : vector<1x9x54xf32> to vector<9x54xf32>
    %4 = vector.extract_strided_slice %1 {offsets = [0, 0], sizes = [8, 54], strides = [1, 1]} : vector<9x54xf32> to vector<8x54xf32>
    %c0_5 = arith.constant 0 : index
    %c0_6 = arith.constant 0 : index
    %c0_7 = arith.constant 0 : index
    %5 = vector.load %arg3[%c0_5, %c0_6, %c0_7] : memref<4x54x160xf32, #tpu.memory_space<vmem>>, vector<1x54x160xf32>
    %6 = vector.shape_cast %5 : vector<1x54x160xf32> to vector<54x160xf32>
    %cst = arith.constant dense<0.000000e+00> : vector<8x160xf32>
    %7 = tpu.matmul %4, %6, %cst {dimension_numbers = #tpu.dot_dimension_numbers<[1], [0], [0], [1], [0, 0, 1, 1], [], []>} : vector<8x54xf32>, vector<54x160xf32>, vector<8x160xf32> -> vector<8x160xf32>
    %8 = vector.extract_strided_slice %3 {offsets = [0, 0], sizes = [8, 54], strides = [1, 1]} : vector<9x54xf32> to vector<8x54xf32>
    %c1 = arith.constant 1 : index
    %c0_8 = arith.constant 0 : index
    %c0_9 = arith.constant 0 : index
    %9 = vector.load %arg3[%c1, %c0_8, %c0_9] : memref<4x54x160xf32, #tpu.memory_space<vmem>>, vector<1x54x160xf32>
    %10 = vector.shape_cast %9 : vector<1x54x160xf32> to vector<54x160xf32>
    %cst_10 = arith.constant dense<0.000000e+00> : vector<8x160xf32>
    %11 = tpu.matmul %8, %10, %cst_10 {dimension_numbers = #tpu.dot_dimension_numbers<[1], [0], [0], [1], [0, 0, 1, 1], [], []>} : vector<8x54xf32>, vector<54x160xf32>, vector<8x160xf32> -> vector<8x160xf32>
    %12 = arith.addf %7, %11 : vector<8x160xf32>
    %13 = vector.extract_strided_slice %1 {offsets = [1, 0], sizes = [8, 54], strides = [1, 1]} : vector<9x54xf32> to vector<8x54xf32>
    %c2 = arith.constant 2 : index
    %c0_11 = arith.constant 0 : index
    %c0_12 = arith.constant 0 : index
    %14 = vector.load %arg3[%c2, %c0_11, %c0_12] : memref<4x54x160xf32, #tpu.memory_space<vmem>>, vector<1x54x160xf32>
    %15 = vector.shape_cast %14 : vector<1x54x160xf32> to vector<54x160xf32>
    %cst_13 = arith.constant dense<0.000000e+00> : vector<8x160xf32>
    %16 = tpu.matmul %13, %15, %cst_13 {dimension_numbers = #tpu.dot_dimension_numbers<[1], [0], [0], [1], [0, 0, 1, 1], [], []>} : vector<8x54xf32>, vector<54x160xf32>, vector<8x160xf32> -> vector<8x160xf32>
    %17 = arith.addf %12, %16 : vector<8x160xf32>
    %18 = vector.extract_strided_slice %3 {offsets = [1, 0], sizes = [8, 54], strides = [1, 1]} : vector<9x54xf32> to vector<8x54xf32>
    %c3 = arith.constant 3 : index
    %c0_14 = arith.constant 0 : index
    %c0_15 = arith.constant 0 : index
    %19 = vector.load %arg3[%c3, %c0_14, %c0_15] : memref<4x54x160xf32, #tpu.memory_space<vmem>>, vector<1x54x160xf32>
    %20 = vector.shape_cast %19 : vector<1x54x160xf32> to vector<54x160xf32>
    %cst_16 = arith.constant dense<0.000000e+00> : vector<8x160xf32>
    %21 = tpu.matmul %18, %20, %cst_16 {dimension_numbers = #tpu.dot_dimension_numbers<[1], [0], [0], [1], [0, 0, 1, 1], [], []>} : vector<8x54xf32>, vector<54x160xf32>, vector<8x160xf32> -> vector<8x160xf32>
    %22 = arith.addf %17, %21 : vector<8x160xf32>
    %c0_17 = arith.constant 0 : index
    %c0_18 = arith.constant 0 : index
    %23 = vector.load %arg4[%c0_17, %c0_18] : memref<1x160xf32, #tpu.memory_space<vmem>>, vector<1x160xf32>
    %24 = vector.broadcast %23 : vector<1x160xf32> to vector<8x160xf32>
    %25 = arith.addf %22, %24 : vector<8x160xf32>
    %cst_19 = arith.constant 0.000000e+00 : f32
    %26 = vector.broadcast %cst_19 : f32 to vector<8x160xf32>
    %27 = arith.maximumf %25, %26 : vector<8x160xf32>
    %cst_20 = arith.constant 0.000000e+00 : f32
    %28 = vector.broadcast %cst_20 : f32 to vector<5x160xf32>
    %c0_21 = arith.constant 0 : index
    %c0_22 = arith.constant 0 : index
    %29 = vector.load %arg39[%c0_21, %c0_22] : memref<5x160xf32, #tpu.memory_space<vmem>>, vector<5x160xf32>
    tpu.vector_store %arg39[%c0_21, %c0_22], %28 {strides = array<i32>} : memref<5x160xf32, #tpu.memory_space<vmem>>, vector<5x160xf32>,
    %cst_23 = arith.constant 0.000000e+00 : f32
    %30 = vector.broadcast %cst_23 : f32 to vector<5x160xf32>
    %c0_24 = arith.constant 0 : index
    %c0_25 = arith.constant 0 : index
    %31 = vector.load %arg40[%c0_24, %c0_25] : memref<5x160xf32, #tpu.memory_space<vmem>>, vector<5x160xf32>
    tpu.vector_store %arg40[%c0_24, %c0_25], %30 {strides = array<i32>} : memref<5x160xf32, #tpu.memory_space<vmem>>, vector<5x160xf32>,
    %32 = vector.extract_strided_slice %27 {offsets = [1, 0], sizes = [1, 160], strides = [1, 1]} : vector<8x160xf32> to vector<1x160xf32>
    %c1_26 = arith.constant 1 : index
    %c0_27 = arith.constant 0 : index
    %33 = vector.load %arg39[%c1_26, %c0_27] : memref<5x160xf32, #tpu.memory_space<vmem>>, vector<1x160xf32>
    tpu.vector_store %arg39[%c1_26, %c0_27], %32 {strides = array<i32>} : memref<5x160xf32, #tpu.memory_space<vmem>>, vector<1x160xf32>,
    %34 = vector.extract_strided_slice %27 {offsets = [0, 0], sizes = [1, 160], strides = [1, 1]} : vector<8x160xf32> to vector<1x160xf32>
    %c0_28 = arith.constant 0 : index
    %c0_29 = arith.constant 0 : index
    %35 = vector.load %arg40[%c0_28, %c0_29] : memref<5x160xf32, #tpu.memory_space<vmem>>, vector<1x160xf32>
    tpu.vector_store %arg40[%c0_28, %c0_29], %34 {strides = array<i32>} : memref<5x160xf32, #tpu.memory_space<vmem>>, vector<1x160xf32>,
    %36 = vector.extract_strided_slice %27 {offsets = [3, 0], sizes = [1, 160], strides = [1, 1]} : vector<8x160xf32> to vector<1x160xf32>
    %c2_30 = arith.constant 2 : index
    %c0_31 = arith.constant 0 : index
    %37 = vector.load %arg39[%c2_30, %c0_31] : memref<5x160xf32, #tpu.memory_space<vmem>>, vector<1x160xf32>
    tpu.vector_store %arg39[%c2_30, %c0_31], %36 {strides = array<i32>} : memref<5x160xf32, #tpu.memory_space<vmem>>, vector<1x160xf32>,
    %38 = vector.extract_strided_slice %27 {offsets = [2, 0], sizes = [1, 160], strides = [1, 1]} : vector<8x160xf32> to vector<1x160xf32>
    %c1_32 = arith.constant 1 : index
    %c0_33 = arith.constant 0 : index
    %39 = vector.load %arg40[%c1_32, %c0_33] : memref<5x160xf32, #tpu.memory_space<vmem>>, vector<1x160xf32>
    tpu.vector_store %arg40[%c1_32, %c0_33], %38 {strides = array<i32>} : memref<5x160xf32, #tpu.memory_space<vmem>>, vector<1x160xf32>,
    %40 = vector.extract_strided_slice %27 {offsets = [5, 0], sizes = [1, 160], strides = [1, 1]} : vector<8x160xf32> to vector<1x160xf32>
    %c3_34 = arith.constant 3 : index
    %c0_35 = arith.constant 0 : index
    %41 = vector.load %arg39[%c3_34, %c0_35] : memref<5x160xf32, #tpu.memory_space<vmem>>, vector<1x160xf32>
    tpu.vector_store %arg39[%c3_34, %c0_35], %40 {strides = array<i32>} : memref<5x160xf32, #tpu.memory_space<vmem>>, vector<1x160xf32>,
    %42 = vector.extract_strided_slice %27 {offsets = [4, 0], sizes = [1, 160], strides = [1, 1]} : vector<8x160xf32> to vector<1x160xf32>
    %c2_36 = arith.constant 2 : index
    %c0_37 = arith.constant 0 : index
    %43 = vector.load %arg40[%c2_36, %c0_37] : memref<5x160xf32, #tpu.memory_space<vmem>>, vector<1x160xf32>
    tpu.vector_store %arg40[%c2_36, %c0_37], %42 {strides = array<i32>} : memref<5x160xf32, #tpu.memory_space<vmem>>, vector<1x160xf32>,
    %44 = vector.extract_strided_slice %27 {offsets = [7, 0], sizes = [1, 160], strides = [1, 1]} : vector<8x160xf32> to vector<1x160xf32>
    %c4 = arith.constant 4 : index
    %c0_38 = arith.constant 0 : index
    %45 = vector.load %arg39[%c4, %c0_38] : memref<5x160xf32, #tpu.memory_space<vmem>>, vector<1x160xf32>
    tpu.vector_store %arg39[%c4, %c0_38], %44 {strides = array<i32>} : memref<5x160xf32, #tpu.memory_space<vmem>>, vector<1x160xf32>,
    %46 = vector.extract_strided_slice %27 {offsets = [6, 0], sizes = [1, 160], strides = [1, 1]} : vector<8x160xf32> to vector<1x160xf32>
    %c3_39 = arith.constant 3 : index
    %c0_40 = arith.constant 0 : index
    %47 = vector.load %arg40[%c3_39, %c0_40] : memref<5x160xf32, #tpu.memory_space<vmem>>, vector<1x160xf32>
    tpu.vector_store %arg40[%c3_39, %c0_40], %46 {strides = array<i32>} : memref<5x160xf32, #tpu.memory_space<vmem>>, vector<1x160xf32>,
    %c0_41 = arith.constant 0 : index
    %c0_42 = arith.constant 0 : index
    %48 = vector.load %arg39[%c0_41, %c0_42] : memref<5x160xf32, #tpu.memory_space<vmem>>, vector<5x160xf32>
    %c0_43 = arith.constant 0 : index
    %c0_44 = arith.constant 0 : index
    %49 = vector.load %arg40[%c0_43, %c0_44] : memref<5x160xf32, #tpu.memory_space<vmem>>, vector<5x160xf32>
    %50 = vector.extract_strided_slice %48 {offsets = [0, 0], sizes = [4, 160], strides = [1, 1]} : vector<5x160xf32> to vector<4x160xf32>
    %c0_45 = arith.constant 0 : index
    %c0_46 = arith.constant 0 : index
    %c0_47 = arith.constant 0 : index
    %51 = vector.load %arg5[%c0_45, %c0_46, %c0_47] : memref<4x160x192xf32, #tpu.memory_space<vmem>>, vector<1x160x192xf32>
    %52 = vector.shape_cast %51 : vector<1x160x192xf32> to vector<160x192xf32>
    %cst_48 = arith.constant dense<0.000000e+00> : vector<4x192xf32>
    %53 = tpu.matmul %50, %52, %cst_48 {dimension_numbers = #tpu.dot_dimension_numbers<[1], [0], [0], [1], [0, 0, 1, 1], [], []>} : vector<4x160xf32>, vector<160x192xf32>, vector<4x192xf32> -> vector<4x192xf32>
    %54 = vector.extract_strided_slice %49 {offsets = [0, 0], sizes = [4, 160], strides = [1, 1]} : vector<5x160xf32> to vector<4x160xf32>
    %c1_49 = arith.constant 1 : index
    %c0_50 = arith.constant 0 : index
    %c0_51 = arith.constant 0 : index
    %55 = vector.load %arg5[%c1_49, %c0_50, %c0_51] : memref<4x160x192xf32, #tpu.memory_space<vmem>>, vector<1x160x192xf32>
    %56 = vector.shape_cast %55 : vector<1x160x192xf32> to vector<160x192xf32>
    %cst_52 = arith.constant dense<0.000000e+00> : vector<4x192xf32>
    %57 = tpu.matmul %54, %56, %cst_52 {dimension_numbers = #tpu.dot_dimension_numbers<[1], [0], [0], [1], [0, 0, 1, 1], [], []>} : vector<4x160xf32>, vector<160x192xf32>, vector<4x192xf32> -> vector<4x192xf32>
    %58 = arith.addf %53, %57 : vector<4x192xf32>
    %59 = vector.extract_strided_slice %48 {offsets = [1, 0], sizes = [4, 160], strides = [1, 1]} : vector<5x160xf32> to vector<4x160xf32>
    %c2_53 = arith.constant 2 : index
    %c0_54 = arith.constant 0 : index
    %c0_55 = arith.constant 0 : index
    %60 = vector.load %arg5[%c2_53, %c0_54, %c0_55] : memref<4x160x192xf32, #tpu.memory_space<vmem>>, vector<1x160x192xf32>
    %61 = vector.shape_cast %60 : vector<1x160x192xf32> to vector<160x192xf32>
    %cst_56 = arith.constant dense<0.000000e+00> : vector<4x192xf32>
    %62 = tpu.matmul %59, %61, %cst_56 {dimension_numbers = #tpu.dot_dimension_numbers<[1], [0], [0], [1], [0, 0, 1, 1], [], []>} : vector<4x160xf32>, vector<160x192xf32>, vector<4x192xf32> -> vector<4x192xf32>
    %63 = arith.addf %58, %62 : vector<4x192xf32>
    %64 = vector.extract_strided_slice %49 {offsets = [1, 0], sizes = [4, 160], strides = [1, 1]} : vector<5x160xf32> to vector<4x160xf32>
    %c3_57 = arith.constant 3 : index
    %c0_58 = arith.constant 0 : index
    %c0_59 = arith.constant 0 : index
    %65 = vector.load %arg5[%c3_57, %c0_58, %c0_59] : memref<4x160x192xf32, #tpu.memory_space<vmem>>, vector<1x160x192xf32>
    %66 = vector.shape_cast %65 : vector<1x160x192xf32> to vector<160x192xf32>
    %cst_60 = arith.constant dense<0.000000e+00> : vector<4x192xf32>
    %67 = tpu.matmul %64, %66, %cst_60 {dimension_numbers = #tpu.dot_dimension_numbers<[1], [0], [0], [1], [0, 0, 1, 1], [], []>} : vector<4x160xf32>, vector<160x192xf32>, vector<4x192xf32> -> vector<4x192xf32>
    %68 = arith.addf %63, %67 : vector<4x192xf32>
    %c0_61 = arith.constant 0 : index
    %c0_62 = arith.constant 0 : index
    %69 = vector.load %arg6[%c0_61, %c0_62] : memref<1x192xf32, #tpu.memory_space<vmem>>, vector<1x192xf32>
    %70 = vector.broadcast %69 : vector<1x192xf32> to vector<4x192xf32>
    %71 = arith.addf %68, %70 : vector<4x192xf32>
    %cst_63 = arith.constant 0.000000e+00 : f32
    %72 = vector.broadcast %cst_63 : f32 to vector<4x192xf32>
    %73 = arith.maximumf %71, %72 : vector<4x192xf32>
    %cst_64 = arith.constant 0.000000e+00 : f32
    %74 = vector.broadcast %cst_64 : f32 to vector<6x192xf32>
    %c0_65 = arith.constant 0 : index
    %c0_66 = arith.constant 0 : index
    %75 = vector.load %arg41[%c0_65, %c0_66] : memref<6x192xf32, #tpu.memory_space<vmem>>, vector<6x192xf32>
    tpu.vector_store %arg41[%c0_65, %c0_66], %74 {strides = array<i32>} : memref<6x192xf32, #tpu.memory_space<vmem>>, vector<6x192xf32>,
    %c1_67 = arith.constant 1 : index
    %c0_68 = arith.constant 0 : index
    %76 = vector.load %arg41[%c1_67, %c0_68] : memref<6x192xf32, #tpu.memory_space<vmem>>, vector<4x192xf32>
    tpu.vector_store %arg41[%c1_67, %c0_68], %73 {strides = array<i32>} : memref<6x192xf32, #tpu.memory_space<vmem>>, vector<4x192xf32>,
    %c0_69 = arith.constant 0 : index
    %c0_70 = arith.constant 0 : index
    %77 = vector.load %arg41[%c0_69, %c0_70] : memref<6x192xf32, #tpu.memory_space<vmem>>, vector<6x192xf32>
    %c0_71 = arith.constant 0 : index
    %c0_72 = arith.constant 0 : index
    %78 = vector.load %arg8[%c0_71, %c0_72] : memref<1x192xf32, #tpu.memory_space<vmem>>, vector<1x192xf32>
    %79 = vector.extract_strided_slice %77 {offsets = [0, 0], sizes = [4, 192], strides = [1, 1]} : vector<6x192xf32> to vector<4x192xf32>
    %c0_73 = arith.constant 0 : index
    %c0_74 = arith.constant 0 : index
    %c0_75 = arith.constant 0 : index
    %80 = vector.load %arg7[%c0_73, %c0_74, %c0_75] : memref<3x192x192xf32, #tpu.memory_space<vmem>>, vector<1x192x192xf32>
    %81 = vector.shape_cast %80 : vector<1x192x192xf32> to vector<192x192xf32>
    %cst_76 = arith.constant dense<0.000000e+00> : vector<4x192xf32>
    %82 = tpu.matmul %79, %81, %cst_76 {dimension_numbers = #tpu.dot_dimension_numbers<[1], [0], [0], [1], [0, 0, 1, 1], [], []>} : vector<4x192xf32>, vector<192x192xf32>, vector<4x192xf32> -> vector<4x192xf32>
    %83 = vector.broadcast %78 : vector<1x192xf32> to vector<4x192xf32>
    %84 = arith.addf %83, %82 : vector<4x192xf32>
    %85 = vector.extract_strided_slice %77 {offsets = [1, 0], sizes = [4, 192], strides = [1, 1]} : vector<6x192xf32> to vector<4x192xf32>
    %c1_77 = arith.constant 1 : index
    %c0_78 = arith.constant 0 : index
    %c0_79 = arith.constant 0 : index
    %86 = vector.load %arg7[%c1_77, %c0_78, %c0_79] : memref<3x192x192xf32, #tpu.memory_space<vmem>>, vector<1x192x192xf32>
    %87 = vector.shape_cast %86 : vector<1x192x192xf32> to vector<192x192xf32>
    %cst_80 = arith.constant dense<0.000000e+00> : vector<4x192xf32>
    %88 = tpu.matmul %85, %87, %cst_80 {dimension_numbers = #tpu.dot_dimension_numbers<[1], [0], [0], [1], [0, 0, 1, 1], [], []>} : vector<4x192xf32>, vector<192x192xf32>, vector<4x192xf32> -> vector<4x192xf32>
    %89 = arith.addf %84, %88 : vector<4x192xf32>
    %90 = vector.extract_strided_slice %77 {offsets = [2, 0], sizes = [4, 192], strides = [1, 1]} : vector<6x192xf32> to vector<4x192xf32>
    %c2_81 = arith.constant 2 : index
    %c0_82 = arith.constant 0 : index
    %c0_83 = arith.constant 0 : index
    %91 = vector.load %arg7[%c2_81, %c0_82, %c0_83] : memref<3x192x192xf32, #tpu.memory_space<vmem>>, vector<1x192x192xf32>
    %92 = vector.shape_cast %91 : vector<1x192x192xf32> to vector<192x192xf32>
    %cst_84 = arith.constant dense<0.000000e+00> : vector<4x192xf32>
    %93 = tpu.matmul %90, %92, %cst_84 {dimension_numbers = #tpu.dot_dimension_numbers<[1], [0], [0], [1], [0, 0, 1, 1], [], []>} : vector<4x192xf32>, vector<192x192xf32>, vector<4x192xf32> -> vector<4x192xf32>
    %94 = arith.addf %89, %93 : vector<4x192xf32>
    %cst_85 = arith.constant 0.000000e+00 : f32
    %95 = vector.broadcast %cst_85 : f32 to vector<6x192xf32>
    %c0_86 = arith.constant 0 : index
    %c0_87 = arith.constant 0 : index
    %96 = vector.load %arg42[%c0_86, %c0_87] : memref<6x192xf32, #tpu.memory_space<vmem>>, vector<6x192xf32>
    tpu.vector_store %arg42[%c0_86, %c0_87], %95 {strides = array<i32>} : memref<6x192xf32, #tpu.memory_space<vmem>>, vector<6x192xf32>,
    %c1_88 = arith.constant 1 : index
    %c0_89 = arith.constant 0 : index
    %97 = vector.load %arg42[%c1_88, %c0_89] : memref<6x192xf32, #tpu.memory_space<vmem>>, vector<4x192xf32>
    tpu.vector_store %arg42[%c1_88, %c0_89], %94 {strides = array<i32>} : memref<6x192xf32, #tpu.memory_space<vmem>>, vector<4x192xf32>,
    %c0_90 = arith.constant 0 : index
    %c0_91 = arith.constant 0 : index
    %98 = vector.load %arg42[%c0_90, %c0_91] : memref<6x192xf32, #tpu.memory_space<vmem>>, vector<6x192xf32>
    %cst_92 = arith.constant 0.000000e+00 : f32
    %99 = vector.broadcast %cst_92 : f32 to vector<6x192xf32>
    %100 = arith.maximumf %98, %99 : vector<6x192xf32>
    %c0_93 = arith.constant 0 : index
    %c0_94 = arith.constant 0 : index
    %101 = vector.load %arg10[%c0_93, %c0_94] : memref<1x32xf32, #tpu.memory_space<vmem>>, vector<1x32xf32>
    %102 = vector.extract_strided_slice %100 {offsets = [0, 0], sizes = [4, 192], strides = [1, 1]} : vector<6x192xf32> to vector<4x192xf32>
    %c0_95 = arith.constant 0 : index
    %c0_96 = arith.constant 0 : index
    %c0_97 = arith.constant 0 : index
    %103 = vector.load %arg9[%c0_95, %c0_96, %c0_97] : memref<3x192x32xf32, #tpu.memory_space<vmem>>, vector<1x192x32xf32>
    %104 = vector.shape_cast %103 : vector<1x192x32xf32> to vector<192x32xf32>
    %cst_98 = arith.constant dense<0.000000e+00> : vector<4x32xf32>
    %105 = tpu.matmul %102, %104, %cst_98 {dimension_numbers = #tpu.dot_dimension_numbers<[1], [0], [0], [1], [0, 0, 1, 1], [], []>} : vector<4x192xf32>, vector<192x32xf32>, vector<4x32xf32> -> vector<4x32xf32>
    %106 = vector.broadcast %101 : vector<1x32xf32> to vector<4x32xf32>
    %107 = arith.addf %106, %105 : vector<4x32xf32>
    %108 = vector.extract_strided_slice %100 {offsets = [1, 0], sizes = [4, 192], strides = [1, 1]} : vector<6x192xf32> to vector<4x192xf32>
    %c1_99 = arith.constant 1 : index
    %c0_100 = arith.constant 0 : index
    %c0_101 = arith.constant 0 : index
    %109 = vector.load %arg9[%c1_99, %c0_100, %c0_101] : memref<3x192x32xf32, #tpu.memory_space<vmem>>, vector<1x192x32xf32>
    %110 = vector.shape_cast %109 : vector<1x192x32xf32> to vector<192x32xf32>
    %cst_102 = arith.constant dense<0.000000e+00> : vector<4x32xf32>
    %111 = tpu.matmul %108, %110, %cst_102 {dimension_numbers = #tpu.dot_dimension_numbers<[1], [0], [0], [1], [0, 0, 1, 1], [], []>} : vector<4x192xf32>, vector<192x32xf32>, vector<4x32xf32> -> vector<4x32xf32>
    %112 = arith.addf %107, %111 : vector<4x32xf32>
    %113 = vector.extract_strided_slice %100 {offsets = [2, 0], sizes = [4, 192], strides = [1, 1]} : vector<6x192xf32> to vector<4x192xf32>
    %c2_103 = arith.constant 2 : index
    %c0_104 = arith.constant 0 : index
    %c0_105 = arith.constant 0 : index
    %114 = vector.load %arg9[%c2_103, %c0_104, %c0_105] : memref<3x192x32xf32, #tpu.memory_space<vmem>>, vector<1x192x32xf32>
    %115 = vector.shape_cast %114 : vector<1x192x32xf32> to vector<192x32xf32>
    %cst_106 = arith.constant dense<0.000000e+00> : vector<4x32xf32>
    %116 = tpu.matmul %113, %115, %cst_106 {dimension_numbers = #tpu.dot_dimension_numbers<[1], [0], [0], [1], [0, 0, 1, 1], [], []>} : vector<4x192xf32>, vector<192x32xf32>, vector<4x32xf32> -> vector<4x32xf32>
    %117 = arith.addf %112, %116 : vector<4x32xf32>
    %cst_107 = arith.constant 0.000000e+00 : f32
    %118 = vector.broadcast %cst_107 : f32 to vector<4x32xf32>
    %119 = arith.maximumf %117, %118 : vector<4x32xf32>
    %c0_108 = arith.constant 0 : index
    %c0_109 = arith.constant 0 : index
    %c0_110 = arith.constant 0 : index
    %120 = vector.load %arg11[%c0_108, %c0_109, %c0_110] : memref<1x32x192xf32, #tpu.memory_space<vmem>>, vector<1x32x192xf32>
    %121 = vector.shape_cast %120 : vector<1x32x192xf32> to vector<32x192xf32>
    %cst_111 = arith.constant dense<0.000000e+00> : vector<4x192xf32>
    %122 = tpu.matmul %119, %121, %cst_111 {dimension_numbers = #tpu.dot_dimension_numbers<[1], [0], [0], [1], [0, 0, 1, 1], [], []>} : vector<4x32xf32>, vector<32x192xf32>, vector<4x192xf32> -> vector<4x192xf32>
    %c0_112 = arith.constant 0 : index
    %c0_113 = arith.constant 0 : index
    %123 = vector.load %arg12[%c0_112, %c0_113] : memref<1x192xf32, #tpu.memory_space<vmem>>, vector<1x192xf32>
    %124 = vector.broadcast %123 : vector<1x192xf32> to vector<4x192xf32>
    %125 = arith.addf %122, %124 : vector<4x192xf32>
    %c1_114 = arith.constant 1 : index
    %c0_115 = arith.constant 0 : index
    %126 = vector.load %arg42[%c1_114, %c0_115] : memref<6x192xf32, #tpu.memory_space<vmem>>, vector<4x192xf32>
    %127 = arith.addf %126, %125 : vector<4x192xf32>
    %c1_116 = arith.constant 1 : index
    %c0_117 = arith.constant 0 : index
    %128 = vector.load %arg42[%c1_116, %c0_117] : memref<6x192xf32, #tpu.memory_space<vmem>>, vector<4x192xf32>
    tpu.vector_store %arg42[%c1_116, %c0_117], %127 {strides = array<i32>} : memref<6x192xf32, #tpu.memory_space<vmem>>, vector<4x192xf32>,
    %c0_118 = arith.constant 0 : index
    %c0_119 = arith.constant 0 : index
    %129 = vector.load %arg42[%c0_118, %c0_119] : memref<6x192xf32, #tpu.memory_space<vmem>>, vector<6x192xf32>
    %cst_120 = arith.constant 0.000000e+00 : f32
    %130 = vector.broadcast %cst_120 : f32 to vector<6x192xf32>
    %131 = arith.maximumf %129, %130 : vector<6x192xf32>
    %c0_121 = arith.constant 0 : index
    %c0_122 = arith.constant 0 : index
    %132 = vector.load %arg14[%c0_121, %c0_122] : memref<1x32xf32, #tpu.memory_space<vmem>>, vector<1x32xf32>
    %133 = vector.extract_strided_slice %131 {offsets = [0, 0], sizes = [4, 192], strides = [1, 1]} : vector<6x192xf32> to vector<4x192xf32>
    %c0_123 = arith.constant 0 : index
    %c0_124 = arith.constant 0 : index
    %c0_125 = arith.constant 0 : index
    %134 = vector.load %arg13[%c0_123, %c0_124, %c0_125] : memref<3x192x32xf32, #tpu.memory_space<vmem>>, vector<1x192x32xf32>
    %135 = vector.shape_cast %134 : vector<1x192x32xf32> to vector<192x32xf32>
    %cst_126 = arith.constant dense<0.000000e+00> : vector<4x32xf32>
    %136 = tpu.matmul %133, %135, %cst_126 {dimension_numbers = #tpu.dot_dimension_numbers<[1], [0], [0], [1], [0, 0, 1, 1], [], []>} : vector<4x192xf32>, vector<192x32xf32>, vector<4x32xf32> -> vector<4x32xf32>
    %137 = vector.broadcast %132 : vector<1x32xf32> to vector<4x32xf32>
    %138 = arith.addf %137, %136 : vector<4x32xf32>
    %139 = vector.extract_strided_slice %131 {offsets = [1, 0], sizes = [4, 192], strides = [1, 1]} : vector<6x192xf32> to vector<4x192xf32>
    %c1_127 = arith.constant 1 : index
    %c0_128 = arith.constant 0 : index
    %c0_129 = arith.constant 0 : index
    %140 = vector.load %arg13[%c1_127, %c0_128, %c0_129] : memref<3x192x32xf32, #tpu.memory_space<vmem>>, vector<1x192x32xf32>
    %141 = vector.shape_cast %140 : vector<1x192x32xf32> to vector<192x32xf32>
    %cst_130 = arith.constant dense<0.000000e+00> : vector<4x32xf32>
    %142 = tpu.matmul %139, %141, %cst_130 {dimension_numbers = #tpu.dot_dimension_numbers<[1], [0], [0], [1], [0, 0, 1, 1], [], []>} : vector<4x192xf32>, vector<192x32xf32>, vector<4x32xf32> -> vector<4x32xf32>
    %143 = arith.addf %138, %142 : vector<4x32xf32>
    %144 = vector.extract_strided_slice %131 {offsets = [2, 0], sizes = [4, 192], strides = [1, 1]} : vector<6x192xf32> to vector<4x192xf32>
    %c2_131 = arith.constant 2 : index
    %c0_132 = arith.constant 0 : index
    %c0_133 = arith.constant 0 : index
    %145 = vector.load %arg13[%c2_131, %c0_132, %c0_133] : memref<3x192x32xf32, #tpu.memory_space<vmem>>, vector<1x192x32xf32>
    %146 = vector.shape_cast %145 : vector<1x192x32xf32> to vector<192x32xf32>
    %cst_134 = arith.constant dense<0.000000e+00> : vector<4x32xf32>
    %147 = tpu.matmul %144, %146, %cst_134 {dimension_numbers = #tpu.dot_dimension_numbers<[1], [0], [0], [1], [0, 0, 1, 1], [], []>} : vector<4x192xf32>, vector<192x32xf32>, vector<4x32xf32> -> vector<4x32xf32>
    %148 = arith.addf %143, %147 : vector<4x32xf32>
    %cst_135 = arith.constant 0.000000e+00 : f32
    %149 = vector.broadcast %cst_135 : f32 to vector<4x32xf32>
    %150 = arith.maximumf %148, %149 : vector<4x32xf32>
    %c0_136 = arith.constant 0 : index
    %c0_137 = arith.constant 0 : index
    %c0_138 = arith.constant 0 : index
    %151 = vector.load %arg15[%c0_136, %c0_137, %c0_138] : memref<1x32x192xf32, #tpu.memory_space<vmem>>, vector<1x32x192xf32>
    %152 = vector.shape_cast %151 : vector<1x32x192xf32> to vector<32x192xf32>
    %cst_139 = arith.constant dense<0.000000e+00> : vector<4x192xf32>
    %153 = tpu.matmul %150, %152, %cst_139 {dimension_numbers = #tpu.dot_dimension_numbers<[1], [0], [0], [1], [0, 0, 1, 1], [], []>} : vector<4x32xf32>, vector<32x192xf32>, vector<4x192xf32> -> vector<4x192xf32>
    %c0_140 = arith.constant 0 : index
    %c0_141 = arith.constant 0 : index
    %154 = vector.load %arg16[%c0_140, %c0_141] : memref<1x192xf32, #tpu.memory_space<vmem>>, vector<1x192xf32>
    %155 = vector.broadcast %154 : vector<1x192xf32> to vector<4x192xf32>
    %156 = arith.addf %153, %155 : vector<4x192xf32>
    %c1_142 = arith.constant 1 : index
    %c0_143 = arith.constant 0 : index
    %157 = vector.load %arg42[%c1_142, %c0_143] : memref<6x192xf32, #tpu.memory_space<vmem>>, vector<4x192xf32>
    %158 = arith.addf %157, %156 : vector<4x192xf32>
    %c1_144 = arith.constant 1 : index
    %c0_145 = arith.constant 0 : index
    %159 = vector.load %arg42[%c1_144, %c0_145] : memref<6x192xf32, #tpu.memory_space<vmem>>, vector<4x192xf32>
    tpu.vector_store %arg42[%c1_144, %c0_145], %158 {strides = array<i32>} : memref<6x192xf32, #tpu.memory_space<vmem>>, vector<4x192xf32>,
    %c0_146 = arith.constant 0 : index
    %c0_147 = arith.constant 0 : index
    %160 = vector.load %arg42[%c0_146, %c0_147] : memref<6x192xf32, #tpu.memory_space<vmem>>, vector<6x192xf32>
    %cst_148 = arith.constant 0.000000e+00 : f32
    %161 = vector.broadcast %cst_148 : f32 to vector<6x192xf32>
    %162 = arith.maximumf %160, %161 : vector<6x192xf32>
    %163 = vector.extract_strided_slice %162 {offsets = [1, 0], sizes = [4, 192], strides = [1, 1]} : vector<6x192xf32> to vector<4x192xf32>
    %c0_149 = arith.constant 0 : index
    %c0_150 = arith.constant 0 : index
    %c0_151 = arith.constant 0 : index
    %164 = vector.load %arg17[%c0_149, %c0_150, %c0_151] : memref<1x192x96xf32, #tpu.memory_space<vmem>>, vector<1x192x96xf32>
    %165 = vector.shape_cast %164 : vector<1x192x96xf32> to vector<192x96xf32>
    %cst_152 = arith.constant dense<0.000000e+00> : vector<4x96xf32>
    %166 = tpu.matmul %163, %165, %cst_152 {dimension_numbers = #tpu.dot_dimension_numbers<[1], [0], [0], [1], [0, 0, 1, 1], [], []>} : vector<4x192xf32>, vector<192x96xf32>, vector<4x96xf32> -> vector<4x96xf32>
    %c0_153 = arith.constant 0 : index
    %c0_154 = arith.constant 0 : index
    %167 = vector.load %arg18[%c0_153, %c0_154] : memref<1x96xf32, #tpu.memory_space<vmem>>, vector<1x96xf32>
    %168 = vector.broadcast %167 : vector<1x96xf32> to vector<4x96xf32>
    %169 = arith.addf %166, %168 : vector<4x96xf32>
    %170 = arith.mulf %169, %169 : vector<4x96xf32>
    %cst_155 = arith.constant 0.000000e+00 : f32
    %171 = vector.broadcast %cst_155 : f32 to vector<4x96xf32>
    %c0_156 = arith.constant 0 : index
    %c0_157 = arith.constant 0 : index
    %c0_158 = arith.constant 0 : index
    %172 = vector.load %arg19[%c0_156, %c0_157, %c0_158] : memref<4x96x32xf32, #tpu.memory_space<vmem>>, vector<1x96x32xf32>
    %173 = vector.shape_cast %172 : vector<1x96x32xf32> to vector<96x32xf32>
    %cst_159 = arith.constant dense<0.000000e+00> : vector<4x32xf32>
    %174 = tpu.matmul %169, %173, %cst_159 {dimension_numbers = #tpu.dot_dimension_numbers<[1], [0], [0], [1], [0, 0, 1, 1], [], []>} : vector<4x96xf32>, vector<96x32xf32>, vector<4x32xf32> -> vector<4x32xf32>
    %c0_160 = arith.constant 0 : index
    %c0_161 = arith.constant 0 : index
    %c0_162 = arith.constant 0 : index
    %175 = vector.load %arg20[%c0_160, %c0_161, %c0_162] : memref<4x96x32xf32, #tpu.memory_space<vmem>>, vector<1x96x32xf32>
    %176 = vector.shape_cast %175 : vector<1x96x32xf32> to vector<96x32xf32>
    %cst_163 = arith.constant dense<0.000000e+00> : vector<4x32xf32>
    %177 = tpu.matmul %170, %176, %cst_163 {dimension_numbers = #tpu.dot_dimension_numbers<[1], [0], [0], [1], [0, 0, 1, 1], [], []>} : vector<4x96xf32>, vector<96x32xf32>, vector<4x32xf32> -> vector<4x32xf32>
    %cst_164 = arith.constant 2.000000e+00 : f32
    %178 = vector.broadcast %cst_164 : f32 to vector<4x32xf32>
    %179 = arith.mulf %178, %174 : vector<4x32xf32>
    %180 = arith.subf %177, %179 : vector<4x32xf32>
    %c0_165 = arith.constant 0 : index
    %c0_166 = arith.constant 0 : index
    %181 = vector.load %arg22[%c0_165, %c0_166] : memref<1x32xf32, #tpu.memory_space<vmem>>, vector<1x32xf32>
    %182 = vector.broadcast %181 : vector<1x32xf32> to vector<4x32xf32>
    %183 = arith.addf %180, %182 : vector<4x32xf32>
    %cst_167 = arith.constant dense<0x7F800000> : vector<4xf32>
    %184 = vector.multi_reduction <minimumf>, %183, %cst_167 [1] : vector<4x32xf32> to vector<4xf32>
    %185 = vector.shape_cast %184 : vector<4xf32> to vector<4x1xf32>
    %186 = tpu.iota {dimensions = array<i32: 1>} : vector<4x32xi32>
    %187 = vector.broadcast %185 : vector<4x1xf32> to vector<4x32xf32>
    %188 = arith.cmpf ole, %183, %187 : vector<4x32xf32>
    %c32_i32 = arith.constant 32 : i32
    %189 = vector.broadcast %c32_i32 : i32 to vector<4x32xi32>
    %190 = arith.select %188, %186, %189 : vector<4x32xi1>, vector<4x32xi32>
    %cst_168 = arith.constant dense<2147483647> : vector<4xi32>
    %191 = vector.multi_reduction <minsi>, %190, %cst_168 [1] : vector<4x32xi32> to vector<4xi32>
    %192 = vector.shape_cast %191 : vector<4xi32> to vector<4x1xi32>
    %193 = vector.broadcast %192 : vector<4x1xi32> to vector<4x32xi32>
    %194 = arith.cmpi eq, %186, %193 : vector<4x32xi32>
    %195 = arith.extui %194 : vector<4x32xi1> to vector<4x32xi32>
    %196 = arith.sitofp %195 : vector<4x32xi32> to vector<4x32xf32>
    %c0_169 = arith.constant 0 : index
    %c0_170 = arith.constant 0 : index
    %c0_171 = arith.constant 0 : index
    %197 = vector.load %arg21[%c0_169, %c0_170, %c0_171] : memref<4x32x96xf32, #tpu.memory_space<vmem>>, vector<1x32x96xf32>
    %198 = vector.shape_cast %197 : vector<1x32x96xf32> to vector<32x96xf32>
    %cst_172 = arith.constant dense<0.000000e+00> : vector<4x96xf32>
    %199 = tpu.matmul %196, %198, %cst_172 {dimension_numbers = #tpu.dot_dimension_numbers<[1], [0], [0], [1], [0, 0, 1, 1], [], []>} : vector<4x32xf32>, vector<32x96xf32>, vector<4x96xf32> -> vector<4x96xf32>
    %200 = arith.addf %171, %199 : vector<4x96xf32>
    %c1_173 = arith.constant 1 : index
    %c0_174 = arith.constant 0 : index
    %c0_175 = arith.constant 0 : index
    %201 = vector.load %arg19[%c1_173, %c0_174, %c0_175] : memref<4x96x32xf32, #tpu.memory_space<vmem>>, vector<1x96x32xf32>
    %202 = vector.shape_cast %201 : vector<1x96x32xf32> to vector<96x32xf32>
    %cst_176 = arith.constant dense<0.000000e+00> : vector<4x32xf32>
    %203 = tpu.matmul %169, %202, %cst_176 {dimension_numbers = #tpu.dot_dimension_numbers<[1], [0], [0], [1], [0, 0, 1, 1], [], []>} : vector<4x96xf32>, vector<96x32xf32>, vector<4x32xf32> -> vector<4x32xf32>
    %c1_177 = arith.constant 1 : index
    %c0_178 = arith.constant 0 : index
    %c0_179 = arith.constant 0 : index
    %204 = vector.load %arg20[%c1_177, %c0_178, %c0_179] : memref<4x96x32xf32, #tpu.memory_space<vmem>>, vector<1x96x32xf32>
    %205 = vector.shape_cast %204 : vector<1x96x32xf32> to vector<96x32xf32>
    %cst_180 = arith.constant dense<0.000000e+00> : vector<4x32xf32>
    %206 = tpu.matmul %170, %205, %cst_180 {dimension_numbers = #tpu.dot_dimension_numbers<[1], [0], [0], [1], [0, 0, 1, 1], [], []>} : vector<4x96xf32>, vector<96x32xf32>, vector<4x32xf32> -> vector<4x32xf32>
    %cst_181 = arith.constant 2.000000e+00 : f32
    %207 = vector.broadcast %cst_181 : f32 to vector<4x32xf32>
    %208 = arith.mulf %207, %203 : vector<4x32xf32>
    %209 = arith.subf %206, %208 : vector<4x32xf32>
    %c0_182 = arith.constant 0 : index
    %c0_183 = arith.constant 0 : index
    %210 = vector.load %arg22[%c0_182, %c0_183] : memref<1x32xf32, #tpu.memory_space<vmem>>, vector<1x32xf32>
    %211 = vector.broadcast %210 : vector<1x32xf32> to vector<4x32xf32>
    %212 = arith.addf %209, %211 : vector<4x32xf32>
    %cst_184 = arith.constant dense<0x7F800000> : vector<4xf32>
    %213 = vector.multi_reduction <minimumf>, %212, %cst_184 [1] : vector<4x32xf32> to vector<4xf32>
    %214 = vector.shape_cast %213 : vector<4xf32> to vector<4x1xf32>
    %215 = tpu.iota {dimensions = array<i32: 1>} : vector<4x32xi32>
    %216 = vector.broadcast %214 : vector<4x1xf32> to vector<4x32xf32>
    %217 = arith.cmpf ole, %212, %216 : vector<4x32xf32>
    %c32_i32_185 = arith.constant 32 : i32
    %218 = vector.broadcast %c32_i32_185 : i32 to vector<4x32xi32>
    %219 = arith.select %217, %215, %218 : vector<4x32xi1>, vector<4x32xi32>
    %cst_186 = arith.constant dense<2147483647> : vector<4xi32>
    %220 = vector.multi_reduction <minsi>, %219, %cst_186 [1] : vector<4x32xi32> to vector<4xi32>
    %221 = vector.shape_cast %220 : vector<4xi32> to vector<4x1xi32>
    %222 = vector.broadcast %221 : vector<4x1xi32> to vector<4x32xi32>
    %223 = arith.cmpi eq, %215, %222 : vector<4x32xi32>
    %224 = arith.extui %223 : vector<4x32xi1> to vector<4x32xi32>
    %225 = arith.sitofp %224 : vector<4x32xi32> to vector<4x32xf32>
    %c1_187 = arith.constant 1 : index
    %c0_188 = arith.constant 0 : index
    %c0_189 = arith.constant 0 : index
    %226 = vector.load %arg21[%c1_187, %c0_188, %c0_189] : memref<4x32x96xf32, #tpu.memory_space<vmem>>, vector<1x32x96xf32>
    %227 = vector.shape_cast %226 : vector<1x32x96xf32> to vector<32x96xf32>
    %cst_190 = arith.constant dense<0.000000e+00> : vector<4x96xf32>
    %228 = tpu.matmul %225, %227, %cst_190 {dimension_numbers = #tpu.dot_dimension_numbers<[1], [0], [0], [1], [0, 0, 1, 1], [], []>} : vector<4x32xf32>, vector<32x96xf32>, vector<4x96xf32> -> vector<4x96xf32>
    %229 = arith.addf %200, %228 : vector<4x96xf32>
    %c2_191 = arith.constant 2 : index
    %c0_192 = arith.constant 0 : index
    %c0_193 = arith.constant 0 : index
    %230 = vector.load %arg19[%c2_191, %c0_192, %c0_193] : memref<4x96x32xf32, #tpu.memory_space<vmem>>, vector<1x96x32xf32>
    %231 = vector.shape_cast %230 : vector<1x96x32xf32> to vector<96x32xf32>
    %cst_194 = arith.constant dense<0.000000e+00> : vector<4x32xf32>
    %232 = tpu.matmul %169, %231, %cst_194 {dimension_numbers = #tpu.dot_dimension_numbers<[1], [0], [0], [1], [0, 0, 1, 1], [], []>} : vector<4x96xf32>, vector<96x32xf32>, vector<4x32xf32> -> vector<4x32xf32>
    %c2_195 = arith.constant 2 : index
    %c0_196 = arith.constant 0 : index
    %c0_197 = arith.constant 0 : index
    %233 = vector.load %arg20[%c2_195, %c0_196, %c0_197] : memref<4x96x32xf32, #tpu.memory_space<vmem>>, vector<1x96x32xf32>
    %234 = vector.shape_cast %233 : vector<1x96x32xf32> to vector<96x32xf32>
    %cst_198 = arith.constant dense<0.000000e+00> : vector<4x32xf32>
    %235 = tpu.matmul %170, %234, %cst_198 {dimension_numbers = #tpu.dot_dimension_numbers<[1], [0], [0], [1], [0, 0, 1, 1], [], []>} : vector<4x96xf32>, vector<96x32xf32>, vector<4x32xf32> -> vector<4x32xf32>
    %cst_199 = arith.constant 2.000000e+00 : f32
    %236 = vector.broadcast %cst_199 : f32 to vector<4x32xf32>
    %237 = arith.mulf %236, %232 : vector<4x32xf32>
    %238 = arith.subf %235, %237 : vector<4x32xf32>
    %c0_200 = arith.constant 0 : index
    %c0_201 = arith.constant 0 : index
    %239 = vector.load %arg22[%c0_200, %c0_201] : memref<1x32xf32, #tpu.memory_space<vmem>>, vector<1x32xf32>
    %240 = vector.broadcast %239 : vector<1x32xf32> to vector<4x32xf32>
    %241 = arith.addf %238, %240 : vector<4x32xf32>
    %cst_202 = arith.constant dense<0x7F800000> : vector<4xf32>
    %242 = vector.multi_reduction <minimumf>, %241, %cst_202 [1] : vector<4x32xf32> to vector<4xf32>
    %243 = vector.shape_cast %242 : vector<4xf32> to vector<4x1xf32>
    %244 = tpu.iota {dimensions = array<i32: 1>} : vector<4x32xi32>
    %245 = vector.broadcast %243 : vector<4x1xf32> to vector<4x32xf32>
    %246 = arith.cmpf ole, %241, %245 : vector<4x32xf32>
    %c32_i32_203 = arith.constant 32 : i32
    %247 = vector.broadcast %c32_i32_203 : i32 to vector<4x32xi32>
    %248 = arith.select %246, %244, %247 : vector<4x32xi1>, vector<4x32xi32>
    %cst_204 = arith.constant dense<2147483647> : vector<4xi32>
    %249 = vector.multi_reduction <minsi>, %248, %cst_204 [1] : vector<4x32xi32> to vector<4xi32>
    %250 = vector.shape_cast %249 : vector<4xi32> to vector<4x1xi32>
    %251 = vector.broadcast %250 : vector<4x1xi32> to vector<4x32xi32>
    %252 = arith.cmpi eq, %244, %251 : vector<4x32xi32>
    %253 = arith.extui %252 : vector<4x32xi1> to vector<4x32xi32>
    %254 = arith.sitofp %253 : vector<4x32xi32> to vector<4x32xf32>
    %c2_205 = arith.constant 2 : index
    %c0_206 = arith.constant 0 : index
    %c0_207 = arith.constant 0 : index
    %255 = vector.load %arg21[%c2_205, %c0_206, %c0_207] : memref<4x32x96xf32, #tpu.memory_space<vmem>>, vector<1x32x96xf32>
    %256 = vector.shape_cast %255 : vector<1x32x96xf32> to vector<32x96xf32>
    %cst_208 = arith.constant dense<0.000000e+00> : vector<4x96xf32>
    %257 = tpu.matmul %254, %256, %cst_208 {dimension_numbers = #tpu.dot_dimension_numbers<[1], [0], [0], [1], [0, 0, 1, 1], [], []>} : vector<4x32xf32>, vector<32x96xf32>, vector<4x96xf32> -> vector<4x96xf32>
    %258 = arith.addf %229, %257 : vector<4x96xf32>
    %c3_209 = arith.constant 3 : index
    %c0_210 = arith.constant 0 : index
    %c0_211 = arith.constant 0 : index
    %259 = vector.load %arg19[%c3_209, %c0_210, %c0_211] : memref<4x96x32xf32, #tpu.memory_space<vmem>>, vector<1x96x32xf32>
    %260 = vector.shape_cast %259 : vector<1x96x32xf32> to vector<96x32xf32>
    %cst_212 = arith.constant dense<0.000000e+00> : vector<4x32xf32>
    %261 = tpu.matmul %169, %260, %cst_212 {dimension_numbers = #tpu.dot_dimension_numbers<[1], [0], [0], [1], [0, 0, 1, 1], [], []>} : vector<4x96xf32>, vector<96x32xf32>, vector<4x32xf32> -> vector<4x32xf32>
    %c3_213 = arith.constant 3 : index
    %c0_214 = arith.constant 0 : index
    %c0_215 = arith.constant 0 : index
    %262 = vector.load %arg20[%c3_213, %c0_214, %c0_215] : memref<4x96x32xf32, #tpu.memory_space<vmem>>, vector<1x96x32xf32>
    %263 = vector.shape_cast %262 : vector<1x96x32xf32> to vector<96x32xf32>
    %cst_216 = arith.constant dense<0.000000e+00> : vector<4x32xf32>
    %264 = tpu.matmul %170, %263, %cst_216 {dimension_numbers = #tpu.dot_dimension_numbers<[1], [0], [0], [1], [0, 0, 1, 1], [], []>} : vector<4x96xf32>, vector<96x32xf32>, vector<4x32xf32> -> vector<4x32xf32>
    %cst_217 = arith.constant 2.000000e+00 : f32
    %265 = vector.broadcast %cst_217 : f32 to vector<4x32xf32>
    %266 = arith.mulf %265, %261 : vector<4x32xf32>
    %267 = arith.subf %264, %266 : vector<4x32xf32>
    %c0_218 = arith.constant 0 : index
    %c0_219 = arith.constant 0 : index
    %268 = vector.load %arg22[%c0_218, %c0_219] : memref<1x32xf32, #tpu.memory_space<vmem>>, vector<1x32xf32>
    %269 = vector.broadcast %268 : vector<1x32xf32> to vector<4x32xf32>
    %270 = arith.addf %267, %269 : vector<4x32xf32>
    %cst_220 = arith.constant dense<0x7F800000> : vector<4xf32>
    %271 = vector.multi_reduction <minimumf>, %270, %cst_220 [1] : vector<4x32xf32> to vector<4xf32>
    %272 = vector.shape_cast %271 : vector<4xf32> to vector<4x1xf32>
    %273 = tpu.iota {dimensions = array<i32: 1>} : vector<4x32xi32>
    %274 = vector.broadcast %272 : vector<4x1xf32> to vector<4x32xf32>
    %275 = arith.cmpf ole, %270, %274 : vector<4x32xf32>
    %c32_i32_221 = arith.constant 32 : i32
    %276 = vector.broadcast %c32_i32_221 : i32 to vector<4x32xi32>
    %277 = arith.select %275, %273, %276 : vector<4x32xi1>, vector<4x32xi32>
    %cst_222 = arith.constant dense<2147483647> : vector<4xi32>
    %278 = vector.multi_reduction <minsi>, %277, %cst_222 [1] : vector<4x32xi32> to vector<4xi32>
    %279 = vector.shape_cast %278 : vector<4xi32> to vector<4x1xi32>
    %280 = vector.broadcast %279 : vector<4x1xi32> to vector<4x32xi32>
    %281 = arith.cmpi eq, %273, %280 : vector<4x32xi32>
    %282 = arith.extui %281 : vector<4x32xi1> to vector<4x32xi32>
    %283 = arith.sitofp %282 : vector<4x32xi32> to vector<4x32xf32>
    %c3_223 = arith.constant 3 : index
    %c0_224 = arith.constant 0 : index
    %c0_225 = arith.constant 0 : index
    %284 = vector.load %arg21[%c3_223, %c0_224, %c0_225] : memref<4x32x96xf32, #tpu.memory_space<vmem>>, vector<1x32x96xf32>
    %285 = vector.shape_cast %284 : vector<1x32x96xf32> to vector<32x96xf32>
    %cst_226 = arith.constant dense<0.000000e+00> : vector<4x96xf32>
    %286 = tpu.matmul %283, %285, %cst_226 {dimension_numbers = #tpu.dot_dimension_numbers<[1], [0], [0], [1], [0, 0, 1, 1], [], []>} : vector<4x32xf32>, vector<32x96xf32>, vector<4x96xf32> -> vector<4x96xf32>
    %287 = arith.addf %258, %286 : vector<4x96xf32>
    %288 = arith.subf %287, %169 : vector<4x96xf32>
    %289 = arith.mulf %288, %288 : vector<4x96xf32>
    %290 = vector.shape_cast %289 : vector<4x96xf32> to vector<1x4x96xf32>
    %cst_227 = arith.constant dense<0.000000e+00> : vector<1xf32>
    %291 = vector.multi_reduction <add>, %290, %cst_227 [1, 2] : vector<1x4x96xf32> to vector<1xf32>
    %292 = vector.shape_cast %291 : vector<1xf32> to vector<1x1x1xf32>
    %293 = vector.extract %292[0, 0, 0] : f32 from vector<1x1x1xf32>
    %294 = vector.broadcast %293 : f32 to vector<1x1xf32>
    %cst_228 = arith.constant 0.00244140625 : f32
    %295 = vector.broadcast %cst_228 : f32 to vector<1x1xf32>
    %296 = arith.mulf %295, %294 : vector<1x1xf32>
    %c0_229 = arith.constant 0 : index
    %c0_230 = arith.constant 0 : index
    %c0_231 = arith.constant 0 : index
    %297 = vector.load %arg38[%c0_229, %c0_230, %c0_231] : memref<1x1x1xf32, #tpu.memory_space<vmem>>, vector<1x1x1xf32>
    %298 = vector.shape_cast %297 : vector<1x1x1xf32> to vector<1x1xf32>
    %299 = vector.shape_cast %296 : vector<1x1xf32> to vector<1x1x1xf32>
    tpu.vector_store %arg38[%c0_229, %c0_230, %c0_231], %299 {strides = array<i32>} : memref<1x1x1xf32, #tpu.memory_space<vmem>>, vector<1x1x1xf32>,
    %cst_232 = arith.constant 0.000000e+00 : f32
    %300 = vector.broadcast %cst_232 : f32 to vector<6x96xf32>
    %c0_233 = arith.constant 0 : index
    %c0_234 = arith.constant 0 : index
    %301 = vector.load %arg43[%c0_233, %c0_234] : memref<6x96xf32, #tpu.memory_space<vmem>>, vector<6x96xf32>
    tpu.vector_store %arg43[%c0_233, %c0_234], %300 {strides = array<i32>} : memref<6x96xf32, #tpu.memory_space<vmem>>, vector<6x96xf32>,
    %c1_235 = arith.constant 1 : index
    %c0_236 = arith.constant 0 : index
    %302 = vector.load %arg43[%c1_235, %c0_236] : memref<6x96xf32, #tpu.memory_space<vmem>>, vector<4x96xf32>
    tpu.vector_store %arg43[%c1_235, %c0_236], %287 {strides = array<i32>} : memref<6x96xf32, #tpu.memory_space<vmem>>, vector<4x96xf32>,
    %c0_237 = arith.constant 0 : index
    %c0_238 = arith.constant 0 : index
    %303 = vector.load %arg43[%c0_237, %c0_238] : memref<6x96xf32, #tpu.memory_space<vmem>>, vector<6x96xf32>
    %c0_239 = arith.constant 0 : index
    %c0_240 = arith.constant 0 : index
    %304 = vector.load %arg24[%c0_239, %c0_240] : memref<1x192xf32, #tpu.memory_space<vmem>>, vector<1x192xf32>
    %305 = vector.extract_strided_slice %303 {offsets = [0, 0], sizes = [4, 96], strides = [1, 1]} : vector<6x96xf32> to vector<4x96xf32>
    %c0_241 = arith.constant 0 : index
    %c0_242 = arith.constant 0 : index
    %c0_243 = arith.constant 0 : index
    %306 = vector.load %arg23[%c0_241, %c0_242, %c0_243] : memref<3x96x192xf32, #tpu.memory_space<vmem>>, vector<1x96x192xf32>
    %307 = vector.shape_cast %306 : vector<1x96x192xf32> to vector<96x192xf32>
    %cst_244 = arith.constant dense<0.000000e+00> : vector<4x192xf32>
    %308 = tpu.matmul %305, %307, %cst_244 {dimension_numbers = #tpu.dot_dimension_numbers<[1], [0], [0], [1], [0, 0, 1, 1], [], []>} : vector<4x96xf32>, vector<96x192xf32>, vector<4x192xf32> -> vector<4x192xf32>
    %309 = vector.broadcast %304 : vector<1x192xf32> to vector<4x192xf32>
    %310 = arith.addf %309, %308 : vector<4x192xf32>
    %311 = vector.extract_strided_slice %303 {offsets = [1, 0], sizes = [4, 96], strides = [1, 1]} : vector<6x96xf32> to vector<4x96xf32>
    %c1_245 = arith.constant 1 : index
    %c0_246 = arith.constant 0 : index
    %c0_247 = arith.constant 0 : index
    %312 = vector.load %arg23[%c1_245, %c0_246, %c0_247] : memref<3x96x192xf32, #tpu.memory_space<vmem>>, vector<1x96x192xf32>
    %313 = vector.shape_cast %312 : vector<1x96x192xf32> to vector<96x192xf32>
    %cst_248 = arith.constant dense<0.000000e+00> : vector<4x192xf32>
    %314 = tpu.matmul %311, %313, %cst_248 {dimension_numbers = #tpu.dot_dimension_numbers<[1], [0], [0], [1], [0, 0, 1, 1], [], []>} : vector<4x96xf32>, vector<96x192xf32>, vector<4x192xf32> -> vector<4x192xf32>
    %315 = arith.addf %310, %314 : vector<4x192xf32>
    %316 = vector.extract_strided_slice %303 {offsets = [2, 0], sizes = [4, 96], strides = [1, 1]} : vector<6x96xf32> to vector<4x96xf32>
    %c2_249 = arith.constant 2 : index
    %c0_250 = arith.constant 0 : index
    %c0_251 = arith.constant 0 : index
    %317 = vector.load %arg23[%c2_249, %c0_250, %c0_251] : memref<3x96x192xf32, #tpu.memory_space<vmem>>, vector<1x96x192xf32>
    %318 = vector.shape_cast %317 : vector<1x96x192xf32> to vector<96x192xf32>
    %cst_252 = arith.constant dense<0.000000e+00> : vector<4x192xf32>
    %319 = tpu.matmul %316, %318, %cst_252 {dimension_numbers = #tpu.dot_dimension_numbers<[1], [0], [0], [1], [0, 0, 1, 1], [], []>} : vector<4x96xf32>, vector<96x192xf32>, vector<4x192xf32> -> vector<4x192xf32>
    %320 = arith.addf %315, %319 : vector<4x192xf32>
    %cst_253 = arith.constant 0.000000e+00 : f32
    %321 = vector.broadcast %cst_253 : f32 to vector<6x192xf32>
    %c0_254 = arith.constant 0 : index
    %c0_255 = arith.constant 0 : index
    %322 = vector.load %arg44[%c0_254, %c0_255] : memref<6x192xf32, #tpu.memory_space<vmem>>, vector<6x192xf32>
    tpu.vector_store %arg44[%c0_254, %c0_255], %321 {strides = array<i32>} : memref<6x192xf32, #tpu.memory_space<vmem>>, vector<6x192xf32>,
    %c1_256 = arith.constant 1 : index
    %c0_257 = arith.constant 0 : index
    %323 = vector.load %arg44[%c1_256, %c0_257] : memref<6x192xf32, #tpu.memory_space<vmem>>, vector<4x192xf32>
    tpu.vector_store %arg44[%c1_256, %c0_257], %320 {strides = array<i32>} : memref<6x192xf32, #tpu.memory_space<vmem>>, vector<4x192xf32>,
    %c0_258 = arith.constant 0 : index
    %c0_259 = arith.constant 0 : index
    %324 = vector.load %arg44[%c0_258, %c0_259] : memref<6x192xf32, #tpu.memory_space<vmem>>, vector<6x192xf32>
    %cst_260 = arith.constant 0.000000e+00 : f32
    %325 = vector.broadcast %cst_260 : f32 to vector<6x192xf32>
    %326 = arith.maximumf %324, %325 : vector<6x192xf32>
    %c0_261 = arith.constant 0 : index
    %c0_262 = arith.constant 0 : index
    %327 = vector.load %arg26[%c0_261, %c0_262] : memref<1x32xf32, #tpu.memory_space<vmem>>, vector<1x32xf32>
    %328 = vector.extract_strided_slice %326 {offsets = [0, 0], sizes = [4, 192], strides = [1, 1]} : vector<6x192xf32> to vector<4x192xf32>
    %c0_263 = arith.constant 0 : index
    %c0_264 = arith.constant 0 : index
    %c0_265 = arith.constant 0 : index
    %329 = vector.load %arg25[%c0_263, %c0_264, %c0_265] : memref<3x192x32xf32, #tpu.memory_space<vmem>>, vector<1x192x32xf32>
    %330 = vector.shape_cast %329 : vector<1x192x32xf32> to vector<192x32xf32>
    %cst_266 = arith.constant dense<0.000000e+00> : vector<4x32xf32>
    %331 = tpu.matmul %328, %330, %cst_266 {dimension_numbers = #tpu.dot_dimension_numbers<[1], [0], [0], [1], [0, 0, 1, 1], [], []>} : vector<4x192xf32>, vector<192x32xf32>, vector<4x32xf32> -> vector<4x32xf32>
    %332 = vector.broadcast %327 : vector<1x32xf32> to vector<4x32xf32>
    %333 = arith.addf %332, %331 : vector<4x32xf32>
    %334 = vector.extract_strided_slice %326 {offsets = [1, 0], sizes = [4, 192], strides = [1, 1]} : vector<6x192xf32> to vector<4x192xf32>
    %c1_267 = arith.constant 1 : index
    %c0_268 = arith.constant 0 : index
    %c0_269 = arith.constant 0 : index
    %335 = vector.load %arg25[%c1_267, %c0_268, %c0_269] : memref<3x192x32xf32, #tpu.memory_space<vmem>>, vector<1x192x32xf32>
    %336 = vector.shape_cast %335 : vector<1x192x32xf32> to vector<192x32xf32>
    %cst_270 = arith.constant dense<0.000000e+00> : vector<4x32xf32>
    %337 = tpu.matmul %334, %336, %cst_270 {dimension_numbers = #tpu.dot_dimension_numbers<[1], [0], [0], [1], [0, 0, 1, 1], [], []>} : vector<4x192xf32>, vector<192x32xf32>, vector<4x32xf32> -> vector<4x32xf32>
    %338 = arith.addf %333, %337 : vector<4x32xf32>
    %339 = vector.extract_strided_slice %326 {offsets = [2, 0], sizes = [4, 192], strides = [1, 1]} : vector<6x192xf32> to vector<4x192xf32>
    %c2_271 = arith.constant 2 : index
    %c0_272 = arith.constant 0 : index
    %c0_273 = arith.constant 0 : index
    %340 = vector.load %arg25[%c2_271, %c0_272, %c0_273] : memref<3x192x32xf32, #tpu.memory_space<vmem>>, vector<1x192x32xf32>
    %341 = vector.shape_cast %340 : vector<1x192x32xf32> to vector<192x32xf32>
    %cst_274 = arith.constant dense<0.000000e+00> : vector<4x32xf32>
    %342 = tpu.matmul %339, %341, %cst_274 {dimension_numbers = #tpu.dot_dimension_numbers<[1], [0], [0], [1], [0, 0, 1, 1], [], []>} : vector<4x192xf32>, vector<192x32xf32>, vector<4x32xf32> -> vector<4x32xf32>
    %343 = arith.addf %338, %342 : vector<4x32xf32>
    %cst_275 = arith.constant 0.000000e+00 : f32
    %344 = vector.broadcast %cst_275 : f32 to vector<4x32xf32>
    %345 = arith.maximumf %343, %344 : vector<4x32xf32>
    %c0_276 = arith.constant 0 : index
    %c0_277 = arith.constant 0 : index
    %c0_278 = arith.constant 0 : index
    %346 = vector.load %arg27[%c0_276, %c0_277, %c0_278] : memref<1x32x192xf32, #tpu.memory_space<vmem>>, vector<1x32x192xf32>
    %347 = vector.shape_cast %346 : vector<1x32x192xf32> to vector<32x192xf32>
    %cst_279 = arith.constant dense<0.000000e+00> : vector<4x192xf32>
    %348 = tpu.matmul %345, %347, %cst_279 {dimension_numbers = #tpu.dot_dimension_numbers<[1], [0], [0], [1], [0, 0, 1, 1], [], []>} : vector<4x32xf32>, vector<32x192xf32>, vector<4x192xf32> -> vector<4x192xf32>
    %c0_280 = arith.constant 0 : index
    %c0_281 = arith.constant 0 : index
    %349 = vector.load %arg28[%c0_280, %c0_281] : memref<1x192xf32, #tpu.memory_space<vmem>>, vector<1x192xf32>
    %350 = vector.broadcast %349 : vector<1x192xf32> to vector<4x192xf32>
    %351 = arith.addf %348, %350 : vector<4x192xf32>
    %c1_282 = arith.constant 1 : index
    %c0_283 = arith.constant 0 : index
    %352 = vector.load %arg44[%c1_282, %c0_283] : memref<6x192xf32, #tpu.memory_space<vmem>>, vector<4x192xf32>
    %353 = arith.addf %352, %351 : vector<4x192xf32>
    %c1_284 = arith.constant 1 : index
    %c0_285 = arith.constant 0 : index
    %354 = vector.load %arg44[%c1_284, %c0_285] : memref<6x192xf32, #tpu.memory_space<vmem>>, vector<4x192xf32>
    tpu.vector_store %arg44[%c1_284, %c0_285], %353 {strides = array<i32>} : memref<6x192xf32, #tpu.memory_space<vmem>>, vector<4x192xf32>,
    %c0_286 = arith.constant 0 : index
    %c0_287 = arith.constant 0 : index
    %355 = vector.load %arg44[%c0_286, %c0_287] : memref<6x192xf32, #tpu.memory_space<vmem>>, vector<6x192xf32>
    %cst_288 = arith.constant 0.000000e+00 : f32
    %356 = vector.broadcast %cst_288 : f32 to vector<6x192xf32>
    %357 = arith.maximumf %355, %356 : vector<6x192xf32>
    %c0_289 = arith.constant 0 : index
    %c0_290 = arith.constant 0 : index
    %358 = vector.load %arg30[%c0_289, %c0_290] : memref<1x32xf32, #tpu.memory_space<vmem>>, vector<1x32xf32>
    %359 = vector.extract_strided_slice %357 {offsets = [0, 0], sizes = [4, 192], strides = [1, 1]} : vector<6x192xf32> to vector<4x192xf32>
    %c0_291 = arith.constant 0 : index
    %c0_292 = arith.constant 0 : index
    %c0_293 = arith.constant 0 : index
    %360 = vector.load %arg29[%c0_291, %c0_292, %c0_293] : memref<3x192x32xf32, #tpu.memory_space<vmem>>, vector<1x192x32xf32>
    %361 = vector.shape_cast %360 : vector<1x192x32xf32> to vector<192x32xf32>
    %cst_294 = arith.constant dense<0.000000e+00> : vector<4x32xf32>
    %362 = tpu.matmul %359, %361, %cst_294 {dimension_numbers = #tpu.dot_dimension_numbers<[1], [0], [0], [1], [0, 0, 1, 1], [], []>} : vector<4x192xf32>, vector<192x32xf32>, vector<4x32xf32> -> vector<4x32xf32>
    %363 = vector.broadcast %358 : vector<1x32xf32> to vector<4x32xf32>
    %364 = arith.addf %363, %362 : vector<4x32xf32>
    %365 = vector.extract_strided_slice %357 {offsets = [1, 0], sizes = [4, 192], strides = [1, 1]} : vector<6x192xf32> to vector<4x192xf32>
    %c1_295 = arith.constant 1 : index
    %c0_296 = arith.constant 0 : index
    %c0_297 = arith.constant 0 : index
    %366 = vector.load %arg29[%c1_295, %c0_296, %c0_297] : memref<3x192x32xf32, #tpu.memory_space<vmem>>, vector<1x192x32xf32>
    %367 = vector.shape_cast %366 : vector<1x192x32xf32> to vector<192x32xf32>
    %cst_298 = arith.constant dense<0.000000e+00> : vector<4x32xf32>
    %368 = tpu.matmul %365, %367, %cst_298 {dimension_numbers = #tpu.dot_dimension_numbers<[1], [0], [0], [1], [0, 0, 1, 1], [], []>} : vector<4x192xf32>, vector<192x32xf32>, vector<4x32xf32> -> vector<4x32xf32>
    %369 = arith.addf %364, %368 : vector<4x32xf32>
    %370 = vector.extract_strided_slice %357 {offsets = [2, 0], sizes = [4, 192], strides = [1, 1]} : vector<6x192xf32> to vector<4x192xf32>
    %c2_299 = arith.constant 2 : index
    %c0_300 = arith.constant 0 : index
    %c0_301 = arith.constant 0 : index
    %371 = vector.load %arg29[%c2_299, %c0_300, %c0_301] : memref<3x192x32xf32, #tpu.memory_space<vmem>>, vector<1x192x32xf32>
    %372 = vector.shape_cast %371 : vector<1x192x32xf32> to vector<192x32xf32>
    %cst_302 = arith.constant dense<0.000000e+00> : vector<4x32xf32>
    %373 = tpu.matmul %370, %372, %cst_302 {dimension_numbers = #tpu.dot_dimension_numbers<[1], [0], [0], [1], [0, 0, 1, 1], [], []>} : vector<4x192xf32>, vector<192x32xf32>, vector<4x32xf32> -> vector<4x32xf32>
    %374 = arith.addf %369, %373 : vector<4x32xf32>
    %cst_303 = arith.constant 0.000000e+00 : f32
    %375 = vector.broadcast %cst_303 : f32 to vector<4x32xf32>
    %376 = arith.maximumf %374, %375 : vector<4x32xf32>
    %c0_304 = arith.constant 0 : index
    %c0_305 = arith.constant 0 : index
    %c0_306 = arith.constant 0 : index
    %377 = vector.load %arg31[%c0_304, %c0_305, %c0_306] : memref<1x32x192xf32, #tpu.memory_space<vmem>>, vector<1x32x192xf32>
    %378 = vector.shape_cast %377 : vector<1x32x192xf32> to vector<32x192xf32>
    %cst_307 = arith.constant dense<0.000000e+00> : vector<4x192xf32>
    %379 = tpu.matmul %376, %378, %cst_307 {dimension_numbers = #tpu.dot_dimension_numbers<[1], [0], [0], [1], [0, 0, 1, 1], [], []>} : vector<4x32xf32>, vector<32x192xf32>, vector<4x192xf32> -> vector<4x192xf32>
    %c0_308 = arith.constant 0 : index
    %c0_309 = arith.constant 0 : index
    %380 = vector.load %arg32[%c0_308, %c0_309] : memref<1x192xf32, #tpu.memory_space<vmem>>, vector<1x192xf32>
    %381 = vector.broadcast %380 : vector<1x192xf32> to vector<4x192xf32>
    %382 = arith.addf %379, %381 : vector<4x192xf32>
    %c1_310 = arith.constant 1 : index
    %c0_311 = arith.constant 0 : index
    %383 = vector.load %arg44[%c1_310, %c0_311] : memref<6x192xf32, #tpu.memory_space<vmem>>, vector<4x192xf32>
    %384 = arith.addf %383, %382 : vector<4x192xf32>
    %c1_312 = arith.constant 1 : index
    %c0_313 = arith.constant 0 : index
    %385 = vector.load %arg44[%c1_312, %c0_313] : memref<6x192xf32, #tpu.memory_space<vmem>>, vector<4x192xf32>
    tpu.vector_store %arg44[%c1_312, %c0_313], %384 {strides = array<i32>} : memref<6x192xf32, #tpu.memory_space<vmem>>, vector<4x192xf32>,
    %c0_314 = arith.constant 0 : index
    %c0_315 = arith.constant 0 : index
    %386 = vector.load %arg44[%c0_314, %c0_315] : memref<6x192xf32, #tpu.memory_space<vmem>>, vector<6x192xf32>
    %cst_316 = arith.constant 0.000000e+00 : f32
    %387 = vector.broadcast %cst_316 : f32 to vector<6x192xf32>
    %388 = arith.maximumf %386, %387 : vector<6x192xf32>
    %cst_317 = arith.constant 0.000000e+00 : f32
    %389 = vector.broadcast %cst_317 : f32 to vector<10x160xf32>
    %c0_318 = arith.constant 0 : index
    %c0_319 = arith.constant 0 : index
    %390 = vector.load %arg45[%c0_318, %c0_319] : memref<10x160xf32, #tpu.memory_space<vmem>>, vector<10x160xf32>
    tpu.vector_store %arg45[%c0_318, %c0_319], %389 {strides = array<i32>} : memref<10x160xf32, #tpu.memory_space<vmem>>, vector<10x160xf32>,
    %c0_320 = arith.constant 0 : index
    %c0_321 = arith.constant 0 : index
    %391 = vector.load %arg34[%c0_320, %c0_321] : memref<1x160xf32, #tpu.memory_space<vmem>>, vector<1x160xf32>
    %392 = vector.extract_strided_slice %388 {offsets = [0, 0], sizes = [4, 192], strides = [1, 1]} : vector<6x192xf32> to vector<4x192xf32>
    %c0_322 = arith.constant 0 : index
    %c0_323 = arith.constant 0 : index
    %c0_324 = arith.constant 0 : index
    %393 = vector.load %arg33[%c0_322, %c0_323, %c0_324] : memref<4x192x160xf32, #tpu.memory_space<vmem>>, vector<1x192x160xf32>
    %394 = vector.shape_cast %393 : vector<1x192x160xf32> to vector<192x160xf32>
    %cst_325 = arith.constant dense<0.000000e+00> : vector<4x160xf32>
    %395 = tpu.matmul %392, %394, %cst_325 {dimension_numbers = #tpu.dot_dimension_numbers<[1], [0], [0], [1], [0, 0, 1, 1], [], []>} : vector<4x192xf32>, vector<192x160xf32>, vector<4x160xf32> -> vector<4x160xf32>
    %396 = vector.broadcast %391 : vector<1x160xf32> to vector<4x160xf32>
    %397 = arith.addf %396, %395 : vector<4x160xf32>
    %398 = vector.extract_strided_slice %388 {offsets = [1, 0], sizes = [4, 192], strides = [1, 1]} : vector<6x192xf32> to vector<4x192xf32>
    %c1_326 = arith.constant 1 : index
    %c0_327 = arith.constant 0 : index
    %c0_328 = arith.constant 0 : index
    %399 = vector.load %arg33[%c1_326, %c0_327, %c0_328] : memref<4x192x160xf32, #tpu.memory_space<vmem>>, vector<1x192x160xf32>
    %400 = vector.shape_cast %399 : vector<1x192x160xf32> to vector<192x160xf32>
    %cst_329 = arith.constant dense<0.000000e+00> : vector<4x160xf32>
    %401 = tpu.matmul %398, %400, %cst_329 {dimension_numbers = #tpu.dot_dimension_numbers<[1], [0], [0], [1], [0, 0, 1, 1], [], []>} : vector<4x192xf32>, vector<192x160xf32>, vector<4x160xf32> -> vector<4x160xf32>
    %402 = arith.addf %397, %401 : vector<4x160xf32>
    %cst_330 = arith.constant 0.000000e+00 : f32
    %403 = vector.broadcast %cst_330 : f32 to vector<4x160xf32>
    %404 = arith.maximumf %402, %403 : vector<4x160xf32>
    %405 = vector.extract_strided_slice %404 {offsets = [0, 0], sizes = [1, 160], strides = [1, 1]} : vector<4x160xf32> to vector<1x160xf32>
    %c1_331 = arith.constant 1 : index
    %c0_332 = arith.constant 0 : index
    %406 = vector.load %arg45[%c1_331, %c0_332] : memref<10x160xf32, #tpu.memory_space<vmem>>, vector<1x160xf32>
    tpu.vector_store %arg45[%c1_331, %c0_332], %405 {strides = array<i32>} : memref<10x160xf32, #tpu.memory_space<vmem>>, vector<1x160xf32>,
    %407 = vector.extract_strided_slice %404 {offsets = [1, 0], sizes = [1, 160], strides = [1, 1]} : vector<4x160xf32> to vector<1x160xf32>
    %c3_333 = arith.constant 3 : index
    %c0_334 = arith.constant 0 : index
    %408 = vector.load %arg45[%c3_333, %c0_334] : memref<10x160xf32, #tpu.memory_space<vmem>>, vector<1x160xf32>
    tpu.vector_store %arg45[%c3_333, %c0_334], %407 {strides = array<i32>} : memref<10x160xf32, #tpu.memory_space<vmem>>, vector<1x160xf32>,
    %409 = vector.extract_strided_slice %404 {offsets = [2, 0], sizes = [1, 160], strides = [1, 1]} : vector<4x160xf32> to vector<1x160xf32>
    %c5 = arith.constant 5 : index
    %c0_335 = arith.constant 0 : index
    %410 = vector.load %arg45[%c5, %c0_335] : memref<10x160xf32, #tpu.memory_space<vmem>>, vector<1x160xf32>
    tpu.vector_store %arg45[%c5, %c0_335], %409 {strides = array<i32>} : memref<10x160xf32, #tpu.memory_space<vmem>>, vector<1x160xf32>,
    %411 = vector.extract_strided_slice %404 {offsets = [3, 0], sizes = [1, 160], strides = [1, 1]} : vector<4x160xf32> to vector<1x160xf32>
    %c7 = arith.constant 7 : index
    %c0_336 = arith.constant 0 : index
    %412 = vector.load %arg45[%c7, %c0_336] : memref<10x160xf32, #tpu.memory_space<vmem>>, vector<1x160xf32>
    tpu.vector_store %arg45[%c7, %c0_336], %411 {strides = array<i32>} : memref<10x160xf32, #tpu.memory_space<vmem>>, vector<1x160xf32>,
    %c0_337 = arith.constant 0 : index
    %c0_338 = arith.constant 0 : index
    %413 = vector.load %arg34[%c0_337, %c0_338] : memref<1x160xf32, #tpu.memory_space<vmem>>, vector<1x160xf32>
    %414 = vector.extract_strided_slice %388 {offsets = [1, 0], sizes = [4, 192], strides = [1, 1]} : vector<6x192xf32> to vector<4x192xf32>
    %c2_339 = arith.constant 2 : index
    %c0_340 = arith.constant 0 : index
    %c0_341 = arith.constant 0 : index
    %415 = vector.load %arg33[%c2_339, %c0_340, %c0_341] : memref<4x192x160xf32, #tpu.memory_space<vmem>>, vector<1x192x160xf32>
    %416 = vector.shape_cast %415 : vector<1x192x160xf32> to vector<192x160xf32>
    %cst_342 = arith.constant dense<0.000000e+00> : vector<4x160xf32>
    %417 = tpu.matmul %414, %416, %cst_342 {dimension_numbers = #tpu.dot_dimension_numbers<[1], [0], [0], [1], [0, 0, 1, 1], [], []>} : vector<4x192xf32>, vector<192x160xf32>, vector<4x160xf32> -> vector<4x160xf32>
    %418 = vector.broadcast %413 : vector<1x160xf32> to vector<4x160xf32>
    %419 = arith.addf %418, %417 : vector<4x160xf32>
    %420 = vector.extract_strided_slice %388 {offsets = [2, 0], sizes = [4, 192], strides = [1, 1]} : vector<6x192xf32> to vector<4x192xf32>
    %c3_343 = arith.constant 3 : index
    %c0_344 = arith.constant 0 : index
    %c0_345 = arith.constant 0 : index
    %421 = vector.load %arg33[%c3_343, %c0_344, %c0_345] : memref<4x192x160xf32, #tpu.memory_space<vmem>>, vector<1x192x160xf32>
    %422 = vector.shape_cast %421 : vector<1x192x160xf32> to vector<192x160xf32>
    %cst_346 = arith.constant dense<0.000000e+00> : vector<4x160xf32>
    %423 = tpu.matmul %420, %422, %cst_346 {dimension_numbers = #tpu.dot_dimension_numbers<[1], [0], [0], [1], [0, 0, 1, 1], [], []>} : vector<4x192xf32>, vector<192x160xf32>, vector<4x160xf32> -> vector<4x160xf32>
    %424 = arith.addf %419, %423 : vector<4x160xf32>
    %cst_347 = arith.constant 0.000000e+00 : f32
    %425 = vector.broadcast %cst_347 : f32 to vector<4x160xf32>
    %426 = arith.maximumf %424, %425 : vector<4x160xf32>
    %427 = vector.extract_strided_slice %426 {offsets = [0, 0], sizes = [1, 160], strides = [1, 1]} : vector<4x160xf32> to vector<1x160xf32>
    %c2_348 = arith.constant 2 : index
    %c0_349 = arith.constant 0 : index
    %428 = vector.load %arg45[%c2_348, %c0_349] : memref<10x160xf32, #tpu.memory_space<vmem>>, vector<1x160xf32>
    tpu.vector_store %arg45[%c2_348, %c0_349], %427 {strides = array<i32>} : memref<10x160xf32, #tpu.memory_space<vmem>>, vector<1x160xf32>,
    %429 = vector.extract_strided_slice %426 {offsets = [1, 0], sizes = [1, 160], strides = [1, 1]} : vector<4x160xf32> to vector<1x160xf32>
    %c4_350 = arith.constant 4 : index
    %c0_351 = arith.constant 0 : index
    %430 = vector.load %arg45[%c4_350, %c0_351] : memref<10x160xf32, #tpu.memory_space<vmem>>, vector<1x160xf32>
    tpu.vector_store %arg45[%c4_350, %c0_351], %429 {strides = array<i32>} : memref<10x160xf32, #tpu.memory_space<vmem>>, vector<1x160xf32>,
    %431 = vector.extract_strided_slice %426 {offsets = [2, 0], sizes = [1, 160], strides = [1, 1]} : vector<4x160xf32> to vector<1x160xf32>
    %c6 = arith.constant 6 : index
    %c0_352 = arith.constant 0 : index
    %432 = vector.load %arg45[%c6, %c0_352] : memref<10x160xf32, #tpu.memory_space<vmem>>, vector<1x160xf32>
    tpu.vector_store %arg45[%c6, %c0_352], %431 {strides = array<i32>} : memref<10x160xf32, #tpu.memory_space<vmem>>, vector<1x160xf32>,
    %433 = vector.extract_strided_slice %426 {offsets = [3, 0], sizes = [1, 160], strides = [1, 1]} : vector<4x160xf32> to vector<1x160xf32>
    %c8 = arith.constant 8 : index
    %c0_353 = arith.constant 0 : index
    %434 = vector.load %arg45[%c8, %c0_353] : memref<10x160xf32, #tpu.memory_space<vmem>>, vector<1x160xf32>
    tpu.vector_store %arg45[%c8, %c0_353], %433 {strides = array<i32>} : memref<10x160xf32, #tpu.memory_space<vmem>>, vector<1x160xf32>,
    %c0_354 = arith.constant 0 : index
    %c0_355 = arith.constant 0 : index
    %435 = vector.load %arg45[%c0_354, %c0_355] : memref<10x160xf32, #tpu.memory_space<vmem>>, vector<10x160xf32>
    %c0_356 = arith.constant 0 : index
    %c0_357 = arith.constant 0 : index
    %436 = vector.load %arg36[%c0_356, %c0_357] : memref<1x48xf32, #tpu.memory_space<vmem>>, vector<1x48xf32>
    %437 = vector.extract_strided_slice %435 {offsets = [0, 0], sizes = [8, 160], strides = [1, 1]} : vector<10x160xf32> to vector<8x160xf32>
    %c0_358 = arith.constant 0 : index
    %c0_359 = arith.constant 0 : index
    %c0_360 = arith.constant 0 : index
    %438 = vector.load %arg35[%c0_358, %c0_359, %c0_360] : memref<4x160x48xf32, #tpu.memory_space<vmem>>, vector<1x160x48xf32>
    %439 = vector.shape_cast %438 : vector<1x160x48xf32> to vector<160x48xf32>
    %cst_361 = arith.constant dense<0.000000e+00> : vector<8x48xf32>
    %440 = tpu.matmul %437, %439, %cst_361 {dimension_numbers = #tpu.dot_dimension_numbers<[1], [0], [0], [1], [0, 0, 1, 1], [], []>} : vector<8x160xf32>, vector<160x48xf32>, vector<8x48xf32> -> vector<8x48xf32>
    %441 = vector.broadcast %436 : vector<1x48xf32> to vector<8x48xf32>
    %442 = arith.addf %441, %440 : vector<8x48xf32>
    %443 = vector.extract_strided_slice %435 {offsets = [1, 0], sizes = [8, 160], strides = [1, 1]} : vector<10x160xf32> to vector<8x160xf32>
    %c1_362 = arith.constant 1 : index
    %c0_363 = arith.constant 0 : index
    %c0_364 = arith.constant 0 : index
    %444 = vector.load %arg35[%c1_362, %c0_363, %c0_364] : memref<4x160x48xf32, #tpu.memory_space<vmem>>, vector<1x160x48xf32>
    %445 = vector.shape_cast %444 : vector<1x160x48xf32> to vector<160x48xf32>
    %cst_365 = arith.constant dense<0.000000e+00> : vector<8x48xf32>
    %446 = tpu.matmul %443, %445, %cst_365 {dimension_numbers = #tpu.dot_dimension_numbers<[1], [0], [0], [1], [0, 0, 1, 1], [], []>} : vector<8x160xf32>, vector<160x48xf32>, vector<8x48xf32> -> vector<8x48xf32>
    %447 = arith.addf %442, %446 : vector<8x48xf32>
    %448 = math.tanh %447 : vector<8x48xf32>
    %c0_366 = arith.constant 0 : index
    %c0_367 = arith.constant 0 : index
    %c0_368 = arith.constant 0 : index
    %c0_369 = arith.constant 0 : index
    %449 = vector.load %arg37[%c0_366, %c0_367, %c0_368, %c0_369] : memref<1x2x8x48xf32, #tpu.memory_space<vmem>>, vector<1x1x8x48xf32>
    %450 = vector.shape_cast %449 : vector<1x1x8x48xf32> to vector<8x48xf32>
    %451 = vector.shape_cast %448 : vector<8x48xf32> to vector<1x1x8x48xf32>
    tpu.vector_store %arg37[%c0_366, %c0_367, %c0_368, %c0_369], %451 {strides = array<i32>} : memref<1x2x8x48xf32, #tpu.memory_space<vmem>>, vector<1x1x8x48xf32>,
    %c0_370 = arith.constant 0 : index
    %c0_371 = arith.constant 0 : index
    %452 = vector.load %arg36[%c0_370, %c0_371] : memref<1x48xf32, #tpu.memory_space<vmem>>, vector<1x48xf32>
    %453 = vector.extract_strided_slice %435 {offsets = [1, 0], sizes = [8, 160], strides = [1, 1]} : vector<10x160xf32> to vector<8x160xf32>
    %c2_372 = arith.constant 2 : index
    %c0_373 = arith.constant 0 : index
    %c0_374 = arith.constant 0 : index
    %454 = vector.load %arg35[%c2_372, %c0_373, %c0_374] : memref<4x160x48xf32, #tpu.memory_space<vmem>>, vector<1x160x48xf32>
    %455 = vector.shape_cast %454 : vector<1x160x48xf32> to vector<160x48xf32>
    %cst_375 = arith.constant dense<0.000000e+00> : vector<8x48xf32>
    %456 = tpu.matmul %453, %455, %cst_375 {dimension_numbers = #tpu.dot_dimension_numbers<[1], [0], [0], [1], [0, 0, 1, 1], [], []>} : vector<8x160xf32>, vector<160x48xf32>, vector<8x48xf32> -> vector<8x48xf32>
    %457 = vector.broadcast %452 : vector<1x48xf32> to vector<8x48xf32>
    %458 = arith.addf %457, %456 : vector<8x48xf32>
    %459 = vector.extract_strided_slice %435 {offsets = [2, 0], sizes = [8, 160], strides = [1, 1]} : vector<10x160xf32> to vector<8x160xf32>
    %c3_376 = arith.constant 3 : index
    %c0_377 = arith.constant 0 : index
    %c0_378 = arith.constant 0 : index
    %460 = vector.load %arg35[%c3_376, %c0_377, %c0_378] : memref<4x160x48xf32, #tpu.memory_space<vmem>>, vector<1x160x48xf32>
    %461 = vector.shape_cast %460 : vector<1x160x48xf32> to vector<160x48xf32>
    %cst_379 = arith.constant dense<0.000000e+00> : vector<8x48xf32>
    %462 = tpu.matmul %459, %461, %cst_379 {dimension_numbers = #tpu.dot_dimension_numbers<[1], [0], [0], [1], [0, 0, 1, 1], [], []>} : vector<8x160xf32>, vector<160x48xf32>, vector<8x48xf32> -> vector<8x48xf32>
    %463 = arith.addf %458, %462 : vector<8x48xf32>
    %464 = math.tanh %463 : vector<8x48xf32>
    %c0_380 = arith.constant 0 : index
    %c1_381 = arith.constant 1 : index
    %c0_382 = arith.constant 0 : index
    %c0_383 = arith.constant 0 : index
    %465 = vector.load %arg37[%c0_380, %c1_381, %c0_382, %c0_383] : memref<1x2x8x48xf32, #tpu.memory_space<vmem>>, vector<1x1x8x48xf32>
    %466 = vector.shape_cast %465 : vector<1x1x8x48xf32> to vector<8x48xf32>
    %467 = vector.shape_cast %464 : vector<8x48xf32> to vector<1x1x8x48xf32>
    tpu.vector_store %arg37[%c0_380, %c1_381, %c0_382, %c0_383], %467 {strides = array<i32>} : memref<1x2x8x48xf32, #tpu.memory_space<vmem>>, vector<1x1x8x48xf32>,
    return
  }
  func.func @transform_0(%arg0: i32) -> (i32, i32, i32) {
    %c0_i32 = arith.constant 0 : i32
    %c0_i32_0 = arith.constant 0 : i32
    %c0_i32_1 = arith.constant 0 : i32
    return %arg0, %c0_i32, %c0_i32_0 : i32, i32, i32
  }
  func.func @transform_1(%arg0: i32) -> (i32, i32, i32) {
    %c0_i32 = arith.constant 0 : i32
    %c0_i32_0 = arith.constant 0 : i32
    %c0_i32_1 = arith.constant 0 : i32
    return %arg0, %c0_i32, %c0_i32_0 : i32, i32, i32
  }
  func.func @transform_2(%arg0: i32) -> (i32, i32, i32) {
    %c0_i32 = arith.constant 0 : i32
    %c0_i32_0 = arith.constant 0 : i32
    %c0_i32_1 = arith.constant 0 : i32
    %c0_i32_2 = arith.constant 0 : i32
    return %c0_i32, %c0_i32_0, %c0_i32_1 : i32, i32, i32
  }
  func.func @transform_3(%arg0: i32) -> (i32, i32) {
    %c0_i32 = arith.constant 0 : i32
    %c0_i32_0 = arith.constant 0 : i32
    %c0_i32_1 = arith.constant 0 : i32
    return %c0_i32, %c0_i32_0 : i32, i32
  }
  func.func @transform_4(%arg0: i32) -> (i32, i32, i32) {
    %c0_i32 = arith.constant 0 : i32
    %c0_i32_0 = arith.constant 0 : i32
    %c0_i32_1 = arith.constant 0 : i32
    %c0_i32_2 = arith.constant 0 : i32
    return %c0_i32, %c0_i32_0, %c0_i32_1 : i32, i32, i32
  }
  func.func @transform_5(%arg0: i32) -> (i32, i32) {
    %c0_i32 = arith.constant 0 : i32
    %c0_i32_0 = arith.constant 0 : i32
    %c0_i32_1 = arith.constant 0 : i32
    return %c0_i32, %c0_i32_0 : i32, i32
  }
  func.func @transform_6(%arg0: i32) -> (i32, i32, i32) {
    %c0_i32 = arith.constant 0 : i32
    %c0_i32_0 = arith.constant 0 : i32
    %c0_i32_1 = arith.constant 0 : i32
    %c0_i32_2 = arith.constant 0 : i32
    return %c0_i32, %c0_i32_0, %c0_i32_1 : i32, i32, i32
  }
  func.func @transform_7(%arg0: i32) -> (i32, i32) {
    %c0_i32 = arith.constant 0 : i32
    %c0_i32_0 = arith.constant 0 : i32
    %c0_i32_1 = arith.constant 0 : i32
    return %c0_i32, %c0_i32_0 : i32, i32
  }
  func.func @transform_8(%arg0: i32) -> (i32, i32, i32) {
    %c0_i32 = arith.constant 0 : i32
    %c0_i32_0 = arith.constant 0 : i32
    %c0_i32_1 = arith.constant 0 : i32
    %c0_i32_2 = arith.constant 0 : i32
    return %c0_i32, %c0_i32_0, %c0_i32_1 : i32, i32, i32
  }
  func.func @transform_9(%arg0: i32) -> (i32, i32) {
    %c0_i32 = arith.constant 0 : i32
    %c0_i32_0 = arith.constant 0 : i32
    %c0_i32_1 = arith.constant 0 : i32
    return %c0_i32, %c0_i32_0 : i32, i32
  }
  func.func @transform_10(%arg0: i32) -> (i32, i32, i32) {
    %c0_i32 = arith.constant 0 : i32
    %c0_i32_0 = arith.constant 0 : i32
    %c0_i32_1 = arith.constant 0 : i32
    %c0_i32_2 = arith.constant 0 : i32
    return %c0_i32, %c0_i32_0, %c0_i32_1 : i32, i32, i32
  }
  func.func @transform_11(%arg0: i32) -> (i32, i32) {
    %c0_i32 = arith.constant 0 : i32
    %c0_i32_0 = arith.constant 0 : i32
    %c0_i32_1 = arith.constant 0 : i32
    return %c0_i32, %c0_i32_0 : i32, i32
  }
  func.func @transform_12(%arg0: i32) -> (i32, i32, i32) {
    %c0_i32 = arith.constant 0 : i32
    %c0_i32_0 = arith.constant 0 : i32
    %c0_i32_1 = arith.constant 0 : i32
    %c0_i32_2 = arith.constant 0 : i32
    return %c0_i32, %c0_i32_0, %c0_i32_1 : i32, i32, i32
  }
  func.func @transform_13(%arg0: i32) -> (i32, i32) {
    %c0_i32 = arith.constant 0 : i32
    %c0_i32_0 = arith.constant 0 : i32
    %c0_i32_1 = arith.constant 0 : i32
    return %c0_i32, %c0_i32_0 : i32, i32
  }
  func.func @transform_14(%arg0: i32) -> (i32, i32, i32) {
    %c0_i32 = arith.constant 0 : i32
    %c0_i32_0 = arith.constant 0 : i32
    %c0_i32_1 = arith.constant 0 : i32
    %c0_i32_2 = arith.constant 0 : i32
    return %c0_i32, %c0_i32_0, %c0_i32_1 : i32, i32, i32
  }
  func.func @transform_15(%arg0: i32) -> (i32, i32) {
    %c0_i32 = arith.constant 0 : i32
    %c0_i32_0 = arith.constant 0 : i32
    %c0_i32_1 = arith.constant 0 : i32
    return %c0_i32, %c0_i32_0 : i32, i32
  }
  func.func @transform_16(%arg0: i32) -> (i32, i32, i32) {
    %c0_i32 = arith.constant 0 : i32
    %c0_i32_0 = arith.constant 0 : i32
    %c0_i32_1 = arith.constant 0 : i32
    %c0_i32_2 = arith.constant 0 : i32
    return %c0_i32, %c0_i32_0, %c0_i32_1 : i32, i32, i32
  }
  func.func @transform_17(%arg0: i32) -> (i32, i32) {
    %c0_i32 = arith.constant 0 : i32
    %c0_i32_0 = arith.constant 0 : i32
    %c0_i32_1 = arith.constant 0 : i32
    return %c0_i32, %c0_i32_0 : i32, i32
  }
  func.func @transform_18(%arg0: i32) -> (i32, i32, i32) {
    %c0_i32 = arith.constant 0 : i32
    %c0_i32_0 = arith.constant 0 : i32
    %c0_i32_1 = arith.constant 0 : i32
    %c0_i32_2 = arith.constant 0 : i32
    return %c0_i32, %c0_i32_0, %c0_i32_1 : i32, i32, i32
  }
  func.func @transform_19(%arg0: i32) -> (i32, i32, i32) {
    %c0_i32 = arith.constant 0 : i32
    %c0_i32_0 = arith.constant 0 : i32
    %c0_i32_1 = arith.constant 0 : i32
    %c0_i32_2 = arith.constant 0 : i32
    return %c0_i32, %c0_i32_0, %c0_i32_1 : i32, i32, i32
  }
  func.func @transform_20(%arg0: i32) -> (i32, i32, i32) {
    %c0_i32 = arith.constant 0 : i32
    %c0_i32_0 = arith.constant 0 : i32
    %c0_i32_1 = arith.constant 0 : i32
    %c0_i32_2 = arith.constant 0 : i32
    return %c0_i32, %c0_i32_0, %c0_i32_1 : i32, i32, i32
  }
  func.func @transform_21(%arg0: i32) -> (i32, i32) {
    %c0_i32 = arith.constant 0 : i32
    %c0_i32_0 = arith.constant 0 : i32
    %c0_i32_1 = arith.constant 0 : i32
    return %c0_i32, %c0_i32_0 : i32, i32
  }
  func.func @transform_22(%arg0: i32) -> (i32, i32, i32) {
    %c0_i32 = arith.constant 0 : i32
    %c0_i32_0 = arith.constant 0 : i32
    %c0_i32_1 = arith.constant 0 : i32
    %c0_i32_2 = arith.constant 0 : i32
    return %c0_i32, %c0_i32_0, %c0_i32_1 : i32, i32, i32
  }
  func.func @transform_23(%arg0: i32) -> (i32, i32) {
    %c0_i32 = arith.constant 0 : i32
    %c0_i32_0 = arith.constant 0 : i32
    %c0_i32_1 = arith.constant 0 : i32
    return %c0_i32, %c0_i32_0 : i32, i32
  }
  func.func @transform_24(%arg0: i32) -> (i32, i32, i32) {
    %c0_i32 = arith.constant 0 : i32
    %c0_i32_0 = arith.constant 0 : i32
    %c0_i32_1 = arith.constant 0 : i32
    %c0_i32_2 = arith.constant 0 : i32
    return %c0_i32, %c0_i32_0, %c0_i32_1 : i32, i32, i32
  }
  func.func @transform_25(%arg0: i32) -> (i32, i32) {
    %c0_i32 = arith.constant 0 : i32
    %c0_i32_0 = arith.constant 0 : i32
    %c0_i32_1 = arith.constant 0 : i32
    return %c0_i32, %c0_i32_0 : i32, i32
  }
  func.func @transform_26(%arg0: i32) -> (i32, i32, i32) {
    %c0_i32 = arith.constant 0 : i32
    %c0_i32_0 = arith.constant 0 : i32
    %c0_i32_1 = arith.constant 0 : i32
    %c0_i32_2 = arith.constant 0 : i32
    return %c0_i32, %c0_i32_0, %c0_i32_1 : i32, i32, i32
  }
  func.func @transform_27(%arg0: i32) -> (i32, i32) {
    %c0_i32 = arith.constant 0 : i32
    %c0_i32_0 = arith.constant 0 : i32
    %c0_i32_1 = arith.constant 0 : i32
    return %c0_i32, %c0_i32_0 : i32, i32
  }
  func.func @transform_28(%arg0: i32) -> (i32, i32, i32) {
    %c0_i32 = arith.constant 0 : i32
    %c0_i32_0 = arith.constant 0 : i32
    %c0_i32_1 = arith.constant 0 : i32
    %c0_i32_2 = arith.constant 0 : i32
    return %c0_i32, %c0_i32_0, %c0_i32_1 : i32, i32, i32
  }
  func.func @transform_29(%arg0: i32) -> (i32, i32) {
    %c0_i32 = arith.constant 0 : i32
    %c0_i32_0 = arith.constant 0 : i32
    %c0_i32_1 = arith.constant 0 : i32
    return %c0_i32, %c0_i32_0 : i32, i32
  }
  func.func @transform_30(%arg0: i32) -> (i32, i32, i32) {
    %c0_i32 = arith.constant 0 : i32
    %c0_i32_0 = arith.constant 0 : i32
    %c0_i32_1 = arith.constant 0 : i32
    %c0_i32_2 = arith.constant 0 : i32
    return %c0_i32, %c0_i32_0, %c0_i32_1 : i32, i32, i32
  }
  func.func @transform_31(%arg0: i32) -> (i32, i32) {
    %c0_i32 = arith.constant 0 : i32
    %c0_i32_0 = arith.constant 0 : i32
    %c0_i32_1 = arith.constant 0 : i32
    return %c0_i32, %c0_i32_0 : i32, i32
  }
  func.func @transform_32(%arg0: i32) -> (i32, i32, i32) {
    %c0_i32 = arith.constant 0 : i32
    %c0_i32_0 = arith.constant 0 : i32
    %c0_i32_1 = arith.constant 0 : i32
    %c0_i32_2 = arith.constant 0 : i32
    return %c0_i32, %c0_i32_0, %c0_i32_1 : i32, i32, i32
  }
  func.func @transform_33(%arg0: i32) -> (i32, i32) {
    %c0_i32 = arith.constant 0 : i32
    %c0_i32_0 = arith.constant 0 : i32
    %c0_i32_1 = arith.constant 0 : i32
    return %c0_i32, %c0_i32_0 : i32, i32
  }
  func.func @transform_34(%arg0: i32) -> (i32, i32, i32) {
    %c0_i32 = arith.constant 0 : i32
    %c0_i32_0 = arith.constant 0 : i32
    %c0_i32_1 = arith.constant 0 : i32
    %c0_i32_2 = arith.constant 0 : i32
    return %c0_i32, %c0_i32_0, %c0_i32_1 : i32, i32, i32
  }
  func.func @transform_35(%arg0: i32) -> (i32, i32) {
    %c0_i32 = arith.constant 0 : i32
    %c0_i32_0 = arith.constant 0 : i32
    %c0_i32_1 = arith.constant 0 : i32
    return %c0_i32, %c0_i32_0 : i32, i32
  }
  func.func @transform_36(%arg0: i32) -> (i32, i32, i32, i32) {
    %c0_i32 = arith.constant 0 : i32
    %c0_i32_0 = arith.constant 0 : i32
    %c0_i32_1 = arith.constant 0 : i32
    %c0_i32_2 = arith.constant 0 : i32
    return %arg0, %c0_i32, %c0_i32_0, %c0_i32_1 : i32, i32, i32, i32
  }
  func.func @transform_37(%arg0: i32) -> (i32, i32, i32) {
    %c0_i32 = arith.constant 0 : i32
    %c0_i32_0 = arith.constant 0 : i32
    %c0_i32_1 = arith.constant 0 : i32
    return %arg0, %c0_i32, %c0_i32_0 : i32, i32, i32
  }
}

</mosaic_0001>

<bundles_post_ra>
// kernel: mul.2193
= control target key start
LH: loop header
LB: loop body
LE: loop exit
PB: predicated region body
PF: predicated region fallthrough
CT: control target
= control target key end

     0   :  { %s34_s0 = inlined_call_operand.vmem [shape: f32[1,96], index: 0, kind: input, shape index: {}]   ;;  %s35_s1 = inlined_call_operand.vmem [shape: f32[1,96], index: 1, kind: input, shape index: {}]   ;;  %s36_s2 = inlined_call_operand.vmem [shape: f32[1,96], index: 2, kind: output, shape index: {}]  }
   0x1   :  { %v3_v0 = vld [vmem:[%s34_s0] sm:$0x1] }
   0x2   :  { %v4_v1 = vld [vmem:[%s35_s1] sm:$0x1] }
   0x3   :  { %v7_v2 = vmul.f32 %v4_v1, %v3_v0 }
   0x5   :  { %9 = vst [vmem:[%s36_s2] sm:$0x1] %v7_v2 }

// kernel: vqvae_forward.1
= control target key start
LH: loop header
LB: loop body
LE: loop exit
PB: predicated region body
PF: predicated region fallthrough
CT: control target
= control target key end

     0   :  { %s9757_s6 = smov 1   ;;  %s9758_s10 = smov 2   ;;  %s11815_s0 = inlined_call_operand.smem [shape: u32[38], index: -1, kind: input, shape index: {}] }
   0x1   :  { %s9806_s5 = sld [smem:[%s11815_s0]]   ;;  %s9759_s14 = smov 3  }
   0x2   :  { %s9811_s9 = sld [smem:[%s11815_s0 + %s9757_s6]]   ;;  %s9760_s18 = smov 4  }
   0x3   :  { %s9816_s13 = sld [smem:[%s11815_s0 + %s9758_s10]]   ;;  %s9761_s22 = smov 5  }
   0x4   :  { %s9821_s17 = sld [smem:[%s11815_s0 + %s9759_s14]]   ;;  %s9762_s26 = smov 6  }
   0x5   :  { %s9826_s21 = sld [smem:[%s11815_s0 + %s9760_s18]]   ;;  %s9763_s30 = smov 7  }
   0x6   :  { %s9831_s25 = sld [smem:[%s11815_s0 + %s9761_s22]]   ;;  %s9764_s4 = smov 8  }
   0x7   :  { %s9836_s29 = sld [smem:[%s11815_s0 + %s9762_s26]]   ;;  %s9765_s10 = smov 9  }
   0x8   :  { %s9841_s3 = sld [smem:[%s11815_s0 + %s9763_s30]]   ;;  %s9766_s15 = smov 10  }
   0x9   :  { %s9846_s8 = sld [smem:[%s11815_s0 + %s9764_s4]]   ;;  %s9767_s20 = smov 11  }
   0xa   :  { %s9851_s14 = sld [smem:[%s11815_s0 + %s9765_s10]]   ;;  %s9768_s26 = smov 12  }
   0xb   :  { %s9856_s19 = sld [smem:[%s11815_s0 + %s9766_s15]]   ;;  %s9769_s1 = smov 13  }
   0xc   :  { %s9861_s24 = sld [smem:[%s11815_s0 + %s9767_s20]]   ;;  %s9770_s7 = smov 14  }
   0xd   :  { %s9866_s30 = sld [smem:[%s11815_s0 + %s9768_s26]]   ;;  %s9771_s15 = smov 15  }
   0xe   :  { %s9871_s6 = sld [smem:[%s11815_s0 + %s9769_s1]]   ;;  %s9772_s22 = smov 16  }
   0xf   :  { %s9876_s12 = sld [smem:[%s11815_s0 + %s9770_s7]]   ;;  %s9773_s28 = smov 17  }
  0x10   :  { %s9881_s20 = sld [smem:[%s11815_s0 + %s9771_s15]]   ;;  %s9774_s7 = smov 18  }
  0x11   :  { %s9886_s27 = sld [smem:[%s11815_s0 + %s9772_s22]]   ;;  %s9775_s15 = smov 19  }
  0x12   :  { %s9891_s4 = sld [smem:[%s11815_s0 + %s9773_s28]]   ;;  %s9776_s22 = smov 20  }
  0x13   :  { %s9777_s28 = smov 21  }
  0x14   :  { %11828 = sst [smem:[#allocation9_spill]] %s9871_s6 }
  0x15   :  { %s9896_s6 = sld [smem:[%s11815_s0 + %s9774_s7]]   ;;  %s9778_s7 = smov 22  }
  0x16   :  { %11829 = sst [smem:[#allocation10_spill]] %s9881_s20 }
  0x17   :  { %11830 = sst [smem:[#allocation11_spill]] %s9886_s27 }
  0x18   :  { %11831 = sst [smem:[#allocation12_spill]] %s9891_s4 }
  0x19   :  { %s9901_s20 = sld [smem:[%s11815_s0 + %s9775_s15]]   ;;  %s9779_s15 = smov 23  }
  0x1a   :  { %s9906_s27 = sld [smem:[%s11815_s0 + %s9776_s22]]   ;;  %s9780_s22 = smov 24  }
  0x1b   :  { %11832 = sst [smem:[#allocation13_spill]] %s9896_s6 }
  0x1c   :  { %s9911_s4 = sld [smem:[%s11815_s0 + %s9777_s28]]   ;;  %s9781_s28 = smov 25  }
  0x1d   :  { %s9916_s6 = sld [smem:[%s11815_s0 + %s9778_s7]]   ;;  %s9782_s7 = smov 26  }
  0x1f   :  { %11833 = sst [smem:[#allocation14_spill]] %s9901_s20 }
  0x20   :  { %11834 = sst [smem:[#allocation15_spill]] %s9906_s27 }
  0x21   :  { %s9921_s20 = sld [smem:[%s11815_s0 + %s9779_s15]]   ;;  %s9783_s15 = smov 27  }
  0x22   :  { %11835 = sst [smem:[#allocation16_spill]] %s9911_s4 }
  0x23   :  { %11836 = sst [smem:[#allocation17_spill]] %s9916_s6 }
  0x24   :  { %s9926_s27 = sld [smem:[%s11815_s0 + %s9780_s22]]   ;;  %s9784_s22 = smov 28  }
  0x25   :  { %s9931_s4 = sld [smem:[%s11815_s0 + %s9781_s28]]   ;;  %s9785_s28 = smov 29  }
  0x26   :  { %s9936_s6 = sld [smem:[%s11815_s0 + %s9782_s7]]   ;;  %s9786_s7 = smov 30  }
  0x27   :  { %11837 = sst [smem:[#allocation18_spill]] %s9921_s20 }
  0x28   :  { %s9941_s20 = sld [smem:[%s11815_s0 + %s9783_s15]]   ;;  %s9787_s15 = smov 31  }
  0x2a   :  { %11838 = sst [smem:[#allocation19_spill]] %s9926_s27 }
  0x2b   :  { %11839 = sst [smem:[#allocation20_spill]] %s9931_s4 }
  0x2c   :  { %11840 = sst [smem:[#allocation21_spill]] %s9936_s6 }
  0x2d   :  { %s9946_s27 = sld [smem:[%s11815_s0 + %s9784_s22]]   ;;  %s9788_s22 = smov 32  }
  0x2e   :  { %11841 = sst [smem:[#allocation22_spill]] %s9941_s20 }
  0x2f   :  { %s9951_s4 = sld [smem:[%s11815_s0 + %s9785_s28]]   ;;  %s9789_s28 = smov 33  }
  0x30   :  { %s9956_s6 = sld [smem:[%s11815_s0 + %s9786_s7]]   ;;  %s9790_s7 = smov 34  }
  0x31   :  { %s9961_s20 = sld [smem:[%s11815_s0 + %s9787_s15]]   ;;  %s9791_s15 = smov 35  }
  0x33   :  { %11842 = sst [smem:[#allocation23_spill]] %s9946_s27 }
  0x34   :  { %s9966_s27 = sld [smem:[%s11815_s0 + %s9788_s22]]   ;;  %s9792_s22 = smov 36  }
  0x35   :  { %11843 = sst [smem:[#allocation24_spill]] %s9951_s4 }
  0x36   :  { %11844 = sst [smem:[#allocation25_spill]] %s9956_s6 }
  0x37   :  { %11845 = sst [smem:[#allocation26_spill]] %s9961_s20 }
  0x38   :  { %s9971_s4 = sld [smem:[%s11815_s0 + %s9789_s28]]   ;;  %s9793_s28 = smov 37  }
  0x39   :  { %s9976_s6 = sld [smem:[%s11815_s0 + %s9790_s7]]   ;;  %s9993_s7 = smov 0  }
  0x3a   :  { %11846 = sst [smem:[#allocation27_spill]] %s9966_s27 }
  0x3b   :  { %s9981_s20 = sld [smem:[%s11815_s0 + %s9791_s15]]  }
  0x3c   :  { %s9986_s27 = sld [smem:[%s11815_s0 + %s9792_s22]]  }
  0x3e   :  { %11847 = sst [smem:[#allocation28_spill]] %s9971_s4 }
  0x3f   :  { %s9991_s4 = sld [smem:[%s11815_s0 + %s9793_s28]]  }
  0x40 LB: > { %s6964_s10 = sadd.s32 4294967295, %s9755_s7   ;;  %p6968_p0 = scmp.ge.s32.totalorder %s9755_s7, 1  ;;  %s9755_s7 = sphi %s9993_s7, %s86_s7  }
  0x41   : > { %p1038_p1 = scmp.lt.s32.totalorder %s9755_s7, 3 }
  0x43   : > { %p1039_p2 = pnand %p6968_p0, %p1038_p1 }
  0x44   : > { %v6976_v0 = vld [vmem:[%s9816_s13 + $0x78] sm:$0xff] (!%p1039_p2)  ;;  %v6978_v1 = vld [vmem:[%s9816_s13 + $0x88] sm:$0xff] (!%p1039_p2)  ;;  %v6975_v2 = vld [vmem:[%s9816_s13 + $0x70] sm:$0xff] (!%p1039_p2)  ;;  %p10006_p3 = scmp.lt.s32.totalorder (!%p1039_p2), %s6964_s10, 1  ;;  %v9794_v7 = vmov (!%p1039_p2), 0.0   ;;  %vm1193_vm0 = vcmask (!%p1039_p2), 1045504  }
  0x45   : > { %1042 = sbr.rel (%p1039_p2) target bundleno = 6550 (0x1996), region = 164  ;;  %v8222_v3 = vpack.c.bf16 (!%p1039_p2), %v6978_v1, %v6976_v0  ;;  %v6977_v4 = vld [vmem:[%s9816_s13 + $0x80] sm:$0xff] (!%p1039_p2)  ;;  %v6980_v5 = vld [vmem:[%s9816_s13 + $0x98] sm:$0xff] (!%p1039_p2)  ;;  %v6982_v6 = vld [vmem:[%s9816_s13 + $0xa8] sm:$0xff] (!%p1039_p2)  ;;  %1264 = vmatprep.mubr.f32.mxu0 (!%p1039_p2), %v9794_v7  ;;  %1568 = vst [vmem:[#allocation2] sm:$0x1f] (!%p1039_p2), %v9794_v7 }
  0x46   : > { %1571 = vst [vmem:[#allocation3] sm:$0x1f] (!%p1039_p2), %v9794_v7  ;;  %2150 = vst [vmem:[#allocation4] sm:$0x3f] (!%p1039_p2), %v9794_v7  ;;  %v8224_v8 = vpack.c.bf16 (!%p1039_p2), %v6977_v4, %v6975_v2  ;;  %v8226_v9 = vpack.c.bf16 (!%p1039_p2), %v6982_v6, %v6980_v5  ;;  %v6979_v10 = vld [vmem:[%s9816_s13 + $0x90] sm:$0xff] (!%p1039_p2)  ;;  %v6981_v11 = vld [vmem:[%s9816_s13 + $0xa0] sm:$0xff] (!%p1039_p2) }
  0x47   : > { %2556 = vst [vmem:[#allocation5] sm:$0x3f] (!%p1039_p2), %v9794_v7  ;;  %4948 = vst [vmem:[#allocation7] sm:$0x3f] (!%p1039_p2), %v9794_v7  ;;  %v6984_v12 = vld [vmem:[%s9816_s13 + $0xb8] sm:$0xff] (!%p1039_p2)  ;;  %8223 = vmatprep.subr.bf16.mxu0 (!%p1039_p2), %v8222_v3  ;;  %v6986_v13 = vld [vmem:[%s9816_s13 + $0xc8] sm:$0xff] (!%p1039_p2)  ;;  %v8228_v14 = vpack.c.bf16 (!%p1039_p2), %v6981_v11, %v6979_v10 }
  0x48   : > { %5800 = vst [vmem:[#allocation8] sm:$0xff] (!%p1039_p2), %v9794_v7  ;;  %5802 = vst [vmem:[#allocation8 + $0x10] sm:$0x3] (!%p1039_p2), %v9794_v7  ;;  %8225 = vmatpush1.bf16.msra.mxu0 (!%p1039_p2), %v8224_v8  ;;  %v8230_v15 = vpack.c.bf16 (!%p1039_p2), %v6986_v13, %v6984_v12  ;;  %v6983_v16 = vld [vmem:[%s9816_s13 + $0xb0] sm:$0xff] (!%p1039_p2)  ;;  %v6985_v17 = vld [vmem:[%s9816_s13 + $0xc0] sm:$0xff] (!%p1039_p2)  ;;  %vm1189_vm1 = vcmask (!%p1039_p2), 441344  }
  0x49   : > { %8227 = vmatprep.subr.bf16.mxu0 (!%p1039_p2), %v8226_v9  ;;  %v8232_v18 = vpack.c.bf16 (!%p1039_p2), %v6985_v17, %v6983_v16  ;;  %v6988_v19 = vld [vmem:[%s9816_s13 + $0xd8] sm:$0x3f] (!%p1039_p2)  ;;  %v1161_v20 = vld [vmem:[%s9816_s13 + $0x8] sm:$0xff] (!%p1039_p2)  ;;  %v1160_v22 = vld [vmem:[%s9816_s13] sm:$0xff] (!%p1039_p2)  ;;  %vm1367_vm2 = vcmask (!%p1039_p2), 1046528   ;;  %vm1569_vm3 = vcmask (!%p1039_p2), 258048  }
  0x4a   : > { %v1163_v21 = vld [vmem:[%s9816_s13 + $0x18] sm:$0xff] (!%p1039_p2)  ;;  %v1162_v23 = vld [vmem:[%s9816_s13 + $0x10] sm:$0xff] (!%p1039_p2)  ;;  %v1165_v24 = vld [vmem:[%s9816_s13 + $0x28] sm:$0xff] (!%p1039_p2)  ;;  %1570 = vst.msk [vmem:[#allocation2 + $0x8] sm:$0x1f] (!%p1039_p2), %vm1569_vm3, %v9794_v7  ;;  %vm1745_vm4 = vcmask (!%p1039_p2), 261120  }
  0x4b   : > { %v1167_v25 = vld [vmem:[%s9816_s13 + $0x38] sm:$0xff] (!%p1039_p2)  ;;  %v6987_v26 = vld [vmem:[%s9816_s13 + $0xd0] sm:$0x3f] (!%p1039_p2)  ;;  %v8234_v27 = vpack.c.bf16 (!%p1039_p2), %v1163_v21, %v1161_v20  ;;  %v8236_v29 = vpack.c.bf16 (!%p1039_p2), %v1162_v23, %v1160_v22  ;;  %v1164_v31 = vld [vmem:[%s9816_s13 + $0x20] sm:$0xff] (!%p1039_p2)  ;;  %1572 = vst.msk [vmem:[#allocation3 + $0x8] sm:$0x1f] (!%p1039_p2), %vm1569_vm3, %v9794_v7 }
  0x4c   : > { %s11872_s10 = smov (!%p10006_p3, %s6964_s10), 1  ;;  %8229 = vmatpush1.bf16.msra.mxu0 %v8228_v14  ;;  %v8238_v30 = vpack.c.bf16 %v1167_v25, %v1165_v24  ;;  %v1166_v32 = vld [vmem:[%s9816_s13 + $0x30] sm:$0xff]  ;;  %v1169_v33 = vld [vmem:[%s9816_s13 + $0x48] sm:$0xff]  ;;  %v1171_v34 = vld [vmem:[%s9816_s13 + $0x58] sm:$0xff]  ;;  %5801 = vst.msk [vmem:[#allocation8 + $0x8] sm:$0xff] %vm1745_vm4, %v9794_v7  ;;  %vm2151_vm6 = vcmask 521216  }
  0x4d   : > { %s10034_s11 = sshll.u32 %s11872_s10, 4  ;;  %8231 = vmatprep.subr.bf16.mxu0 %v8230_v15  ;;  %v8240_v35 = vpack.c.bf16 %v1166_v32, %v1164_v31  ;;  %v8242_v36 = vpack.c.bf16 %v1171_v34, %v1169_v33  ;;  %v1168_v37 = vld [vmem:[%s9816_s13 + $0x40] sm:$0xff]  ;;  %v1170_v38 = vld [vmem:[%s9816_s13 + $0x50] sm:$0xff]  ;;  %v7030_v39 = vld [vmem:[%s9826_s21 + $0x148] sm:$0xff]  ;;  %vm2160_vm7 = vcmask 520193   ;;  %vm2213_vm8 = vcmask 523264  }
  0x4e   : > { %s10041_s15 = scalar_lea.vmem %s9811_s9, %s10034_s11  ;;  %v7032_v40 = vld [vmem:[%s9826_s21 + $0x158] sm:$0xff]  ;;  %v7029_v41 = vld [vmem:[%s9826_s21 + $0x140] sm:$0xff]  ;;  %v7031_v43 = vld [vmem:[%s9826_s21 + $0x150] sm:$0xff]  ;;  %v8244_v46 = vpack.c.bf16 %v1170_v38, %v1168_v37  ;;  %s10077_s16 = scalar_lea.vmem %s9806_s5, %s10034_s11  ;;  %vm9797_vm9 = vmmov 0   ;;  %vm3529_vm10 = vcmask 785408   ;;  %vm3698_vm11 = vcmask 257024  }
  0x4f   : > { %v10050_v28 = vld [vmem:[%s10041_s15] sm:$0xff]  ;;  %v8270_v42 = vpack.c.bf16 %v7032_v40, %v7030_v39  ;;  %v7034_v44 = vld [vmem:[%s9826_s21 + $0x168] sm:$0xff]  ;;  %v7036_v45 = vld [vmem:[%s9826_s21 + $0x178] sm:$0xff]  ;;  %v8272_v47 = vpack.c.bf16 %v7031_v43, %v7029_v41  ;;  %s11851_s18 = sld [smem:[#allocation9_spill]]  ;;  %s11852_s22 = sld [smem:[#allocation11_spill]] }
  0x50   : > { %8233 = vmatpush1.bf16.msra.mxu0 %v8232_v18  ;;  %v8274_v48 = vpack.c.bf16 %v7036_v45, %v7034_v44  ;;  %v7033_v49 = vld [vmem:[%s9826_s21 + $0x160] sm:$0xff]  ;;  %v7035_v50 = vld [vmem:[%s9826_s21 + $0x170] sm:$0xff]  ;;  %v7038_v51 = vld [vmem:[%s9826_s21 + $0x188] sm:$0xff]  ;;  %s11853_s23 = sld [smem:[#allocation13_spill]]  ;;  %s11854_s26 = sld [smem:[#allocation10_spill]] }
  0x51   : > { %6989 = vmatprep.subr.msk.mxu0 %vm1193_vm0, %v6988_v19  ;;  %8271 = vmatprep.subr.bf16.mxu1 %v8270_v42  ;;  %v7040_v52 = vld [vmem:[%s9826_s21 + $0x198] sm:$0xff]  ;;  %v1173_v53 = vld [vmem:[%s9816_s13 + $0x68] sm:$0x3f]  ;;  %v8276_v56 = vpack.c.bf16 %v7035_v50, %v7033_v49  ;;  %v6995_v57 = vld [vmem:[%s9816_s13 + $0xe0] sm:$0xff]  ;;  %s11855_s28 = sld [smem:[#allocation14_spill]]  ;;  %s11856_s1 = sld [smem:[#allocation12_spill]] }
  0x52   : > { %v6996_v54 = vld [vmem:[%s9816_s13 + $0xe8] sm:$0xff]  ;;  %v6998_v55 = vld [vmem:[%s9816_s13 + $0xf8] sm:$0xff]  ;;  %8273 = vmatpush1.bf16.msra.mxu1 %v8272_v47  ;;  %v6997_v58 = vld [vmem:[%s9816_s13 + $0xf0] sm:$0xff]  ;;  %v8278_v60 = vpack.c.bf16 %v7040_v52, %v7038_v51  ;;  %s11857_s2 = sld [smem:[#allocation16_spill]]  ;;  %s11858_s0 = sld [smem:[#allocation15_spill]] }
  0x53   : > { %v7000_v59 = vld [vmem:[%s9816_s13 + $0x108] sm:$0xff]  ;;  %8275 = vmatprep.subr.bf16.mxu1 %v8274_v48  ;;  %v7002_v61 = vld [vmem:[%s9816_s13 + $0x118] sm:$0xff]  ;;  %v7037_v62 = vld [vmem:[%s9826_s21 + $0x180] sm:$0xff]  ;;  %v8246_v1 = vpack.c.bf16 %v6998_v55, %v6996_v54  ;;  %v8248_v5 = vpack.c.bf16 %v6997_v58, %v6995_v57  ;;  %v1468_v54 = vrot.slane %v10050_v28, 1 }
  0x54   : > { %6990 = vmatpush1.msk.msra.mxu0 %vm1193_vm0, %v6987_v26  ;;  %v7039_v63 = vld [vmem:[%s9826_s21 + $0x190] sm:$0xff]  ;;  %v1172_v0 = vld [vmem:[%s9816_s13 + $0x60] sm:$0x3f]  ;;  %v7042_v2 = vld [vmem:[%s9826_s21 + $0x1a8] sm:$0xff]  ;;  %v8250_v6 = vpack.c.bf16 %v7002_v61, %v7000_v59 }
  0x55   : > { %8235 = vmatprep.subr.bf16.mxu0 %v8234_v27  ;;  %6991 = vmatmul.mubr.msk.f32.vlgmr.msra.gmra.mrb[0].mxu0 %vm1189_vm1, %v10050_v28  ;;  %v7044_v3 = vld [vmem:[%s9826_s21 + $0x1b8] sm:$0xff]  ;;  %v1156_v4 = vld [vmem:[%s10077_s16] sm:$0xff]  ;;  %v7001_v9 = vld [vmem:[%s9816_s13 + $0x110] sm:$0xff]  ;;  %v8280_v11 = vpack.c.bf16 %v7039_v63, %v7037_v62 }
  0x56   : > { %8237 = vmatpush1.bf16.msra.mxu0 %v8236_v29  ;;  %1344 = vmatprep.mubr.f32.mxu0 %v9794_v7  ;;  %v6999_v8 = vld [vmem:[%s9816_s13 + $0x100] sm:$0xff]  ;;  %v7004_v10 = vld [vmem:[%s9816_s13 + $0x128] sm:$0xff]  ;;  %v7006_v12 = vld [vmem:[%s9816_s13 + $0x138] sm:$0xff]  ;;  %v8282_v13 = vpack.c.bf16 %v7044_v3, %v7042_v2 }
  0x57   : > { %8239 = vmatprep.subr.bf16.mxu0 %v8238_v30  ;;  %8277 = vmatpush1.bf16.msra.mxu1 %v8276_v56  ;;  %v7041_v14 = vld [vmem:[%s9826_s21 + $0x1a0] sm:$0xff]  ;;  %v7043_v15 = vld [vmem:[%s9826_s21 + $0x1b0] sm:$0xff]  ;;  %v7046_v16 = vld [vmem:[%s9826_s21 + $0x1c8] sm:$0xff]  ;;  %v8252_v18 = vpack.c.bf16 %v7001_v9, %v6999_v8  ;;  %v8254_v19 = vpack.c.bf16 %v7006_v12, %v7004_v10  ;;  %v1368_v30 = vrot.slane %v1156_v4, 1 }
  0x58   : > { %8279 = vmatprep.subr.bf16.mxu1 %v8278_v60  ;;  %v7048_v17 = vld [vmem:[%s9826_s21 + $0x1d8] sm:$0xff]  ;;  %v7003_v20 = vld [vmem:[%s9816_s13 + $0x120] sm:$0xff]  ;;  %v7005_v21 = vld [vmem:[%s9816_s13 + $0x130] sm:$0xff]  ;;  %v8284_v22 = vpack.c.bf16 %v7043_v15, %v7041_v14 }
  0x59   : > { %v8286_v23 = vpack.c.bf16 %v7048_v17, %v7046_v16  ;;  %v7045_v24 = vld [vmem:[%s9826_s21 + $0x1c0] sm:$0xff]  ;;  %v7047_v25 = vld [vmem:[%s9826_s21 + $0x1d0] sm:$0xff]  ;;  %v1157_v26 = vld [vmem:[%s10077_s16 + $0x8] sm:$0x1]  ;;  %v8256_v27 = vpack.c.bf16 %v7005_v21, %v7003_v20  ;;  %s11860_s16 = sld [smem:[#allocation19_spill]] }
  0x5a   : > { %8241 = vmatpush1.bf16.msra.mxu0 %v8240_v35  ;;  %v8288_v29 = vpack.c.bf16 %v7047_v25, %v7045_v24  ;;  %v1369_v31 = vrot.slane %v1157_v26, 1  ;;  %v7008_v32 = vld [vmem:[%s9816_s13 + $0x148] sm:$0x3f]  ;;  %v7013_v33 = vld [vmem:[%s9816_s13 + $0x158] sm:$0xff]  ;;  %v7012_v35 = vld [vmem:[%s9816_s13 + $0x150] sm:$0xff] }
  0x5b   : > { %8243 = vmatprep.subr.bf16.mxu0 %v8242_v36  ;;  %8281 = vmatpush1.bf16.msra.mxu1 %v8280_v11  ;;  %v7015_v34 = vld [vmem:[%s9816_s13 + $0x168] sm:$0xff]  ;;  %v7014_v36 = vld [vmem:[%s9816_s13 + $0x160] sm:$0xff]  ;;  %v7017_v37 = vld [vmem:[%s9816_s13 + $0x178] sm:$0xff] }
  0x5c   : > { %8283 = vmatprep.subr.bf16.mxu1 %v8282_v13  ;;  %v7019_v38 = vld [vmem:[%s9816_s13 + $0x188] sm:$0xff]  ;;  %v7007_v39 = vld [vmem:[%s9816_s13 + $0x140] sm:$0x3f]  ;;  %v8258_v40 = vpack.c.bf16 %v7015_v34, %v7013_v33  ;;  %v1370_v41 = vsel %vm1367_vm2, %v1368_v30, %v1369_v31  ;;  %v8260_v42 = vpack.c.bf16 %v7014_v36, %v7012_v35  ;;  %v7016_v44 = vld [vmem:[%s9816_s13 + $0x170] sm:$0xff]  ;;  %v9795_v34 = vmov 1966171168  }
  0x5d   : > { %v8262_v43 = vpack.c.bf16 %v7019_v38, %v7017_v37  ;;  %v7018_v45 = vld [vmem:[%s9816_s13 + $0x180] sm:$0xff]  ;;  %v7023_v47 = vld [vmem:[%s9816_s13 + $0x1a8] sm:$0xff]  ;;  %v7020_v50 = vld [vmem:[%s9816_s13 + $0x190] sm:$0xff]  ;;  %v1577_v35 = vunpack.c.l.s4 %v9795_v34 }
  0x5e   : > { %8245 = vmatpush1.bf16.msra.mxu0 %v8244_v46  ;;  %v7021_v46 = vld [vmem:[%s9816_s13 + $0x198] sm:$0xff]  ;;  %v8264_v48 = vpack.c.bf16 %v7018_v45, %v7016_v44  ;;  %v7022_v51 = vld [vmem:[%s9816_s13 + $0x1a0] sm:$0xff]  ;;  %v1159_v52 = vld [vmem:[%s10041_s15 + $0x8] sm:$0x1]  ;;  %s11859_s15 = sld [smem:[#allocation17_spill]] }
  0x5f   : > { %6992 = vmatprep.subr.msk.mxu0 %vm1193_vm0, %v1173_v53  ;;  %8285 = vmatpush1.bf16.msra.mxu1 %v8284_v22  ;;  %v8266_v49 = vpack.c.bf16 %v7023_v47, %v7021_v46  ;;  %v8268_v53 = vpack.c.bf16 %v7022_v51, %v7020_v50  ;;  %v1469_v55 = vrot.slane %v1159_v52, 1  ;;  %v7025_v56 = vld [vmem:[%s9816_s13 + $0x1b8] sm:$0x3f]  ;;  %v7024_v57 = vld [vmem:[%s9816_s13 + $0x1b0] sm:$0x3f]  ;;  %v7050_v59 = vld [vmem:[%s9826_s21 + $0x1e8] sm:$0xff] }
  0x60   : > { %8287 = vmatprep.subr.bf16.mxu1 %v8286_v23  ;;  %v7052_v60 = vld [vmem:[%s9826_s21 + $0x1f8] sm:$0xff]  ;;  %v7049_v28 = vld [vmem:[%s9826_s21 + $0x1e0] sm:$0xff]  ;;  %v7051_v62 = vld [vmem:[%s9826_s21 + $0x1f0] sm:$0xff] }
  0x61   : > { %v1470_v58 = vsel %vm1367_vm2, %v1468_v54, %v1469_v55  ;;  %v8290_v61 = vpack.c.bf16 %v7052_v60, %v7050_v59  ;;  %v8292_v63 = vpack.c.bf16 %v7051_v62, %v7049_v28  ;;  %v7053_v3 = vld [vmem:[%s9826_s21 + $0x200] sm:$0xff]  ;;  %v7060_v8 = vld [vmem:[%s9826_s21 + $0x238] sm:$0xff]  ;;  %v7059_v11 = vld [vmem:[%s9826_s21 + $0x230] sm:$0xff] }
  0x62   : > { %6993 = vmatpush1.msk.msra.mxu0 %vm1193_vm0, %v1172_v0  ;;  %v7054_v0 = vld [vmem:[%s9826_s21 + $0x208] sm:$0xff]  ;;  %v7057_v10 = vld [vmem:[%s9826_s21 + $0x220] sm:$0xff]  ;;  %v7064_v14 = vld [vmem:[%s9826_s21 + $0x258] sm:$0xff] }
  0x63   : > { %8247 = vmatprep.subr.bf16.mxu0 %v8246_v1  ;;  %6994 = vmatmul.mubr.msk.f32.vlgmr.msra.gmra.mrb[0].mxu0 %vm1189_vm1, %v1156_v4  ;;  %v7056_v1 = vld [vmem:[%s9826_s21 + $0x218] sm:$0xff]  ;;  %v7055_v4 = vld [vmem:[%s9826_s21 + $0x210] sm:$0xff]  ;;  %v8300_v12 = vpack.c.bf16 %v7059_v11, %v7057_v10  ;;  %v7062_v13 = vld [vmem:[%s9826_s21 + $0x248] sm:$0xff] }
  0x64   : > { %8249 = vmatpush1.bf16.msra.mxu0 %v8248_v5  ;;  %1443 = vmatprep.mubr.f32.mxu0 %v9794_v7  ;;  %v8294_v2 = vpack.c.bf16 %v7056_v1, %v7054_v0  ;;  %v8296_v5 = vpack.c.bf16 %v7055_v4, %v7053_v3  ;;  %v8302_v15 = vpack.c.bf16 %v7064_v14, %v7062_v13  ;;  %v7061_v16 = vld [vmem:[%s9826_s21 + $0x240] sm:$0xff]  ;;  %v7063_v17 = vld [vmem:[%s9826_s21 + $0x250] sm:$0xff]  ;;  %v7068_v20 = vld [vmem:[%s9826_s21 + $0x278] sm:$0xff] }
  0x65   : > { %8251 = vmatprep.subr.bf16.mxu0 %v8250_v6  ;;  %8289 = vmatpush1.bf16.msra.mxu1 %v8288_v29  ;;  %v7058_v6 = vld [vmem:[%s9826_s21 + $0x228] sm:$0xff]  ;;  %v7065_v22 = vld [vmem:[%s9826_s21 + $0x260] sm:$0xff]  ;;  %v7067_v23 = vld [vmem:[%s9826_s21 + $0x270] sm:$0xff]  ;;  %v1554_v29 = vlaneseq }
  0x66   : > { %8291 = vmatprep.subr.bf16.mxu1 %v8290_v61  ;;  %v8298_v9 = vpack.c.bf16 %v7060_v8, %v7058_v6  ;;  %v8308_v24 = vpack.c.bf16 %v7067_v23, %v7065_v22  ;;  %v1665_v25 = vld [vmem:[%s9826_s21 + $0x8] sm:$0xff]  ;;  %v1667_v26 = vld [vmem:[%s9826_s21 + $0x18] sm:$0xff]  ;;  %v1664_v60 = vld [vmem:[%s9826_s21] sm:$0xff] }
  0x67   : > { %v1555_v30 = vshrl.u32 %v1554_v29, 7  ;;  %vm10172_vm5 = vcmp.lt.s32.totalorder %v1554_v29, 160  ;;  %v1666_v61 = vld [vmem:[%s9826_s21 + $0x10] sm:$0xff]  ;;  %v2166_v28 = vld [vmem:[%s9836_s29 + $0x8] sm:$0xff]  ;;  %v2168_v62 = vld [vmem:[%s9836_s29 + $0x18] sm:$0xff] }
  0x68   : > { %8253 = vmatpush1.bf16.msra.mxu0 %v8252_v18  ;;  %v8304_v18 = vpack.c.bf16 %v7063_v17, %v7061_v16  ;;  %v8430_v0 = vpack.c.bf16 %v2168_v62, %v2166_v28  ;;  %v2167_v1 = vld [vmem:[%s9836_s29 + $0x10] sm:$0xff]  ;;  %v2172_v3 = vld [vmem:[%s9836_s29 + $0x38] sm:$0xff]  ;;  %v1669_v4 = vld [vmem:[%s9826_s21 + $0x28] sm:$0xff]  ;;  %v8312_v16 = vpack.c.bf16 %v1666_v61, %v1664_v60 }
  0x69   : > { %8255 = vmatprep.subr.bf16.mxu0 %v8254_v19  ;;  %8293 = vmatpush1.bf16.msra.mxu1 %v8292_v63  ;;  %v7066_v19 = vld [vmem:[%s9826_s21 + $0x268] sm:$0xff]  ;;  %v10160_v31 = vsub.s32 0, %v1555_v30  ;;  %v10163_v33 = vsub.s32 1, %v1555_v30  ;;  %v2165_v63 = vld [vmem:[%s9836_s29] sm:$0xff]  ;;  %v1671_v10 = vld [vmem:[%s9826_s21 + $0x38] sm:$0xff] }
  0x6a   : > { %8295 = vmatprep.subr.bf16.mxu1 %v8294_v2  ;;  %v8306_v21 = vpack.c.bf16 %v7068_v20, %v7066_v19  ;;  %v2170_v2 = vld [vmem:[%s9836_s29 + $0x28] sm:$0xff]  ;;  %v2169_v8 = vld [vmem:[%s9836_s29 + $0x20] sm:$0xff]  ;;  %v1670_v14 = vld [vmem:[%s9826_s21 + $0x30] sm:$0xff]  ;;  %v8314_v22 = vpack.c.bf16 %v1671_v10, %v1669_v4 }
  0x6b   : > { %v8434_v6 = vpack.c.bf16 %v2172_v3, %v2170_v2  ;;  %v2174_v11 = vld [vmem:[%s9836_s29 + $0x48] sm:$0xff]  ;;  %v1668_v13 = vld [vmem:[%s9826_s21 + $0x20] sm:$0xff]  ;;  %v2187_v28 = vld [vmem:[%s9836_s29 + $0xb0] sm:$0xff] }
  0x6c   : > { %8257 = vmatpush1.bf16.msra.mxu0 %v8256_v27  ;;  %v8310_v27 = vpack.c.bf16 %v1667_v26, %v1665_v25  ;;  %v2173_v17 = vld [vmem:[%s9836_s29 + $0x40] sm:$0xff]  ;;  %v2178_v19 = vld [vmem:[%s9836_s29 + $0x68] sm:$0xff]  ;;  %v1675_v26 = vld [vmem:[%s9826_s21 + $0x58] sm:$0xff] }
  0x6d   : > { %7009 = vmatprep.subr.msk.mxu0 %vm1193_vm0, %v7008_v32  ;;  %8297 = vmatpush1.bf16.msra.mxu1 %v8296_v5  ;;  %v1552_v32 = vld [vmem:[%s9821_s17] sm:$0x3]  ;;  %v8432_v5 = vpack.c.bf16 %v2167_v1, %v2165_v63  ;;  %v1673_v25 = vld [vmem:[%s9826_s21 + $0x48] sm:$0xff]  ;;  %v1682_v63 = vld [vmem:[%s9826_s21 + $0x90] sm:$0xff] }
  0x6e   : > { %8299 = vmatprep.subr.bf16.mxu1 %v8298_v9  ;;  %v1557_v36 = vrot.slane %v1552_v32, %v10160_v31  ;;  %v1561_v37 = vrot.slane %v1552_v32, %v10163_v33  ;;  %v2171_v9 = vld [vmem:[%s9836_s29 + $0x30] sm:$0xff]  ;;  %v8316_v32 = vpack.c.bf16 %v1670_v14, %v1668_v13  ;;  %v1672_v34 = vld [vmem:[%s9826_s21 + $0x40] sm:$0xff]  ;;  %v2192_v1 = vld [vmem:[%s9836_s29 + $0xd8] sm:$0xff] }
  0x6f   : > { %v2185_v61 = vld [vmem:[%s9836_s29 + $0xa0] sm:$0xff]  ;;  %v1685_v2 = vld [vmem:[%s9826_s21 + $0xa8] sm:$0xff]  ;;  %v1687_v3 = vld [vmem:[%s9826_s21 + $0xb8] sm:$0xff] }
  0x70   : > { %7010 = vmatpush1.msk.msra.mxu0 %vm1193_vm0, %v7007_v39  ;;  %v1578_v39 = vunpack.c.0.s8 %v1577_v35  ;;  %v8452_v4 = vpack.c.bf16 %v2187_v28, %v2185_v61  ;;  %v2191_v10 = vld [vmem:[%s9836_s29 + $0xd0] sm:$0xff]  ;;  %v2194_v13 = vld [vmem:[%s9836_s29 + $0xe8] sm:$0xff]  ;;  %v2196_v14 = vld [vmem:[%s9836_s29 + $0xf8] sm:$0xff] }
  0x71   : > { %8259 = vmatprep.subr.bf16.mxu0 %v8258_v40  ;;  %7011 = vmatmul.mubr.msk.f32.vlgmr.msra.gmra.mrb[0].mxu0 %vm1189_vm1, %v1370_v41  ;;  %v7075_v28 = vld [vmem:[%s9826_s21 + $0x2a0] sm:$0xff] }
  0x72   : > { %8261 = vmatpush1.bf16.msra.mxu0 %v8260_v42  ;;  %1543 = vmatprep.mubr.f32.mxu0 %v9794_v7 }
  0x73   : > { %8263 = vmatprep.subr.bf16.mxu0 %v8262_v43  ;;  %8301 = vmatpush1.bf16.msra.mxu1 %v8300_v12  ;;  %v10167_v43 = vsub.s32 %v1578_v39, %v1555_v30  ;;  %v2176_v12 = vld [vmem:[%s9836_s29 + $0x58] sm:$0xff]  ;;  %v1674_v39 = vld [vmem:[%s9826_s21 + $0x50] sm:$0xff] }
  0x74   : > { %8303 = vmatprep.subr.bf16.mxu1 %v8302_v15  ;;  %v8436_v15 = vpack.c.bf16 %v2171_v9, %v2169_v8  ;;  %v8438_v23 = vpack.c.bf16 %v2176_v12, %v2174_v11  ;;  %v2189_v9 = vld [vmem:[%s9836_s29 + $0xc0] sm:$0xff]  ;;  %v8330_v11 = vpack.c.bf16 %v1687_v3, %v1685_v2  ;;  %v1686_v12 = vld [vmem:[%s9826_s21 + $0xb0] sm:$0xff]  ;;  %v7082_v2 = vld [vmem:[%s9826_s21 + $0x2d8] sm:$0xff] }
  0x76   : > { %8265 = vmatpush1.bf16.msra.mxu0 %v8264_v48 }
  0x77   : > { %8267 = vmatprep.subr.bf16.mxu0 %v8266_v49  ;;  %8305 = vmatpush1.bf16.msra.mxu1 %v8304_v18  ;;  %v2175_v18 = vld [vmem:[%s9836_s29 + $0x50] sm:$0xff] }
  0x78   : > { %8307 = vmatprep.subr.bf16.mxu1 %v8306_v21  ;;  %v8440_v30 = vpack.c.bf16 %v2175_v18, %v2173_v17  ;;  %v8456_v17 = vpack.c.bf16 %v2191_v10, %v2189_v9 }
  0x7a   : > { %8269 = vmatpush1.bf16.msra.mxu0 %v8268_v53 }
  0x7b   : > { %7026 = vmatprep.subr.msk.mxu0 %vm1193_vm0, %v7025_v56  ;;  %8309 = vmatpush1.bf16.msra.mxu1 %v8308_v24  ;;  %v2180_v24 = vld [vmem:[%s9836_s29 + $0x78] sm:$0xff] }
  0x7c   : > { %8311 = vmatprep.subr.bf16.mxu1 %v8310_v27  ;;  %v8442_v35 = vpack.c.bf16 %v2180_v24, %v2178_v19  ;;  %v8458_v19 = vpack.c.bf16 %v2196_v14, %v2194_v13  ;;  %v7088_v13 = vld [vmem:[%s9826_s21 + $0x308] sm:$0xff]  ;;  %v7090_v14 = vld [vmem:[%s9826_s21 + $0x318] sm:$0xff] }
  0x7e   : > { %7027 = vmatpush1.msk.msra.mxu0 %vm1193_vm0, %v7024_v57 }
  0x7f   : > { %7028 = vmatmul.mubr.msk.f32.vlgmr.msra.gmra.mrb[0].mxu0 %vm1189_vm1, %v1470_v58  ;;  %8431 = vmatprep.subr.bf16.mxu0 %v8430_v0  ;;  %v2190_v0 = vld [vmem:[%s9836_s29 + $0xc8] sm:$0xff] }
  0x80   : > { %8433 = vmatpush1.bf16.msra.mxu0 %v8432_v5  ;;  %v8454_v8 = vpack.c.bf16 %v2192_v1, %v2190_v0  ;;  %v7080_v1 = vld [vmem:[%s9826_s21 + $0x2c8] sm:$0xff] }
  0x81   : > { %8435 = vmatprep.subr.bf16.mxu0 %v8434_v6  ;;  %v1684_v6 = vld [vmem:[%s9826_s21 + $0xa0] sm:$0xff] }
  0x82   : > { %v8332_v18 = vpack.c.bf16 %v1686_v12, %v1684_v6  ;;  %v7081_v6 = vld [vmem:[%s9826_s21 + $0x2d0] sm:$0xff] }
  0x83   : > { %v7085_v12 = vld [vmem:[%s9826_s21 + $0x2f0] sm:$0xff] }
  0x84   : > { %8437 = vmatpush1.bf16.msra.mxu0 %v8436_v15  ;;  %v1689_v15 = vld [vmem:[%s9826_s21 + $0xc8] sm:$0xff] }
  0x85   : > { %8439 = vmatprep.subr.bf16.mxu0 %v8438_v23  ;;  %v2195_v23 = vld [vmem:[%s9836_s29 + $0xf0] sm:$0xff] }
  0x88   : > { %8441 = vmatpush1.bf16.msra.mxu0 %v8440_v30  ;;  %v1693_v30 = vld [vmem:[%s9826_s21 + $0xe8] sm:$0xff] }
  0x89   : > { %8443 = vmatprep.subr.bf16.mxu0 %v8442_v35 }
 0x152   : > { %v1545_v38 = vpop.f32.mrb[0].mxu0 }
 0x153   : > { %v1564_v40 = vadd.f32 %v1557_v36, %v1545_v38  ;;  %v1547_v41 = vpop.f32.mrb[1].mxu0  ;;  %v2177_v36 = vld [vmem:[%s9836_s29 + $0x60] sm:$0xff]  ;;  %v8318_v38 = vpack.c.bf16 %v1675_v26, %v1673_v25  ;;  %v1690_v26 = vld [vmem:[%s9826_s21 + $0xd0] sm:$0xff] }
 0x154   : > { %v1565_v7 = vadd.f32 %v1561_v37, %v1547_v41  ;;  %v2179_v37 = vld [vmem:[%s9836_s29 + $0x70] sm:$0xff]  ;;  %v2184_v41 = vld [vmem:[%s9836_s29 + $0x98] sm:$0xff]  ;;  %v1688_v25 = vld [vmem:[%s9826_s21 + $0xc0] sm:$0xff] }
 0x155   : > { %v1566_v42 = vmax.f32 %v1564_v40, 0.0  ;;  %v2182_v40 = vld [vmem:[%s9836_s29 + $0x88] sm:$0xff]  ;;  %v8336_v35 = vpack.c.bf16 %v1690_v26, %v1688_v25  ;;  %v7091_v25 = vld [vmem:[%s9826_s21 + $0x320] sm:$0xff]  ;;  %v7093_v26 = vld [vmem:[%s9826_s21 + $0x330] sm:$0xff] }
 0x156   : > { %v1567_v44 = vmax.f32 %v1565_v7, 0.0  ;;  %v1677_v7 = vld [vmem:[%s9826_s21 + $0x68] sm:$0xff] }
 0x158   : > { %v1575_v45 = vcombine.low %v1566_v42, %v1567_v44  ;;  %v1619_v46 = vcombine.high %v1566_v42, %v1567_v44  ;;  %v1679_v42 = vld [vmem:[%s9826_s21 + $0x78] sm:$0xff]  ;;  %v8444_v44 = vpack.c.bf16 %v2179_v37, %v2177_v36  ;;  %v1692_v37 = vld [vmem:[%s9826_s21 + $0xe0] sm:$0xff] }
 0x15a   : > { %v1582_v47 = vrot.slane %v1575_v45, %v10167_v43  ;;  %v1626_v48 = vrot.slane %v1619_v46, %v10167_v43  ;;  %v8320_v45 = vpack.c.bf16 %v1674_v39, %v1672_v34  ;;  %v1676_v46 = vld [vmem:[%s9826_s21 + $0x60] sm:$0xff]  ;;  %8445 = vmatpush1.bf16.msra.mxu0 %v8444_v44  ;;  %v1697_v39 = vld [vmem:[%s9826_s21 + $0x108] sm:$0xff]  ;;  %v1698_v44 = vld [vmem:[%s9826_s21 + $0x110] sm:$0xff] }
 0x15c   : > { %v1583_v50 = vcombine.high %v1582_v47, %v1582_v47  ;;  %v1605_v51 = vrot.slane %v1582_v47, %v10167_v43  ;;  %v1627_v52 = vcombine.high %v1626_v48, %v1626_v48  ;;  %v1645_v53 = vrot.slane %v1626_v48, %v10167_v43  ;;  %v2181_v48 = vld [vmem:[%s9836_s29 + $0x80] sm:$0xff] }
 0x15d   : > { %v8446_v47 = vpack.c.bf16 %v2184_v41, %v2182_v40  ;;  %v1699_v40 = vld [vmem:[%s9826_s21 + $0x118] sm:$0xff] }
 0x15e   : > { %v1590_v54 = vrot.slane %v1583_v50, %v10167_v43  ;;  %1607 = vst.msk [vmem:[#allocation3] ss:$8 sm:$0x3] %vm10172_vm5, %v1605_v51  ;;  %v1614_v55 = vcombine.high %v1605_v51, %v1605_v51  ;;  %v1634_v56 = vrot.slane %v1627_v52, %v10167_v43  ;;  %1648 = vst.msk [vmem:[#allocation3 + $0x2] ss:$8 sm:$0x3] %vm10172_vm5, %v1645_v53 }
 0x15f   : > { %v1655_v57 = vcombine.high %v1645_v53, %v1645_v53  ;;  %v2183_v50 = vld [vmem:[%s9836_s29 + $0x90] sm:$0xff]  ;;  %v8322_v51 = vpack.c.bf16 %v1679_v42, %v1677_v7  ;;  %v2186_v53 = vld [vmem:[%s9836_s29 + $0xa8] sm:$0xff]  ;;  %8447 = vmatprep.subr.bf16.mxu0 %v8446_v47  ;;  %v8342_v7 = vpack.c.bf16 %v1699_v40, %v1697_v39  ;;  %v1696_v42 = vld [vmem:[%s9826_s21 + $0x100] sm:$0xff] }
 0x160   : > { %1597 = vst.msk [vmem:[#allocation2 + $0x1] ss:$8 sm:$0x3] %vm10172_vm5, %v1590_v54  ;;  %v1609_v58 = vcombine.high %v1590_v54, %v1590_v54  ;;  %1617 = vst.msk [vmem:[#allocation3 + $0x1] ss:$8 sm:$0x3] %vm10172_vm5, %v1614_v55  ;;  %v1650_v59 = vcombine.high %v1634_v56, %v1634_v56  ;;  %v8344_v47 = vpack.c.bf16 %v1698_v44, %v1696_v42 }
 0x161   : > { %1637 = vst.msk [vmem:[#allocation2 + $0x3] ss:$8 sm:$0x3] %vm10172_vm5, %v1634_v56  ;;  %1658 = vst.msk [vmem:[#allocation3 + $0x3] ss:$8 sm:$0x3] %vm10172_vm5, %v1655_v57  ;;  %v8448_v57 = vpack.c.bf16 %v2183_v50, %v2181_v48 }
 0x162   : > { %1612 = vst.msk [vmem:[#allocation2 + $0x2] ss:$8 sm:$0x3] %vm10172_vm5, %v1609_v58  ;;  %1653 = vst.msk [vmem:[#allocation2 + $0x4] ss:$8 sm:$0x3] %vm10172_vm5, %v1650_v59 }
 0x163   : > { %v1678_v52 = vld [vmem:[%s9826_s21 + $0x70] sm:$0xff]  ;;  %v2188_v54 = vld [vmem:[%s9836_s29 + $0xb8] sm:$0xff]  ;;  %v1681_v55 = vld [vmem:[%s9826_s21 + $0x88] sm:$0xff]  ;;  %8449 = vmatpush1.bf16.msra.mxu0 %v8448_v57 }
 0x164   : > { %v1683_v56 = vld [vmem:[%s9826_s21 + $0x98] sm:$0xff]  ;;  %v8324_v58 = vpack.c.bf16 %v1678_v52, %v1676_v46  ;;  %v1680_v59 = vld [vmem:[%s9826_s21 + $0x80] sm:$0xff]  ;;  %v8450_v60 = vpack.c.bf16 %v2188_v54, %v2186_v53  ;;  %v7072_v52 = vld [vmem:[%s9826_s21 + $0x288] sm:$0xff] }
 0x165   : > { %v8326_v62 = vpack.c.bf16 %v1683_v56, %v1681_v55  ;;  %v8328_v5 = vpack.c.bf16 %v1682_v63, %v1680_v59  ;;  %v1703_v46 = vld [vmem:[%s9826_s21 + $0x138] sm:$0xff]  ;;  %v1700_v50 = vld [vmem:[%s9826_s21 + $0x120] sm:$0xff]  ;;  %v7073_v57 = vld [vmem:[%s9826_s21 + $0x290] sm:$0xff] }
 0x166   : > { %8451 = vmatprep.subr.bf16.mxu0 %v8450_v60  ;;  %v7074_v53 = vld [vmem:[%s9826_s21 + $0x298] sm:$0xff]  ;;  %v7071_v56 = vld [vmem:[%s9826_s21 + $0x280] sm:$0xff]  ;;  %v7101_v42 = vld [vmem:[%s9826_s21 + $0x370] sm:$0xff] }
 0x167   : > { %8453 = vmatpush1.bf16.msra.mxu0 %v8452_v4  ;;  %v8350_v55 = vpack.c.bf16 %v7074_v53, %v7072_v52  ;;  %v7078_v59 = vld [vmem:[%s9826_s21 + $0x2b8] sm:$0xff]  ;;  %v8352_v60 = vpack.c.bf16 %v7073_v57, %v7071_v56  ;;  %v8358_v4 = vpack.c.bf16 %v7082_v2, %v7080_v1  ;;  %v7104_v44 = vld [vmem:[%s9826_s21 + $0x388] sm:$0xff]  ;;  %v7109_v56 = vld [vmem:[%s9826_s21 + $0x3b0] sm:$0xff] }
 0x168   : > { %v10215_v20 = vld [vmem:[#allocation3 + $0x8] sm:$0x1f]  ;;  %v10217_v21 = vld [vmem:[#allocation3] sm:$0x1f]  ;;  %8455 = vmatprep.subr.bf16.mxu0 %v8454_v8  ;;  %v7113_v57 = vld [vmem:[%s9826_s21 + $0x3c8] sm:$0xff] }
 0x169   : > { %7069 = vmatprep.mubr.msk.f32.mxu1 %vm1745_vm4, %v10215_v20  ;;  %v10225_v27 = vld [vmem:[#allocation2 + $0x8] sm:$0x1f]  ;;  %v10286_v0 = vld [vmem:[#allocation2] sm:$0x1f]  ;;  %v7086_v8 = vld [vmem:[%s9826_s21 + $0x2f8] sm:$0xff] }
 0x16a   : > { %1814 = vmatmul.mubr.f32.vlgmr.msra.gmra.mrb[0].mxu1 %v10217_v21  ;;  %v1937_v63 = vrot.slane %v10225_v27, 1  ;;  %v7102_v39 = vld [vmem:[%s9826_s21 + $0x378] sm:$0xff]  ;;  %v1936_v2 = vrot.slane %v10286_v0, 1 }
 0x16b   : > { %8313 = vmatpush1.bf16.msra.mxu1 %v8312_v16  ;;  %7070 = vmatprep.mubr.msk.f32.mxu1 %vm1745_vm4, %v10225_v27  ;;  %v1691_v16 = vld [vmem:[%s9826_s21 + $0xd8] sm:$0xff]  ;;  %v7084_v27 = vld [vmem:[%s9826_s21 + $0x2e8] sm:$0xff] }
 0x16c   : > { %8315 = vmatprep.subr.bf16.mxu1 %v8314_v22  ;;  %v2193_v22 = vld [vmem:[%s9836_s29 + $0xe0] sm:$0xff]  ;;  %v8334_v24 = vpack.c.bf16 %v1691_v16, %v1689_v15  ;;  %8457 = vmatpush1.bf16.msra.mxu0 %v8456_v17  ;;  %v8362_v10 = vpack.c.bf16 %v7086_v8, %v7084_v27  ;;  %v8366_v16 = vpack.c.bf16 %v7090_v14, %v7088_v13  ;;  %v7110_v52 = vld [vmem:[%s9826_s21 + $0x3b8] sm:$0xff]  ;;  %v7121_v27 = vld [vmem:[%s9826_s21 + $0x408] sm:$0xff] }
 0x16d   : > { %v8460_v34 = vpack.c.bf16 %v2195_v23, %v2193_v22  ;;  %8459 = vmatprep.subr.bf16.mxu0 %v8458_v19  ;;  %v7087_v17 = vld [vmem:[%s9826_s21 + $0x300] sm:$0xff]  ;;  %v7092_v19 = vld [vmem:[%s9826_s21 + $0x328] sm:$0xff]  ;;  %v7094_v22 = vld [vmem:[%s9826_s21 + $0x338] sm:$0xff] }
 0x16e   : > { %v7123_v8 = vld [vmem:[%s9826_s21 + $0x418] sm:$0xff] }
 0x16f   : > { %8317 = vmatpush1.bf16.msra.mxu1 %v8316_v32  ;;  %v1695_v32 = vld [vmem:[%s9826_s21 + $0xf8] sm:$0xff] }
 0x170   : > { %8319 = vmatprep.subr.bf16.mxu1 %v8318_v38  ;;  %v8338_v36 = vpack.c.bf16 %v1695_v32, %v1693_v30  ;;  %v1694_v38 = vld [vmem:[%s9826_s21 + $0xf0] sm:$0xff]  ;;  %8461 = vmatpush1.bf16.msra.mxu0 %v8460_v34  ;;  %v7096_v30 = vld [vmem:[%s9826_s21 + $0x348] sm:$0xff]  ;;  %v7098_v32 = vld [vmem:[%s9826_s21 + $0x358] sm:$0xff]  ;;  %v8372_v34 = vpack.c.bf16 %v7093_v26, %v7091_v25 }
 0x171   : > { %v8340_v41 = vpack.c.bf16 %v1694_v38, %v1692_v37  ;;  %v7097_v37 = vld [vmem:[%s9826_s21 + $0x350] sm:$0xff]  ;;  %v7100_v38 = vld [vmem:[%s9826_s21 + $0x368] sm:$0xff]  ;;  %v7135_v26 = vld [vmem:[%s9826_s21 + $0x478] sm:$0xff] }
 0x172   : > { %v7133_v25 = vld [vmem:[%s9826_s21 + $0x468] sm:$0xff] }
 0x173   : > { %8321 = vmatpush1.bf16.msra.mxu1 %v8320_v45  ;;  %v1701_v45 = vld [vmem:[%s9826_s21 + $0x128] sm:$0xff] }
 0x174   : > { %8323 = vmatprep.subr.bf16.mxu1 %v8322_v51  ;;  %v8346_v48 = vpack.c.bf16 %v1703_v46, %v1701_v45  ;;  %v1702_v51 = vld [vmem:[%s9826_s21 + $0x130] sm:$0xff]  ;;  %v7106_v45 = vld [vmem:[%s9826_s21 + $0x398] sm:$0xff] }
 0x175   : > { %v8348_v54 = vpack.c.bf16 %v1702_v51, %v1700_v50  ;;  %v7105_v50 = vld [vmem:[%s9826_s21 + $0x390] sm:$0xff]  ;;  %v7108_v51 = vld [vmem:[%s9826_s21 + $0x3a8] sm:$0xff] }
 0x177   : > { %8325 = vmatpush1.bf16.msra.mxu1 %v8324_v58  ;;  %v7076_v58 = vld [vmem:[%s9826_s21 + $0x2a8] sm:$0xff] }
 0x178   : > { %8327 = vmatprep.subr.bf16.mxu1 %v8326_v62  ;;  %v8354_v61 = vpack.c.bf16 %v7078_v59, %v7076_v58  ;;  %v7077_v62 = vld [vmem:[%s9826_s21 + $0x2b0] sm:$0xff]  ;;  %v7115_v58 = vld [vmem:[%s9826_s21 + $0x3d8] sm:$0xff] }
 0x179   : > { %v8356_v3 = vpack.c.bf16 %v7077_v62, %v7075_v28  ;;  %v7114_v28 = vld [vmem:[%s9826_s21 + $0x3d0] sm:$0xff]  ;;  %v7117_v62 = vld [vmem:[%s9826_s21 + $0x3e8] sm:$0xff] }
 0x17b   : > { %8329 = vmatpush1.bf16.msra.mxu1 %v8328_v5  ;;  %v7079_v5 = vld [vmem:[%s9826_s21 + $0x2c0] sm:$0xff] }
 0x17c   : > { %8331 = vmatprep.subr.bf16.mxu1 %v8330_v11  ;;  %v8360_v9 = vpack.c.bf16 %v7081_v6, %v7079_v5  ;;  %v7083_v11 = vld [vmem:[%s9826_s21 + $0x2e0] sm:$0xff]  ;;  %v7118_v5 = vld [vmem:[%s9826_s21 + $0x3f0] sm:$0xff]  ;;  %v2057_v6 = vrot.slane %v10215_v20, 1  ;;  %v7127_v20 = vld [vmem:[%s9826_s21 + $0x438] sm:$0xff] }
 0x17d   : > { %v8364_v15 = vpack.c.bf16 %v7085_v12, %v7083_v11  ;;  %v7122_v11 = vld [vmem:[%s9826_s21 + $0x410] sm:$0xff]  ;;  %v7125_v12 = vld [vmem:[%s9826_s21 + $0x428] sm:$0xff] }
 0x17e   : > { %v8402_v14 = vpack.c.bf16 %v7127_v20, %v7125_v12  ;;  %v2205_v12 = vld [vmem:[%s9836_s29 + $0x140] sm:$0xff]  ;;  %v2207_v20 = vld [vmem:[%s9836_s29 + $0x150] sm:$0xff] }
 0x17f   : > { %8333 = vmatpush1.bf16.msra.mxu1 %v8332_v18  ;;  %v7089_v18 = vld [vmem:[%s9826_s21 + $0x310] sm:$0xff] }
 0x180   : > { %8335 = vmatprep.subr.bf16.mxu1 %v8334_v24  ;;  %v8368_v23 = vpack.c.bf16 %v7089_v18, %v7087_v17  ;;  %v8370_v24 = vpack.c.bf16 %v7094_v22, %v7092_v19  ;;  %v7129_v17 = vld [vmem:[%s9826_s21 + $0x448] sm:$0xff]  ;;  %v7131_v18 = vld [vmem:[%s9826_s21 + $0x458] sm:$0xff] }
 0x181   : > { %v8406_v22 = vpack.c.bf16 %v7131_v18, %v7129_v17  ;;  %v2209_v17 = vld [vmem:[%s9836_s29 + $0x160] sm:$0xff] }
 0x183   : > { %8337 = vmatpush1.bf16.msra.mxu1 %v8336_v35  ;;  %v8374_v35 = vpack.c.bf16 %v7098_v32, %v7096_v30  ;;  %v8410_v32 = vpack.c.bf16 %v7135_v26, %v7133_v25  ;;  %v2571_v26 = vld [vmem:[%s9846_s8] sm:$0xff] }
 0x184   : > { %8339 = vmatprep.subr.bf16.mxu1 %v8338_v36  ;;  %v7095_v36 = vld [vmem:[%s9826_s21 + $0x340] sm:$0xff] }
 0x185   : > { %v8376_v40 = vpack.c.bf16 %v7097_v37, %v7095_v36  ;;  %v7137_v36 = vld [vmem:[%s9826_s21 + $0x488] sm:$0xff]  ;;  %v7139_v37 = vld [vmem:[%s9826_s21 + $0x498] sm:$0xff] }
 0x187   : > { %8341 = vmatpush1.bf16.msra.mxu1 %v8340_v41  ;;  %v8378_v41 = vpack.c.bf16 %v7102_v39, %v7100_v38  ;;  %v8414_v39 = vpack.c.bf16 %v7139_v37, %v7137_v36  ;;  %v2574_v36 = vld [vmem:[%s9846_s8 + $0x18] sm:$0xff] }
 0x188   : > { %8343 = vmatprep.subr.bf16.mxu1 %v8342_v7  ;;  %v7099_v7 = vld [vmem:[%s9826_s21 + $0x360] sm:$0xff] }
 0x189   : > { %v8380_v46 = vpack.c.bf16 %v7101_v42, %v7099_v7  ;;  %v7141_v7 = vld [vmem:[%s9826_s21 + $0x4a8] sm:$0xff]  ;;  %v7143_v42 = vld [vmem:[%s9826_s21 + $0x4b8] sm:$0xff] }
 0x18b   : > { %8345 = vmatpush1.bf16.msra.mxu1 %v8344_v47  ;;  %v8382_v47 = vpack.c.bf16 %v7106_v45, %v7104_v44  ;;  %v8418_v45 = vpack.c.bf16 %v7143_v42, %v7141_v7  ;;  %v2578_v7 = vld [vmem:[%s9846_s8 + $0x38] sm:$0xff]  ;;  %v2134_v42 = vld [vmem:[%s9831_s25] sm:$0x3] }
 0x18c   : > { %8347 = vmatprep.subr.bf16.mxu1 %v8346_v48  ;;  %v7103_v48 = vld [vmem:[%s9826_s21 + $0x380] sm:$0xff] }
 0x18d   : > { %v8384_v53 = vpack.c.bf16 %v7105_v50, %v7103_v48  ;;  %v7145_v48 = vld [vmem:[%s9826_s21 + $0x4c8] sm:$0xff]  ;;  %v7147_v50 = vld [vmem:[%s9826_s21 + $0x4d8] sm:$0xff] }
 0x18f   : > { %8349 = vmatpush1.bf16.msra.mxu1 %v8348_v54  ;;  %v8386_v54 = vpack.c.bf16 %v7110_v52, %v7108_v51  ;;  %v8422_v52 = vpack.c.bf16 %v7147_v50, %v7145_v48  ;;  %v2143_v48 = vrot.slane %v2134_v42, %v10163_v33 }
 0x190   : > { %8351 = vmatprep.subr.bf16.mxu1 %v8350_v55  ;;  %v7107_v55 = vld [vmem:[%s9826_s21 + $0x3a0] sm:$0xff] }
 0x191   : > { %v8388_v59 = vpack.c.bf16 %v7109_v56, %v7107_v55  ;;  %v7149_v55 = vld [vmem:[%s9826_s21 + $0x4e8] sm:$0xff]  ;;  %v7151_v56 = vld [vmem:[%s9826_s21 + $0x4f8] sm:$0xff] }
 0x192   : > { %1888 = vmatmul.mubr.f32.vlgmr.msra.gmra.mrb[0].mxu1 %v10286_v0  ;;  %v8398_v0 = vpack.c.bf16 %v7123_v8, %v7121_v27  ;;  %v2201_v8 = vld [vmem:[%s9836_s29 + $0x120] sm:$0xff] }
 0x193   : > { %8353 = vmatpush1.bf16.msra.mxu1 %v8352_v60  ;;  %7111 = vmatprep.mubr.msk.f32.mxu1 %vm1745_vm4, %v1937_v63  ;;  %v8390_v60 = vpack.c.bf16 %v7115_v58, %v7113_v57  ;;  %v7119_v63 = vld [vmem:[%s9826_s21 + $0x3f8] sm:$0xff]  ;;  %v8426_v58 = vpack.c.bf16 %v7151_v56, %v7149_v55 }
 0x194   : > { %8355 = vmatprep.subr.bf16.mxu1 %v8354_v61  ;;  %v7112_v61 = vld [vmem:[%s9826_s21 + $0x3c0] sm:$0xff]  ;;  %v2582_v55 = vld [vmem:[%s9846_s8 + $0x58] sm:$0xff] }
 0x195   : > { %v8392_v1 = vpack.c.bf16 %v7114_v28, %v7112_v61  ;;  %v2056_v28 = vrot.slane %v10217_v21, 1 }
 0x197   : > { %8357 = vmatpush1.bf16.msra.mxu1 %v8356_v3  ;;  %v8394_v3 = vpack.c.bf16 %v7119_v63, %v7117_v62  ;;  %v2198_v62 = vld [vmem:[%s9836_s29 + $0x108] sm:$0xff]  ;;  %v2200_v63 = vld [vmem:[%s9836_s29 + $0x118] sm:$0xff] }
 0x198   : > { %8359 = vmatprep.subr.bf16.mxu1 %v8358_v4  ;;  %v7116_v4 = vld [vmem:[%s9826_s21 + $0x3e0] sm:$0xff] }
 0x19b   : > { %8361 = vmatpush1.bf16.msra.mxu1 %v8360_v9  ;;  %v8396_v9 = vpack.c.bf16 %v7118_v5, %v7116_v4  ;;  %v2202_v5 = vld [vmem:[%s9836_s29 + $0x128] sm:$0xff] }
 0x19c   : > { %8363 = vmatprep.subr.bf16.mxu1 %v8362_v10  ;;  %v7120_v10 = vld [vmem:[%s9826_s21 + $0x400] sm:$0xff] }
 0x19d   : > { %v8400_v13 = vpack.c.bf16 %v7122_v11, %v7120_v10  ;;  %v2208_v10 = vld [vmem:[%s9836_s29 + $0x158] sm:$0xff] }
 0x19f   : > { %8365 = vmatpush1.bf16.msra.mxu1 %v8364_v15  ;;  %v7124_v15 = vld [vmem:[%s9826_s21 + $0x420] sm:$0xff] }
 0x1a0   : > { %8367 = vmatprep.subr.bf16.mxu1 %v8366_v16  ;;  %v7126_v16 = vld [vmem:[%s9826_s21 + $0x430] sm:$0xff] }
 0x1a1   : > { %v8404_v19 = vpack.c.bf16 %v7126_v16, %v7124_v15  ;;  %v2210_v15 = vld [vmem:[%s9836_s29 + $0x168] sm:$0xff]  ;;  %v2212_v16 = vld [vmem:[%s9836_s29 + $0x178] sm:$0xff] }
 0x1a2   : > { %v8474_v18 = vpack.c.bf16 %v2212_v16, %v2210_v15 }
 0x1a3   : > { %8369 = vmatpush1.bf16.msra.mxu1 %v8368_v23  ;;  %v7128_v23 = vld [vmem:[%s9826_s21 + $0x440] sm:$0xff] }
 0x1a4   : > { %8371 = vmatprep.subr.bf16.mxu1 %v8370_v24  ;;  %v7130_v24 = vld [vmem:[%s9826_s21 + $0x450] sm:$0xff] }
 0x1a5   : > { %v8408_v30 = vpack.c.bf16 %v7130_v24, %v7128_v23  ;;  %v7155_v23 = vld [vmem:[%s9836_s29 + $0x188] sm:$0xff]  ;;  %v7157_v24 = vld [vmem:[%s9836_s29 + $0x198] sm:$0xff] }
 0x1a6   : > { %v8478_v25 = vpack.c.bf16 %v7157_v24, %v7155_v23 }
 0x1a7   : > { %8373 = vmatpush1.bf16.msra.mxu1 %v8372_v34  ;;  %v7132_v34 = vld [vmem:[%s9826_s21 + $0x460] sm:$0xff] }
 0x1a8   : > { %8375 = vmatprep.subr.bf16.mxu1 %v8374_v35  ;;  %v7134_v35 = vld [vmem:[%s9826_s21 + $0x470] sm:$0xff] }
 0x1a9   : > { %v8412_v38 = vpack.c.bf16 %v7134_v35, %v7132_v34  ;;  %v9796_v34 = vmov 0.0|0.0  }
 0x1ab   : > { %8377 = vmatpush1.bf16.msra.mxu1 %v8376_v40  ;;  %v7136_v40 = vld [vmem:[%s9826_s21 + $0x480] sm:$0xff] }
 0x1ac   : > { %8379 = vmatprep.subr.bf16.mxu1 %v8378_v41  ;;  %v7138_v41 = vld [vmem:[%s9826_s21 + $0x490] sm:$0xff] }
 0x1ad   : > { %v8416_v44 = vpack.c.bf16 %v7138_v41, %v7136_v40  ;;  %v2577_v41 = vld [vmem:[%s9846_s8 + $0x30] sm:$0xff] }
 0x1af   : > { %8381 = vmatpush1.bf16.msra.mxu1 %v8380_v46  ;;  %v7140_v46 = vld [vmem:[%s9826_s21 + $0x4a0] sm:$0xff] }
 0x1b0   : > { %8383 = vmatprep.subr.bf16.mxu1 %v8382_v47  ;;  %v7142_v47 = vld [vmem:[%s9826_s21 + $0x4b0] sm:$0xff] }
 0x1b1   : > { %v8420_v51 = vpack.c.bf16 %v7142_v47, %v7140_v46  ;;  %v2579_v46 = vld [vmem:[%s9846_s8 + $0x40] sm:$0xff]  ;;  %v2580_v47 = vld [vmem:[%s9846_s8 + $0x48] sm:$0xff] }
 0x1b3   : > { %8385 = vmatpush1.bf16.msra.mxu1 %v8384_v53  ;;  %v7144_v53 = vld [vmem:[%s9826_s21 + $0x4c0] sm:$0xff] }
 0x1b4   : > { %8387 = vmatprep.subr.bf16.mxu1 %v8386_v54  ;;  %v7146_v54 = vld [vmem:[%s9826_s21 + $0x4d0] sm:$0xff] }
 0x1b5   : > { %v8424_v57 = vpack.c.bf16 %v7146_v54, %v7144_v53  ;;  %v2581_v54 = vld [vmem:[%s9846_s8 + $0x50] sm:$0xff] }
 0x1b7   : > { %8389 = vmatpush1.bf16.msra.mxu1 %v8388_v59  ;;  %v7148_v59 = vld [vmem:[%s9826_s21 + $0x4e0] sm:$0xff] }
 0x1b8   : > { %8391 = vmatprep.subr.bf16.mxu1 %v8390_v60  ;;  %v7150_v60 = vld [vmem:[%s9826_s21 + $0x4f0] sm:$0xff] }
 0x1b9   : > { %v8428_v61 = vpack.c.bf16 %v7150_v60, %v7148_v59  ;;  %v8590_v59 = vpack.c.bf16 %v2582_v55, %v2581_v54 }
 0x1ba   : > { %2006 = vmatmul.mubr.f32.vlgmr.msra.gmra.mrb[0].mxu1 %v1936_v2  ;;  %v2197_v2 = vld [vmem:[%s9836_s29 + $0x100] sm:$0xff] }
 0x1bb   : > { %8393 = vmatpush1.bf16.msra.mxu1 %v8392_v1  ;;  %7152 = vmatprep.mubr.msk.f32.mxu1 %vm1745_vm4, %v2057_v6  ;;  %v8462_v1 = vpack.c.bf16 %v2200_v63, %v2198_v62  ;;  %v2204_v6 = vld [vmem:[%s9836_s29 + $0x138] sm:$0xff] }
 0x1bc   : > { %8395 = vmatprep.subr.bf16.mxu1 %v8394_v3  ;;  %v2199_v3 = vld [vmem:[%s9836_s29 + $0x110] sm:$0xff]  ;;  %v8466_v27 = vpack.c.bf16 %v2204_v6, %v2202_v5  ;;  %v7159_v5 = vld [vmem:[%s9836_s29 + $0x1a8] sm:$0xff]  ;;  %v7161_v6 = vld [vmem:[%s9836_s29 + $0x1b8] sm:$0xff] }
 0x1bd   : > { %v8464_v4 = vpack.c.bf16 %v2199_v3, %v2197_v2  ;;  %8463 = vmatprep.subr.bf16.mxu0 %v8462_v1  ;;  %v2585_v1 = vld [vmem:[%s9846_s8 + $0x70] sm:$0xff]  ;;  %v2586_v2 = vld [vmem:[%s9846_s8 + $0x78] sm:$0xff]  ;;  %v7154_v3 = vld [vmem:[%s9836_s29 + $0x180] sm:$0xff] }
 0x1bf   : > { %8397 = vmatpush1.bf16.msra.mxu1 %v8396_v9  ;;  %8465 = vmatpush1.bf16.msra.mxu0 %v8464_v4  ;;  %v2203_v9 = vld [vmem:[%s9836_s29 + $0x130] sm:$0xff] }
 0x1c0   : > { %8399 = vmatprep.subr.bf16.mxu1 %v8398_v0  ;;  %v8468_v21 = vpack.c.bf16 %v2203_v9, %v2201_v8  ;;  %8467 = vmatprep.subr.bf16.mxu0 %v8466_v27  ;;  %v2206_v0 = vld [vmem:[%s9836_s29 + $0x148] sm:$0xff]  ;;  %v7156_v4 = vld [vmem:[%s9836_s29 + $0x190] sm:$0xff]  ;;  %v8596_v27 = vpack.c.bf16 %v2586_v2, %v2585_v1  ;;  %v7193_v1 = vld [vmem:[%s9836_s29 + $0x2b8] sm:$0xff] }
 0x1c1   : > { %v8470_v11 = vpack.c.bf16 %v2208_v10, %v2206_v0  ;;  %v8480_v8 = vpack.c.bf16 %v7156_v4, %v7154_v3  ;;  %v7158_v0 = vld [vmem:[%s9836_s29 + $0x1a0] sm:$0xff]  ;;  %v7160_v10 = vld [vmem:[%s9836_s29 + $0x1b0] sm:$0xff] }
 0x1c2   : > { %v8484_v15 = vpack.c.bf16 %v7160_v10, %v7158_v0  ;;  %v7190_v4 = vld [vmem:[%s9836_s29 + $0x2a0] sm:$0xff]  ;;  %v7196_v10 = vld [vmem:[%s9836_s29 + $0x2d0] sm:$0xff] }
 0x1c3   : > { %8401 = vmatpush1.bf16.msra.mxu1 %v8400_v13  ;;  %8469 = vmatpush1.bf16.msra.mxu0 %v8468_v21  ;;  %v10378_v13 = vld [vmem:[#allocation8] sm:$0xff]  ;;  %v8482_v21 = vpack.c.bf16 %v7161_v6, %v7159_v5  ;;  %v7192_v5 = vld [vmem:[%s9836_s29 + $0x2b0] sm:$0xff]  ;;  %v7195_v6 = vld [vmem:[%s9836_s29 + $0x2c8] sm:$0xff] }
 0x1c4   : > { %8403 = vmatprep.subr.bf16.mxu1 %v8402_v14  ;;  %2152 = vst.msk [vmem:[#allocation4 + $0x8] sm:$0x3f] %vm2151_vm6, %v10378_v13  ;;  %2557 = vst.msk [vmem:[#allocation5 + $0x8] sm:$0x3f] %vm2151_vm6, %v10378_v13  ;;  %v8472_v14 = vpack.c.bf16 %v2207_v20, %v2205_v12  ;;  %8471 = vmatprep.subr.bf16.mxu0 %v8470_v11  ;;  %v7163_v20 = vld [vmem:[%s9836_s29 + $0x1c8] sm:$0xff]  ;;  %v7194_v0 = vld [vmem:[%s9836_s29 + $0x2c0] sm:$0xff] }
 0x1c5   : > { %4949 = vst.msk [vmem:[#allocation7 + $0x8] sm:$0x3f] %vm2151_vm6, %v10378_v13 }
 0x1c7   : > { %8405 = vmatpush1.bf16.msra.mxu1 %v8404_v19  ;;  %8473 = vmatpush1.bf16.msra.mxu0 %v8472_v14  ;;  %v2211_v19 = vld [vmem:[%s9836_s29 + $0x170] sm:$0xff]  ;;  %v7165_v14 = vld [vmem:[%s9836_s29 + $0x1d8] sm:$0xff] }
 0x1c8   : > { %8407 = vmatprep.subr.bf16.mxu1 %v8406_v22  ;;  %v8476_v22 = vpack.c.bf16 %v2211_v19, %v2209_v17  ;;  %8475 = vmatprep.subr.bf16.mxu0 %v8474_v18  ;;  %v8486_v16 = vpack.c.bf16 %v7165_v14, %v7163_v20  ;;  %v7162_v17 = vld [vmem:[%s9836_s29 + $0x1c0] sm:$0xff]  ;;  %v7164_v18 = vld [vmem:[%s9836_s29 + $0x1d0] sm:$0xff]  ;;  %v7167_v19 = vld [vmem:[%s9836_s29 + $0x1e8] sm:$0xff]  ;;  %v8520_v14 = vpack.c.bf16 %v7196_v10, %v7194_v0 }
 0x1c9   : > { %v8488_v23 = vpack.c.bf16 %v7164_v18, %v7162_v17  ;;  %v7201_v20 = vld [vmem:[%s9836_s29 + $0x2f8] sm:$0xff]  ;;  %v7200_v17 = vld [vmem:[%s9836_s29 + $0x2f0] sm:$0xff]  ;;  %v7204_v18 = vld [vmem:[%s9836_s29 + $0x308] sm:$0xff] }
 0x1ca   : > { %v7231_v0 = vld [vmem:[%s9836_s29 + $0x3e0] sm:$0xff]  ;;  %v7233_v10 = vld [vmem:[%s9836_s29 + $0x3f0] sm:$0xff] }
 0x1cb   : > { %8409 = vmatpush1.bf16.msra.mxu1 %v8408_v30  ;;  %8477 = vmatpush1.bf16.msra.mxu0 %v8476_v22  ;;  %v2572_v30 = vld [vmem:[%s9846_s8 + $0x8] sm:$0xff]  ;;  %v7169_v22 = vld [vmem:[%s9836_s29 + $0x1f8] sm:$0xff] }
 0x1cc   : > { %8411 = vmatprep.subr.bf16.mxu1 %v8410_v32  ;;  %8479 = vmatprep.subr.bf16.mxu0 %v8478_v25  ;;  %v2573_v32 = vld [vmem:[%s9846_s8 + $0x10] sm:$0xff]  ;;  %v8575_v35 = vpack.c.bf16 %v2572_v30, %v2571_v26  ;;  %v8490_v24 = vpack.c.bf16 %v7169_v22, %v7167_v19  ;;  %v7166_v25 = vld [vmem:[%s9836_s29 + $0x1e0] sm:$0xff]  ;;  %v7171_v30 = vld [vmem:[%s9836_s29 + $0x208] sm:$0xff] }
 0x1cd   : > { %v8578_v37 = vpack.c.bf16 %v2574_v36, %v2573_v32  ;;  %v7168_v26 = vld [vmem:[%s9836_s29 + $0x1f0] sm:$0xff]  ;;  %v7173_v32 = vld [vmem:[%s9836_s29 + $0x218] sm:$0xff] }
 0x1ce   : > { %v8494_v36 = vpack.c.bf16 %v7173_v32, %v7171_v30  ;;  %v7206_v19 = vld [vmem:[%s9836_s29 + $0x318] sm:$0xff] }
 0x1cf   : > { %8413 = vmatpush1.bf16.msra.mxu1 %v8412_v38  ;;  %v2575_v38 = vld [vmem:[%s9846_s8 + $0x20] sm:$0xff]  ;;  %v7210_v30 = vld [vmem:[%s9836_s29 + $0x338] sm:$0xff] }
 0x1d0   : > { %8415 = vmatprep.subr.bf16.mxu1 %v8414_v39  ;;  %v2576_v39 = vld [vmem:[%s9846_s8 + $0x28] sm:$0xff] }
 0x1d1   : > { %v8581_v40 = vpack.c.bf16 %v2576_v39, %v2575_v38  ;;  %v7172_v38 = vld [vmem:[%s9836_s29 + $0x210] sm:$0xff]  ;;  %v7175_v39 = vld [vmem:[%s9836_s29 + $0x228] sm:$0xff] }
 0x1d3   : > { %8417 = vmatpush1.bf16.msra.mxu1 %v8416_v44  ;;  %v8584_v44 = vpack.c.bf16 %v2578_v7, %v2577_v41 }
 0x1d4   : > { %8419 = vmatprep.subr.bf16.mxu1 %v8418_v45  ;;  %v2139_v45 = vrot.slane %v2134_v42, %v10160_v31  ;;  %v7174_v42 = vld [vmem:[%s9836_s29 + $0x220] sm:$0xff] }
 0x1d7   : > { %8421 = vmatpush1.bf16.msra.mxu1 %v8420_v51  ;;  %v8587_v51 = vpack.c.bf16 %v2580_v47, %v2579_v46  ;;  %v7181_v46 = vld [vmem:[%s9836_s29 + $0x258] sm:$0xff] }
 0x1d8   : > { %8423 = vmatprep.subr.bf16.mxu1 %v8422_v52 }
 0x1db   : > { %8425 = vmatpush1.bf16.msra.mxu1 %v8424_v57 }
 0x1dc   : > { %8427 = vmatprep.subr.bf16.mxu1 %v8426_v58 }
 0x1df   : > { %8429 = vmatpush1.bf16.msra.mxu1 %v8428_v61  ;;  %v2583_v61 = vld [vmem:[%s9846_s8 + $0x60] sm:$0xff] }
 0x1e0   : > { %8574 = vmatprep.subr.bf16.mxu1 %v9796_v34 }
 0x1e2   : > { %2126 = vmatmul.mubr.f32.vlgmr.msra.gmra.mrb[0].mxu1 %v2056_v28  ;;  %v2584_v28 = vld [vmem:[%s9846_s8 + $0x68] sm:$0xff] }
 0x1e3   : > { %8576 = vmatpush1.bf16.msra.mxu1 %v8575_v35  ;;  %v8593_v63 = vpack.c.bf16 %v2584_v28, %v2583_v61  ;;  %v8492_v35 = vpack.c.bf16 %v7168_v26, %v7166_v25  ;;  %v7186_v28 = vld [vmem:[%s9836_s29 + $0x280] sm:$0xff]  ;;  %v7205_v25 = vld [vmem:[%s9836_s29 + $0x310] sm:$0xff]  ;;  %v7208_v26 = vld [vmem:[%s9836_s29 + $0x328] sm:$0xff] }
 0x1e4   : > { %8577 = vmatprep.subr.bf16.mxu1 %v9796_v34 }
 0x1e7   : > { %8579 = vmatpush1.bf16.msra.mxu1 %v8578_v37  ;;  %v7170_v37 = vld [vmem:[%s9836_s29 + $0x200] sm:$0xff] }
 0x1e8   : > { %8580 = vmatprep.subr.bf16.mxu1 %v9796_v34  ;;  %v8496_v41 = vpack.c.bf16 %v7172_v38, %v7170_v37  ;;  %v7207_v37 = vld [vmem:[%s9836_s29 + $0x320] sm:$0xff]  ;;  %v7209_v38 = vld [vmem:[%s9836_s29 + $0x330] sm:$0xff] }
 0x1eb   : > { %8582 = vmatpush1.bf16.msra.mxu1 %v8581_v40  ;;  %v7177_v40 = vld [vmem:[%s9836_s29 + $0x238] sm:$0xff] }
 0x1ec   : > { %8583 = vmatprep.subr.bf16.mxu1 %v9796_v34  ;;  %v8498_v7 = vpack.c.bf16 %v7177_v40, %v7175_v39  ;;  %v7212_v40 = vld [vmem:[%s9836_s29 + $0x348] sm:$0xff] }
 0x1ef   : > { %8585 = vmatpush1.bf16.msra.mxu1 %v8584_v44  ;;  %v7176_v44 = vld [vmem:[%s9836_s29 + $0x230] sm:$0xff] }
 0x1f0   : > { %8586 = vmatprep.subr.bf16.mxu1 %v9796_v34  ;;  %v8500_v47 = vpack.c.bf16 %v7176_v44, %v7174_v42  ;;  %v7211_v44 = vld [vmem:[%s9836_s29 + $0x340] sm:$0xff] }
 0x1f3   : > { %8588 = vmatpush1.bf16.msra.mxu1 %v8587_v51  ;;  %v7180_v51 = vld [vmem:[%s9836_s29 + $0x250] sm:$0xff] }
 0x1f4   : > { %8589 = vmatprep.subr.bf16.mxu1 %v9796_v34 }
 0x1f7   : > { %8591 = vmatpush1.bf16.msra.mxu1 %v8590_v59  ;;  %v7189_v59 = vld [vmem:[%s9836_s29 + $0x298] sm:$0xff] }
 0x1f8   : > { %8592 = vmatprep.subr.bf16.mxu1 %v9796_v34 }
 0x1fb   : > { %8594 = vmatpush1.bf16.msra.mxu1 %v8593_v63  ;;  %v7191_v63 = vld [vmem:[%s9836_s29 + $0x2a8] sm:$0xff] }
 0x1fc   : > { %8595 = vmatprep.subr.bf16.mxu1 %v9796_v34  ;;  %v8514_v3 = vpack.c.bf16 %v7193_v1, %v7191_v63  ;;  %v7228_v63 = vld [vmem:[%s9836_s29 + $0x3c8] sm:$0xff]  ;;  %v7230_v1 = vld [vmem:[%s9836_s29 + $0x3d8] sm:$0xff] }
 0x1ff   : > { %8597 = vmatpush1.bf16.msra.mxu1 %v8596_v27  ;;  %v7197_v27 = vld [vmem:[%s9836_s29 + $0x2d8] sm:$0xff] }
 0x200   : > { %8598 = vmatprep.subr.bf16.mxu1 %v9796_v34 }
 0x2b5   : > { %v2127_v50 = vpop.f32.mrb[0].mxu1 }
 0x2b6   : > { %v2146_v52 = vadd.f32 %v2139_v45, %v2127_v50  ;;  %v2129_v53 = vpop.f32.mrb[1].mxu1  ;;  %v7179_v45 = vld [vmem:[%s9836_s29 + $0x248] sm:$0xff]  ;;  %v7178_v50 = vld [vmem:[%s9836_s29 + $0x240] sm:$0xff] }
 0x2b7   : > { %v2147_v56 = vadd.f32 %v2143_v48, %v2129_v53  ;;  %v8502_v48 = vpack.c.bf16 %v7181_v46, %v7179_v45  ;;  %v7185_v53 = vld [vmem:[%s9836_s29 + $0x278] sm:$0xff]  ;;  %v8504_v54 = vpack.c.bf16 %v7180_v51, %v7178_v50  ;;  %v7213_v45 = vld [vmem:[%s9836_s29 + $0x350] sm:$0xff]  ;;  %v7216_v46 = vld [vmem:[%s9836_s29 + $0x368] sm:$0xff] }
 0x2b8   : > { %v2148_v57 = vmax.f32 %v2146_v52, 0.0  ;;  %v7183_v52 = vld [vmem:[%s9836_s29 + $0x268] sm:$0xff]  ;;  %v7215_v50 = vld [vmem:[%s9836_s29 + $0x360] sm:$0xff]  ;;  %v7217_v51 = vld [vmem:[%s9836_s29 + $0x370] sm:$0xff] }
 0x2b9   : > { %v2149_v58 = vmax.f32 %v2147_v56, 0.0  ;;  %v8506_v55 = vpack.c.bf16 %v7185_v53, %v7183_v52  ;;  %v7182_v56 = vld [vmem:[%s9836_s29 + $0x260] sm:$0xff]  ;;  %v7220_v52 = vld [vmem:[%s9836_s29 + $0x388] sm:$0xff]  ;;  %v7222_v53 = vld [vmem:[%s9836_s29 + $0x398] sm:$0xff] }
 0x2ba   : > { %v2155_v60 = vrot.slane %v2148_v57, 7  ;;  %v7184_v57 = vld [vmem:[%s9836_s29 + $0x270] sm:$0xff] }
 0x2bb   : > { %v2156_v62 = vrot.slane %v2149_v58, 7  ;;  %v7187_v58 = vld [vmem:[%s9836_s29 + $0x288] sm:$0xff] }
 0x2bc   : > { %2159 = vst [vmem:[#allocation4] sm:$0x1e] %v2155_v60  ;;  %v8508_v60 = vpack.c.bf16 %v7184_v57, %v7182_v56  ;;  %v8510_v61 = vpack.c.bf16 %v7189_v59, %v7187_v58  ;;  %v7219_v56 = vld [vmem:[%s9836_s29 + $0x380] sm:$0xff]  ;;  %v7221_v57 = vld [vmem:[%s9836_s29 + $0x390] sm:$0xff]  ;;  %v7224_v58 = vld [vmem:[%s9836_s29 + $0x3a8] sm:$0xff] }
 0x2bd   : > { %2161 = vst.msk [vmem:[#allocation4 + $0x8] sm:$0x1e] %vm2160_vm7, %v2156_v62  ;;  %v7188_v62 = vld [vmem:[%s9836_s29 + $0x290] sm:$0xff]  ;;  %v7226_v59 = vld [vmem:[%s9836_s29 + $0x3b8] sm:$0xff] }
 0x2be   : > { %v8512_v2 = vpack.c.bf16 %v7188_v62, %v7186_v28  ;;  %v7223_v28 = vld [vmem:[%s9836_s29 + $0x3a0] sm:$0xff]  ;;  %v7225_v62 = vld [vmem:[%s9836_s29 + $0x3b0] sm:$0xff] }
 0x2c3   : > { %v10428_v12 = vld [vmem:[#allocation4] sm:$0x3f] }
 0x2c4   : > { %v10421_v9 = vld [vmem:[#allocation4 + $0x8] sm:$0x3f] }
 0x2c5   : > { %7153 = vmatprep.mubr.msk.f32.mxu0 %vm2213_vm8, %v10421_v9  ;;  %v2352_v11 = vrot.slane %v10421_v9, 1  ;;  %v2479_v39 = vrot.slane %v10421_v9, 2  ;;  %v7218_v9 = vld [vmem:[%s9836_s29 + $0x378] sm:$0xff] }
 0x2c6   : > { %2282 = vmatmul.mubr.f32.vlgmr.msra.gmra.mrb[2].mxu0 %v10428_v12 }
 0x2c7   : > { %8481 = vmatpush1.bf16.msra.mxu0 %v8480_v8  ;;  %7202 = vmatprep.mubr.msk.f32.mxu0 %vm2213_vm8, %v2352_v11  ;;  %v8516_v8 = vpack.c.bf16 %v7192_v5, %v7190_v4  ;;  %v7199_v11 = vld [vmem:[%s9836_s29 + $0x2e8] sm:$0xff]  ;;  %v7227_v4 = vld [vmem:[%s9836_s29 + $0x3c0] sm:$0xff]  ;;  %v7229_v5 = vld [vmem:[%s9836_s29 + $0x3d0] sm:$0xff] }
 0x2c8   : > { %8483 = vmatprep.subr.bf16.mxu0 %v8482_v21  ;;  %v8518_v21 = vpack.c.bf16 %v7197_v27, %v7195_v6  ;;  %v7232_v6 = vld [vmem:[%s9836_s29 + $0x3e8] sm:$0xff]  ;;  %v7234_v27 = vld [vmem:[%s9836_s29 + $0x3f8] sm:$0xff] }
 0x2cb   : > { %8485 = vmatpush1.bf16.msra.mxu0 %v8484_v15  ;;  %v8522_v15 = vpack.c.bf16 %v7201_v20, %v7199_v11  ;;  %v7236_v11 = vld [vmem:[%s9836_s29 + $0x408] sm:$0xff]  ;;  %v7238_v20 = vld [vmem:[%s9836_s29 + $0x418] sm:$0xff] }
 0x2cc   : > { %8487 = vmatprep.subr.bf16.mxu0 %v8486_v16  ;;  %v7198_v16 = vld [vmem:[%s9836_s29 + $0x2e0] sm:$0xff] }
 0x2cd   : > { %v8524_v22 = vpack.c.bf16 %v7200_v17, %v7198_v16  ;;  %v7235_v16 = vld [vmem:[%s9836_s29 + $0x400] sm:$0xff]  ;;  %v7237_v17 = vld [vmem:[%s9836_s29 + $0x410] sm:$0xff] }
 0x2cf   : > { %8489 = vmatpush1.bf16.msra.mxu0 %v8488_v23  ;;  %v8526_v23 = vpack.c.bf16 %v7206_v19, %v7204_v18  ;;  %v7240_v18 = vld [vmem:[%s9836_s29 + $0x428] sm:$0xff]  ;;  %v7242_v19 = vld [vmem:[%s9836_s29 + $0x438] sm:$0xff] }
 0x2d0   : > { %8491 = vmatprep.subr.bf16.mxu0 %v8490_v24  ;;  %v7203_v24 = vld [vmem:[%s9836_s29 + $0x300] sm:$0xff] }
 0x2d1   : > { %v8528_v32 = vpack.c.bf16 %v7205_v25, %v7203_v24  ;;  %v7239_v24 = vld [vmem:[%s9836_s29 + $0x420] sm:$0xff]  ;;  %v7241_v25 = vld [vmem:[%s9836_s29 + $0x430] sm:$0xff] }
 0x2d3   : > { %8493 = vmatpush1.bf16.msra.mxu0 %v8492_v35  ;;  %v2351_v35 = vrot.slane %v10428_v12, 1 }
 0x2d4   : > { %8495 = vmatprep.subr.bf16.mxu0 %v8494_v36  ;;  %v8530_v36 = vpack.c.bf16 %v7210_v30, %v7208_v26  ;;  %v7244_v26 = vld [vmem:[%s9836_s29 + $0x448] sm:$0xff]  ;;  %v7246_v30 = vld [vmem:[%s9836_s29 + $0x458] sm:$0xff] }
 0x2d7   : > { %8497 = vmatpush1.bf16.msra.mxu0 %v8496_v41  ;;  %v7214_v41 = vld [vmem:[%s9836_s29 + $0x358] sm:$0xff] }
 0x2d8   : > { %8499 = vmatprep.subr.bf16.mxu0 %v8498_v7  ;;  %v8532_v7 = vpack.c.bf16 %v7209_v38, %v7207_v37  ;;  %v8534_v42 = vpack.c.bf16 %v7214_v41, %v7212_v40  ;;  %v7245_v37 = vld [vmem:[%s9836_s29 + $0x450] sm:$0xff]  ;;  %v7248_v38 = vld [vmem:[%s9836_s29 + $0x468] sm:$0xff] }
 0x2db   : > { %8501 = vmatpush1.bf16.msra.mxu0 %v8500_v47  ;;  %v8536_v47 = vpack.c.bf16 %v7213_v45, %v7211_v44  ;;  %v2478_v45 = vrot.slane %v10428_v12, 2  ;;  %v2591_v12 = vld [vmem:[%s9846_s8 + $0xa0] sm:$0xff] }
 0x2dc   : > { %8503 = vmatprep.subr.bf16.mxu0 %v8502_v48  ;;  %v8538_v48 = vpack.c.bf16 %v7218_v9, %v7216_v46  ;;  %v2587_v46 = vld [vmem:[%s9846_s8 + $0x80] sm:$0xff]  ;;  %v2588_v9 = vld [vmem:[%s9846_s8 + $0x88] sm:$0xff] }
 0x2df   : > { %8505 = vmatpush1.bf16.msra.mxu0 %v8504_v54  ;;  %v8540_v54 = vpack.c.bf16 %v7217_v51, %v7215_v50  ;;  %v2590_v50 = vld [vmem:[%s9846_s8 + $0x98] sm:$0xff] }
 0x2e0   : > { %8507 = vmatprep.subr.bf16.mxu0 %v8506_v55  ;;  %v8542_v55 = vpack.c.bf16 %v7222_v53, %v7220_v52  ;;  %v2592_v52 = vld [vmem:[%s9846_s8 + $0xa8] sm:$0xff]  ;;  %v2593_v53 = vld [vmem:[%s9846_s8 + $0xb0] sm:$0xff] }
 0x2e3   : > { %8509 = vmatpush1.bf16.msra.mxu0 %v8508_v60  ;;  %v8544_v60 = vpack.c.bf16 %v7221_v57, %v7219_v56  ;;  %v2880_v57 = vld [vmem:[%s9856_s19 + $0x8] sm:$0xff] }
 0x2e4   : > { %8511 = vmatprep.subr.bf16.mxu0 %v8510_v61  ;;  %v8546_v61 = vpack.c.bf16 %v7226_v59, %v7224_v58  ;;  %v2882_v58 = vld [vmem:[%s9856_s19 + $0x18] sm:$0xff]  ;;  %v2879_v59 = vld [vmem:[%s9856_s19] sm:$0xff] }
 0x2e7   : > { %8513 = vmatpush1.bf16.msra.mxu0 %v8512_v2  ;;  %v8548_v2 = vpack.c.bf16 %v7225_v62, %v7223_v28  ;;  %v2164_v62 = vld [vmem:[%s9841_s3] sm:$0x3] }
 0x2e8   : > { %8515 = vmatprep.subr.bf16.mxu0 %v8514_v3  ;;  %v8550_v3 = vpack.c.bf16 %v7230_v1, %v7228_v63  ;;  %v2292_v63 = vrot.slane %v2164_v62, %v10160_v31  ;;  %v2296_v1 = vrot.slane %v2164_v62, %v10163_v33 }
 0x2eb   : > { %8517 = vmatpush1.bf16.msra.mxu0 %v8516_v8  ;;  %v8552_v8 = vpack.c.bf16 %v7229_v5, %v7227_v4 }
 0x2ec   : > { %8519 = vmatprep.subr.bf16.mxu0 %v8518_v21  ;;  %v8554_v21 = vpack.c.bf16 %v7234_v27, %v7232_v6 }
 0x2ef   : > { %8521 = vmatpush1.bf16.msra.mxu0 %v8520_v14  ;;  %v8556_v14 = vpack.c.bf16 %v7233_v10, %v7231_v0 }
 0x2f0   : > { %8523 = vmatprep.subr.bf16.mxu0 %v8522_v15  ;;  %v8558_v15 = vpack.c.bf16 %v7238_v20, %v7236_v11 }
 0x2f3   : > { %8525 = vmatpush1.bf16.msra.mxu0 %v8524_v22  ;;  %v8560_v22 = vpack.c.bf16 %v7237_v17, %v7235_v16  ;;  %v7257_v16 = vld [vmem:[%s9846_s8 + $0xd8] sm:$0xff] }
 0x2f4   : > { %8527 = vmatprep.subr.bf16.mxu0 %v8526_v23  ;;  %v8562_v23 = vpack.c.bf16 %v7242_v19, %v7240_v18  ;;  %v7258_v19 = vld [vmem:[%s9846_s8 + $0xe0] sm:$0xff] }
 0x2f6   : > { %2421 = vmatmul.mubr.f32.vlgmr.msra.gmra.mrb[2].mxu0 %v2351_v35  ;;  %v8566_v35 = vpack.c.bf16 %v7246_v30, %v7244_v26  ;;  %v7262_v30 = vld [vmem:[%s9846_s8 + $0x100] sm:$0xff] }
 0x2f7   : > { %8529 = vmatpush1.bf16.msra.mxu0 %v8528_v32  ;;  %7251 = vmatprep.mubr.msk.f32.mxu0 %vm2213_vm8, %v2479_v39  ;;  %v8564_v32 = vpack.c.bf16 %v7241_v25, %v7239_v24  ;;  %v7250_v39 = vld [vmem:[%s9836_s29 + $0x478] sm:$0xff]  ;;  %v7260_v24 = vld [vmem:[%s9846_s8 + $0xf0] sm:$0xff] }
 0x2f8   : > { %8531 = vmatprep.subr.bf16.mxu0 %v8530_v36  ;;  %v7243_v36 = vld [vmem:[%s9836_s29 + $0x440] sm:$0xff]  ;;  %v8570_v41 = vpack.c.bf16 %v7250_v39, %v7248_v38  ;;  %v7261_v25 = vld [vmem:[%s9846_s8 + $0xf8] sm:$0xff] }
 0x2f9   : > { %v8568_v40 = vpack.c.bf16 %v7245_v37, %v7243_v36  ;;  %v8620_v26 = vpack.c.bf16 %v7261_v25, %v7260_v24  ;;  %v7264_v36 = vld [vmem:[%s9846_s8 + $0x110] sm:$0xff]  ;;  %v7265_v37 = vld [vmem:[%s9846_s8 + $0x118] sm:$0xff]  ;;  %v7266_v39 = vld [vmem:[%s9846_s8 + $0x120] sm:$0xff] }
 0x2fa   : > { %v8626_v38 = vpack.c.bf16 %v7265_v37, %v7264_v36  ;;  %v7297_v24 = vld [vmem:[%s9846_s8 + $0x210] sm:$0xff]  ;;  %v7298_v25 = vld [vmem:[%s9846_s8 + $0x218] sm:$0xff] }
 0x2fb   : > { %8533 = vmatpush1.bf16.msra.mxu0 %v8532_v7  ;;  %v7247_v7 = vld [vmem:[%s9836_s29 + $0x460] sm:$0xff]  ;;  %v7301_v36 = vld [vmem:[%s9846_s8 + $0x230] sm:$0xff]  ;;  %v7302_v37 = vld [vmem:[%s9846_s8 + $0x238] sm:$0xff] }
 0x2fc   : > { %8535 = vmatprep.subr.bf16.mxu0 %v8534_v42  ;;  %v7249_v42 = vld [vmem:[%s9836_s29 + $0x470] sm:$0xff] }
 0x2fd   : > { %v8572_v44 = vpack.c.bf16 %v7249_v42, %v7247_v7  ;;  %v7268_v7 = vld [vmem:[%s9846_s8 + $0x130] sm:$0xff]  ;;  %v7269_v42 = vld [vmem:[%s9846_s8 + $0x138] sm:$0xff] }
 0x2ff   : > { %8537 = vmatpush1.bf16.msra.mxu0 %v8536_v47  ;;  %v8599_v47 = vpack.c.bf16 %v2588_v9, %v2587_v46  ;;  %v7271_v46 = vld [vmem:[%s9846_s8 + $0x148] sm:$0xff] }
 0x300   : > { %8539 = vmatprep.subr.bf16.mxu0 %v8538_v48  ;;  %v2589_v48 = vld [vmem:[%s9846_s8 + $0x90] sm:$0xff] }
 0x301   : > { %8600 = vmatpush1.bf16.msra.mxu1 %v8599_v47  ;;  %v8602_v51 = vpack.c.bf16 %v2590_v50, %v2589_v48  ;;  %v7272_v47 = vld [vmem:[%s9846_s8 + $0x150] sm:$0xff]  ;;  %v7273_v48 = vld [vmem:[%s9846_s8 + $0x158] sm:$0xff] }
 0x302   : > { %8601 = vmatprep.subr.bf16.mxu1 %v9796_v34  ;;  %v8638_v50 = vpack.c.bf16 %v7273_v48, %v7272_v47 }
 0x303   : > { %8541 = vmatpush1.bf16.msra.mxu0 %v8540_v54  ;;  %v8605_v54 = vpack.c.bf16 %v2592_v52, %v2591_v12  ;;  %v7275_v12 = vld [vmem:[%s9846_s8 + $0x168] sm:$0xff] }
 0x304   : > { %8543 = vmatprep.subr.bf16.mxu0 %v8542_v55  ;;  %v2594_v55 = vld [vmem:[%s9846_s8 + $0xb8] sm:$0xff] }
 0x305   : > { %8603 = vmatpush1.bf16.msra.mxu1 %v8602_v51  ;;  %v8608_v56 = vpack.c.bf16 %v2594_v55, %v2593_v53  ;;  %v7274_v51 = vld [vmem:[%s9846_s8 + $0x160] sm:$0xff]  ;;  %v7276_v53 = vld [vmem:[%s9846_s8 + $0x170] sm:$0xff] }
 0x306   : > { %8604 = vmatprep.subr.bf16.mxu1 %v9796_v34  ;;  %v8641_v52 = vpack.c.bf16 %v7275_v12, %v7274_v51  ;;  %v2992_v12 = vld [vmem:[%s9866_s30 + $0x10] sm:$0xff] }
 0x307   : > { %8545 = vmatpush1.bf16.msra.mxu0 %v8544_v60  ;;  %v8682_v60 = vpack.c.bf16 %v2882_v58, %v2880_v57  ;;  %v7280_v57 = vld [vmem:[%s9846_s8 + $0x188] sm:$0xff] }
 0x308   : > { %8547 = vmatprep.subr.bf16.mxu0 %v8546_v61  ;;  %v2881_v61 = vld [vmem:[%s9856_s19 + $0x10] sm:$0xff] }
 0x309   : > { %8606 = vmatpush1.bf16.msra.mxu1 %v8605_v54  ;;  %v8684_v28 = vpack.c.bf16 %v2881_v61, %v2879_v59  ;;  %v7277_v54 = vld [vmem:[%s9846_s8 + $0x178] sm:$0xff] }
 0x30a   : > { %8607 = vmatprep.subr.bf16.mxu1 %v9796_v34  ;;  %v8644_v55 = vpack.c.bf16 %v7277_v54, %v7276_v53  ;;  %v7282_v61 = vld [vmem:[%s9846_s8 + $0x198] sm:$0xff]  ;;  %v2994_v54 = vld [vmem:[%s9866_s30 + $0x20] sm:$0xff] }
 0x30b   : > { %8549 = vmatpush1.bf16.msra.mxu0 %v8548_v2 }
 0x30c   : > { %8551 = vmatprep.subr.bf16.mxu0 %v8550_v3 }
 0x30d   : > { %8609 = vmatpush1.bf16.msra.mxu1 %v8608_v56  ;;  %v7279_v56 = vld [vmem:[%s9846_s8 + $0x180] sm:$0xff] }
 0x30e   : > { %8610 = vmatprep.subr.bf16.mxu1 %v9796_v34  ;;  %v8647_v58 = vpack.c.bf16 %v7280_v57, %v7279_v56  ;;  %v2996_v57 = vld [vmem:[%s9866_s30 + $0x30] sm:$0xff] }
 0x30f   : > { %8553 = vmatpush1.bf16.msra.mxu0 %v8552_v8  ;;  %v7254_v8 = vld [vmem:[%s9846_s8 + $0xc0] sm:$0xff] }
 0x310   : > { %8555 = vmatprep.subr.bf16.mxu0 %v8554_v21  ;;  %v7255_v21 = vld [vmem:[%s9846_s8 + $0xc8] sm:$0xff] }
 0x311   : > { %v8611_v20 = vpack.c.bf16 %v7255_v21, %v7254_v8  ;;  %v7289_v21 = vld [vmem:[%s9846_s8 + $0x1d0] sm:$0xff] }
 0x313   : > { %8557 = vmatpush1.bf16.msra.mxu0 %v8556_v14 }
 0x314   : > { %8559 = vmatprep.subr.bf16.mxu0 %v8558_v15  ;;  %v7256_v15 = vld [vmem:[%s9846_s8 + $0xd0] sm:$0xff] }
 0x315   : > { %v8614_v18 = vpack.c.bf16 %v7257_v16, %v7256_v15  ;;  %v7293_v16 = vld [vmem:[%s9846_s8 + $0x1f0] sm:$0xff] }
 0x317   : > { %8561 = vmatpush1.bf16.msra.mxu0 %v8560_v22  ;;  %v7259_v22 = vld [vmem:[%s9846_s8 + $0xe8] sm:$0xff] }
 0x318   : > { %8563 = vmatprep.subr.bf16.mxu0 %v8562_v23  ;;  %v8617_v23 = vpack.c.bf16 %v7259_v22, %v7258_v19  ;;  %v7295_v19 = vld [vmem:[%s9846_s8 + $0x200] sm:$0xff]  ;;  %v7296_v22 = vld [vmem:[%s9846_s8 + $0x208] sm:$0xff] }
 0x31b   : > { %8565 = vmatpush1.bf16.msra.mxu0 %v8564_v32  ;;  %v7263_v32 = vld [vmem:[%s9846_s8 + $0x108] sm:$0xff] }
 0x31c   : > { %8567 = vmatprep.subr.bf16.mxu0 %v8566_v35  ;;  %v8623_v35 = vpack.c.bf16 %v7263_v32, %v7262_v30  ;;  %v7299_v30 = vld [vmem:[%s9846_s8 + $0x220] sm:$0xff]  ;;  %v7300_v32 = vld [vmem:[%s9846_s8 + $0x228] sm:$0xff] }
 0x31f   : > { %8569 = vmatpush1.bf16.msra.mxu0 %v8568_v40  ;;  %v7267_v40 = vld [vmem:[%s9846_s8 + $0x128] sm:$0xff] }
 0x320   : > { %8571 = vmatprep.subr.bf16.mxu0 %v8570_v41  ;;  %v8629_v41 = vpack.c.bf16 %v7267_v40, %v7266_v39  ;;  %v2884_v40 = vld [vmem:[%s9856_s19 + $0x28] sm:$0xff] }
 0x323   : > { %8573 = vmatpush1.bf16.msra.mxu0 %v8572_v44  ;;  %v8632_v44 = vpack.c.bf16 %v7269_v42, %v7268_v7  ;;  %v2883_v42 = vld [vmem:[%s9856_s19 + $0x20] sm:$0xff] }
 0x324   : > { %8683 = vmatprep.subr.bf16.mxu0 %v8682_v60  ;;  %v7281_v60 = vld [vmem:[%s9846_s8 + $0x190] sm:$0xff] }
 0x325   : > { %v8650_v62 = vpack.c.bf16 %v7282_v61, %v7281_v60  ;;  %v2998_v60 = vld [vmem:[%s9866_s30 + $0x40] sm:$0xff]  ;;  %v2999_v61 = vld [vmem:[%s9866_s30 + $0x48] sm:$0xff] }
 0x326   : > { %2548 = vmatmul.mubr.f32.vlgmr.msra.gmra.mrb[2].mxu0 %v2478_v45  ;;  %v7270_v45 = vld [vmem:[%s9846_s8 + $0x140] sm:$0xff] }
 0x327   : > { %2966 = vmatprep.mubr.f32.mxu0 %v10378_v13  ;;  %8685 = vmatpush1.bf16.msra.mxu0 %v8684_v28  ;;  %v8635_v9 = vpack.c.bf16 %v7271_v46, %v7270_v45  ;;  %v7253_v46 = vld [vmem:[%s9851_s14] ss:$0 sm:$0xff] }
 0x3f9   : > { %v2549_v2 = vpop.f32.mrb[2].mxu0 }
 0x3fa   : > { %v9626_v3 = vadd.f32 %v2549_v2, %v2292_v63  ;;  %v2551_v4 = vpop.f32.mrb[3].mxu0  ;;  %v7283_v63 = vld [vmem:[%s9846_s8 + $0x1a0] sm:$0xff] }
 0x3fb   : > { %v9627_v5 = vadd.f32 %v2551_v4, %v2296_v1  ;;  %v7284_v1 = vld [vmem:[%s9846_s8 + $0x1a8] sm:$0xff]  ;;  %v7286_v4 = vld [vmem:[%s9846_s8 + $0x1b8] sm:$0xff] }
 0x3fc   : > { %v2560_v6 = vrot.slane %v9626_v3, 7  ;;  %v8653_v2 = vpack.c.bf16 %v7284_v1, %v7283_v63  ;;  %v7285_v3 = vld [vmem:[%s9846_s8 + $0x1b0] sm:$0xff]  ;;  %v3001_v63 = vld [vmem:[%s9866_s30 + $0x58] sm:$0xff] }
 0x3fd   : > { %v2561_v27 = vrot.slane %v9627_v5, 7  ;;  %v8656_v5 = vpack.c.bf16 %v7286_v4, %v7285_v3  ;;  %v3003_v3 = vld [vmem:[%s9866_s30 + $0x68] sm:$0xff] }
 0x3fe   : > { %2564 = vst [vmem:[#allocation5] sm:$0x1e] %v2560_v6  ;;  %v7287_v6 = vld [vmem:[%s9846_s8 + $0x1c0] sm:$0xff] }
 0x3ff   : > { %2565 = vst.msk [vmem:[#allocation5 + $0x8] sm:$0x1e] %vm2160_vm7, %v2561_v27  ;;  %v7288_v27 = vld [vmem:[%s9846_s8 + $0x1c8] sm:$0xff] }
 0x400   : > { %v8659_v8 = vpack.c.bf16 %v7288_v27, %v7287_v6  ;;  %v3005_v6 = vld [vmem:[%s9866_s30 + $0x78] sm:$0xff] }
 0x405   : > { %v2566_v0 = vld [vmem:[#allocation5] sm:$0x3f] }
 0x406   : > { %v2567_v10 = vld [vmem:[#allocation5 + $0x8] sm:$0x3f]  ;;  %v10550_v14 = vmax.f32 %v2566_v0, 0.0 }
 0x407   : > { %v10548_v11 = vmax.f32 %v2567_v10, 0.0  ;;  %v7290_v0 = vld [vmem:[%s9846_s8 + $0x1d8] sm:$0xff] }
 0x408   : > { %v2701_v59 = vrot.slane %v10550_v14, 1  ;;  %v8662_v10 = vpack.c.bf16 %v7290_v0, %v7289_v21  ;;  %v2802_v39 = vrot.slane %v10550_v14, 2  ;;  %v3007_v21 = vld [vmem:[%s9866_s30 + $0x88] sm:$0xff] }
 0x409   : > { %7252 = vmatprep.mubr.msk.f32.mxu1 %vm2213_vm8, %v10548_v11  ;;  %v2702_v17 = vrot.slane %v10548_v11, 1  ;;  %v2803_v28 = vrot.slane %v10548_v11, 2  ;;  %v7291_v11 = vld [vmem:[%s9846_s8 + $0x1e0] sm:$0xff] }
 0x40a   : > { %2663 = vmatmul.mubr.f32.vlgmr.msra.gmra.mrb[2].mxu1 %v10550_v14  ;;  %v2991_v14 = vld [vmem:[%s9866_s30 + $0x8] sm:$0xff] }
 0x40b   : > { %8612 = vmatpush1.bf16.msra.mxu1 %v8611_v20  ;;  %7278 = vmatprep.mubr.msk.f32.mxu1 %vm2213_vm8, %v2702_v17  ;;  %v7292_v20 = vld [vmem:[%s9846_s8 + $0x1e8] sm:$0xff]  ;;  %v7294_v17 = vld [vmem:[%s9846_s8 + $0x1f8] sm:$0xff] }
 0x40c   : > { %8613 = vmatprep.subr.bf16.mxu1 %v9796_v34  ;;  %v8665_v15 = vpack.c.bf16 %v7292_v20, %v7291_v11  ;;  %v3009_v11 = vld [vmem:[%s9866_s30 + $0x98] sm:$0xff] }
 0x40f   : > { %8615 = vmatpush1.bf16.msra.mxu1 %v8614_v18  ;;  %v8668_v18 = vpack.c.bf16 %v7294_v17, %v7293_v16  ;;  %v3011_v16 = vld [vmem:[%s9866_s30 + $0xa8] sm:$0xff]  ;;  %v3012_v17 = vld [vmem:[%s9866_s30 + $0xb0] sm:$0xff] }
 0x410   : > { %8616 = vmatprep.subr.bf16.mxu1 %v9796_v34 }
 0x413   : > { %8618 = vmatpush1.bf16.msra.mxu1 %v8617_v23  ;;  %v8671_v23 = vpack.c.bf16 %v7296_v22, %v7295_v19  ;;  %v3013_v19 = vld [vmem:[%s9866_s30 + $0xb8] sm:$0xff] }
 0x414   : > { %8619 = vmatprep.subr.bf16.mxu1 %v9796_v34  ;;  %v8724_v22 = vpack.c.bf16 %v3013_v19, %v3012_v17  ;;  %v7327_v17 = vld [vmem:[%s9866_s30 + $0x160] sm:$0xff] }
 0x417   : > { %8621 = vmatpush1.bf16.msra.mxu1 %v8620_v26  ;;  %v8674_v26 = vpack.c.bf16 %v7298_v25, %v7297_v24  ;;  %v3301_v24 = vld [vmem:[%s9876_s12 + $0x18] sm:$0xff]  ;;  %v3298_v25 = vld [vmem:[%s9876_s12] sm:$0xff] }
 0x418   : > { %8622 = vmatprep.subr.bf16.mxu1 %v9796_v34 }
 0x41b   : > { %8624 = vmatpush1.bf16.msra.mxu1 %v8623_v35  ;;  %v8677_v35 = vpack.c.bf16 %v7300_v32, %v7299_v30  ;;  %v3300_v30 = vld [vmem:[%s9876_s12 + $0x10] sm:$0xff] }
 0x41c   : > { %8625 = vmatprep.subr.bf16.mxu1 %v9796_v34  ;;  %v8800_v32 = vpack.c.bf16 %v3300_v30, %v3298_v25  ;;  %v7332_v25 = vld [vmem:[%s9866_s30 + $0x180] sm:$0xff] }
 0x41f   : > { %8627 = vmatpush1.bf16.msra.mxu1 %v8626_v38  ;;  %v8680_v38 = vpack.c.bf16 %v7302_v37, %v7301_v36 }
 0x420   : > { %8628 = vmatprep.subr.bf16.mxu1 %v9796_v34 }
 0x423   : > { %8630 = vmatpush1.bf16.msra.mxu1 %v8629_v41  ;;  %v2886_v41 = vld [vmem:[%s9856_s19 + $0x38] sm:$0xff] }
 0x424   : > { %8631 = vmatprep.subr.bf16.mxu1 %v9796_v34  ;;  %v8686_v7 = vpack.c.bf16 %v2886_v41, %v2884_v40 }
 0x426   : > { %8687 = vmatprep.subr.bf16.mxu0 %v8686_v7 }
 0x427   : > { %8633 = vmatpush1.bf16.msra.mxu1 %v8632_v44  ;;  %v2885_v44 = vld [vmem:[%s9856_s19 + $0x30] sm:$0xff] }
 0x428   : > { %8634 = vmatprep.subr.bf16.mxu1 %v9796_v34  ;;  %v8688_v45 = vpack.c.bf16 %v2885_v44, %v2883_v42  ;;  %v2973_v42 = vld [vmem:[#allocation5] sm:$0x1e] }
 0x42a   : > { %8689 = vmatpush1.bf16.msra.mxu0 %v8688_v45 }
 0x42b   : > { %8636 = vmatpush1.bf16.msra.mxu1 %v8635_v9  ;;  %8690 = vmatprep.subr.bf16.mxu0 %v9796_v34  ;;  %v2990_v9 = vld [vmem:[%s9866_s30] sm:$0xff] }
 0x42c   : > { %8637 = vmatprep.subr.bf16.mxu1 %v9796_v34 }
 0x42f   : > { %8639 = vmatpush1.bf16.msra.mxu1 %v8638_v50  ;;  %v8691_v50 = vpack.c.bf16 %v2991_v14, %v2990_v9  ;;  %v7307_v14 = vld [vmem:[%s9866_s30 + $0xc0] sm:$0xff] }
 0x430   : > { %8640 = vmatprep.subr.bf16.mxu1 %v9796_v34 }
 0x433   : > { %8642 = vmatpush1.bf16.msra.mxu1 %v8641_v52  ;;  %v2993_v52 = vld [vmem:[%s9866_s30 + $0x18] sm:$0xff] }
 0x434   : > { %8643 = vmatprep.subr.bf16.mxu1 %v9796_v34  ;;  %v8694_v53 = vpack.c.bf16 %v2993_v52, %v2992_v12  ;;  %v7309_v52 = vld [vmem:[%s9866_s30 + $0xd0] sm:$0xff] }
 0x437   : > { %8645 = vmatpush1.bf16.msra.mxu1 %v8644_v55  ;;  %v2995_v55 = vld [vmem:[%s9866_s30 + $0x28] sm:$0xff] }
 0x438   : > { %8646 = vmatprep.subr.bf16.mxu1 %v9796_v34  ;;  %v8697_v56 = vpack.c.bf16 %v2995_v55, %v2994_v54 }
 0x43a   : > { %2771 = vmatmul.mubr.f32.vlgmr.msra.gmra.mrb[2].mxu1 %v2701_v59 }
 0x43b   : > { %8648 = vmatpush1.bf16.msra.mxu1 %v8647_v58  ;;  %7303 = vmatprep.mubr.msk.f32.mxu1 %vm2213_vm8, %v2803_v28  ;;  %v2997_v58 = vld [vmem:[%s9866_s30 + $0x38] sm:$0xff]  ;;  %v8703_v28 = vpack.c.bf16 %v2999_v61, %v2998_v60 }
 0x43c   : > { %8649 = vmatprep.subr.bf16.mxu1 %v9796_v34  ;;  %v8700_v59 = vpack.c.bf16 %v2997_v58, %v2996_v57  ;;  %v7312_v57 = vld [vmem:[%s9866_s30 + $0xe8] sm:$0xff]  ;;  %v7314_v60 = vld [vmem:[%s9866_s30 + $0xf8] sm:$0xff] }
 0x43f   : > { %8651 = vmatpush1.bf16.msra.mxu1 %v8650_v62  ;;  %v3000_v62 = vld [vmem:[%s9866_s30 + $0x50] sm:$0xff] }
 0x440   : > { %8652 = vmatprep.subr.bf16.mxu1 %v9796_v34  ;;  %v8706_v1 = vpack.c.bf16 %v3001_v63, %v3000_v62  ;;  %v7316_v62 = vld [vmem:[%s9866_s30 + $0x108] sm:$0xff] }
 0x443   : > { %8654 = vmatpush1.bf16.msra.mxu1 %v8653_v2  ;;  %v3002_v2 = vld [vmem:[%s9866_s30 + $0x60] sm:$0xff] }
 0x444   : > { %8655 = vmatprep.subr.bf16.mxu1 %v9796_v34  ;;  %v8709_v4 = vpack.c.bf16 %v3003_v3, %v3002_v2  ;;  %v7318_v2 = vld [vmem:[%s9866_s30 + $0x118] sm:$0xff] }
 0x447   : > { %8657 = vmatpush1.bf16.msra.mxu1 %v8656_v5  ;;  %v3004_v5 = vld [vmem:[%s9866_s30 + $0x70] sm:$0xff] }
 0x448   : > { %8658 = vmatprep.subr.bf16.mxu1 %v9796_v34  ;;  %v8712_v27 = vpack.c.bf16 %v3005_v6, %v3004_v5  ;;  %v7320_v5 = vld [vmem:[%s9866_s30 + $0x128] sm:$0xff] }
 0x44b   : > { %8660 = vmatpush1.bf16.msra.mxu1 %v8659_v8  ;;  %v3006_v8 = vld [vmem:[%s9866_s30 + $0x80] sm:$0xff] }
 0x44c   : > { %8661 = vmatprep.subr.bf16.mxu1 %v9796_v34  ;;  %v8715_v0 = vpack.c.bf16 %v3007_v21, %v3006_v8  ;;  %v7322_v8 = vld [vmem:[%s9866_s30 + $0x138] sm:$0xff] }
 0x44f   : > { %8663 = vmatpush1.bf16.msra.mxu1 %v8662_v10  ;;  %v3008_v10 = vld [vmem:[%s9866_s30 + $0x90] sm:$0xff] }
 0x450   : > { %8664 = vmatprep.subr.bf16.mxu1 %v9796_v34  ;;  %v8718_v20 = vpack.c.bf16 %v3009_v11, %v3008_v10  ;;  %v7324_v10 = vld [vmem:[%s9866_s30 + $0x148] sm:$0xff] }
 0x453   : > { %8666 = vmatpush1.bf16.msra.mxu1 %v8665_v15  ;;  %v3010_v15 = vld [vmem:[%s9866_s30 + $0xa0] sm:$0xff] }
 0x454   : > { %8667 = vmatprep.subr.bf16.mxu1 %v9796_v34 }
 0x457   : > { %8669 = vmatpush1.bf16.msra.mxu1 %v8668_v18  ;;  %v8721_v18 = vpack.c.bf16 %v3011_v16, %v3010_v15  ;;  %v7326_v15 = vld [vmem:[%s9866_s30 + $0x158] sm:$0xff] }
 0x458   : > { %8670 = vmatprep.subr.bf16.mxu1 %v9796_v34 }
 0x45b   : > { %8672 = vmatpush1.bf16.msra.mxu1 %v8671_v23  ;;  %v3299_v23 = vld [vmem:[%s9876_s12 + $0x8] sm:$0xff] }
 0x45c   : > { %8673 = vmatprep.subr.bf16.mxu1 %v9796_v34 }
 0x45f   : > { %8675 = vmatpush1.bf16.msra.mxu1 %v8674_v26  ;;  %v8798_v26 = vpack.c.bf16 %v3301_v24, %v3299_v23  ;;  %v7330_v23 = vld [vmem:[%s9866_s30 + $0x178] sm:$0xff] }
 0x460   : > { %8676 = vmatprep.subr.bf16.mxu1 %v9796_v34 }
 0x463   : > { %8678 = vmatpush1.bf16.msra.mxu1 %v8677_v35  ;;  %v2887_v35 = vld [vmem:[%s9861_s24] sm:$0x3] }
 0x464   : > { %8679 = vmatprep.subr.bf16.mxu1 %v9796_v34  ;;  %v2892_v36 = vrot.slane %v2887_v35, %v10160_v31  ;;  %v2896_v37 = vrot.slane %v2887_v35, %v10163_v33  ;;  %v7334_v35 = vld [vmem:[%s9866_s30 + $0x190] sm:$0xff] }
 0x467   : > { %8681 = vmatpush1.bf16.msra.mxu1 %v8680_v38 }
 0x468   : > { %8799 = vmatprep.subr.bf16.mxu1 %v8798_v26  ;;  %v7333_v26 = vld [vmem:[%s9866_s30 + $0x188] sm:$0xff] }
 0x469   : > { %v8763_v30 = vpack.c.bf16 %v7333_v26, %v7332_v25  ;;  %v3414_v26 = vld [vmem:[%s11852_s22 + $0x30] sm:$0xff] }
 0x46a   : > { %2872 = vmatmul.mubr.f32.vlgmr.msra.gmra.mrb[2].mxu1 %v2802_v39 }
 0x46b   : > { %3385 = vmatprep.mubr.f32.mxu1 %v10378_v13  ;;  %8801 = vmatpush1.bf16.msra.mxu1 %v8800_v32 }
 0x53d   : > { %v2873_v47 = vpop.f32.mrb[2].mxu1 }
 0x53e   : > { %v9628_v13 = vadd.f32 %v7253_v46, %v2873_v47  ;;  %v2875_v48 = vpop.f32.mrb[3].mxu1  ;;  %v2974_v46 = vld [vmem:[#allocation5 + $0x8] sm:$0x1e]  ;;  %v7308_v47 = vld [vmem:[%s9866_s30 + $0xc8] sm:$0xff] }
 0x540   : > { %v2878_v51 = vmax.f32 %v9628_v13, 0.0 }
 0x542   : > { %7304 = vmatmul.mubr.msk.f32.vlgmr.msra.gmra.mrb[4].mxu0 %vm1745_vm4, %v2878_v51  ;;  %v8727_v51 = vpack.c.bf16 %v7308_v47, %v7307_v14  ;;  %v7342_v14 = vld [vmem:[%s9866_s30 + $0x1d0] sm:$0xff]  ;;  %v7343_v47 = vld [vmem:[%s9866_s30 + $0x1d8] sm:$0xff] }
 0x543   : > { %8692 = vmatpush1.bf16.msra.mxu0 %v8691_v50 }
 0x544   : > { %8693 = vmatprep.subr.bf16.mxu0 %v9796_v34 }
 0x547   : > { %8695 = vmatpush1.bf16.msra.mxu0 %v8694_v53  ;;  %v7310_v53 = vld [vmem:[%s9866_s30 + $0xd8] sm:$0xff] }
 0x548   : > { %8696 = vmatprep.subr.bf16.mxu0 %v9796_v34  ;;  %v8730_v55 = vpack.c.bf16 %v7310_v53, %v7309_v52  ;;  %v7346_v52 = vld [vmem:[%s9866_s30 + $0x1f0] sm:$0xff]  ;;  %v7347_v53 = vld [vmem:[%s9866_s30 + $0x1f8] sm:$0xff] }
 0x54b   : > { %8698 = vmatpush1.bf16.msra.mxu0 %v8697_v56  ;;  %v7311_v56 = vld [vmem:[%s9866_s30 + $0xe0] sm:$0xff] }
 0x54c   : > { %8699 = vmatprep.subr.bf16.mxu0 %v9796_v34  ;;  %v8733_v58 = vpack.c.bf16 %v7312_v57, %v7311_v56  ;;  %v7349_v56 = vld [vmem:[%s9866_s30 + $0x208] sm:$0xff] }
 0x54f   : > { %8701 = vmatpush1.bf16.msra.mxu0 %v8700_v59  ;;  %v7313_v59 = vld [vmem:[%s9866_s30 + $0xf0] sm:$0xff] }
 0x550   : > { %8702 = vmatprep.subr.bf16.mxu0 %v9796_v34  ;;  %v8736_v61 = vpack.c.bf16 %v7314_v60, %v7313_v59  ;;  %v7351_v59 = vld [vmem:[%s9866_s30 + $0x218] sm:$0xff] }
 0x553   : > { %8704 = vmatpush1.bf16.msra.mxu0 %v8703_v28  ;;  %v7315_v28 = vld [vmem:[%s9866_s30 + $0x100] sm:$0xff] }
 0x554   : > { %8705 = vmatprep.subr.bf16.mxu0 %v9796_v34  ;;  %v8739_v63 = vpack.c.bf16 %v7316_v62, %v7315_v28  ;;  %v7353_v28 = vld [vmem:[%s9866_s30 + $0x228] sm:$0xff] }
 0x557   : > { %8707 = vmatpush1.bf16.msra.mxu0 %v8706_v1  ;;  %v7317_v1 = vld [vmem:[%s9866_s30 + $0x110] sm:$0xff] }
 0x558   : > { %8708 = vmatprep.subr.bf16.mxu0 %v9796_v34  ;;  %v8742_v3 = vpack.c.bf16 %v7318_v2, %v7317_v1  ;;  %v7355_v1 = vld [vmem:[%s9866_s30 + $0x238] sm:$0xff] }
 0x55b   : > { %8710 = vmatpush1.bf16.msra.mxu0 %v8709_v4  ;;  %v7319_v4 = vld [vmem:[%s9866_s30 + $0x120] sm:$0xff] }
 0x55c   : > { %8711 = vmatprep.subr.bf16.mxu0 %v9796_v34  ;;  %v8745_v6 = vpack.c.bf16 %v7320_v5, %v7319_v4  ;;  %v3303_v4 = vld [vmem:[%s9876_s12 + $0x28] sm:$0xff]  ;;  %v3305_v5 = vld [vmem:[%s9876_s12 + $0x38] sm:$0xff] }
 0x55f   : > { %8713 = vmatpush1.bf16.msra.mxu0 %v8712_v27  ;;  %v7321_v27 = vld [vmem:[%s9866_s30 + $0x130] sm:$0xff] }
 0x560   : > { %8714 = vmatprep.subr.bf16.mxu0 %v9796_v34  ;;  %v8748_v21 = vpack.c.bf16 %v7322_v8, %v7321_v27  ;;  %v3302_v27 = vld [vmem:[%s9876_s12 + $0x20] sm:$0xff]  ;;  %v3304_v8 = vld [vmem:[%s9876_s12 + $0x30] sm:$0xff] }
 0x563   : > { %8716 = vmatpush1.bf16.msra.mxu0 %v8715_v0  ;;  %v7323_v0 = vld [vmem:[%s9866_s30 + $0x140] sm:$0xff] }
 0x564   : > { %8717 = vmatprep.subr.bf16.mxu0 %v9796_v34  ;;  %v8751_v11 = vpack.c.bf16 %v7324_v10, %v7323_v0  ;;  %v7306_v0 = vld [vmem:[%s11851_s18] ss:$0 sm:$0xff]  ;;  %s11861_s18 = sld [smem:[#allocation21_spill]] }
 0x565   : > { %v3408_v10 = vld [vmem:[%s11852_s22] sm:$0xff] }
 0x567   : > { %8719 = vmatpush1.bf16.msra.mxu0 %v8718_v20  ;;  %v7325_v20 = vld [vmem:[%s9866_s30 + $0x150] sm:$0xff] }
 0x568   : > { %8720 = vmatprep.subr.bf16.mxu0 %v9796_v34  ;;  %v8754_v16 = vpack.c.bf16 %v7326_v15, %v7325_v20 }
 0x56b   : > { %8722 = vmatpush1.bf16.msra.mxu0 %v8721_v18  ;;  %v7328_v18 = vld [vmem:[%s9866_s30 + $0x168] sm:$0xff] }
 0x56c   : > { %8723 = vmatprep.subr.bf16.mxu0 %v9796_v34  ;;  %v8757_v19 = vpack.c.bf16 %v7328_v18, %v7327_v17  ;;  %v3410_v18 = vld [vmem:[%s11852_s22 + $0x10] sm:$0xff] }
 0x56f   : > { %8725 = vmatpush1.bf16.msra.mxu0 %v8724_v22  ;;  %v7329_v22 = vld [vmem:[%s9866_s30 + $0x170] sm:$0xff] }
 0x570   : > { %8726 = vmatprep.subr.bf16.mxu0 %v9796_v34  ;;  %v8760_v24 = vpack.c.bf16 %v7330_v23, %v7329_v22  ;;  %v3412_v23 = vld [vmem:[%s11852_s22 + $0x20] sm:$0xff] }
 0x615   : > { %v2968_v38 = vpop.f32.mrb[4].mxu0 }
 0x616   : > { %v2969_v39 = vadd.f32 %v2968_v38, %v2892_v36  ;;  %v2970_v40 = vpop.f32.mrb[5].mxu0  ;;  %v7335_v36 = vld [vmem:[%s9866_s30 + $0x198] sm:$0xff] }
 0x617   : > { %v2971_v41 = vadd.f32 %v2970_v40, %v2896_v37  ;;  %v8766_v38 = vpack.c.bf16 %v7335_v36, %v7334_v35  ;;  %v7337_v40 = vld [vmem:[%s9866_s30 + $0x1a8] sm:$0xff]  ;;  %v3416_v35 = vld [vmem:[%s11852_s22 + $0x40] sm:$0xff] }
 0x618   : > { %v2977_v7 = vrot.slane %v2969_v39, 7  ;;  %v7336_v39 = vld [vmem:[%s9866_s30 + $0x1a0] sm:$0xff]  ;;  %v3417_v36 = vld [vmem:[%s11852_s22 + $0x48] sm:$0xff] }
 0x619   : > { %v2978_v44 = vrot.slane %v2971_v41, 7  ;;  %v8769_v41 = vpack.c.bf16 %v7337_v40, %v7336_v39  ;;  %v3419_v39 = vld [vmem:[%s11852_s22 + $0x58] sm:$0xff] }
 0x61a   : > { %v2981_v45 = vadd.f32 %v2977_v7, %v2973_v42  ;;  %v7338_v7 = vld [vmem:[%s9866_s30 + $0x1b0] sm:$0xff]  ;;  %v7339_v42 = vld [vmem:[%s9866_s30 + $0x1b8] sm:$0xff] }
 0x61b   : > { %v2982_v9 = vadd.f32 %v2978_v44, %v2974_v46  ;;  %v8772_v44 = vpack.c.bf16 %v7339_v42, %v7338_v7  ;;  %v7341_v46 = vld [vmem:[%s9866_s30 + $0x1c8] sm:$0xff] }
 0x61c   : > { %2983 = vst [vmem:[#allocation5] sm:$0x1e] %v2981_v45  ;;  %v7340_v45 = vld [vmem:[%s9866_s30 + $0x1c0] sm:$0xff]  ;;  %v3421_v7 = vld [vmem:[%s11852_s22 + $0x68] sm:$0xff] }
 0x61d   : > { %2984 = vst.msk [vmem:[#allocation5 + $0x8] sm:$0x1e] %vm2160_vm7, %v2982_v9  ;;  %v8775_v9 = vpack.c.bf16 %v7341_v46, %v7340_v45  ;;  %v3423_v45 = vld [vmem:[%s11852_s22 + $0x78] sm:$0xff] }
 0x623   : > { %v2985_v13 = vld [vmem:[#allocation5] sm:$0x3f] }
 0x624   : > { %v2986_v48 = vld [vmem:[#allocation5 + $0x8] sm:$0x3f]  ;;  %v10686_v12 = vmax.f32 %v2985_v13, 0.0  ;;  %v8778_v13 = vpack.c.bf16 %v7343_v47, %v7342_v14  ;;  %v3425_v14 = vld [vmem:[%s11852_s22 + $0x88] sm:$0xff] }
 0x625   : > { %v10684_v50 = vmax.f32 %v2986_v48, 0.0  ;;  %v7344_v48 = vld [vmem:[%s9866_s30 + $0x1e0] sm:$0xff] }
 0x626   : > { %v3120_v32 = vrot.slane %v10686_v12, 1 }
 0x627   : > { %7305 = vmatprep.mubr.msk.f32.mxu0 %vm2213_vm8, %v10684_v50  ;;  %v3121_v54 = vrot.slane %v10684_v50, 1  ;;  %v3222_v37 = vrot.slane %v10684_v50, 2  ;;  %v7345_v50 = vld [vmem:[%s9866_s30 + $0x1e8] sm:$0xff] }
 0x628   : > { %3082 = vmatmul.mubr.f32.vlgmr.msra.gmra.mrb[6].mxu0 %v10686_v12 }
 0x629   : > { %8728 = vmatpush1.bf16.msra.mxu0 %v8727_v51  ;;  %7331 = vmatprep.mubr.msk.f32.mxu0 %vm2213_vm8, %v3121_v54  ;;  %v8781_v51 = vpack.c.bf16 %v7345_v50, %v7344_v48  ;;  %v8784_v54 = vpack.c.bf16 %v7347_v53, %v7346_v52  ;;  %v3427_v48 = vld [vmem:[%s11852_s22 + $0x98] sm:$0xff]  ;;  %v3429_v52 = vld [vmem:[%s11852_s22 + $0xa8] sm:$0xff] }
 0x62a   : > { %8729 = vmatprep.subr.bf16.mxu0 %v9796_v34 }
 0x62d   : > { %8731 = vmatpush1.bf16.msra.mxu0 %v8730_v55  ;;  %v7348_v55 = vld [vmem:[%s9866_s30 + $0x200] sm:$0xff] }
 0x62e   : > { %8732 = vmatprep.subr.bf16.mxu0 %v9796_v34  ;;  %v8787_v57 = vpack.c.bf16 %v7349_v56, %v7348_v55  ;;  %v3431_v55 = vld [vmem:[%s11852_s22 + $0xb8] sm:$0xff] }
 0x631   : > { %8734 = vmatpush1.bf16.msra.mxu0 %v8733_v58  ;;  %v7350_v58 = vld [vmem:[%s9866_s30 + $0x210] sm:$0xff] }
 0x632   : > { %8735 = vmatprep.subr.bf16.mxu0 %v9796_v34  ;;  %v8790_v60 = vpack.c.bf16 %v7351_v59, %v7350_v58  ;;  %v3518_v58 = vld [vmem:[%s11853_s23 + $0x8] sm:$0xff] }
 0x635   : > { %8737 = vmatpush1.bf16.msra.mxu0 %v8736_v61  ;;  %v7352_v61 = vld [vmem:[%s9866_s30 + $0x220] sm:$0xff] }
 0x636   : > { %8738 = vmatprep.subr.bf16.mxu0 %v9796_v34  ;;  %v8793_v62 = vpack.c.bf16 %v7353_v28, %v7352_v61  ;;  %v3520_v61 = vld [vmem:[%s11853_s23 + $0x18] sm:$0xff] }
 0x639   : > { %8740 = vmatpush1.bf16.msra.mxu0 %v8739_v63  ;;  %v7354_v63 = vld [vmem:[%s9866_s30 + $0x230] sm:$0xff] }
 0x63a   : > { %8741 = vmatprep.subr.bf16.mxu0 %v9796_v34  ;;  %v8796_v2 = vpack.c.bf16 %v7355_v1, %v7354_v63  ;;  %v3522_v63 = vld [vmem:[%s11853_s23 + $0x28] sm:$0xff] }
 0x63d   : > { %8743 = vmatpush1.bf16.msra.mxu0 %v8742_v3  ;;  %v3221_v3 = vrot.slane %v10686_v12, 2  ;;  %v3409_v12 = vld [vmem:[%s11852_s22 + $0x8] sm:$0xff] }
 0x63e   : > { %8744 = vmatprep.subr.bf16.mxu0 %v9796_v34 }
 0x641   : > { %8746 = vmatpush1.bf16.msra.mxu0 %v8745_v6  ;;  %v8802_v6 = vpack.c.bf16 %v3305_v5, %v3303_v4  ;;  %v3525_v5 = vld [vmem:[%s11853_s23 + $0x40] sm:$0xff] }
 0x642   : > { %8747 = vmatprep.subr.bf16.mxu0 %v9796_v34 }
 0x643   : > { %8803 = vmatprep.subr.bf16.mxu1 %v8802_v6  ;;  %v3526_v6 = vld [vmem:[%s11853_s23 + $0x48] sm:$0xff] }
 0x645   : > { %8749 = vmatpush1.bf16.msra.mxu0 %v8748_v21  ;;  %v8804_v21 = vpack.c.bf16 %v3304_v8, %v3302_v27  ;;  %v8855_v27 = vpack.c.bf16 %v3526_v6, %v3525_v5  ;;  %v3527_v8 = vld [vmem:[%s11853_s23 + $0x50] sm:$0xff]  ;;  %v7400_v5 = vld [vmem:[%s11853_s23 + $0xd8] sm:$0xff] }
 0x646   : > { %8750 = vmatprep.subr.bf16.mxu0 %v9796_v34 }
 0x647   : > { %8805 = vmatpush1.bf16.msra.mxu1 %v8804_v21  ;;  %v3528_v21 = vld [vmem:[%s11853_s23 + $0x58] sm:$0xff] }
 0x648   : > { %8806 = vmatprep.subr.bf16.mxu1 %v9796_v34 }
 0x649   : > { %8752 = vmatpush1.bf16.msra.mxu0 %v8751_v11 }
 0x64a   : > { %8753 = vmatprep.subr.bf16.mxu0 %v9796_v34 }
 0x64d   : > { %8755 = vmatpush1.bf16.msra.mxu0 %v8754_v16  ;;  %v8807_v16 = vpack.c.bf16 %v3409_v12, %v3408_v10  ;;  %v3306_v10 = vld [vmem:[%s11854_s26] sm:$0x3]  ;;  %s11862_s26 = sld [smem:[#allocation18_spill]] }
 0x64e   : > { %8756 = vmatprep.subr.bf16.mxu0 %v9796_v34  ;;  %v3311_v12 = vrot.slane %v3306_v10, %v10160_v31 }
 0x651   : > { %8758 = vmatpush1.bf16.msra.mxu0 %v8757_v19  ;;  %v3411_v19 = vld [vmem:[%s11852_s22 + $0x18] sm:$0xff] }
 0x652   : > { %8759 = vmatprep.subr.bf16.mxu0 %v9796_v34  ;;  %v8810_v22 = vpack.c.bf16 %v3411_v19, %v3410_v18  ;;  %v3392_v19 = vld [vmem:[#allocation5] sm:$0x1e] }
 0x655   : > { %8761 = vmatpush1.bf16.msra.mxu0 %v8760_v24  ;;  %v3413_v24 = vld [vmem:[%s11852_s22 + $0x28] sm:$0xff] }
 0x656   : > { %8762 = vmatprep.subr.bf16.mxu0 %v9796_v34  ;;  %v8813_v25 = vpack.c.bf16 %v3413_v24, %v3412_v23  ;;  %v3393_v24 = vld [vmem:[#allocation5 + $0x8] sm:$0x1e] }
 0x658   : > { %3190 = vmatmul.mubr.f32.vlgmr.msra.gmra.mrb[6].mxu0 %v3120_v32 }
 0x659   : > { %8764 = vmatpush1.bf16.msra.mxu0 %v8763_v30  ;;  %7356 = vmatprep.mubr.msk.f32.mxu0 %vm2213_vm8, %v3222_v37  ;;  %v3415_v30 = vld [vmem:[%s11852_s22 + $0x38] sm:$0xff]  ;;  %v8819_v37 = vpack.c.bf16 %v3417_v36, %v3416_v35  ;;  %v7377_v35 = vld [vmem:[%s11855_s28 + $0x60] sm:$0xff]  ;;  %v7378_v36 = vld [vmem:[%s11855_s28 + $0x68] sm:$0xff] }
 0x65a   : > { %8765 = vmatprep.subr.bf16.mxu0 %v9796_v34  ;;  %v8816_v32 = vpack.c.bf16 %v3415_v30, %v3414_v26 }
 0x65d   : > { %8767 = vmatpush1.bf16.msra.mxu0 %v8766_v38  ;;  %v3418_v38 = vld [vmem:[%s11852_s22 + $0x50] sm:$0xff] }
 0x65e   : > { %8768 = vmatprep.subr.bf16.mxu0 %v9796_v34  ;;  %v8822_v40 = vpack.c.bf16 %v3419_v39, %v3418_v38  ;;  %v8897_v39 = vpack.c.bf16 %v7378_v36, %v7377_v35  ;;  %v7407_v36 = vld [vmem:[%s11853_s23 + $0x110] sm:$0xff] }
 0x661   : > { %8770 = vmatpush1.bf16.msra.mxu0 %v8769_v41  ;;  %v3420_v41 = vld [vmem:[%s11852_s22 + $0x60] sm:$0xff] }
 0x662   : > { %8771 = vmatprep.subr.bf16.mxu0 %v9796_v34  ;;  %v8825_v42 = vpack.c.bf16 %v3421_v7, %v3420_v41  ;;  %v7379_v41 = vld [vmem:[%s11855_s28 + $0x70] sm:$0xff]  ;;  %v7380_v7 = vld [vmem:[%s11855_s28 + $0x78] sm:$0xff] }
 0x665   : > { %8773 = vmatpush1.bf16.msra.mxu0 %v8772_v44  ;;  %v3422_v44 = vld [vmem:[%s11852_s22 + $0x70] sm:$0xff] }
 0x666   : > { %8774 = vmatprep.subr.bf16.mxu0 %v9796_v34  ;;  %v8828_v46 = vpack.c.bf16 %v3423_v45, %v3422_v44  ;;  %v7381_v44 = vld [vmem:[%s11855_s28 + $0x80] sm:$0xff]  ;;  %v7382_v45 = vld [vmem:[%s11855_s28 + $0x88] sm:$0xff] }
 0x669   : > { %8776 = vmatpush1.bf16.msra.mxu0 %v8775_v9  ;;  %v3424_v9 = vld [vmem:[%s11852_s22 + $0x80] sm:$0xff] }
 0x66a   : > { %8777 = vmatprep.subr.bf16.mxu0 %v9796_v34  ;;  %v8831_v47 = vpack.c.bf16 %v3425_v14, %v3424_v9  ;;  %v7383_v9 = vld [vmem:[%s11855_s28 + $0x90] sm:$0xff]  ;;  %v7384_v14 = vld [vmem:[%s11855_s28 + $0x98] sm:$0xff] }
 0x66d   : > { %8779 = vmatpush1.bf16.msra.mxu0 %v8778_v13  ;;  %v3426_v13 = vld [vmem:[%s11852_s22 + $0x90] sm:$0xff] }
 0x66e   : > { %8780 = vmatprep.subr.bf16.mxu0 %v9796_v34  ;;  %v8834_v50 = vpack.c.bf16 %v3427_v48, %v3426_v13  ;;  %v7385_v13 = vld [vmem:[%s11855_s28 + $0xa0] sm:$0xff]  ;;  %v7386_v48 = vld [vmem:[%s11855_s28 + $0xa8] sm:$0xff] }
 0x671   : > { %8782 = vmatpush1.bf16.msra.mxu0 %v8781_v51  ;;  %v3428_v51 = vld [vmem:[%s11852_s22 + $0xa0] sm:$0xff] }
 0x672   : > { %8783 = vmatprep.subr.bf16.mxu0 %v9796_v34  ;;  %v8837_v53 = vpack.c.bf16 %v3429_v52, %v3428_v51  ;;  %v7387_v51 = vld [vmem:[%s11855_s28 + $0xb0] sm:$0xff]  ;;  %v7388_v52 = vld [vmem:[%s11855_s28 + $0xb8] sm:$0xff] }
 0x675   : > { %8785 = vmatpush1.bf16.msra.mxu0 %v8784_v54  ;;  %v3430_v54 = vld [vmem:[%s11852_s22 + $0xb0] sm:$0xff] }
 0x676   : > { %8786 = vmatprep.subr.bf16.mxu0 %v9796_v34  ;;  %v8840_v56 = vpack.c.bf16 %v3431_v55, %v3430_v54  ;;  %v10850_v54 = vld [vmem:[#allocation8] sm:$0xff]  ;;  %v3603_v55 = vld [vmem:[%s11855_s28] sm:$0xff] }
 0x679   : > { %8788 = vmatpush1.bf16.msra.mxu0 %v8787_v57  ;;  %v3517_v57 = vld [vmem:[%s11853_s23] sm:$0xff] }
 0x67a   : > { %8789 = vmatprep.subr.bf16.mxu0 %v9796_v34  ;;  %v8843_v59 = vpack.c.bf16 %v3518_v58, %v3517_v57  ;;  %v7358_v57 = vld [vmem:[%s11856_s1] ss:$0 sm:$0xff] }
 0x67b   : > { %v7397_v58 = vld [vmem:[%s11853_s23 + $0xc0] sm:$0xff] }
 0x67d   : > { %8791 = vmatpush1.bf16.msra.mxu0 %v8790_v60  ;;  %v3519_v60 = vld [vmem:[%s11853_s23 + $0x10] sm:$0xff] }
 0x67e   : > { %8792 = vmatprep.subr.bf16.mxu0 %v9796_v34  ;;  %v8846_v28 = vpack.c.bf16 %v3520_v61, %v3519_v60 }
 0x681   : > { %8794 = vmatpush1.bf16.msra.mxu0 %v8793_v62  ;;  %v3521_v62 = vld [vmem:[%s11853_s23 + $0x20] sm:$0xff] }
 0x682   : > { %8795 = vmatprep.subr.bf16.mxu0 %v9796_v34  ;;  %v8849_v1 = vpack.c.bf16 %v3522_v63, %v3521_v62  ;;  %v3605_v63 = vld [vmem:[%s11855_s28 + $0x10] sm:$0xff] }
 0x685   : > { %8797 = vmatpush1.bf16.msra.mxu0 %v8796_v2  ;;  %v3523_v2 = vld [vmem:[%s11853_s23 + $0x30] sm:$0xff] }
 0x686   : > { %8842 = vmatprep.subr.bf16.mxu0 %v9796_v34 }
 0x688   : > { %3291 = vmatmul.mubr.f32.vlgmr.msra.gmra.mrb[6].mxu0 %v3221_v3  ;;  %v3524_v3 = vld [vmem:[%s11853_s23 + $0x38] sm:$0xff] }
 0x689   : > { %8844 = vmatpush3.bf16.msra.mxu0 %v8843_v59  ;;  %v8852_v4 = vpack.c.bf16 %v3524_v3, %v3523_v2  ;;  %7986 = vmatprep.mubr.msk.f32.mxu0 %vm9797_vm9, %v10850_v54  ;;  %v7398_v59 = vld [vmem:[%s11853_s23 + $0xc8] sm:$0xff] }
 0x68a   : > { %8845 = vmatprep.subr.bf16.mxu0 %v9796_v34  ;;  %v8927_v2 = vpack.c.bf16 %v7398_v59, %v7397_v58  ;;  %v7435_v59 = vld [vmem:[%s11853_s23 + $0x150] sm:$0xff] }
 0x68d   : > { %8847 = vmatpush3.bf16.msra.mxu0 %v8846_v28 }
 0x68e   : > { %8848 = vmatprep.subr.bf16.mxu0 %v9796_v34 }
 0x691   : > { %8850 = vmatpush3.bf16.msra.mxu0 %v8849_v1  ;;  %v3606_v1 = vld [vmem:[%s11855_s28 + $0x18] sm:$0xff] }
 0x692   : > { %8851 = vmatprep.subr.bf16.mxu0 %v9796_v34  ;;  %v8864_v6 = vpack.c.bf16 %v3606_v1, %v3605_v63  ;;  %v7373_v63 = vld [vmem:[%s11853_s23 + $0xa8] sm:$0xff] }
 0x695   : > { %8853 = vmatpush3.bf16.msra.mxu0 %v8852_v4  ;;  %v7399_v4 = vld [vmem:[%s11853_s23 + $0xd0] sm:$0xff] }
 0x696   : > { %8854 = vmatprep.subr.bf16.mxu0 %v9796_v34 }
 0x699   : > { %8856 = vmatpush3.bf16.msra.mxu0 %v8855_v27  ;;  %v3607_v27 = vld [vmem:[%s11855_s28 + $0x20] sm:$0xff] }
 0x69a   : > { %8857 = vmatprep.subr.bf16.mxu0 %v9796_v34 }
 0x75b   : > { %v3292_v11 = vpop.f32.mrb[6].mxu0 }
 0x75c   : > { %v9629_v20 = vadd.f32 %v7306_v0, %v3292_v11  ;;  %v3294_v15 = vpop.f32.mrb[7].mxu0  ;;  %v8858_v0 = vpack.c.bf16 %v3528_v21, %v3527_v8  ;;  %v3315_v11 = vrot.slane %v3306_v10, %v10163_v33  ;;  %v3608_v8 = vld [vmem:[%s11855_s28 + $0x28] sm:$0xff]  ;;  %v8930_v21 = vpack.c.bf16 %v7400_v5, %v7399_v4 }
 0x75d   : > { %v7402_v10 = vld [vmem:[%s11853_s23 + $0xe8] sm:$0xff] }
 0x75e   : > { %v3297_v17 = vmax.f32 %v9629_v20, 0.0  ;;  %8859 = vmatpush3.bf16.msra.mxu0 %v8858_v0  ;;  %v7401_v0 = vld [vmem:[%s11853_s23 + $0xe0] sm:$0xff]  ;;  %v7438_v4 = vld [vmem:[%s11853_s23 + $0x168] sm:$0xff] }
 0x75f   : > { %8860 = vmatprep.subr.bf16.mxu0 %v9796_v34 }
 0x760   : > { %7357 = vmatmul.mubr.msk.f32.vlgmr.msra.gmra.mrb[4].mxu1 %vm1745_vm4, %v3297_v17 }
 0x761   : > { %8808 = vmatpush1.bf16.msra.mxu1 %v8807_v16 }
 0x762   : > { %8809 = vmatprep.subr.bf16.mxu1 %v9796_v34 }
 0x765   : > { %8811 = vmatpush1.bf16.msra.mxu1 %v8810_v22 }
 0x766   : > { %8812 = vmatprep.subr.bf16.mxu1 %v9796_v34 }
 0x769   : > { %8814 = vmatpush1.bf16.msra.mxu1 %v8813_v25 }
 0x76a   : > { %8815 = vmatprep.subr.bf16.mxu1 %v9796_v34 }
 0x76d   : > { %8817 = vmatpush1.bf16.msra.mxu1 %v8816_v32 }
 0x76e   : > { %8818 = vmatprep.subr.bf16.mxu1 %v9796_v34 }
 0x771   : > { %8820 = vmatpush1.bf16.msra.mxu1 %v8819_v37 }
 0x772   : > { %8821 = vmatprep.subr.bf16.mxu1 %v9796_v34 }
 0x775   : > { %8823 = vmatpush1.bf16.msra.mxu1 %v8822_v40 }
 0x776   : > { %8824 = vmatprep.subr.bf16.mxu1 %v9796_v34 }
 0x779   : > { %8826 = vmatpush1.bf16.msra.mxu1 %v8825_v42  ;;  %v8900_v42 = vpack.c.bf16 %v7380_v7, %v7379_v41  ;;  %v7429_v7 = vld [vmem:[%s11853_s23 + $0x120] sm:$0xff] }
 0x77a   : > { %8827 = vmatprep.subr.bf16.mxu1 %v9796_v34 }
 0x77d   : > { %8829 = vmatpush1.bf16.msra.mxu1 %v8828_v46  ;;  %v8903_v46 = vpack.c.bf16 %v7382_v45, %v7381_v44  ;;  %v7366_v45 = vld [vmem:[%s11853_s23 + $0x70] sm:$0xff] }
 0x77e   : > { %8830 = vmatprep.subr.bf16.mxu1 %v9796_v34 }
 0x781   : > { %8832 = vmatpush1.bf16.msra.mxu1 %v8831_v47  ;;  %v8906_v47 = vpack.c.bf16 %v7384_v14, %v7383_v9  ;;  %v7431_v14 = vld [vmem:[%s11853_s23 + $0x130] sm:$0xff] }
 0x782   : > { %8833 = vmatprep.subr.bf16.mxu1 %v9796_v34 }
 0x785   : > { %8835 = vmatpush1.bf16.msra.mxu1 %v8834_v50  ;;  %v8909_v50 = vpack.c.bf16 %v7386_v48, %v7385_v13  ;;  %v7368_v48 = vld [vmem:[%s11853_s23 + $0x80] sm:$0xff] }
 0x786   : > { %8836 = vmatprep.subr.bf16.mxu1 %v9796_v34 }
 0x789   : > { %8838 = vmatpush1.bf16.msra.mxu1 %v8837_v53  ;;  %v8912_v53 = vpack.c.bf16 %v7388_v52, %v7387_v51  ;;  %v7433_v52 = vld [vmem:[%s11853_s23 + $0x140] sm:$0xff] }
 0x78a   : > { %8839 = vmatprep.subr.bf16.mxu1 %v9796_v34 }
 0x78d   : > { %8841 = vmatpush1.bf16.msra.mxu1 %v8840_v56  ;;  %v3604_v56 = vld [vmem:[%s11855_s28 + $0x8] sm:$0xff] }
 0x78e   : > { %8896 = vmatprep.subr.bf16.mxu1 %v9796_v34  ;;  %v8861_v61 = vpack.c.bf16 %v3604_v56, %v3603_v55  ;;  %v7370_v56 = vld [vmem:[%s11853_s23 + $0x90] sm:$0xff] }
 0x833   : > { %v3387_v20 = vpop.f32.mrb[4].mxu1 }
 0x834   : > { %v3388_v15 = vadd.f32 %v3387_v20, %v3311_v12  ;;  %v3389_v16 = vpop.f32.mrb[5].mxu1  ;;  %v8867_v12 = vpack.c.bf16 %v3608_v8, %v3607_v27  ;;  %v3610_v20 = vld [vmem:[%s11855_s28 + $0x38] sm:$0xff] }
 0x835   : > { %v3390_v17 = vadd.f32 %v3389_v16, %v3315_v11  ;;  %v3609_v11 = vld [vmem:[%s11855_s28 + $0x30] sm:$0xff]  ;;  %v7375_v27 = vld [vmem:[%s11853_s23 + $0xb8] sm:$0xff] }
 0x836   : > { %v3396_v18 = vrot.slane %v3388_v15, 7  ;;  %v8933_v15 = vpack.c.bf16 %v7402_v10, %v7401_v0  ;;  %v7403_v16 = vld [vmem:[%s11853_s23 + $0xf0] sm:$0xff]  ;;  %v7440_v0 = vld [vmem:[%s11853_s23 + $0x178] sm:$0xff] }
 0x837   : > { %v3397_v22 = vrot.slane %v3390_v17, 7  ;;  %v7404_v17 = vld [vmem:[%s11853_s23 + $0xf8] sm:$0xff] }
 0x838   : > { %v3400_v23 = vadd.f32 %v3396_v18, %v3392_v19  ;;  %v8870_v18 = vpack.c.bf16 %v3610_v20, %v3609_v11  ;;  %v3611_v19 = vld [vmem:[%s11855_s28 + $0x40] sm:$0xff] }
 0x839   : > { %v3401_v25 = vadd.f32 %v3397_v22, %v3393_v24  ;;  %v3612_v22 = vld [vmem:[%s11855_s28 + $0x48] sm:$0xff]  ;;  %v7405_v24 = vld [vmem:[%s11853_s23 + $0x100] sm:$0xff] }
 0x83a   : > { %3402 = vst [vmem:[#allocation5] sm:$0x1e] %v3400_v23  ;;  %v8936_v23 = vpack.c.bf16 %v7404_v17, %v7403_v16 }
 0x83b   : > { %3403 = vst.msk [vmem:[#allocation5 + $0x8] sm:$0x1e] %vm2160_vm7, %v3401_v25  ;;  %v7406_v25 = vld [vmem:[%s11853_s23 + $0x108] sm:$0xff] }
 0x83c   : > { %v8939_v35 = vpack.c.bf16 %v7406_v25, %v7405_v24 }
 0x841   : > { %v3404_v26 = vld [vmem:[#allocation5] sm:$0x3f] }
 0x842   : > { %v3405_v30 = vld [vmem:[#allocation5 + $0x8] sm:$0x3f]  ;;  %v3406_v32 = vmax.f32 %v3404_v26, 0.0  ;;  %v8873_v26 = vpack.c.bf16 %v3612_v22, %v3611_v19 }
 0x843   : > { %v3407_v37 = vmax.f32 %v3405_v30, 0.0  ;;  %v3613_v30 = vld [vmem:[%s11855_s28 + $0x50] sm:$0xff] }
 0x844   : > { %v3441_v40 = vrot.slane %v3406_v32, 1  ;;  %v3614_v32 = vld [vmem:[%s11855_s28 + $0x58] sm:$0xff] }
 0x845   : > { %v3442_v38 = vrot.slane %v3407_v37, 1  ;;  %v7408_v37 = vld [vmem:[%s11853_s23 + $0x118] sm:$0xff] }
 0x846   : > { %v8942_v41 = vpack.c.bf16 %v7408_v37, %v7407_v36  ;;  %v10963_v37 = vld [vmem:[%s11857_s2] ss:$0 sm:$0xff]  ;;  %s1155_s2 = scalar_lea.vmem %s9991_s4, %s11872_s10  ;;  %s11863_s10 = sld [smem:[#allocation20_spill]] }
 0x847   : > { %7359 = vmatprep.mubr.msk.f32.mxu1 %vm2213_vm8, %v3442_v38  ;;  %v8876_v38 = vpack.c.bf16 %v3614_v32, %v3613_v30 }
 0x848   : > { %3511 = vmatmul.mubr.f32.vlgmr.msra.gmra.mrb[6].mxu1 %v3441_v40  ;;  %v7365_v40 = vld [vmem:[%s11853_s23 + $0x68] sm:$0xff] }
 0x849   : > { %8898 = vmatpush3.bf16.msra.mxu1 %v8897_v39  ;;  %8067 = vmatprep.mubr.msk.f32.mxu1 %vm9797_vm9, %v10850_v54  ;;  %v7364_v39 = vld [vmem:[%s11853_s23 + $0x60] sm:$0xff] }
 0x84a   : > { %8899 = vmatprep.subr.bf16.mxu1 %v9796_v34  ;;  %v8879_v44 = vpack.c.bf16 %v7365_v40, %v7364_v39 }
 0x84d   : > { %8901 = vmatpush3.bf16.msra.mxu1 %v8900_v42  ;;  %v7430_v42 = vld [vmem:[%s11853_s23 + $0x128] sm:$0xff] }
 0x84e   : > { %8902 = vmatprep.subr.bf16.mxu1 %v9796_v34  ;;  %v8969_v9 = vpack.c.bf16 %v7430_v42, %v7429_v7  ;;  %v10970_v7 = vand.u32 127, %v1554_v29  ;;  %v7391_v29 = vld [vmem:[%s11858_s0 + $0x20] sm:$0xff] }
 0x851   : > { %8904 = vmatpush3.bf16.msra.mxu1 %v8903_v46  ;;  %v7367_v46 = vld [vmem:[%s11853_s23 + $0x78] sm:$0xff] }
 0x852   : > { %8905 = vmatprep.subr.bf16.mxu1 %v9796_v34  ;;  %v8882_v13 = vpack.c.bf16 %v7367_v46, %v7366_v45 }
 0x855   : > { %8907 = vmatpush3.bf16.msra.mxu1 %v8906_v47  ;;  %v7432_v47 = vld [vmem:[%s11853_s23 + $0x138] sm:$0xff] }
 0x856   : > { %8908 = vmatprep.subr.bf16.mxu1 %v9796_v34  ;;  %v8972_v51 = vpack.c.bf16 %v7432_v47, %v7431_v14 }
 0x859   : > { %8910 = vmatpush3.bf16.msra.mxu1 %v8909_v50  ;;  %v7369_v50 = vld [vmem:[%s11853_s23 + $0x88] sm:$0xff] }
 0x85a   : > { %8911 = vmatprep.subr.bf16.mxu1 %v9796_v34  ;;  %v8885_v55 = vpack.c.bf16 %v7369_v50, %v7368_v48 }
 0x85d   : > { %8913 = vmatpush3.bf16.msra.mxu1 %v8912_v53  ;;  %v7434_v53 = vld [vmem:[%s11853_s23 + $0x148] sm:$0xff] }
 0x85e   : > { %8926 = vmatprep.subr.bf16.mxu1 %v9796_v34  ;;  %v8975_v58 = vpack.c.bf16 %v7434_v53, %v7433_v52 }
 0x91b   : > { %v3512_v60 = vpop.f32.mrb[6].mxu1 }
 0x91c   : > { %v10862_v28 = vadd.f32 %v7358_v57, %v3512_v60  ;;  %v3514_v62 = vpop.f32.mrb[7].mxu1  ;;  %v7371_v57 = vld [vmem:[%s11853_s23 + $0x98] sm:$0xff] }
 0x91d   : > { %v7436_v60 = vld [vmem:[%s11853_s23 + $0x158] sm:$0xff]  ;;  %v7372_v62 = vld [vmem:[%s11853_s23 + $0xa0] sm:$0xff] }
 0x91e   : > { %7987 = vmatmul.mubr.msk.f32.vlgmr.msra.gmra.mrb[8].mxu0 %vm3529_vm10, %v10862_v28  ;;  %v10870_v3 = vmul.f32 %v10862_v28, %v10862_v28  ;;  %v8978_v1 = vpack.c.bf16 %v7436_v60, %v7435_v59  ;;  %v8891_v5 = vpack.c.bf16 %v7373_v63, %v7372_v62  ;;  %v7393_v62 = vld [vmem:[%s11858_s0 + $0x30] sm:$0xff]  ;;  %v7394_v63 = vld [vmem:[%s11858_s0 + $0x38] sm:$0xff] }
 0x91f   : > { %8862 = vmatpush3.bf16.msra.mxu0 %v8861_v61  ;;  %8013 = vmatprep.mubr.msk.f32.mxu0 %vm9797_vm9, %v10850_v54  ;;  %v8888_v61 = vpack.c.bf16 %v7371_v57, %v7370_v56 }
 0x920   : > { %8068 = vmatmul.mubr.msk.f32.vlgmr.msra.gmra.mrb[8].mxu1 %vm3529_vm10, %v10870_v3  ;;  %8863 = vmatprep.subr.bf16.mxu0 %v9796_v34 }
 0x921   : > { %8928 = vmatpush3.bf16.msra.mxu1 %v8927_v2  ;;  %8116 = vmatprep.mubr.msk.f32.mxu1 %vm9797_vm9, %v10850_v54  ;;  %v7437_v2 = vld [vmem:[%s11853_s23 + $0x160] sm:$0xff] }
 0x922   : > { %8929 = vmatprep.subr.bf16.mxu1 %v9796_v34  ;;  %v8981_v8 = vpack.c.bf16 %v7438_v4, %v7437_v2 }
 0x923   : > { %8865 = vmatpush3.bf16.msra.mxu0 %v8864_v6  ;;  %v7374_v6 = vld [vmem:[%s11853_s23 + $0xb0] sm:$0xff] }
 0x924   : > { %8866 = vmatprep.subr.bf16.mxu0 %v9796_v34  ;;  %v8894_v10 = vpack.c.bf16 %v7375_v27, %v7374_v6 }
 0x925   : > { %8931 = vmatpush3.bf16.msra.mxu1 %v8930_v21  ;;  %v7439_v21 = vld [vmem:[%s11853_s23 + $0x170] sm:$0xff] }
 0x926   : > { %8932 = vmatprep.subr.bf16.mxu1 %v9796_v34 }
 0x927   : > { %8868 = vmatpush3.bf16.msra.mxu0 %v8867_v12  ;;  %v8984_v12 = vpack.c.bf16 %v7440_v0, %v7439_v21  ;;  %v3725_v21 = vld [vmem:[%s11858_s0 + $0x8] sm:$0xff] }
 0x928   : > { %8869 = vmatprep.subr.bf16.mxu0 %v9796_v34 }
 0x929   : > { %8934 = vmatpush3.bf16.msra.mxu1 %v8933_v15 }
 0x92a   : > { %8935 = vmatprep.subr.bf16.mxu1 %v9796_v34 }
 0x92b   : > { %8871 = vmatpush3.bf16.msra.mxu0 %v8870_v18 }
 0x92c   : > { %8872 = vmatprep.subr.bf16.mxu0 %v9796_v34 }
 0x92d   : > { %8937 = vmatpush3.bf16.msra.mxu1 %v8936_v23 }
 0x92e   : > { %8938 = vmatprep.subr.bf16.mxu1 %v9796_v34 }
 0x92f   : > { %8874 = vmatpush3.bf16.msra.mxu0 %v8873_v26 }
 0x930   : > { %8875 = vmatprep.subr.bf16.mxu0 %v9796_v34 }
 0x931   : > { %8940 = vmatpush3.bf16.msra.mxu1 %v8939_v35 }
 0x932   : > { %8941 = vmatprep.subr.bf16.mxu1 %v9796_v34 }
 0x933   : > { %8877 = vmatpush3.bf16.msra.mxu0 %v8876_v38 }
 0x934   : > { %8878 = vmatprep.subr.bf16.mxu0 %v9796_v34 }
 0x935   : > { %8943 = vmatpush3.bf16.msra.mxu1 %v8942_v41 }
 0x936   : > { %8014 = vmatmul.mubr.msk.f32.vlgmr.msra.gmra.mrb[10].mxu0 %vm3529_vm10, %v10870_v3  ;;  %8968 = vmatprep.subr.bf16.mxu1 %v9796_v34 }
 0x937   : > { %8880 = vmatpush3.bf16.msra.mxu0 %v8879_v44  ;;  %8040 = vmatprep.mubr.msk.f32.mxu0 %vm9797_vm9, %v10850_v54 }
 0x938   : > { %8117 = vmatmul.mubr.msk.f32.vlgmr.msra.gmra.mrb[10].mxu1 %vm3529_vm10, %v10862_v28  ;;  %8881 = vmatprep.subr.bf16.mxu0 %v9796_v34 }
 0x939   : > { %8970 = vmatpush3.bf16.msra.mxu1 %v8969_v9  ;;  %8181 = vmatprep.mubr.msk.f32.mxu1 %vm9797_vm9, %v10850_v54 }
 0x93a   : > { %8971 = vmatprep.subr.bf16.mxu1 %v9796_v34 }
 0x93b   : > { %8883 = vmatpush3.bf16.msra.mxu0 %v8882_v13 }
 0x93c   : > { %8884 = vmatprep.subr.bf16.mxu0 %v9796_v34 }
 0x93d   : > { %8973 = vmatpush3.bf16.msra.mxu1 %v8972_v51  ;;  %v7392_v51 = vld [vmem:[%s11858_s0 + $0x28] sm:$0xff] }
 0x93e   : > { %8974 = vmatprep.subr.bf16.mxu1 %v9796_v34  ;;  %v8915_v52 = vpack.c.bf16 %v7392_v51, %v7391_v29 }
 0x93f   : > { %8886 = vmatpush3.bf16.msra.mxu0 %v8885_v55 }
 0x940   : > { %8887 = vmatprep.subr.bf16.mxu0 %v9796_v34 }
 0x941   : > { %8976 = vmatpush3.bf16.msra.mxu1 %v8975_v58 }
 0x942   : > { %8977 = vmatprep.subr.bf16.mxu1 %v9796_v34 }
 0x943   : > { %8889 = vmatpush3.bf16.msra.mxu0 %v8888_v61 }
 0x944   : > { %8890 = vmatprep.subr.bf16.mxu0 %v9796_v34 }
 0x945   : > { %8979 = vmatpush3.bf16.msra.mxu1 %v8978_v1  ;;  %v8918_v1 = vpack.c.bf16 %v7394_v63, %v7393_v62 }
 0x946   : > { %8980 = vmatprep.subr.bf16.mxu1 %v9796_v34 }
 0x947   : > { %8892 = vmatpush3.bf16.msra.mxu0 %v8891_v5 }
 0x948   : > { %8893 = vmatprep.subr.bf16.mxu0 %v9796_v34 }
 0x949   : > { %8982 = vmatpush3.bf16.msra.mxu1 %v8981_v8  ;;  %v3724_v8 = vld [vmem:[%s11858_s0] sm:$0xff] }
 0x94a   : > { %8983 = vmatprep.subr.bf16.mxu1 %v9796_v34 }
 0x94b   : > { %8895 = vmatpush3.bf16.msra.mxu0 %v8894_v10 }
 0x94c   : > { %8914 = vmatprep.subr.bf16.mxu0 %v9796_v34 }
 0x94d   : > { %8985 = vmatpush3.bf16.msra.mxu1 %v8984_v12  ;;  %v8921_v12 = vpack.c.bf16 %v3725_v21, %v3724_v8 }
 0x94e   : > { %8041 = vmatmul.mubr.msk.f32.vlgmr.msra.gmra.mrb[12].mxu0 %vm3529_vm10, %v10862_v28 }
 0x94f   : > { %8078 = vmatprep.mubr.msk.f32.mxu0 %vm9797_vm9, %v10850_v54  ;;  %8916 = vmatpush3.bf16.msra.mxu0 %v8915_v52 }
 0x950   : > { %8182 = vmatmul.mubr.msk.f32.vlgmr.msra.gmra.mrb[12].mxu1 %vm3529_vm10, %v10862_v28  ;;  %8917 = vmatprep.subr.bf16.mxu0 %v9796_v34 }
 0x951   : > { %4726 = vmatprep.mubr.f32.mxu1 %v10850_v54 }
 0x953   : > { %8919 = vmatpush3.bf16.msra.mxu0 %v8918_v1 }
 0x954   : > { %8920 = vmatprep.subr.bf16.mxu0 %v9796_v34 }
 0x9f1   : > { %v3599_v11 = vpop.f32.mrb[8].mxu0 }
 0x9f2   : > { %v7988_v20 = vpop.f32.mrb[9].mxu0  ;;  %v3688_v17 = vmul.f32 2.0, %v3599_v11 }
 0x9f3   : > { %v3890_v15 = vpop.f32.mrb[8].mxu1 }
 0x9f4   : > { %v8069_v16 = vpop.f32.mrb[9].mxu1 }
 0x9f5   : > { %v3727_v16 = vld [vmem:[%s11858_s0 + $0x18] sm:$0xff] }
 0xa09   : > { %v3684_v18 = vpop.f32.mrb[10].mxu0 }
 0xa0a   : > { %v3689_v19 = vsub.f32 %v3684_v18, %v3688_v17  ;;  %v8015_v22 = vpop.f32.mrb[11].mxu0 }
 0xa0b   : > { %v10958_v23 = vpop.f32.mrb[10].mxu1  ;;  %v7410_v22 = vld [vmem:[%s11855_s28 + $0xc0] sm:$0xff] }
 0xa0c   : > { %v8118_v24 = vpop.f32.mrb[11].mxu1  ;;  %v3697_v40 = vadd.f32 %v10963_v37, %v3689_v19 }
 0xa0d   : > { %v7411_v24 = vld [vmem:[%s11855_s28 + $0xc8] sm:$0xff] }
 0xa0e   : > { %v3699_v41 = vsel %vm3698_vm11, %v3697_v40, inf }
 0xa21   : > { %v3807_v25 = vpop.f32.mrb[12].mxu0 }
 0xa22   : > { %v3894_v26 = vmul.f32 2.0, %v3807_v25  ;;  %v8042_v30 = vpop.f32.mrb[13].mxu0  ;;  %v8945_v25 = vpack.c.bf16 %v7411_v24, %v7410_v22  ;;  %v7447_v22 = vld [vmem:[%s11855_s28 + $0x148] sm:$0xff] }
 0xa23   : > { %v10960_v32 = vpop.f32.mrb[12].mxu1  ;;  %v7413_v30 = vld [vmem:[%s11855_s28 + $0xd8] sm:$0xff] }
 0xa24   : > { %v3895_v35 = vsub.f32 %v3890_v15, %v3894_v26  ;;  %v8183_v36 = vpop.f32.mrb[13].mxu1  ;;  %v3726_v15 = vld [vmem:[%s11858_s0 + $0x10] sm:$0xff] }
 0xa25   : > { %v8924_v19 = vpack.c.bf16 %v3727_v16, %v3726_v15  ;;  %v7412_v26 = vld [vmem:[%s11855_s28 + $0xd0] sm:$0xff]  ;;  %v7445_v16 = vld [vmem:[%s11855_s28 + $0x138] sm:$0xff] }
 0xa26   : > { %v3896_v38 = vadd.f32 %v10963_v37, %v3895_v35  ;;  %v8948_v36 = vpack.c.bf16 %v7413_v30, %v7412_v26  ;;  %v7444_v15 = vld [vmem:[%s11855_s28 + $0x130] sm:$0xff]  ;;  %v7449_v26 = vld [vmem:[%s11855_s28 + $0x158] sm:$0xff] }
 0xa28   : > { %v3897_v39 = vsel %vm3698_vm11, %v3896_v38, inf }
 0xa29   : > { %3898 = vmin.xlane.f32.xlu0 %v3897_v39  ;;  %v7415_v39 = vld [vmem:[%s11855_s28 + $0xe8] sm:$0xff] }
 0xa2d   : > { %3700 = vmin.xlane.f32.xlu0 %v3699_v41  ;;  %v7416_v41 = vld [vmem:[%s11855_s28 + $0xf0] sm:$0xff] }
 0xab6   : > { %v3899_v42 = vpop.xlane.xlu0 %3898 }
 0xab7   : > { %vm3900_vm12 = vcmp.le.f32.partialorder %v3896_v38, %v3899_v42  ;;  %v7414_v38 = vld [vmem:[%s11855_s28 + $0xe0] sm:$0xff]  ;;  %v7417_v42 = vld [vmem:[%s11855_s28 + $0xf8] sm:$0xff] }
 0xab8   : > { %v3901_v44 = vsel %vm3900_vm12, %v10970_v7, 32 }
 0xab9   : > { %v3902_v45 = vsel %vm3698_vm11, %v3901_v44, 2147483647  ;;  %v8954_v44 = vpack.c.bf16 %v7417_v42, %v7416_v41  ;;  %v4508_v42 = vmul.f32 2.0, %v10960_v32  ;;  %v7456_v32 = vld [vmem:[%s11858_s0 + $0x60] sm:$0xff] }
 0xaba   : > { %v3701_v46 = vpop.xlane.xlu0 %3700  ;;  %v3904_v9 = vshra.s32 %v3902_v45, 16  ;;  %v3903_v53 = vand.u32 65535, %v3902_v45  ;;  %v7418_v45 = vld [vmem:[%s11855_s28 + $0x100] sm:$0xff] }
 0xabb   : > { %vm3704_vm13 = vcmp.le.f32.partialorder %v3697_v40, %v3701_v46  ;;  %v8951_v40 = vpack.c.bf16 %v7415_v39, %v7414_v38  ;;  %v7419_v46 = vld [vmem:[%s11855_s28 + $0x108] sm:$0xff]  ;;  %v7452_v39 = vld [vmem:[%s11855_s28 + $0x170] sm:$0xff] }
 0xabc   : > { %v3705_v14 = vsel %vm3704_vm13, %v10970_v7, 32  ;;  %v3906_v47 = vcvt.s32.f32 %v3904_v9  ;;  %v3905_v56 = vcvt.s32.f32 %v3903_v53  ;;  %v8957_v9 = vpack.c.bf16 %v7419_v46, %v7418_v45 }
 0xabd   : > { %v3706_v13 = vsel %vm3698_vm11, %v3705_v14, 2147483647  ;;  %v7420_v14 = vld [vmem:[%s11855_s28 + $0x110] sm:$0xff] }
 0xabe   : > { %3907 = vmin.xlane.f32.xlu1 %v3906_v47  ;;  %v3708_v48 = vshra.s32 %v3706_v13, 16  ;;  %v3707_v57 = vand.u32 65535, %v3706_v13 }
 0xac0   : > { %v3710_v50 = vcvt.s32.f32 %v3708_v48  ;;  %v3709_v60 = vcvt.s32.f32 %v3707_v57  ;;  %v4237_v48 = vmul.f32 2.0, %v10958_v23  ;;  %v7424_v23 = vld [vmem:[%s11858_s0 + $0x40] sm:$0xff] }
 0xac2   : > { %3711 = vmin.xlane.f32.xlu1 %v3710_v50 }
 0xb4b   : > { %v3908_v55 = vpop.xlane.xlu1 %3907 }
 0xb4c   : > { %vm3909_vm14 = vcmp.eq.f32.partialorder %v3906_v47, %v3908_v55  ;;  %v3914_v2 = vcvt.f32.s32 %v3908_v55  ;;  %v7421_v47 = vld [vmem:[%s11855_s28 + $0x118] sm:$0xff] }
 0xb4d   : > { %v3910_v58 = vsel %vm3909_vm14, %v3905_v56, inf  ;;  %v8960_v13 = vpack.c.bf16 %v7421_v47, %v7420_v14 }
 0xb4e   : > { %3911 = vmin.xlane.f32.xlu0 %v3910_v58  ;;  %v3915_v5 = vshll.u32 %v3914_v2, 16 }
 0xb4f   : > { %v3712_v59 = vpop.xlane.xlu1 %3711 }
 0xb50   : > { %vm3713_vm15 = vcmp.eq.f32.partialorder %v3710_v50, %v3712_v59  ;;  %v3718_v6 = vcvt.f32.s32 %v3712_v59 }
 0xb51   : > { %v3714_v61 = vsel %vm3713_vm15, %v3709_v60, inf  ;;  %v7425_v60 = vld [vmem:[%s11858_s0 + $0x48] sm:$0xff]  ;;  %vm4630_vm15 = vcmask 783360  }
 0xb52   : > { %3715 = vmin.xlane.f32.xlu1 %v3714_v61  ;;  %v3719_v11 = vshll.u32 %v3718_v6, 16  ;;  %v8963_v61 = vpack.c.bf16 %v7425_v60, %v7424_v23  ;;  %v4638_v23 = vld [vmem:[%s11859_s15 + $0x18] sm:$0xff]  ;;  %v4635_v60 = vld [vmem:[%s11859_s15] sm:$0xff]  ;;  %4631 = vst.msk [vmem:[#allocation6] sm:$0x3f] %vm4630_vm15, %v10850_v54 }
 0xbdb   : > { %v3912_v4 = vpop.xlane.xlu0 %3911 }
 0xbdc   : > { %v3913_v27 = vcvt.f32.s32 %v3912_v4  ;;  %v7426_v4 = vld [vmem:[%s11858_s0 + $0x50] sm:$0xff] }
 0xbde   : > { %v3916_v0 = vadd.s32 %v3915_v5, %v3913_v27  ;;  %v7427_v5 = vld [vmem:[%s11858_s0 + $0x58] sm:$0xff] }
 0xbdf   : > { %v3716_v10 = vpop.xlane.xlu1 %3715  ;;  %v8966_v6 = vpack.c.bf16 %v7427_v5, %v7426_v4  ;;  %v4639_v5 = vld [vmem:[%s11859_s15 + $0x20] sm:$0xff] }
 0xbe0   : > { %vm3917_vm1 = vcmp.eq.s32.totalorder %v10970_v7, %v3916_v0  ;;  %v3717_v20 = vcvt.f32.s32 %v3716_v10  ;;  %v7442_v10 = vld [vmem:[%s11855_s28 + $0x120] sm:$0xff] }
 0xbe1   : > { %v7390_v17 = vsel %vm3917_vm1, 1.0, %v10850_v54  ;;  %vm4615_vm1 = vcmask 781312  }
 0xbe2   : > { %v3720_v18 = vadd.s32 %v3719_v11, %v3717_v20  ;;  %8079 = vmatmul.mubr.msk.f32.vlgmr.msra.gmra.mrb[14].mxu0 %vm1745_vm4, %v7390_v17 }
 0xbe3   : > { %8922 = vmatpush3.bf16.msra.mxu0 %v8921_v12  ;;  %8089 = vmatprep.mubr.msk.f32.mxu0 %vm9797_vm9, %v10850_v54  ;;  %v7443_v12 = vld [vmem:[%s11855_s28 + $0x128] sm:$0xff] }
 0xbe4   : > { %8923 = vmatprep.subr.bf16.mxu0 %v9796_v34  ;;  %vm3721_vm3 = vcmp.eq.s32.totalorder %v10970_v7, %v3720_v18  ;;  %v8987_v20 = vpack.c.bf16 %v7443_v12, %v7442_v10  ;;  %v8990_v18 = vpack.c.bf16 %v7445_v16, %v7444_v15  ;;  %v4643_v10 = vld [vmem:[%s11859_s15 + $0x40] sm:$0xff]  ;;  %v4645_v12 = vld [vmem:[%s11859_s15 + $0x50] sm:$0xff] }
 0xbe5   : > { %v7363_v35 = vsel %vm3721_vm3, 1.0, %v10850_v54  ;;  %v9020_v15 = vpack.c.bf16 %v4645_v12, %v4643_v10 }
 0xbe7   : > { %8925 = vmatpush3.bf16.msra.mxu0 %v8924_v19  ;;  %v7446_v19 = vld [vmem:[%s11855_s28 + $0x140] sm:$0xff] }
 0xbe8   : > { %8944 = vmatprep.subr.bf16.mxu0 %v9796_v34  ;;  %v8993_v24 = vpack.c.bf16 %v7447_v22, %v7446_v19 }
 0xbea   : > { %8090 = vmatmul.mubr.msk.f32.vlgmr.msra.gmra.mrb[14].mxu0 %vm1745_vm4, %v7363_v35  ;;  %v7450_v35 = vld [vmem:[%s11855_s28 + $0x160] sm:$0xff] }
 0xbeb   : > { %8946 = vmatpush3.bf16.msra.mxu0 %v8945_v25  ;;  %8143 = vmatprep.mubr.msk.f32.mxu0 %vm9797_vm9, %v10850_v54  ;;  %v7448_v25 = vld [vmem:[%s11855_s28 + $0x150] sm:$0xff] }
 0xbec   : > { %8947 = vmatprep.subr.bf16.mxu0 %v9796_v34  ;;  %v8996_v30 = vpack.c.bf16 %v7449_v26, %v7448_v25 }
 0xbef   : > { %8949 = vmatpush3.bf16.msra.mxu0 %v8948_v36  ;;  %v7451_v36 = vld [vmem:[%s11855_s28 + $0x168] sm:$0xff] }
 0xbf0   : > { %8950 = vmatprep.subr.bf16.mxu0 %v9796_v34  ;;  %v8999_v38 = vpack.c.bf16 %v7451_v36, %v7450_v35  ;;  %v4652_v36 = vld [vmem:[%s11859_s15 + $0x88] sm:$0xff] }
 0xbf3   : > { %8952 = vmatpush3.bf16.msra.mxu0 %v8951_v40  ;;  %v7453_v40 = vld [vmem:[%s11855_s28 + $0x178] sm:$0xff] }
 0xbf4   : > { %8953 = vmatprep.subr.bf16.mxu0 %v9796_v34  ;;  %v9002_v41 = vpack.c.bf16 %v7453_v40, %v7452_v39  ;;  %v4651_v40 = vld [vmem:[%s11859_s15 + $0x80] sm:$0xff] }
 0xbf7   : > { %8955 = vmatpush3.bf16.msra.mxu0 %v8954_v44 }
 0xbf8   : > { %8956 = vmatprep.subr.bf16.mxu0 %v9796_v34 }
 0xbfb   : > { %8958 = vmatpush3.bf16.msra.mxu0 %v8957_v9 }
 0xbfc   : > { %8959 = vmatprep.subr.bf16.mxu0 %v9796_v34 }
 0xbff   : > { %8961 = vmatpush3.bf16.msra.mxu0 %v8960_v13 }
 0xc00   : > { %8962 = vmatprep.subr.bf16.mxu0 %v9796_v34 }
 0xc02   : > { %8144 = vmatmul.mubr.msk.f32.vlgmr.msra.gmra.mrb[16].mxu0 %vm3529_vm10, %v10870_v3 }
 0xc03   : > { %8154 = vmatprep.mubr.msk.f32.mxu0 %vm9797_vm9, %v10850_v54  ;;  %8964 = vmatpush3.bf16.msra.mxu0 %v8963_v61 }
 0xc04   : > { %8965 = vmatprep.subr.bf16.mxu0 %v9796_v34 }
 0xc07   : > { %8967 = vmatpush3.bf16.msra.mxu0 %v8966_v6  ;;  %v4641_v6 = vld [vmem:[%s11859_s15 + $0x30] sm:$0xff] }
 0xc08   : > { %8986 = vmatprep.subr.bf16.mxu0 %v9796_v34 }
 0xcd5   : > { %v4233_v50 = vpop.f32.mrb[16].mxu0 }
 0xcd6   : > { %v4238_v29 = vsub.f32 %v4233_v50, %v4237_v48  ;;  %v8145_v51 = vpop.f32.mrb[17].mxu0 }
 0xcd8   : > { %v4239_v52 = vadd.f32 %v10963_v37, %v4238_v29  ;;  %v7457_v29 = vld [vmem:[%s11858_s0 + $0x68] sm:$0xff] }
 0xcd9   : > { %v9005_v51 = vpack.c.bf16 %v7457_v29, %v7456_v32 }
 0xcda   : > { %v4240_v53 = vsel %vm3698_vm11, %v4239_v52, inf }
 0xcdb   : > { %4241 = vmin.xlane.f32.xlu0 %v4240_v53 }
 0xd68   : > { %v4242_v55 = vpop.xlane.xlu0 %4241 }
 0xd69   : > { %vm4243_vm6 = vcmp.le.f32.partialorder %v4239_v52, %v4242_v55 }
 0xd6a   : > { %v4244_v56 = vsel %vm4243_vm6, %v10970_v7, 32 }
 0xd6b   : > { %v4245_v57 = vsel %vm3698_vm11, %v4244_v56, 2147483647  ;;  %v7458_v56 = vld [vmem:[%s11858_s0 + $0x70] sm:$0xff] }
 0xd6c   : > { %v4247_v58 = vshra.s32 %v4245_v57, 16  ;;  %v4246_v62 = vand.u32 65535, %v4245_v57  ;;  %v7459_v57 = vld [vmem:[%s11858_s0 + $0x78] sm:$0xff]  ;;  %s1152_s0 = scalar_lea.vmem %s9986_s27, %s10034_s11 }
 0xd6e   : > { %v4249_v59 = vcvt.s32.f32 %v4247_v58  ;;  %v4248_v1 = vcvt.s32.f32 %v4246_v62  ;;  %v9008_v58 = vpack.c.bf16 %v7459_v57, %v7458_v56  ;;  %v4637_v62 = vld [vmem:[%s11859_s15 + $0x10] sm:$0xff] }
 0xd70   : > { %4250 = vmin.xlane.f32.xlu1 %v4249_v59 }
 0xdfd   : > { %v4251_v63 = vpop.xlane.xlu1 %4250 }
 0xdfe   : > { %vm4252_vm12 = vcmp.eq.f32.partialorder %v4249_v59, %v4251_v63  ;;  %v4257_v27 = vcvt.f32.s32 %v4251_v63  ;;  %v4636_v59 = vld [vmem:[%s11859_s15 + $0x8] sm:$0xff] }
 0xdff   : > { %v4253_v2 = vsel %vm4252_vm12, %v4248_v1, inf  ;;  %v9010_v61 = vpack.c.bf16 %v4638_v23, %v4636_v59  ;;  %v4640_v63 = vld [vmem:[%s11859_s15 + $0x28] sm:$0xff]  ;;  %v4642_v1 = vld [vmem:[%s11859_s15 + $0x38] sm:$0xff]  ;;  %v7468_v59 = vld [vmem:[%s11859_s15 + $0xf0] sm:$0xff] }
 0xe00   : > { %4254 = vmin.xlane.f32.xlu0 %v4253_v2  ;;  %v4258_v21 = vshll.u32 %v4257_v27, 16  ;;  %v9012_v2 = vpack.c.bf16 %v4637_v62, %v4635_v60  ;;  %v9014_v4 = vpack.c.bf16 %v4642_v1, %v4640_v63  ;;  %v4644_v27 = vld [vmem:[%s11859_s15 + $0x48] sm:$0xff]  ;;  %v7473_v60 = vld [vmem:[%s11859_s15 + $0x118] sm:$0xff]  ;;  %v7470_v63 = vld [vmem:[%s11859_s15 + $0x100] sm:$0xff] }
 0xe01   : > { %9011 = vmatprep.subr.bf16.mxu1 %v9010_v61  ;;  %v7472_v1 = vld [vmem:[%s11859_s15 + $0x110] sm:$0xff] }
 0xe02   : > { %9013 = vmatpush1.bf16.msra.mxu1 %v9012_v2  ;;  %v7475_v2 = vld [vmem:[%s11859_s15 + $0x128] sm:$0xff] }
 0xe03   : > { %9015 = vmatprep.subr.bf16.mxu1 %v9014_v4  ;;  %v7477_v4 = vld [vmem:[%s11859_s15 + $0x138] sm:$0xff] }
 0xe8d   : > { %v4255_v8 = vpop.xlane.xlu0 %4254 }
 0xe8e   : > { %v4256_v0 = vcvt.f32.s32 %v4255_v8  ;;  %v4646_v8 = vld [vmem:[%s11859_s15 + $0x58] sm:$0xff] }
 0xe90   : > { %v4259_v11 = vadd.s32 %v4258_v21, %v4256_v0  ;;  %v9016_v21 = vpack.c.bf16 %v4641_v6, %v4639_v5  ;;  %v9018_v0 = vpack.c.bf16 %v4646_v8, %v4644_v27  ;;  %v9044_v5 = vpack.c.bf16 %v7472_v1, %v7470_v63  ;;  %v7474_v27 = vld [vmem:[%s11859_s15 + $0x120] sm:$0xff]  ;;  %v7476_v8 = vld [vmem:[%s11859_s15 + $0x130] sm:$0xff]  ;;  %v11156_v1 = vld [vmem:[#allocation8] sm:$0xff] }
 0xe91   : > { %v9046_v6 = vpack.c.bf16 %v7477_v4, %v7475_v2  ;;  %v9048_v10 = vpack.c.bf16 %v7476_v8, %v7474_v27  ;;  %v4963_v2 = vld [vmem:[%s11860_s16] sm:$0xff]  ;;  %v4964_v4 = vld [vmem:[%s11860_s16 + $0x8] sm:$0xff]  ;;  %v4966_v27 = vld [vmem:[%s11860_s16 + $0x18] sm:$0xff] }
 0xe92   : > { %vm4260_vm13 = vcmp.eq.s32.totalorder %v10970_v7, %v4259_v11  ;;  %v4648_v11 = vld [vmem:[%s11859_s15 + $0x68] sm:$0xff]  ;;  %9017 = vmatpush1.bf16.msra.mxu1 %v9016_v21 }
 0xe93   : > { %v7423_v17 = vsel %vm4260_vm13, 1.0, %v10850_v54  ;;  %9019 = vmatprep.subr.bf16.mxu1 %v9018_v0  ;;  %v7479_v21 = vld [vmem:[%s11859_s15 + $0x148] sm:$0xff]  ;;  %v7481_v0 = vld [vmem:[%s11859_s15 + $0x158] sm:$0xff] }
 0xe94   : > { %8155 = vmatmul.mubr.msk.f32.vlgmr.msra.gmra.mrb[14].mxu0 %vm1745_vm4, %v7423_v17  ;;  %v4647_v17 = vld [vmem:[%s11859_s15 + $0x60] sm:$0xff]  ;;  %v9050_v12 = vpack.c.bf16 %v7481_v0, %v7479_v21  ;;  %v4968_v21 = vld [vmem:[%s11860_s16 + $0x28] sm:$0xff] }
 0xe95   : > { %8988 = vmatpush3.bf16.msra.mxu0 %v8987_v20  ;;  %8208 = vmatprep.mubr.msk.f32.mxu0 %vm9797_vm9, %v10850_v54  ;;  %v4650_v20 = vld [vmem:[%s11859_s15 + $0x78] sm:$0xff] }
 0xe96   : > { %8989 = vmatprep.subr.bf16.mxu0 %v9796_v34  ;;  %v9022_v16 = vpack.c.bf16 %v4650_v20, %v4648_v11  ;;  %9021 = vmatpush1.bf16.msra.mxu1 %v9020_v15  ;;  %v7478_v11 = vld [vmem:[%s11859_s15 + $0x140] sm:$0xff]  ;;  %v7480_v20 = vld [vmem:[%s11859_s15 + $0x150] sm:$0xff]  ;;  %v7483_v15 = vld [vmem:[%s11859_s15 + $0x168] sm:$0xff] }
 0xe98   : > { %9023 = vmatprep.subr.bf16.mxu1 %v9022_v16  ;;  %v7485_v16 = vld [vmem:[%s11859_s15 + $0x178] sm:$0xff] }
 0xe99   : > { %8991 = vmatpush3.bf16.msra.mxu0 %v8990_v18  ;;  %v4649_v18 = vld [vmem:[%s11859_s15 + $0x70] sm:$0xff] }
 0xe9a   : > { %8992 = vmatprep.subr.bf16.mxu0 %v9796_v34  ;;  %v9024_v19 = vpack.c.bf16 %v4649_v18, %v4647_v17  ;;  %v9052_v17 = vpack.c.bf16 %v7480_v20, %v7478_v11  ;;  %v9054_v18 = vpack.c.bf16 %v7485_v16, %v7483_v15  ;;  %v4971_v20 = vld [vmem:[%s11860_s16 + $0x40] sm:$0xff]  ;;  %v4972_v15 = vld [vmem:[%s11860_s16 + $0x48] sm:$0xff] }
 0xe9b   : > { %v9095_v16 = vpack.c.bf16 %v4972_v15, %v4971_v20  ;;  %v7518_v15 = vld [vmem:[%s11860_s16 + $0xe0] sm:$0xff] }
 0xe9c   : > { %9025 = vmatpush1.bf16.msra.mxu1 %v9024_v19  ;;  %v7482_v19 = vld [vmem:[%s11859_s15 + $0x160] sm:$0xff] }
 0xe9d   : > { %8994 = vmatpush3.bf16.msra.mxu0 %v8993_v24 }
 0xe9e   : > { %8995 = vmatprep.subr.bf16.mxu0 %v9796_v34 }
 0xea1   : > { %8997 = vmatpush3.bf16.msra.mxu0 %v8996_v30 }
 0xea2   : > { %8998 = vmatprep.subr.bf16.mxu0 %v9796_v34 }
 0xea5   : > { %9000 = vmatpush3.bf16.msra.mxu0 %v8999_v38  ;;  %v4654_v38 = vld [vmem:[%s11859_s15 + $0x98] sm:$0xff] }
 0xea6   : > { %9001 = vmatprep.subr.bf16.mxu0 %v9796_v34  ;;  %v9026_v39 = vpack.c.bf16 %v4654_v38, %v4652_v36  ;;  %v7489_v36 = vld [vmem:[%s11859_s15 + $0x190] sm:$0xff]  ;;  %v7492_v38 = vld [vmem:[%s11859_s15 + $0x1a8] sm:$0xff] }
 0xea8   : > { %9027 = vmatprep.subr.bf16.mxu1 %v9026_v39  ;;  %v7494_v39 = vld [vmem:[%s11859_s15 + $0x1b8] sm:$0xff] }
 0xea9   : > { %9003 = vmatpush3.bf16.msra.mxu0 %v9002_v41  ;;  %v4653_v41 = vld [vmem:[%s11859_s15 + $0x90] sm:$0xff] }
 0xeaa   : > { %9004 = vmatprep.subr.bf16.mxu0 %v9796_v34 }
 0xeac   : > { %8209 = vmatmul.mubr.msk.f32.vlgmr.msra.gmra.mrb[18].mxu0 %vm3529_vm10, %v10870_v3 }
 0xead   : > { %8219 = vmatprep.mubr.msk.f32.mxu0 %vm9797_vm9, %v10850_v54  ;;  %9006 = vmatpush3.bf16.msra.mxu0 %v9005_v51  ;;  %v7462_v51 = vld [vmem:[%s11859_s15 + $0xc0] sm:$0xff] }
 0xeae   : > { %9007 = vmatprep.subr.bf16.mxu0 %v9796_v34 }
 0xeb1   : > { %9009 = vmatpush3.bf16.msra.mxu0 %v9008_v58  ;;  %v7466_v58 = vld [vmem:[%s11859_s15 + $0xe0] sm:$0xff] }
 0xeb2   : > { %9082 = vmatprep.subr.bf16.mxu0 %v9796_v34  ;;  %v9040_v61 = vpack.c.bf16 %v7468_v59, %v7466_v58  ;;  %v7510_v58 = vld [vmem:[%s11859_s15 + $0x238] sm:$0xff] }
 0xf7f   : > { %v4504_v44 = vpop.f32.mrb[18].mxu0 }
 0xf80   : > { %v4509_v45 = vsub.f32 %v4504_v44, %v4508_v42  ;;  %v8210_v46 = vpop.f32.mrb[19].mxu0  ;;  %v9028_v42 = vpack.c.bf16 %v4653_v41, %v4651_v40  ;;  %v4658_v44 = vld [vmem:[%s11859_s15 + $0xb8] sm:$0xff] }
 0xf81   : > { %v4655_v46 = vld [vmem:[%s11859_s15 + $0xa0] sm:$0xff] }
 0xf82   : > { %v4510_v9 = vadd.f32 %v10963_v37, %v4509_v45  ;;  %9029 = vmatpush1.bf16.msra.mxu1 %v9028_v42  ;;  %v9062_v42 = vpack.c.bf16 %v7494_v39, %v7492_v38  ;;  %v4980_v38 = vld [vmem:[%s11860_s16 + $0x88] sm:$0xff] }
 0xf84   : > { %v4511_v14 = vsel %vm3698_vm11, %v4510_v9, inf }
 0xf85   : > { %4512 = vmin.xlane.f32.xlu1 %v4511_v14 }
0x1012   : > { %v4513_v47 = vpop.xlane.xlu1 %4512 }
0x1013   : > { %vm4514_vm14 = vcmp.le.f32.partialorder %v4510_v9, %v4513_v47  ;;  %v4657_v9 = vld [vmem:[%s11859_s15 + $0xb0] sm:$0xff]  ;;  %v7463_v47 = vld [vmem:[%s11859_s15 + $0xc8] sm:$0xff] }
0x1014   : > { %v4515_v13 = vsel %vm4514_vm14, %v10970_v7, 32  ;;  %v9032_v14 = vpack.c.bf16 %v4657_v9, %v4655_v46  ;;  %v7498_v46 = vld [vmem:[%s11859_s15 + $0x1d8] sm:$0xff] }
0x1015   : > { %v4516_v3 = vsel %vm3698_vm11, %v4515_v13, 2147483647  ;;  %v7465_v13 = vld [vmem:[%s11859_s15 + $0xd8] sm:$0xff] }
0x1016   : > { %v4518_v48 = vshra.s32 %v4516_v3, 16  ;;  %v4517_v37 = vand.u32 65535, %v4516_v3  ;;  %v9034_v3 = vpack.c.bf16 %v7465_v13, %v7463_v47  ;;  %v7495_v47 = vld [vmem:[%s11859_s15 + $0x1c0] sm:$0xff]  ;;  %v7497_v13 = vld [vmem:[%s11859_s15 + $0x1d0] sm:$0xff] }
0x1018   : > { %v4520_v50 = vcvt.s32.f32 %v4518_v48  ;;  %v4519_v53 = vcvt.s32.f32 %v4517_v37  ;;  %v7464_v37 = vld [vmem:[%s11859_s15 + $0xd0] sm:$0xff] }
0x1019   : > { %v9036_v56 = vpack.c.bf16 %v7464_v37, %v7462_v51  ;;  %v7501_v51 = vld [vmem:[%s11859_s15 + $0x1f0] sm:$0xff]  ;;  %v7504_v37 = vld [vmem:[%s11859_s15 + $0x208] sm:$0xff] }
0x101a   : > { %4521 = vmin.xlane.f32.xlu0 %v4520_v50 }
0x10a7   : > { %v4522_v52 = vpop.xlane.xlu0 %4521 }
0x10a8   : > { %vm4523_vm9 = vcmp.eq.f32.partialorder %v4520_v50, %v4522_v52  ;;  %v4528_v22 = vcvt.f32.s32 %v4522_v52  ;;  %v7467_v52 = vld [vmem:[%s11859_s15 + $0xe8] sm:$0xff] }
0x10a9   : > { %v4524_v55 = vsel %vm4523_vm9, %v4519_v53, inf  ;;  %v7469_v53 = vld [vmem:[%s11859_s15 + $0xf8] sm:$0xff] }
0x10aa   : > { %4525 = vmin.xlane.f32.xlu1 %v4524_v55  ;;  %v4529_v25 = vshll.u32 %v4528_v22, 16  ;;  %v9038_v57 = vpack.c.bf16 %v7469_v53, %v7467_v52  ;;  %v7484_v22 = vld [vmem:[%s11859_s15 + $0x170] sm:$0xff] }
0x1137   : > { %v4526_v24 = vpop.xlane.xlu1 %4525 }
0x1138   : > { %v4527_v26 = vcvt.f32.s32 %v4526_v24  ;;  %v7488_v24 = vld [vmem:[%s11859_s15 + $0x188] sm:$0xff] }
0x113a   : > { %v4530_v30 = vadd.s32 %v4529_v25, %v4527_v26  ;;  %v7490_v25 = vld [vmem:[%s11859_s15 + $0x198] sm:$0xff]  ;;  %v9056_v26 = vpack.c.bf16 %v7484_v22, %v7482_v19  ;;  %v4975_v22 = vld [vmem:[%s11860_s16 + $0x60] sm:$0xff] }
0x113c   : > { %vm4531_vm11 = vcmp.eq.s32.totalorder %v10970_v7, %v4530_v30  ;;  %v4656_v7 = vld [vmem:[%s11859_s15 + $0xa8] sm:$0xff]  ;;  %v9058_v30 = vpack.c.bf16 %v7490_v25, %v7488_v24 }
0x113d   : > { %v7455_v35 = vsel %vm4531_vm11, 1.0, %v10850_v54  ;;  %v9030_v45 = vpack.c.bf16 %v4658_v44, %v4656_v7  ;;  %v7491_v7 = vld [vmem:[%s11859_s15 + $0x1a0] sm:$0xff]  ;;  %v7493_v44 = vld [vmem:[%s11859_s15 + $0x1b0] sm:$0xff]  ;;  %v4976_v24 = vld [vmem:[%s11860_s16 + $0x68] sm:$0xff] }
0x113e   : > { %8220 = vmatmul.mubr.msk.f32.vlgmr.msra.gmra.mrb[14].mxu0 %vm1745_vm4, %v7455_v35  ;;  %v7487_v35 = vld [vmem:[%s11859_s15 + $0x180] sm:$0xff]  ;;  %v9064_v9 = vpack.c.bf16 %v7493_v44, %v7491_v7  ;;  %v9101_v25 = vpack.c.bf16 %v4976_v24, %v4975_v22  ;;  %v4984_v44 = vld [vmem:[%s11860_s16 + $0xa8] sm:$0xff] }
0x113f   : > { %9031 = vmatprep.subr.bf16.mxu1 %v9030_v45  ;;  %v9060_v40 = vpack.c.bf16 %v7489_v36, %v7487_v35  ;;  %v7496_v45 = vld [vmem:[%s11859_s15 + $0x1c8] sm:$0xff]  ;;  %v4979_v36 = vld [vmem:[%s11860_s16 + $0x80] sm:$0xff] }
0x1140   : > { %9033 = vmatpush1.bf16.msra.mxu1 %v9032_v14  ;;  %v9066_v14 = vpack.c.bf16 %v7498_v46, %v7496_v45  ;;  %v9107_v39 = vpack.c.bf16 %v4980_v38, %v4979_v36  ;;  %v4983_v7 = vld [vmem:[%s11860_s16 + $0xa0] sm:$0xff]  ;;  %v4985_v45 = vld [vmem:[%s11860_s16 + $0xb0] sm:$0xff] }
0x1141   : > { %9035 = vmatprep.subr.bf16.mxu1 %v9034_v3  ;;  %v7500_v3 = vld [vmem:[%s11859_s15 + $0x1e8] sm:$0xff]  ;;  %v7522_v24 = vld [vmem:[%s11860_s16 + $0x100] sm:$0xff] }
0x1142   : > { %v7526_v38 = vld [vmem:[%s11860_s16 + $0x120] sm:$0xff] }
0x1211   : > { %v4608_v48 = vpop.f32.mrb[14].mxu0 }
0x1212   : > { %v4613_v50 = vsub.f32 %v4608_v48, %v10862_v28  ;;  %v8221_v32 = vpop.f32.mrb[15].mxu0  ;;  %4632 = vst.msk [vmem:[#allocation6 + $0x1] sm:$0xf] %vm4615_vm1, %v4608_v48  ;;  %v7471_v28 = vld [vmem:[%s11859_s15 + $0x108] sm:$0xff]  ;;  %v7502_v48 = vld [vmem:[%s11859_s15 + $0x1f8] sm:$0xff] }
0x1213   : > { %v9042_v62 = vpack.c.bf16 %v7473_v60, %v7471_v28  ;;  %v9070_v32 = vpack.c.bf16 %v7502_v48, %v7500_v3  ;;  %v7507_v60 = vld [vmem:[%s11859_s15 + $0x220] sm:$0xff] }
0x1214   : > { %v4614_v29 = vmul.f32 %v4613_v50, %v4613_v50  ;;  %v9068_v50 = vpack.c.bf16 %v7497_v13, %v7495_v47 }
0x1216   : > { %v4616_v55 = vsel %vm4615_vm1, %v4614_v29, 0.0  ;;  %v7499_v29 = vld [vmem:[%s11859_s15 + $0x1e0] sm:$0xff] }
0x1217   : > { %4617 = vadd.xlane.f32.xlu0 %v4616_v55  ;;  %v9072_v52 = vpack.c.bf16 %v7501_v51, %v7499_v29  ;;  %v7503_v55 = vld [vmem:[%s11859_s15 + $0x200] sm:$0xff] }
0x1219   : > { %v11106_v23 = vld [vmem:[#allocation6] sm:$0x3f] }
0x121a   : > { %7461 = vmatmul.mubr.msk.f32.vlgmr.msra.gmra.mrb[14].mxu1 %vm3529_vm10, %v11106_v23  ;;  %v4771_v41 = vrot.slane %v11106_v23, 1  ;;  %v4872_v63 = vrot.slane %v11106_v23, 2  ;;  %v4967_v23 = vld [vmem:[%s11860_s16 + $0x20] sm:$0xff] }
0x121b   : > { %9037 = vmatpush1.bf16.msra.mxu1 %v9036_v56  ;;  %4838 = vmatprep.mubr.f32.mxu1 %v10850_v54  ;;  %v7505_v56 = vld [vmem:[%s11859_s15 + $0x210] sm:$0xff]  ;;  %v9089_v0 = vpack.c.bf16 %v4968_v21, %v4967_v23 }
0x121c   : > { %9039 = vmatprep.subr.bf16.mxu1 %v9038_v57  ;;  %v7508_v57 = vld [vmem:[%s11859_s15 + $0x228] sm:$0xff]  ;;  %v9076_v59 = vpack.c.bf16 %v7505_v56, %v7503_v55  ;;  %v5273_v56 = vld [vmem:[%s11861_s18 + $0x10] sm:$0xff] }
0x121d   : > { %v9078_v28 = vpack.c.bf16 %v7510_v58, %v7508_v57  ;;  %v4634_v58 = vld [vmem:[%s11862_s26] sm:$0x3]  ;;  %s11864_s26 = sld [smem:[#allocation23_spill]] }
0x121f   : > { %9041 = vmatpush1.bf16.msra.mxu1 %v9040_v61  ;;  %v7509_v61 = vld [vmem:[%s11859_s15 + $0x230] sm:$0xff] }
0x1220   : > { %9043 = vmatprep.subr.bf16.mxu1 %v9042_v62  ;;  %v9080_v62 = vpack.c.bf16 %v7509_v61, %v7507_v60 }
0x1223   : > { %9045 = vmatpush1.bf16.msra.mxu1 %v9044_v5  ;;  %v4965_v5 = vld [vmem:[%s11860_s16 + $0x10] sm:$0xff] }
0x1224   : > { %9047 = vmatprep.subr.bf16.mxu1 %v9046_v6  ;;  %v9083_v6 = vpack.c.bf16 %v4964_v4, %v4963_v2  ;;  %v9086_v8 = vpack.c.bf16 %v4966_v27, %v4965_v5  ;;  %v7514_v5 = vld [vmem:[%s11860_s16 + $0xc0] sm:$0xff] }
0x1226   : > { %9084 = vmatpush1.bf16.msra.mxu0 %v9083_v6  ;;  %v7515_v6 = vld [vmem:[%s11860_s16 + $0xc8] sm:$0xff] }
0x1227   : > { %9049 = vmatpush1.bf16.msra.mxu1 %v9048_v10  ;;  %9085 = vmatprep.subr.bf16.mxu0 %v9796_v34  ;;  %v4969_v10 = vld [vmem:[%s11860_s16 + $0x30] sm:$0xff]  ;;  %v9119_v21 = vpack.c.bf16 %v7515_v6, %v7514_v5  ;;  %v7550_v6 = vld [vmem:[%s11860_s16 + $0x1d8] sm:$0xff] }
0x1228   : > { %9051 = vmatprep.subr.bf16.mxu1 %v9050_v12  ;;  %v4970_v12 = vld [vmem:[%s11860_s16 + $0x38] sm:$0xff]  ;;  %v7549_v5 = vld [vmem:[%s11860_s16 + $0x1d0] sm:$0xff] }
0x1229   : > { %v9092_v11 = vpack.c.bf16 %v4970_v12, %v4969_v10  ;;  %v7516_v10 = vld [vmem:[%s11860_s16 + $0xd0] sm:$0xff]  ;;  %v7517_v12 = vld [vmem:[%s11860_s16 + $0xd8] sm:$0xff] }
0x122a   : > { %9087 = vmatpush1.bf16.msra.mxu0 %v9086_v8  ;;  %v9122_v20 = vpack.c.bf16 %v7517_v12, %v7516_v10  ;;  %v7553_v10 = vld [vmem:[%s11860_s16 + $0x1f0] sm:$0xff]  ;;  %v7554_v12 = vld [vmem:[%s11860_s16 + $0x1f8] sm:$0xff] }
0x122b   : > { %9053 = vmatpush1.bf16.msra.mxu1 %v9052_v17  ;;  %9088 = vmatprep.subr.bf16.mxu0 %v9796_v34  ;;  %v4973_v17 = vld [vmem:[%s11860_s16 + $0x50] sm:$0xff] }
0x122c   : > { %9055 = vmatprep.subr.bf16.mxu1 %v9054_v18  ;;  %v4974_v18 = vld [vmem:[%s11860_s16 + $0x58] sm:$0xff] }
0x122d   : > { %v9098_v19 = vpack.c.bf16 %v4974_v18, %v4973_v17  ;;  %v7520_v18 = vld [vmem:[%s11860_s16 + $0xf0] sm:$0xff] }
0x122e   : > { %9090 = vmatpush1.bf16.msra.mxu0 %v9089_v0 }
0x122f   : > { %9057 = vmatpush1.bf16.msra.mxu1 %v9056_v26  ;;  %9091 = vmatprep.subr.bf16.mxu0 %v9796_v34  ;;  %v4977_v26 = vld [vmem:[%s11860_s16 + $0x70] sm:$0xff] }
0x1230   : > { %9059 = vmatprep.subr.bf16.mxu1 %v9058_v30  ;;  %v4978_v30 = vld [vmem:[%s11860_s16 + $0x78] sm:$0xff] }
0x1231   : > { %v9104_v35 = vpack.c.bf16 %v4978_v30, %v4977_v26  ;;  %v7524_v30 = vld [vmem:[%s11860_s16 + $0x110] sm:$0xff] }
0x1232   : > { %7486 = vmatmul.mubr.msk.f32.vlgmr.msra.gmra.mrb[14].mxu1 %vm3529_vm10, %v4771_v41  ;;  %9093 = vmatpush1.bf16.msra.mxu0 %v9092_v11  ;;  %v4982_v41 = vld [vmem:[%s11860_s16 + $0x98] sm:$0xff] }
0x1233   : > { %9061 = vmatpush1.bf16.msra.mxu1 %v9060_v40  ;;  %4939 = vmatprep.mubr.f32.mxu1 %v10850_v54  ;;  %v7506_v54 = vld [vmem:[%s11859_s15 + $0x218] sm:$0xff]  ;;  %v4981_v40 = vld [vmem:[%s11860_s16 + $0x90] sm:$0xff] }
0x1234   : > { %9063 = vmatprep.subr.bf16.mxu1 %v9062_v42  ;;  %v9074_v53 = vpack.c.bf16 %v7506_v54, %v7504_v37  ;;  %9094 = vmatprep.subr.bf16.mxu0 %v9796_v34  ;;  %v9110_v42 = vpack.c.bf16 %v4982_v41, %v4981_v40  ;;  %v5272_v54 = vld [vmem:[%s11861_s18 + $0x8] sm:$0xff]  ;;  %v7528_v41 = vld [vmem:[%s11860_s16 + $0x130] sm:$0xff] }
0x1236   : > { %9096 = vmatpush1.bf16.msra.mxu0 %v9095_v16  ;;  %v7519_v16 = vld [vmem:[%s11860_s16 + $0xe8] sm:$0xff] }
0x1237   : > { %9065 = vmatpush1.bf16.msra.mxu1 %v9064_v9  ;;  %9097 = vmatprep.subr.bf16.mxu0 %v9796_v34  ;;  %v9113_v9 = vpack.c.bf16 %v4984_v44, %v4983_v7  ;;  %v9125_v17 = vpack.c.bf16 %v7519_v16, %v7518_v15  ;;  %v7530_v44 = vld [vmem:[%s11860_s16 + $0x140] sm:$0xff]  ;;  %v7556_v15 = vld [vmem:[%s11860_s16 + $0x208] sm:$0xff] }
0x1238   : > { %9067 = vmatprep.subr.bf16.mxu1 %v9066_v14  ;;  %v4986_v14 = vld [vmem:[%s11860_s16 + $0xb8] sm:$0xff] }
0x1239   : > { %v9116_v13 = vpack.c.bf16 %v4986_v14, %v4985_v45  ;;  %v7531_v45 = vld [vmem:[%s11860_s16 + $0x148] sm:$0xff]  ;;  %v7533_v14 = vld [vmem:[%s11860_s16 + $0x158] sm:$0xff] }
0x123a   : > { %9099 = vmatpush1.bf16.msra.mxu0 %v9098_v19  ;;  %v7521_v19 = vld [vmem:[%s11860_s16 + $0xf8] sm:$0xff] }
0x123b   : > { %9069 = vmatpush1.bf16.msra.mxu1 %v9068_v50  ;;  %9100 = vmatprep.subr.bf16.mxu0 %v9796_v34  ;;  %v9128_v22 = vpack.c.bf16 %v7521_v19, %v7520_v18  ;;  %v7558_v18 = vld [vmem:[%s11860_s16 + $0x218] sm:$0xff] }
0x123c   : > { %9071 = vmatprep.subr.bf16.mxu1 %v9070_v32 }
0x123e   : > { %9102 = vmatpush1.bf16.msra.mxu0 %v9101_v25  ;;  %v7523_v25 = vld [vmem:[%s11860_s16 + $0x108] sm:$0xff] }
0x123f   : > { %9073 = vmatpush1.bf16.msra.mxu1 %v9072_v52  ;;  %9103 = vmatprep.subr.bf16.mxu0 %v9796_v34  ;;  %v5274_v52 = vld [vmem:[%s11861_s18 + $0x18] sm:$0xff]  ;;  %v9131_v26 = vpack.c.bf16 %v7523_v25, %v7522_v24  ;;  %v7560_v24 = vld [vmem:[%s11860_s16 + $0x228] sm:$0xff] }
0x1240   : > { %9075 = vmatprep.subr.bf16.mxu1 %v9074_v53  ;;  %v5271_v53 = vld [vmem:[%s11861_s18] sm:$0xff]  ;;  %v9190_v55 = vpack.c.bf16 %v5274_v52, %v5272_v54 }
0x1241   : > { %v9192_v57 = vpack.c.bf16 %v5273_v56, %v5271_v53  ;;  %v7541_v53 = vld [vmem:[%s11860_s16 + $0x190] sm:$0xff] }
0x1242   : > { %9105 = vmatpush1.bf16.msra.mxu0 %v9104_v35  ;;  %v7525_v35 = vld [vmem:[%s11860_s16 + $0x118] sm:$0xff] }
0x1243   : > { %9077 = vmatpush1.bf16.msra.mxu1 %v9076_v59  ;;  %9106 = vmatprep.subr.bf16.mxu0 %v9796_v34  ;;  %v4737_v59 = vrot.slane %v4634_v58, %v10160_v31  ;;  %v9134_v36 = vpack.c.bf16 %v7525_v35, %v7524_v30  ;;  %v7562_v30 = vld [vmem:[%s11860_s16 + $0x238] sm:$0xff] }
0x1244   : > { %9079 = vmatprep.subr.bf16.mxu1 %v9078_v28  ;;  %v4741_v28 = vrot.slane %v4634_v58, %v10163_v33  ;;  %v7543_v58 = vld [vmem:[%s11860_s16 + $0x1a0] sm:$0xff] }
0x1246   : > { %9108 = vmatpush1.bf16.msra.mxu0 %v9107_v39  ;;  %v7527_v39 = vld [vmem:[%s11860_s16 + $0x128] sm:$0xff] }
0x1247   : > { %9081 = vmatpush1.bf16.msra.mxu1 %v9080_v62  ;;  %9109 = vmatprep.subr.bf16.mxu0 %v9796_v34  ;;  %v9137_v40 = vpack.c.bf16 %v7527_v39, %v7526_v38  ;;  %v5276_v38 = vld [vmem:[%s11861_s18 + $0x28] sm:$0xff]  ;;  %v5278_v39 = vld [vmem:[%s11861_s18 + $0x38] sm:$0xff] }
0x1248   : > { %9191 = vmatprep.subr.bf16.mxu1 %v9190_v55  ;;  %v7542_v55 = vld [vmem:[%s11860_s16 + $0x198] sm:$0xff] }
0x124a   : > { %7511 = vmatmul.mubr.msk.f32.vlgmr.msra.gmra.mrb[14].mxu1 %vm3529_vm10, %v4872_v63  ;;  %9111 = vmatpush1.bf16.msra.mxu0 %v9110_v42  ;;  %vm4628_vm10 = vcmask 0   ;;  %v7529_v42 = vld [vmem:[%s11860_s16 + $0x138] sm:$0xff] }
0x124b   : > { %5358 = vmatprep.mubr.f32.mxu1 %v11156_v1  ;;  %9112 = vmatprep.subr.bf16.mxu0 %v9796_v34  ;;  %v9140_v7 = vpack.c.bf16 %v7529_v42, %v7528_v41  ;;  %v5275_v41 = vld [vmem:[%s11861_s18 + $0x20] sm:$0xff]  ;;  %v5277_v42 = vld [vmem:[%s11861_s18 + $0x30] sm:$0xff] }
0x124c   : > { %9193 = vmatpush1.bf16.msra.mxu1 %v9192_v57  ;;  %v9158_v57 = vpack.c.bf16 %v7542_v55, %v7541_v53  ;;  %v5391_v53 = vld [vmem:[%s11864_s26 + $0x48] sm:$0xff] }
0x124e   : > { %9114 = vmatpush1.bf16.msra.mxu0 %v9113_v9  ;;  %v7532_v9 = vld [vmem:[%s11860_s16 + $0x150] sm:$0xff] }
0x124f   : > { %9115 = vmatprep.subr.bf16.mxu0 %v9796_v34 }
0x1252   : > { %9117 = vmatpush1.bf16.msra.mxu0 %v9116_v13  ;;  %v7534_v13 = vld [vmem:[%s11860_s16 + $0x160] sm:$0xff] }
0x1253   : > { %9118 = vmatprep.subr.bf16.mxu0 %v9796_v34 }
0x12a4   : > { %v4618_v46 = vpop.xlane.xlu0 %4617 }
0x12a5   : > { %v4619_v47 = vrot.slane %v4618_v46, 4 }
0x12a7   : > { %v4620_v3 = vadd.f32 %v4619_v47, %v4618_v46  ;;  %v9143_v46 = vpack.c.bf16 %v7531_v45, %v7530_v44  ;;  %v9146_v47 = vpack.c.bf16 %v7533_v14, %v7532_v9  ;;  %v7513_v44 = vld [vmem:[%s11863_s10] ss:$0 sm:$0xff]  ;;  %s11867_s10 = sld [smem:[#allocation27_spill]] }
0x12a8   : > { %v5382_v45 = vld [vmem:[%s11864_s26] sm:$0xff] }
0x12a9   : > { %v4621_v48 = vrot.slane %v4620_v3, 2 }
0x12ab   : > { %v4622_v50 = vadd.f32 %v4621_v48, %v4620_v3  ;;  %v7535_v3 = vld [vmem:[%s11860_s16 + $0x168] sm:$0xff] }
0x12ac   : > { %v9149_v48 = vpack.c.bf16 %v7535_v3, %v7534_v13  ;;  %v5384_v13 = vld [vmem:[%s11864_s26 + $0x10] sm:$0xff]  ;;  %v5385_v3 = vld [vmem:[%s11864_s26 + $0x18] sm:$0xff] }
0x12ad   : > { %v4623_v32 = vrot.slane %v4622_v50, 1 }
0x12af   : > { %v4624_v29 = vadd.f32 %v4623_v32, %v4622_v50  ;;  %v7536_v50 = vld [vmem:[%s11860_s16 + $0x170] sm:$0xff]  ;;  %v7537_v32 = vld [vmem:[%s11860_s16 + $0x178] sm:$0xff] }
0x12b1   : > { %9690 = vpush %v4624_v29  ;;  %v9152_v29 = vpack.c.bf16 %v7537_v32, %v7536_v50  ;;  %v5386_v50 = vld [vmem:[%s11864_s26 + $0x20] sm:$0xff]  ;;  %v5387_v32 = vld [vmem:[%s11864_s26 + $0x28] sm:$0xff] }
0x12e2   : > { %s9691_s1 = spop %9690 }
0x12e3   : > { %v4626_v51 = vstv %s9691_s1  ;;  %s11865_s1 = sld [smem:[#allocation25_spill]] }
0x12e4   : > { %v4627_v37 = vmul.f32 0.0024414063, %v4626_v51  ;;  %v7539_v51 = vld [vmem:[%s11860_s16 + $0x180] sm:$0xff] }
0x12e6   : > { %4629 = vst.msk [vmem:[%s1155_s2] sm:$0x1] %vm4628_vm10, %v4627_v37  ;;  %v7540_v37 = vld [vmem:[%s11860_s16 + $0x188] sm:$0xff]  ;;  %s11866_s2 = sld [smem:[#allocation22_spill]] }
0x12e7   : > { %v9155_v54 = vpack.c.bf16 %v7540_v37, %v7539_v51  ;;  %v5388_v51 = vld [vmem:[%s11864_s26 + $0x30] sm:$0xff]  ;;  %v5389_v37 = vld [vmem:[%s11864_s26 + $0x38] sm:$0xff] }
0x131d   : > { %v4941_v60 = vpop.f32.mrb[14].mxu1 }
0x131e   : > { %v9630_v61 = vadd.f32 %v4941_v60, %v4737_v59  ;;  %v4943_v62 = vpop.f32.mrb[15].mxu1  ;;  %v7544_v59 = vld [vmem:[%s11860_s16 + $0x1a8] sm:$0xff]  ;;  %v7545_v60 = vld [vmem:[%s11860_s16 + $0x1b0] sm:$0xff] }
0x131f   : > { %v9631_v63 = vadd.f32 %v4943_v62, %v4741_v28  ;;  %v9161_v28 = vpack.c.bf16 %v7544_v59, %v7543_v58  ;;  %v5394_v59 = vld [vmem:[%s11864_s26 + $0x60] sm:$0xff] }
0x1320   : > { %v4952_v2 = vrot.slane %v9630_v61, 7  ;;  %v7546_v61 = vld [vmem:[%s11860_s16 + $0x1b8] sm:$0xff] }
0x1321   : > { %v4953_v4 = vrot.slane %v9631_v63, 7  ;;  %v9164_v62 = vpack.c.bf16 %v7546_v61, %v7545_v60  ;;  %v7547_v63 = vld [vmem:[%s11860_s16 + $0x1c0] sm:$0xff]  ;;  %v5396_v61 = vld [vmem:[%s11864_s26 + $0x70] sm:$0xff] }
0x1322   : > { %4956 = vst [vmem:[#allocation7] sm:$0x1e] %v4952_v2  ;;  %v7548_v2 = vld [vmem:[%s11860_s16 + $0x1c8] sm:$0xff] }
0x1323   : > { %4957 = vst.msk [vmem:[#allocation7 + $0x8] sm:$0x1e] %vm2160_vm7, %v4953_v4  ;;  %v9167_v4 = vpack.c.bf16 %v7548_v2, %v7547_v63  ;;  %v5398_v2 = vld [vmem:[%s11864_s26 + $0x80] sm:$0xff] }
0x1329   : > { %v4958_v27 = vld [vmem:[#allocation7] sm:$0x3f] }
0x132a   : > { %v4959_v8 = vld [vmem:[#allocation7 + $0x8] sm:$0x3f]  ;;  %v11209_v0 = vmax.f32 %v4958_v27, 0.0  ;;  %v9170_v27 = vpack.c.bf16 %v7550_v6, %v7549_v5 }
0x132b   : > { %v11207_v23 = vmax.f32 %v4959_v8, 0.0  ;;  %v7551_v8 = vld [vmem:[%s11860_s16 + $0x1e0] sm:$0xff]  ;;  %v5400_v6 = vld [vmem:[%s11864_s26 + $0x90] sm:$0xff] }
0x132c   : > { %v5093_v52 = vrot.slane %v11209_v0, 1 }
0x132d   : > { %7512 = vmatprep.mubr.msk.f32.mxu0 %vm2213_vm8, %v11207_v23  ;;  %v5094_v11 = vrot.slane %v11207_v23, 1  ;;  %v5195_v56 = vrot.slane %v11207_v23, 2  ;;  %v7552_v23 = vld [vmem:[%s11860_s16 + $0x1e8] sm:$0xff] }
0x132e   : > { %5055 = vmatmul.mubr.f32.vlgmr.msra.gmra.mrb[20].mxu0 %v11209_v0 }
0x132f   : > { %9120 = vmatpush1.bf16.msra.mxu0 %v9119_v21  ;;  %7538 = vmatprep.mubr.msk.f32.mxu0 %vm2213_vm8, %v5094_v11  ;;  %v9173_v21 = vpack.c.bf16 %v7552_v23, %v7551_v8  ;;  %v9176_v11 = vpack.c.bf16 %v7554_v12, %v7553_v10  ;;  %v5402_v23 = vld [vmem:[%s11864_s26 + $0xa0] sm:$0xff]  ;;  %v5404_v10 = vld [vmem:[%s11864_s26 + $0xb0] sm:$0xff] }
0x1330   : > { %9121 = vmatprep.subr.bf16.mxu0 %v9796_v34 }
0x1333   : > { %9123 = vmatpush1.bf16.msra.mxu0 %v9122_v20  ;;  %v7555_v20 = vld [vmem:[%s11860_s16 + $0x200] sm:$0xff] }
0x1334   : > { %9124 = vmatprep.subr.bf16.mxu0 %v9796_v34  ;;  %v9179_v16 = vpack.c.bf16 %v7556_v15, %v7555_v20  ;;  %v5691_v15 = vld [vmem:[%s11865_s1 + $0x8] sm:$0xff] }
0x1337   : > { %9126 = vmatpush1.bf16.msra.mxu0 %v9125_v17  ;;  %v7557_v17 = vld [vmem:[%s11860_s16 + $0x210] sm:$0xff] }
0x1338   : > { %9127 = vmatprep.subr.bf16.mxu0 %v9796_v34  ;;  %v9182_v19 = vpack.c.bf16 %v7558_v18, %v7557_v17  ;;  %v5690_v17 = vld [vmem:[%s11865_s1] sm:$0xff] }
0x133b   : > { %9129 = vmatpush1.bf16.msra.mxu0 %v9128_v22  ;;  %v7559_v22 = vld [vmem:[%s11860_s16 + $0x220] sm:$0xff] }
0x133c   : > { %9130 = vmatprep.subr.bf16.mxu0 %v9796_v34  ;;  %v9185_v25 = vpack.c.bf16 %v7560_v24, %v7559_v22  ;;  %v5279_v24 = vld [vmem:[%s11866_s2] sm:$0x3]  ;;  %s11868_s2 = sld [smem:[#allocation24_spill]] }
0x133f   : > { %9132 = vmatpush1.bf16.msra.mxu0 %v9131_v26  ;;  %v7561_v26 = vld [vmem:[%s11860_s16 + $0x230] sm:$0xff] }
0x1340   : > { %9133 = vmatprep.subr.bf16.mxu0 %v9796_v34  ;;  %v9188_v35 = vpack.c.bf16 %v7562_v30, %v7561_v26  ;;  %v5288_v26 = vrot.slane %v5279_v24, %v10163_v33 }
0x1343   : > { %9135 = vmatpush1.bf16.msra.mxu0 %v9134_v36  ;;  %v5194_v36 = vrot.slane %v11209_v0, 2  ;;  %v5383_v0 = vld [vmem:[%s11864_s26 + $0x8] sm:$0xff] }
0x1344   : > { %9136 = vmatprep.subr.bf16.mxu0 %v9796_v34  ;;  %v9199_v14 = vpack.c.bf16 %v5383_v0, %v5382_v45  ;;  %v7567_v45 = vld [vmem:[%s11864_s26 + $0xc0] sm:$0xff]  ;;  %v7568_v0 = vld [vmem:[%s11864_s26 + $0xc8] sm:$0xff] }
0x1347   : > { %9138 = vmatpush1.bf16.msra.mxu0 %v9137_v40  ;;  %v9194_v40 = vpack.c.bf16 %v5278_v39, %v5276_v38 }
0x1348   : > { %9139 = vmatprep.subr.bf16.mxu0 %v9796_v34 }
0x1349   : > { %9195 = vmatprep.subr.bf16.mxu1 %v9194_v40  ;;  %v5365_v40 = vld [vmem:[#allocation7] sm:$0x1e] }
0x134b   : > { %9141 = vmatpush1.bf16.msra.mxu0 %v9140_v7  ;;  %v9196_v7 = vpack.c.bf16 %v5277_v42, %v5275_v41 }
0x134c   : > { %9142 = vmatprep.subr.bf16.mxu0 %v9796_v34 }
0x134d   : > { %9197 = vmatpush1.bf16.msra.mxu1 %v9196_v7  ;;  %v5366_v7 = vld [vmem:[#allocation7 + $0x8] sm:$0x1e] }
0x134e   : > { %9198 = vmatprep.subr.bf16.mxu1 %v9796_v34 }
0x134f   : > { %9144 = vmatpush1.bf16.msra.mxu0 %v9143_v46 }
0x1350   : > { %9145 = vmatprep.subr.bf16.mxu0 %v9796_v34 }
0x1353   : > { %9147 = vmatpush1.bf16.msra.mxu0 %v9146_v47 }
0x1354   : > { %9148 = vmatprep.subr.bf16.mxu0 %v9796_v34 }
0x1357   : > { %9150 = vmatpush1.bf16.msra.mxu0 %v9149_v48  ;;  %v9202_v48 = vpack.c.bf16 %v5385_v3, %v5384_v13  ;;  %v7569_v13 = vld [vmem:[%s11864_s26 + $0xd0] sm:$0xff]  ;;  %v7570_v3 = vld [vmem:[%s11864_s26 + $0xd8] sm:$0xff] }
0x1358   : > { %9151 = vmatprep.subr.bf16.mxu0 %v9796_v34 }
0x135b   : > { %9153 = vmatpush1.bf16.msra.mxu0 %v9152_v29  ;;  %v9205_v29 = vpack.c.bf16 %v5387_v32, %v5386_v50  ;;  %v9238_v50 = vpack.c.bf16 %v7570_v3, %v7569_v13  ;;  %v7571_v32 = vld [vmem:[%s11864_s26 + $0xe0] sm:$0xff]  ;;  %v7607_v13 = vld [vmem:[%s11864_s26 + $0x1f8] sm:$0xff] }
0x135c   : > { %9154 = vmatprep.subr.bf16.mxu0 %v9796_v34 }
0x135e   : > { %5163 = vmatmul.mubr.f32.vlgmr.msra.gmra.mrb[20].mxu0 %v5093_v52  ;;  %v5390_v52 = vld [vmem:[%s11864_s26 + $0x40] sm:$0xff] }
0x135f   : > { %9156 = vmatpush1.bf16.msra.mxu0 %v9155_v54  ;;  %7563 = vmatprep.mubr.msk.f32.mxu0 %vm2213_vm8, %v5195_v56  ;;  %v9208_v54 = vpack.c.bf16 %v5389_v37, %v5388_v51  ;;  %v9211_v55 = vpack.c.bf16 %v5391_v53, %v5390_v52  ;;  %v5392_v56 = vld [vmem:[%s11864_s26 + $0x50] sm:$0xff]  ;;  %v7575_v53 = vld [vmem:[%s11864_s26 + $0x100] sm:$0xff] }
0x1360   : > { %9157 = vmatprep.subr.bf16.mxu0 %v9796_v34  ;;  %v7573_v37 = vld [vmem:[%s11864_s26 + $0xf0] sm:$0xff] }
0x1363   : > { %9159 = vmatpush1.bf16.msra.mxu0 %v9158_v57  ;;  %v5393_v57 = vld [vmem:[%s11864_s26 + $0x58] sm:$0xff] }
0x1364   : > { %9160 = vmatprep.subr.bf16.mxu0 %v9796_v34  ;;  %v9214_v58 = vpack.c.bf16 %v5393_v57, %v5392_v56  ;;  %v7577_v57 = vld [vmem:[%s11864_s26 + $0x110] sm:$0xff] }
0x1367   : > { %9162 = vmatpush1.bf16.msra.mxu0 %v9161_v28  ;;  %v5395_v28 = vld [vmem:[%s11864_s26 + $0x68] sm:$0xff] }
0x1368   : > { %9163 = vmatprep.subr.bf16.mxu0 %v9796_v34  ;;  %v9217_v60 = vpack.c.bf16 %v5395_v28, %v5394_v59  ;;  %v7579_v28 = vld [vmem:[%s11864_s26 + $0x120] sm:$0xff] }
0x136b   : > { %9165 = vmatpush1.bf16.msra.mxu0 %v9164_v62  ;;  %v5397_v62 = vld [vmem:[%s11864_s26 + $0x78] sm:$0xff] }
0x136c   : > { %9166 = vmatprep.subr.bf16.mxu0 %v9796_v34  ;;  %v9220_v63 = vpack.c.bf16 %v5397_v62, %v5396_v61  ;;  %v7581_v62 = vld [vmem:[%s11864_s26 + $0x130] sm:$0xff] }
0x136f   : > { %9168 = vmatpush1.bf16.msra.mxu0 %v9167_v4  ;;  %v5399_v4 = vld [vmem:[%s11864_s26 + $0x88] sm:$0xff] }
0x1370   : > { %9169 = vmatprep.subr.bf16.mxu0 %v9796_v34  ;;  %v9223_v5 = vpack.c.bf16 %v5399_v4, %v5398_v2  ;;  %v7583_v4 = vld [vmem:[%s11864_s26 + $0x140] sm:$0xff] }
0x1373   : > { %9171 = vmatpush1.bf16.msra.mxu0 %v9170_v27  ;;  %v5401_v27 = vld [vmem:[%s11864_s26 + $0x98] sm:$0xff] }
0x1374   : > { %9172 = vmatprep.subr.bf16.mxu0 %v9796_v34  ;;  %v9226_v8 = vpack.c.bf16 %v5401_v27, %v5400_v6  ;;  %v7585_v27 = vld [vmem:[%s11864_s26 + $0x150] sm:$0xff] }
0x1377   : > { %9174 = vmatpush1.bf16.msra.mxu0 %v9173_v21  ;;  %v5403_v21 = vld [vmem:[%s11864_s26 + $0xa8] sm:$0xff] }
0x1378   : > { %9175 = vmatprep.subr.bf16.mxu0 %v9796_v34  ;;  %v9229_v12 = vpack.c.bf16 %v5403_v21, %v5402_v23  ;;  %v7587_v21 = vld [vmem:[%s11864_s26 + $0x160] sm:$0xff] }
0x137b   : > { %9177 = vmatpush1.bf16.msra.mxu0 %v9176_v11  ;;  %v5405_v11 = vld [vmem:[%s11864_s26 + $0xb8] sm:$0xff] }
0x137c   : > { %9178 = vmatprep.subr.bf16.mxu0 %v9796_v34  ;;  %v9232_v20 = vpack.c.bf16 %v5405_v11, %v5404_v10  ;;  %v7588_v10 = vld [vmem:[%s11864_s26 + $0x168] sm:$0xff]  ;;  %v7589_v11 = vld [vmem:[%s11864_s26 + $0x170] sm:$0xff] }
0x137f   : > { %9180 = vmatpush1.bf16.msra.mxu0 %v9179_v16  ;;  %v5693_v16 = vld [vmem:[%s11865_s1 + $0x18] sm:$0xff] }
0x1380   : > { %9181 = vmatprep.subr.bf16.mxu0 %v9796_v34  ;;  %v9306_v18 = vpack.c.bf16 %v5693_v16, %v5691_v15  ;;  %v7592_v16 = vld [vmem:[%s11864_s26 + $0x180] sm:$0xff] }
0x1383   : > { %9183 = vmatpush1.bf16.msra.mxu0 %v9182_v19  ;;  %v5692_v19 = vld [vmem:[%s11865_s1 + $0x10] sm:$0xff] }
0x1384   : > { %9184 = vmatprep.subr.bf16.mxu0 %v9796_v34  ;;  %v9308_v22 = vpack.c.bf16 %v5692_v19, %v5690_v17  ;;  %v7593_v17 = vld [vmem:[%s11864_s26 + $0x188] sm:$0xff] }
0x1387   : > { %9186 = vmatpush1.bf16.msra.mxu0 %v9185_v25  ;;  %v5284_v25 = vrot.slane %v5279_v24, %v10160_v31  ;;  %v7595_v24 = vld [vmem:[%s11864_s26 + $0x198] sm:$0xff] }
0x1388   : > { %9187 = vmatprep.subr.bf16.mxu0 %v9796_v34 }
0x138b   : > { %9189 = vmatpush1.bf16.msra.mxu0 %v9188_v35 }
0x138c   : > { %9307 = vmatprep.subr.bf16.mxu0 %v9306_v18  ;;  %v9271_v18 = vpack.c.bf16 %v7593_v17, %v7592_v16  ;;  %v7677_v17 = vld [vmem:[%s11867_s10 + $0x348] sm:$0xff] }
0x138e   : > { %5264 = vmatmul.mubr.f32.vlgmr.msra.gmra.mrb[20].mxu0 %v5194_v36 }
0x138f   : > { %5777 = vmatprep.mubr.f32.mxu0 %v11156_v1  ;;  %9309 = vmatpush1.bf16.msra.mxu0 %v9308_v22  ;;  %v7594_v22 = vld [vmem:[%s11864_s26 + $0x190] sm:$0xff] }
0x1461   : > { %v5265_v46 = vpop.f32.mrb[20].mxu0 }
0x1462   : > { %v9632_v1 = vadd.f32 %v7513_v44, %v5265_v46  ;;  %v5267_v9 = vpop.f32.mrb[21].mxu0 }
0x1464   : > { %v5270_v47 = vmax.f32 %v9632_v1, 0.0 }
0x1466   : > { %7564 = vmatmul.mubr.msk.f32.vlgmr.msra.gmra.mrb[16].mxu1 %vm1745_vm4, %v5270_v47 }
0x1467   : > { %9200 = vmatpush1.bf16.msra.mxu1 %v9199_v14  ;;  %v9235_v14 = vpack.c.bf16 %v7568_v0, %v7567_v45  ;;  %v7603_v45 = vld [vmem:[%s11864_s26 + $0x1d8] sm:$0xff] }
0x1468   : > { %9201 = vmatprep.subr.bf16.mxu1 %v9796_v34 }
0x146b   : > { %9203 = vmatpush1.bf16.msra.mxu1 %v9202_v48 }
0x146c   : > { %9204 = vmatprep.subr.bf16.mxu1 %v9796_v34 }
0x146f   : > { %9206 = vmatpush1.bf16.msra.mxu1 %v9205_v29  ;;  %v7572_v29 = vld [vmem:[%s11864_s26 + $0xe8] sm:$0xff] }
0x1470   : > { %9207 = vmatprep.subr.bf16.mxu1 %v9796_v34  ;;  %v9241_v51 = vpack.c.bf16 %v7572_v29, %v7571_v32  ;;  %v7610_v29 = vld [vmem:[%s11864_s26 + $0x210] sm:$0xff] }
0x1473   : > { %9209 = vmatpush1.bf16.msra.mxu1 %v9208_v54  ;;  %v7574_v54 = vld [vmem:[%s11864_s26 + $0xf8] sm:$0xff] }
0x1474   : > { %9210 = vmatprep.subr.bf16.mxu1 %v9796_v34  ;;  %v9244_v52 = vpack.c.bf16 %v7574_v54, %v7573_v37  ;;  %v7612_v54 = vld [vmem:[%s11864_s26 + $0x220] sm:$0xff] }
0x1477   : > { %9212 = vmatpush1.bf16.msra.mxu1 %v9211_v55  ;;  %v7576_v55 = vld [vmem:[%s11864_s26 + $0x108] sm:$0xff] }
0x1478   : > { %9213 = vmatprep.subr.bf16.mxu1 %v9796_v34  ;;  %v9247_v56 = vpack.c.bf16 %v7576_v55, %v7575_v53  ;;  %v7614_v55 = vld [vmem:[%s11864_s26 + $0x230] sm:$0xff] }
0x147b   : > { %9215 = vmatpush1.bf16.msra.mxu1 %v9214_v58  ;;  %v7578_v58 = vld [vmem:[%s11864_s26 + $0x118] sm:$0xff] }
0x147c   : > { %9216 = vmatprep.subr.bf16.mxu1 %v9796_v34  ;;  %v9250_v59 = vpack.c.bf16 %v7578_v58, %v7577_v57 }
0x147f   : > { %9218 = vmatpush1.bf16.msra.mxu1 %v9217_v60  ;;  %v7580_v60 = vld [vmem:[%s11864_s26 + $0x128] sm:$0xff] }
0x1480   : > { %9219 = vmatprep.subr.bf16.mxu1 %v9796_v34  ;;  %v9253_v61 = vpack.c.bf16 %v7580_v60, %v7579_v28  ;;  %v5697_v28 = vld [vmem:[%s11865_s1 + $0x38] sm:$0xff] }
0x1483   : > { %9221 = vmatpush1.bf16.msra.mxu1 %v9220_v63  ;;  %v7582_v63 = vld [vmem:[%s11864_s26 + $0x138] sm:$0xff] }
0x1484   : > { %9222 = vmatprep.subr.bf16.mxu1 %v9796_v34  ;;  %v9256_v2 = vpack.c.bf16 %v7582_v63, %v7581_v62  ;;  %v5696_v62 = vld [vmem:[%s11865_s1 + $0x30] sm:$0xff] }
0x1487   : > { %9224 = vmatpush1.bf16.msra.mxu1 %v9223_v5  ;;  %v7584_v5 = vld [vmem:[%s11864_s26 + $0x148] sm:$0xff] }
0x1488   : > { %9225 = vmatprep.subr.bf16.mxu1 %v9796_v34  ;;  %v9259_v6 = vpack.c.bf16 %v7584_v5, %v7583_v4  ;;  %v5809_v4 = vld [vmem:[%s11867_s10 + $0x18] sm:$0xff] }
0x148b   : > { %9227 = vmatpush1.bf16.msra.mxu1 %v9226_v8  ;;  %v7586_v8 = vld [vmem:[%s11864_s26 + $0x158] sm:$0xff] }
0x148c   : > { %9228 = vmatprep.subr.bf16.mxu1 %v9796_v34  ;;  %v9262_v23 = vpack.c.bf16 %v7586_v8, %v7585_v27  ;;  %v7668_v8 = vld [vmem:[%s11867_s10 + $0x300] sm:$0xff] }
0x148f   : > { %9230 = vmatpush1.bf16.msra.mxu1 %v9229_v12  ;;  %v9265_v12 = vpack.c.bf16 %v7588_v10, %v7587_v21  ;;  %v7673_v10 = vld [vmem:[%s11867_s10 + $0x328] sm:$0xff] }
0x1490   : > { %9231 = vmatprep.subr.bf16.mxu1 %v9796_v34 }
0x1493   : > { %9233 = vmatpush1.bf16.msra.mxu1 %v9232_v20  ;;  %v7590_v20 = vld [vmem:[%s11864_s26 + $0x178] sm:$0xff] }
0x1494   : > { %9234 = vmatprep.subr.bf16.mxu1 %v9796_v34  ;;  %v9268_v15 = vpack.c.bf16 %v7590_v20, %v7589_v11  ;;  %v7672_v11 = vld [vmem:[%s11867_s10 + $0x320] sm:$0xff] }
0x1539   : > { %v5360_v30 = vpop.f32.mrb[16].mxu1 }
0x153a   : > { %v5361_v35 = vadd.f32 %v5360_v30, %v5284_v25  ;;  %v5362_v36 = vpop.f32.mrb[17].mxu1  ;;  %v7596_v30 = vld [vmem:[%s11864_s26 + $0x1a0] sm:$0xff] }
0x153b   : > { %v5363_v38 = vadd.f32 %v5362_v36, %v5288_v26  ;;  %v9274_v26 = vpack.c.bf16 %v7595_v24, %v7594_v22  ;;  %v7678_v24 = vld [vmem:[%s11867_s10 + $0x350] sm:$0xff] }
0x153c   : > { %v5369_v39 = vrot.slane %v5361_v35, 7  ;;  %v7597_v35 = vld [vmem:[%s11864_s26 + $0x1a8] sm:$0xff] }
0x153d   : > { %v5370_v41 = vrot.slane %v5363_v38, 7  ;;  %v9277_v36 = vpack.c.bf16 %v7597_v35, %v7596_v30  ;;  %v7598_v38 = vld [vmem:[%s11864_s26 + $0x1b0] sm:$0xff]  ;;  %v7683_v30 = vld [vmem:[%s11867_s10 + $0x378] sm:$0xff]  ;;  %v7680_v35 = vld [vmem:[%s11867_s10 + $0x360] sm:$0xff] }
0x153e   : > { %v5373_v42 = vadd.f32 %v5369_v39, %v5365_v40  ;;  %v7599_v39 = vld [vmem:[%s11864_s26 + $0x1b8] sm:$0xff] }
0x153f   : > { %v5374_v44 = vadd.f32 %v5370_v41, %v5366_v7  ;;  %v9280_v40 = vpack.c.bf16 %v7599_v39, %v7598_v38  ;;  %v7600_v41 = vld [vmem:[%s11864_s26 + $0x1c0] sm:$0xff]  ;;  %v7682_v38 = vld [vmem:[%s11867_s10 + $0x370] sm:$0xff] }
0x1540   : > { %5375 = vst [vmem:[#allocation7] sm:$0x1e] %v5373_v42  ;;  %v7601_v42 = vld [vmem:[%s11864_s26 + $0x1c8] sm:$0xff]  ;;  %v9424_v39 = vpack.c.bf16 %v7682_v38, %v7680_v35 }
0x1541   : > { %5376 = vst.msk [vmem:[#allocation7 + $0x8] sm:$0x1e] %vm2160_vm7, %v5374_v44  ;;  %v9283_v7 = vpack.c.bf16 %v7601_v42, %v7600_v41  ;;  %v7602_v44 = vld [vmem:[%s11864_s26 + $0x1d0] sm:$0xff]  ;;  %v7687_v41 = vld [vmem:[%s11867_s10 + $0x398] sm:$0xff]  ;;  %v7684_v42 = vld [vmem:[%s11867_s10 + $0x380] sm:$0xff] }
0x1542   : > { %v9286_v0 = vpack.c.bf16 %v7603_v45, %v7602_v44  ;;  %v7686_v44 = vld [vmem:[%s11867_s10 + $0x390] sm:$0xff]  ;;  %v5831_v35 = vld [vmem:[%s11867_s10 + $0xc8] sm:$0xff] }
0x1543   : > { %v9428_v45 = vpack.c.bf16 %v7686_v44, %v7684_v42  ;;  %v5835_v42 = vld [vmem:[%s11867_s10 + $0xe8] sm:$0xff] }
0x1547   : > { %v5377_v46 = vld [vmem:[#allocation7] sm:$0x3f] }
0x1548   : > { %v5378_v1 = vld [vmem:[#allocation7 + $0x8] sm:$0x3f]  ;;  %v11345_v47 = vmax.f32 %v5377_v46, 0.0  ;;  %v7604_v46 = vld [vmem:[%s11864_s26 + $0x1e0] sm:$0xff] }
0x1549   : > { %v11343_v9 = vmax.f32 %v5378_v1, 0.0  ;;  %v7605_v1 = vld [vmem:[%s11864_s26 + $0x1e8] sm:$0xff] }
0x154a   : > { %v5512_v19 = vrot.slane %v11345_v47, 1  ;;  %v5613_v58 = vrot.slane %v11345_v47, 2 }
0x154b   : > { %7565 = vmatprep.mubr.msk.f32.mxu1 %vm2213_vm8, %v11343_v9  ;;  %v5513_v48 = vrot.slane %v11343_v9, 1  ;;  %v5614_v25 = vrot.slane %v11343_v9, 2  ;;  %v9289_v9 = vpack.c.bf16 %v7605_v1, %v7604_v46  ;;  %v7691_v46 = vld [vmem:[%s11867_s10 + $0x3b8] sm:$0xff]  ;;  %v7688_v1 = vld [vmem:[%s11867_s10 + $0x3a0] sm:$0xff] }
0x154c   : > { %5474 = vmatmul.mubr.f32.vlgmr.msra.gmra.mrb[18].mxu1 %v11345_v47  ;;  %v7671_v47 = vld [vmem:[%s11867_s10 + $0x318] sm:$0xff] }
0x154d   : > { %9236 = vmatpush1.bf16.msra.mxu1 %v9235_v14  ;;  %7591 = vmatprep.mubr.msk.f32.mxu1 %vm2213_vm8, %v5513_v48  ;;  %v7606_v14 = vld [vmem:[%s11864_s26 + $0x1f0] sm:$0xff]  ;;  %v7608_v48 = vld [vmem:[%s11864_s26 + $0x200] sm:$0xff] }
0x154e   : > { %9237 = vmatprep.subr.bf16.mxu1 %v9796_v34  ;;  %v9292_v3 = vpack.c.bf16 %v7607_v13, %v7606_v14  ;;  %v7690_v14 = vld [vmem:[%s11867_s10 + $0x3b0] sm:$0xff] }
0x154f   : > { %v9432_v13 = vpack.c.bf16 %v7690_v14, %v7688_v1  ;;  %v7699_v14 = vld [vmem:[%s11867_s10 + $0x3f8] sm:$0xff] }
0x1551   : > { %9239 = vmatpush1.bf16.msra.mxu1 %v9238_v50  ;;  %v7609_v50 = vld [vmem:[%s11864_s26 + $0x208] sm:$0xff] }
0x1552   : > { %9240 = vmatprep.subr.bf16.mxu1 %v9796_v34  ;;  %v9295_v32 = vpack.c.bf16 %v7609_v50, %v7608_v48  ;;  %v7695_v48 = vld [vmem:[%s11867_s10 + $0x3d8] sm:$0xff]  ;;  %v7692_v50 = vld [vmem:[%s11867_s10 + $0x3c0] sm:$0xff] }
0x1555   : > { %9242 = vmatpush1.bf16.msra.mxu1 %v9241_v51  ;;  %v7611_v51 = vld [vmem:[%s11864_s26 + $0x218] sm:$0xff] }
0x1556   : > { %9243 = vmatprep.subr.bf16.mxu1 %v9796_v34  ;;  %v9298_v37 = vpack.c.bf16 %v7611_v51, %v7610_v29  ;;  %v7694_v29 = vld [vmem:[%s11867_s10 + $0x3d0] sm:$0xff] }
0x1557   : > { %v9436_v51 = vpack.c.bf16 %v7694_v29, %v7692_v50  ;;  %v5841_v29 = vld [vmem:[%s11867_s10 + $0x118] sm:$0xff] }
0x1559   : > { %9245 = vmatpush1.bf16.msra.mxu1 %v9244_v52  ;;  %v7613_v52 = vld [vmem:[%s11864_s26 + $0x228] sm:$0xff] }
0x155a   : > { %9246 = vmatprep.subr.bf16.mxu1 %v9796_v34  ;;  %v9301_v53 = vpack.c.bf16 %v7613_v52, %v7612_v54  ;;  %v5806_v54 = vld [vmem:[%s11867_s10] sm:$0xff]  ;;  %v5808_v52 = vld [vmem:[%s11867_s10 + $0x10] sm:$0xff] }
0x155d   : > { %9248 = vmatpush1.bf16.msra.mxu1 %v9247_v56  ;;  %v7615_v56 = vld [vmem:[%s11864_s26 + $0x238] sm:$0xff] }
0x155e   : > { %9249 = vmatprep.subr.bf16.mxu1 %v9796_v34  ;;  %v9304_v57 = vpack.c.bf16 %v7615_v56, %v7614_v55  ;;  %v5811_v55 = vld [vmem:[%s11867_s10 + $0x28] sm:$0xff]  ;;  %v5813_v56 = vld [vmem:[%s11867_s10 + $0x38] sm:$0xff] }
0x1561   : > { %9251 = vmatpush1.bf16.msra.mxu1 %v9250_v59  ;;  %v5695_v59 = vld [vmem:[%s11865_s1 + $0x28] sm:$0xff] }
0x1562   : > { %9252 = vmatprep.subr.bf16.mxu1 %v9796_v34  ;;  %v9310_v60 = vpack.c.bf16 %v5697_v28, %v5695_v59  ;;  %v9316_v59 = vpack.c.bf16 %v5808_v52, %v5806_v54  ;;  %v5840_v54 = vld [vmem:[%s11867_s10 + $0x110] sm:$0xff] }
0x1564   : > { %9311 = vmatprep.subr.bf16.mxu0 %v9310_v60  ;;  %v9318_v60 = vpack.c.bf16 %v5813_v56, %v5811_v55  ;;  %v7703_v55 = vld [vmem:[%s11867_s10 + $0x418] sm:$0xff] }
0x1565   : > { %9254 = vmatpush1.bf16.msra.mxu1 %v9253_v61  ;;  %v5694_v61 = vld [vmem:[%s11865_s1 + $0x20] sm:$0xff] }
0x1566   : > { %9255 = vmatprep.subr.bf16.mxu1 %v9796_v34  ;;  %v9312_v63 = vpack.c.bf16 %v5696_v62, %v5694_v61  ;;  %v5810_v61 = vld [vmem:[%s11867_s10 + $0x20] sm:$0xff]  ;;  %v5812_v62 = vld [vmem:[%s11867_s10 + $0x30] sm:$0xff] }
0x1568   : > { %9313 = vmatpush1.bf16.msra.mxu0 %v9312_v63  ;;  %v5815_v63 = vld [vmem:[%s11867_s10 + $0x48] sm:$0xff] }
0x1569   : > { %9257 = vmatpush1.bf16.msra.mxu1 %v9256_v2  ;;  %v5807_v2 = vld [vmem:[%s11867_s10 + $0x8] sm:$0xff] }
0x156a   : > { %9258 = vmatprep.subr.bf16.mxu1 %v9796_v34  ;;  %v9314_v5 = vpack.c.bf16 %v5809_v4, %v5807_v2  ;;  %v5817_v2 = vld [vmem:[%s11867_s10 + $0x58] sm:$0xff]  ;;  %v9320_v4 = vpack.c.bf16 %v5812_v62, %v5810_v61  ;;  %v5842_v62 = vld [vmem:[%s11867_s10 + $0x120] sm:$0xff] }
0x156c   : > { %9315 = vmatprep.subr.bf16.mxu0 %v9314_v5  ;;  %v9322_v5 = vpack.c.bf16 %v5817_v2, %v5815_v63  ;;  %v5844_v63 = vld [vmem:[%s11867_s10 + $0x130] sm:$0xff] }
0x156d   : > { %9260 = vmatpush1.bf16.msra.mxu1 %v9259_v6  ;;  %v7669_v6 = vld [vmem:[%s11867_s10 + $0x308] sm:$0xff]  ;;  %v9352_v2 = vpack.c.bf16 %v5844_v63, %v5842_v62 }
0x156e   : > { %9261 = vmatprep.subr.bf16.mxu1 %v9796_v34  ;;  %v9410_v27 = vpack.c.bf16 %v7671_v47, %v7669_v6  ;;  %v5814_v6 = vld [vmem:[%s11867_s10 + $0x40] sm:$0xff]  ;;  %v5816_v47 = vld [vmem:[%s11867_s10 + $0x50] sm:$0xff] }
0x1571   : > { %9263 = vmatpush1.bf16.msra.mxu1 %v9262_v23  ;;  %v7670_v23 = vld [vmem:[%s11867_s10 + $0x310] sm:$0xff] }
0x1572   : > { %9264 = vmatprep.subr.bf16.mxu1 %v9796_v34  ;;  %v9412_v21 = vpack.c.bf16 %v7670_v23, %v7668_v8  ;;  %v5821_v8 = vld [vmem:[%s11867_s10 + $0x78] sm:$0xff]  ;;  %v9324_v23 = vpack.c.bf16 %v5816_v47, %v5814_v6  ;;  %v7704_v47 = vld [vmem:[%s11867_s10 + $0x420] sm:$0xff] }
0x1575   : > { %9266 = vmatpush1.bf16.msra.mxu1 %v9265_v12  ;;  %v7675_v12 = vld [vmem:[%s11867_s10 + $0x338] sm:$0xff] }
0x1576   : > { %9267 = vmatprep.subr.bf16.mxu1 %v9796_v34  ;;  %v9414_v20 = vpack.c.bf16 %v7675_v12, %v7673_v10  ;;  %v5818_v10 = vld [vmem:[%s11867_s10 + $0x60] sm:$0xff]  ;;  %v5820_v12 = vld [vmem:[%s11867_s10 + $0x70] sm:$0xff] }
0x1579   : > { %9269 = vmatpush1.bf16.msra.mxu1 %v9268_v15  ;;  %v7674_v15 = vld [vmem:[%s11867_s10 + $0x330] sm:$0xff] }
0x157a   : > { %9270 = vmatprep.subr.bf16.mxu1 %v9796_v34  ;;  %v9416_v16 = vpack.c.bf16 %v7674_v15, %v7672_v11  ;;  %v5823_v11 = vld [vmem:[%s11867_s10 + $0x88] sm:$0xff]  ;;  %v9328_v15 = vpack.c.bf16 %v5820_v12, %v5818_v10  ;;  %v5846_v12 = vld [vmem:[%s11867_s10 + $0x140] sm:$0xff] }
0x157c   : > { %5582 = vmatmul.mubr.f32.vlgmr.msra.gmra.mrb[18].mxu1 %v5512_v19  ;;  %v7676_v19 = vld [vmem:[%s11867_s10 + $0x340] sm:$0xff] }
0x157d   : > { %9272 = vmatpush1.bf16.msra.mxu1 %v9271_v18  ;;  %7616 = vmatprep.mubr.msk.f32.mxu1 %vm2213_vm8, %v5614_v25  ;;  %v7679_v18 = vld [vmem:[%s11867_s10 + $0x358] sm:$0xff]  ;;  %v9420_v25 = vpack.c.bf16 %v7678_v24, %v7676_v19  ;;  %v5827_v19 = vld [vmem:[%s11867_s10 + $0xa8] sm:$0xff] }
0x157e   : > { %9273 = vmatprep.subr.bf16.mxu1 %v9796_v34  ;;  %v9418_v22 = vpack.c.bf16 %v7679_v18, %v7677_v17  ;;  %v5822_v17 = vld [vmem:[%s11867_s10 + $0x80] sm:$0xff]  ;;  %v5824_v18 = vld [vmem:[%s11867_s10 + $0x90] sm:$0xff] }
0x157f   : > { %v9332_v24 = vpack.c.bf16 %v5824_v18, %v5822_v17  ;;  %v7708_v17 = vld [vmem:[%s11867_s10 + $0x440] sm:$0xff]  ;;  %v7710_v18 = vld [vmem:[%s11867_s10 + $0x450] sm:$0xff] }
0x1581   : > { %9275 = vmatpush1.bf16.msra.mxu1 %v9274_v26  ;;  %v7681_v26 = vld [vmem:[%s11867_s10 + $0x368] sm:$0xff] }
0x1582   : > { %9276 = vmatprep.subr.bf16.mxu1 %v9796_v34 }
0x1585   : > { %9278 = vmatpush1.bf16.msra.mxu1 %v9277_v36  ;;  %v9422_v36 = vpack.c.bf16 %v7683_v30, %v7681_v26  ;;  %v5826_v26 = vld [vmem:[%s11867_s10 + $0xa0] sm:$0xff]  ;;  %v5828_v30 = vld [vmem:[%s11867_s10 + $0xb0] sm:$0xff] }
0x1586   : > { %9279 = vmatprep.subr.bf16.mxu1 %v9796_v34  ;;  %v9336_v38 = vpack.c.bf16 %v5828_v30, %v5826_v26  ;;  %v5850_v26 = vld [vmem:[%s11867_s10 + $0x160] sm:$0xff] }
0x1589   : > { %9281 = vmatpush1.bf16.msra.mxu1 %v9280_v40  ;;  %v7685_v40 = vld [vmem:[%s11867_s10 + $0x388] sm:$0xff] }
0x158a   : > { %9282 = vmatprep.subr.bf16.mxu1 %v9796_v34 }
0x158d   : > { %9284 = vmatpush1.bf16.msra.mxu1 %v9283_v7  ;;  %v9426_v7 = vpack.c.bf16 %v7687_v41, %v7685_v40  ;;  %v5830_v40 = vld [vmem:[%s11867_s10 + $0xc0] sm:$0xff]  ;;  %v5832_v41 = vld [vmem:[%s11867_s10 + $0xd0] sm:$0xff] }
0x158e   : > { %9285 = vmatprep.subr.bf16.mxu1 %v9796_v34  ;;  %v9340_v44 = vpack.c.bf16 %v5832_v41, %v5830_v40  ;;  %v7712_v41 = vld [vmem:[%s11867_s10 + $0x460] sm:$0xff] }
0x1591   : > { %9287 = vmatpush1.bf16.msra.mxu1 %v9286_v0  ;;  %v7689_v0 = vld [vmem:[%s11867_s10 + $0x3a8] sm:$0xff] }
0x1592   : > { %9288 = vmatprep.subr.bf16.mxu1 %v9796_v34 }
0x1595   : > { %9290 = vmatpush1.bf16.msra.mxu1 %v9289_v9  ;;  %v9430_v9 = vpack.c.bf16 %v7691_v46, %v7689_v0  ;;  %v5834_v0 = vld [vmem:[%s11867_s10 + $0xe0] sm:$0xff]  ;;  %v5836_v46 = vld [vmem:[%s11867_s10 + $0xf0] sm:$0xff] }
0x1596   : > { %9291 = vmatprep.subr.bf16.mxu1 %v9796_v34  ;;  %v9344_v1 = vpack.c.bf16 %v5836_v46, %v5834_v0  ;;  %v7718_v46 = vld [vmem:[%s11867_s10 + $0x488] sm:$0xff] }
0x1599   : > { %9293 = vmatpush1.bf16.msra.mxu1 %v9292_v3  ;;  %v7693_v3 = vld [vmem:[%s11867_s10 + $0x3c8] sm:$0xff] }
0x159a   : > { %9294 = vmatprep.subr.bf16.mxu1 %v9796_v34 }
0x159d   : > { %9296 = vmatpush1.bf16.msra.mxu1 %v9295_v32  ;;  %v9434_v32 = vpack.c.bf16 %v7695_v48, %v7693_v3  ;;  %v7696_v3 = vld [vmem:[%s11867_s10 + $0x3e0] sm:$0xff]  ;;  %v7698_v48 = vld [vmem:[%s11867_s10 + $0x3f0] sm:$0xff] }
0x159e   : > { %9297 = vmatprep.subr.bf16.mxu1 %v9796_v34  ;;  %v9440_v50 = vpack.c.bf16 %v7698_v48, %v7696_v3 }
0x15a1   : > { %9299 = vmatpush1.bf16.msra.mxu1 %v9298_v37  ;;  %v7566_v37 = vld [vmem:[%s11868_s2] ss:$0 sm:$0xff]  ;;  %s11869_s2 = sld [smem:[#allocation26_spill]] }
0x15a2   : > { %9300 = vmatprep.subr.bf16.mxu1 %v9796_v34 }
0x15a5   : > { %9302 = vmatpush1.bf16.msra.mxu1 %v9301_v53 }
0x15a6   : > { %9303 = vmatprep.subr.bf16.mxu1 %v9796_v34 }
0x15a9   : > { %9305 = vmatpush1.bf16.msra.mxu1 %v9304_v57 }
0x15aa   : > { %9411 = vmatprep.subr.bf16.mxu1 %v9410_v27  ;;  %v5819_v27 = vld [vmem:[%s11867_s10 + $0x68] sm:$0xff] }
0x15ac   : > { %5683 = vmatmul.mubr.f32.vlgmr.msra.gmra.mrb[18].mxu1 %v5613_v58 }
0x15ad   : > { %9413 = vmatpush1.bf16.msra.mxu1 %v9412_v21  ;;  %v9326_v21 = vpack.c.bf16 %v5821_v8, %v5819_v27  ;;  %v7706_v27 = vld [vmem:[%s11867_s10 + $0x430] sm:$0xff] }
0x15ae   : > { %9415 = vmatprep.subr.bf16.mxu1 %v9414_v20  ;;  %v5825_v20 = vld [vmem:[%s11867_s10 + $0x98] sm:$0xff]  ;;  %v9448_v8 = vpack.c.bf16 %v7706_v27, %v7704_v47  ;;  %v7625_v47 = vld [vmem:[%s11867_s10 + $0x1b0] sm:$0xff]  ;;  %v7722_v27 = vld [vmem:[%s11867_s10 + $0x4a8] sm:$0xff] }
0x15b1   : > { %9417 = vmatpush1.bf16.msra.mxu1 %v9416_v16  ;;  %v9330_v16 = vpack.c.bf16 %v5825_v20, %v5823_v11  ;;  %v5848_v11 = vld [vmem:[%s11867_s10 + $0x150] sm:$0xff]  ;;  %v7709_v20 = vld [vmem:[%s11867_s10 + $0x448] sm:$0xff] }
0x15b2   : > { %9419 = vmatprep.subr.bf16.mxu1 %v9418_v22  ;;  %v5829_v22 = vld [vmem:[%s11867_s10 + $0xb8] sm:$0xff] }
0x15b5   : > { %9421 = vmatpush1.bf16.msra.mxu1 %v9420_v25  ;;  %v9334_v25 = vpack.c.bf16 %v5829_v22, %v5827_v19  ;;  %v9452_v22 = vpack.c.bf16 %v7710_v18, %v7708_v17  ;;  %v7723_v17 = vld [vmem:[%s11867_s10 + $0x4b0] sm:$0xff]  ;;  %v7627_v18 = vld [vmem:[%s11867_s10 + $0x1c0] sm:$0xff] }
0x15b6   : > { %9423 = vmatprep.subr.bf16.mxu1 %v9422_v36  ;;  %v5833_v36 = vld [vmem:[%s11867_s10 + $0xd8] sm:$0xff] }
0x15b9   : > { %9425 = vmatpush1.bf16.msra.mxu1 %v9424_v39  ;;  %v9338_v39 = vpack.c.bf16 %v5833_v36, %v5831_v35  ;;  %v5852_v35 = vld [vmem:[%s11867_s10 + $0x170] sm:$0xff]  ;;  %v7713_v36 = vld [vmem:[%s11867_s10 + $0x468] sm:$0xff] }
0x15ba   : > { %9427 = vmatprep.subr.bf16.mxu1 %v9426_v7  ;;  %v5837_v7 = vld [vmem:[%s11867_s10 + $0xf8] sm:$0xff] }
0x15bd   : > { %9429 = vmatpush1.bf16.msra.mxu1 %v9428_v45  ;;  %v9342_v45 = vpack.c.bf16 %v5837_v7, %v5835_v42  ;;  %v7714_v42 = vld [vmem:[%s11867_s10 + $0x470] sm:$0xff] }
0x15be   : > { %9431 = vmatprep.subr.bf16.mxu1 %v9430_v9  ;;  %v7697_v9 = vld [vmem:[%s11867_s10 + $0x3e8] sm:$0xff]  ;;  %v9456_v7 = vpack.c.bf16 %v7714_v42, %v7712_v41  ;;  %v7727_v41 = vld [vmem:[%s11867_s10 + $0x4d0] sm:$0xff]  ;;  %v7631_v42 = vld [vmem:[%s11867_s10 + $0x1e0] sm:$0xff] }
0x15c1   : > { %9433 = vmatpush1.bf16.msra.mxu1 %v9432_v13  ;;  %v9438_v13 = vpack.c.bf16 %v7699_v14, %v7697_v9  ;;  %v5698_v14 = vld [vmem:[%s11869_s2] sm:$0x3]  ;;  %s11870_s2 = sld [smem:[#allocation28_spill]] }
0x15c2   : > { %9435 = vmatprep.subr.bf16.mxu1 %v9434_v32  ;;  %v5839_v32 = vld [vmem:[%s11867_s10 + $0x108] sm:$0xff]  ;;  %v5707_v3 = vrot.slane %v5698_v14, %v10163_v33 }
0x15c5   : > { %9437 = vmatpush1.bf16.msra.mxu1 %v9436_v51  ;;  %v9346_v51 = vpack.c.bf16 %v5841_v29, %v5839_v32 }
0x15c6   : > { %9439 = vmatprep.subr.bf16.mxu1 %v9438_v13  ;;  %v5703_v13 = vrot.slane %v5698_v14, %v10160_v31 }
0x15c9   : > { %9441 = vmatpush1.bf16.msra.mxu1 %v9440_v50 }
0x167f   : > { %v5684_v53 = vpop.f32.mrb[18].mxu1 }
0x1680   : > { %v9633_v57 = vadd.f32 %v7566_v37, %v5684_v53  ;;  %v5686_v58 = vpop.f32.mrb[19].mxu1  ;;  %v5838_v37 = vld [vmem:[%s11867_s10 + $0x100] sm:$0xff]  ;;  %v7701_v53 = vld [vmem:[%s11867_s10 + $0x408] sm:$0xff] }
0x1681   : > { %v9348_v52 = vpack.c.bf16 %v5840_v54, %v5838_v37  ;;  %v9442_v56 = vpack.c.bf16 %v7703_v55, %v7701_v53  ;;  %v7702_v58 = vld [vmem:[%s11867_s10 + $0x410] sm:$0xff]  ;;  %v5784_v37 = vld [vmem:[#allocation7] sm:$0x1e] }
0x1682   : > { %v5689_v28 = vmax.f32 %v9633_v57, 0.0  ;;  %v7700_v57 = vld [vmem:[%s11867_s10 + $0x400] sm:$0xff]  ;;  %v5785_v53 = vld [vmem:[#allocation7 + $0x8] sm:$0x1e] }
0x1683   : > { %9443 = vmatprep.subr.bf16.mxu1 %v9442_v56  ;;  %v7619_v56 = vld [vmem:[%s11867_s10 + $0x180] sm:$0xff] }
0x1684   : > { %7617 = vmatmul.mubr.msk.f32.vlgmr.msra.gmra.mrb[22].mxu0 %vm1745_vm4, %v5689_v28  ;;  %v5843_v28 = vld [vmem:[%s11867_s10 + $0x128] sm:$0xff] }
0x1685   : > { %9317 = vmatpush1.bf16.msra.mxu0 %v9316_v59  ;;  %v9444_v59 = vpack.c.bf16 %v7702_v58, %v7700_v57  ;;  %v7621_v57 = vld [vmem:[%s11867_s10 + $0x190] sm:$0xff] }
0x1686   : > { %9319 = vmatprep.subr.bf16.mxu0 %v9318_v60  ;;  %v5845_v60 = vld [vmem:[%s11867_s10 + $0x138] sm:$0xff]  ;;  %v9364_v63 = vpack.c.bf16 %v7621_v57, %v7619_v56  ;;  %v7733_v57 = vld [vmem:[%s11867_s10 + $0x500] sm:$0xff] }
0x1687   : > { %v9350_v61 = vpack.c.bf16 %v5845_v60, %v5843_v28  ;;  %9445 = vmatpush1.bf16.msra.mxu1 %v9444_v59  ;;  %v7624_v59 = vld [vmem:[%s11867_s10 + $0x1a8] sm:$0xff]  ;;  %v7626_v28 = vld [vmem:[%s11867_s10 + $0x1b8] sm:$0xff] }
0x1689   : > { %9321 = vmatpush1.bf16.msra.mxu0 %v9320_v4  ;;  %v7705_v4 = vld [vmem:[%s11867_s10 + $0x428] sm:$0xff] }
0x168a   : > { %9323 = vmatprep.subr.bf16.mxu0 %v9322_v5  ;;  %v7707_v5 = vld [vmem:[%s11867_s10 + $0x438] sm:$0xff] }
0x168b   : > { %v9446_v6 = vpack.c.bf16 %v7707_v5, %v7705_v4  ;;  %v7719_v4 = vld [vmem:[%s11867_s10 + $0x490] sm:$0xff]  ;;  %v7623_v5 = vld [vmem:[%s11867_s10 + $0x1a0] sm:$0xff] }
0x168d   : > { %9325 = vmatpush1.bf16.msra.mxu0 %v9324_v23  ;;  %v5847_v23 = vld [vmem:[%s11867_s10 + $0x148] sm:$0xff]  ;;  %9447 = vmatprep.subr.bf16.mxu1 %v9446_v6  ;;  %v9366_v6 = vpack.c.bf16 %v7626_v28, %v7624_v59  ;;  %v7639_v59 = vld [vmem:[%s11867_s10 + $0x220] sm:$0xff] }
0x168e   : > { %9327 = vmatprep.subr.bf16.mxu0 %v9326_v21  ;;  %v5849_v21 = vld [vmem:[%s11867_s10 + $0x158] sm:$0xff]  ;;  %9449 = vmatpush1.bf16.msra.mxu1 %v9448_v8 }
0x168f   : > { %v9354_v10 = vpack.c.bf16 %v5849_v21, %v5847_v23  ;;  %v7724_v8 = vld [vmem:[%s11867_s10 + $0x4b8] sm:$0xff]  ;;  %v7628_v21 = vld [vmem:[%s11867_s10 + $0x1c8] sm:$0xff] }
0x1691   : > { %9329 = vmatpush1.bf16.msra.mxu0 %v9328_v15  ;;  %v9356_v15 = vpack.c.bf16 %v5848_v11, %v5846_v12 }
0x1692   : > { %9331 = vmatprep.subr.bf16.mxu0 %v9330_v16  ;;  %v7711_v16 = vld [vmem:[%s11867_s10 + $0x458] sm:$0xff] }
0x1693   : > { %v9450_v19 = vpack.c.bf16 %v7711_v16, %v7709_v20  ;;  %v9368_v20 = vpack.c.bf16 %v7625_v47, %v7623_v5  ;;  %v7721_v16 = vld [vmem:[%s11867_s10 + $0x4a0] sm:$0xff] }
0x1695   : > { %9333 = vmatpush1.bf16.msra.mxu0 %v9332_v24  ;;  %v5851_v24 = vld [vmem:[%s11867_s10 + $0x168] sm:$0xff]  ;;  %9451 = vmatprep.subr.bf16.mxu1 %v9450_v19 }
0x1696   : > { %9335 = vmatprep.subr.bf16.mxu0 %v9334_v25  ;;  %v5853_v25 = vld [vmem:[%s11867_s10 + $0x178] sm:$0xff]  ;;  %9453 = vmatpush1.bf16.msra.mxu1 %v9452_v22 }
0x1697   : > { %v9358_v30 = vpack.c.bf16 %v5853_v25, %v5851_v24  ;;  %v7629_v24 = vld [vmem:[%s11867_s10 + $0x1d0] sm:$0xff]  ;;  %v7726_v25 = vld [vmem:[%s11867_s10 + $0x4c8] sm:$0xff] }
0x1699   : > { %9337 = vmatpush1.bf16.msra.mxu0 %v9336_v38  ;;  %v7715_v38 = vld [vmem:[%s11867_s10 + $0x478] sm:$0xff] }
0x169a   : > { %9339 = vmatprep.subr.bf16.mxu0 %v9338_v39  ;;  %v9360_v39 = vpack.c.bf16 %v5852_v35, %v5850_v26  ;;  %v9454_v40 = vpack.c.bf16 %v7715_v38, %v7713_v36  ;;  %v7728_v26 = vld [vmem:[%s11867_s10 + $0x4d8] sm:$0xff]  ;;  %v9464_v36 = vpack.c.bf16 %v7723_v17, %v7721_v16  ;;  %v9372_v38 = vpack.c.bf16 %v7629_v24, %v7627_v18  ;;  %v7743_v24 = vld [vmem:[%s11867_s10 + $0x550] sm:$0xff] }
0x169b   : > { %v7634_v35 = vld [vmem:[%s11867_s10 + $0x1f8] sm:$0xff] }
0x169c   : > { %9455 = vmatprep.subr.bf16.mxu1 %v9454_v40  ;;  %v7725_v40 = vld [vmem:[%s11867_s10 + $0x4c0] sm:$0xff]  ;;  %v7650_v16 = vld [vmem:[%s11867_s10 + $0x278] sm:$0xff] }
0x169d   : > { %9341 = vmatpush1.bf16.msra.mxu0 %v9340_v44  ;;  %v7620_v44 = vld [vmem:[%s11867_s10 + $0x188] sm:$0xff]  ;;  %9457 = vmatpush1.bf16.msra.mxu1 %v9456_v7 }
0x169e   : > { %9343 = vmatprep.subr.bf16.mxu0 %v9342_v45  ;;  %v7622_v45 = vld [vmem:[%s11867_s10 + $0x198] sm:$0xff] }
0x169f   : > { %v9362_v0 = vpack.c.bf16 %v7622_v45, %v7620_v44  ;;  %v7633_v44 = vld [vmem:[%s11867_s10 + $0x1f0] sm:$0xff]  ;;  %v7730_v45 = vld [vmem:[%s11867_s10 + $0x4e8] sm:$0xff] }
0x16a0   : > { %v9376_v14 = vpack.c.bf16 %v7633_v44, %v7631_v42  ;;  %v7747_v44 = vld [vmem:[%s11867_s10 + $0x570] sm:$0xff] }
0x16a1   : > { %9345 = vmatpush1.bf16.msra.mxu0 %v9344_v1  ;;  %v7720_v1 = vld [vmem:[%s11867_s10 + $0x498] sm:$0xff] }
0x16a2   : > { %9347 = vmatprep.subr.bf16.mxu0 %v9346_v51  ;;  %v9458_v9 = vpack.c.bf16 %v7720_v1, %v7718_v46  ;;  %v7636_v46 = vld [vmem:[%s11867_s10 + $0x208] sm:$0xff]  ;;  %v7638_v1 = vld [vmem:[%s11867_s10 + $0x218] sm:$0xff] }
0x16a4   : > { %9459 = vmatprep.subr.bf16.mxu1 %v9458_v9  ;;  %v9468_v9 = vpack.c.bf16 %v7727_v41, %v7725_v40 }
0x16a5   : > { %9349 = vmatpush1.bf16.msra.mxu0 %v9348_v52 }
0x16a6   : > { %9351 = vmatprep.subr.bf16.mxu0 %v9350_v61 }
0x16a9   : > { %9353 = vmatpush1.bf16.msra.mxu0 %v9352_v2  ;;  %v7717_v2 = vld [vmem:[%s11867_s10 + $0x480] sm:$0xff] }
0x16aa   : > { %9355 = vmatprep.subr.bf16.mxu0 %v9354_v10  ;;  %v7630_v10 = vld [vmem:[%s11867_s10 + $0x1d8] sm:$0xff]  ;;  %v9460_v12 = vpack.c.bf16 %v7719_v4, %v7717_v2  ;;  %v7644_v2 = vld [vmem:[%s11867_s10 + $0x248] sm:$0xff] }
0x16ab   : > { %v9370_v22 = vpack.c.bf16 %v7630_v10, %v7628_v21  ;;  %v7646_v4 = vld [vmem:[%s11867_s10 + $0x258] sm:$0xff]  ;;  %v7645_v10 = vld [vmem:[%s11867_s10 + $0x250] sm:$0xff] }
0x16ac   : > { %v9386_v21 = vpack.c.bf16 %v7646_v4, %v7644_v2  ;;  %v7661_v2 = vld [vmem:[%s11867_s10 + $0x2d0] sm:$0xff]  ;;  %v7758_v4 = vld [vmem:[%s11867_s10 + $0x5c8] sm:$0xff] }
0x16ad   : > { %9357 = vmatpush1.bf16.msra.mxu0 %v9356_v15  ;;  %v9462_v15 = vpack.c.bf16 %v7724_v8, %v7722_v27  ;;  %v7737_v27 = vld [vmem:[%s11867_s10 + $0x520] sm:$0xff]  ;;  %v7739_v8 = vld [vmem:[%s11867_s10 + $0x530] sm:$0xff] }
0x16ae   : > { %9359 = vmatprep.subr.bf16.mxu0 %v9358_v30  ;;  %v7632_v30 = vld [vmem:[%s11867_s10 + $0x1e8] sm:$0xff]  ;;  %v9480_v17 = vpack.c.bf16 %v7739_v8, %v7737_v27 }
0x16af   : > { %v9374_v7 = vpack.c.bf16 %v7634_v35, %v7632_v30  ;;  %v7649_v30 = vld [vmem:[%s11867_s10 + $0x270] sm:$0xff]  ;;  %v7746_v35 = vld [vmem:[%s11867_s10 + $0x568] sm:$0xff] }
0x16b1   : > { %9361 = vmatpush1.bf16.msra.mxu0 %v9360_v39  ;;  %v9466_v39 = vpack.c.bf16 %v7728_v26, %v7726_v25  ;;  %v7647_v25 = vld [vmem:[%s11867_s10 + $0x260] sm:$0xff] }
0x16b2   : > { %9363 = vmatprep.subr.bf16.mxu0 %v9362_v0  ;;  %v7732_v0 = vld [vmem:[%s11867_s10 + $0x4f8] sm:$0xff]  ;;  %v9392_v41 = vpack.c.bf16 %v7649_v30, %v7647_v25  ;;  %v7763_v25 = vld [vmem:[%s11867_s10 + $0x5f0] sm:$0xff]  ;;  %v6426_v30 = vld [vmem:[%s9976_s6 + $0x8] sm:$0xff] }
0x1757   : > { %v5779_v48 = vpop.f32.mrb[22].mxu0 }
0x1758   : > { %v5780_v50 = vadd.f32 %v5779_v48, %v5703_v13  ;;  %v5781_v32 = vpop.f32.mrb[23].mxu0  ;;  %v9470_v13 = vpack.c.bf16 %v7732_v0, %v7730_v45  ;;  %v7731_v48 = vld [vmem:[%s11867_s10 + $0x4f0] sm:$0xff]  ;;  %v7651_v45 = vld [vmem:[%s11867_s10 + $0x280] sm:$0xff] }
0x1759   : > { %v5782_v29 = vadd.f32 %v5781_v32, %v5707_v3  ;;  %v7729_v3 = vld [vmem:[%s11867_s10 + $0x4e0] sm:$0xff]  ;;  %v9378_v32 = vpack.c.bf16 %v7638_v1, %v7636_v46  ;;  %v7653_v46 = vld [vmem:[%s11867_s10 + $0x290] sm:$0xff]  ;;  %v7750_v1 = vld [vmem:[%s11867_s10 + $0x588] sm:$0xff] }
0x175a   : > { %v5788_v51 = vrot.slane %v5780_v50, 7  ;;  %v7635_v50 = vld [vmem:[%s11867_s10 + $0x200] sm:$0xff] }
0x175b   : > { %v5789_v54 = vrot.slane %v5782_v29, 7  ;;  %v7637_v29 = vld [vmem:[%s11867_s10 + $0x210] sm:$0xff] }
0x175c   : > { %v5792_v52 = vadd.f32 %v5788_v51, %v5784_v37  ;;  %v7734_v51 = vld [vmem:[%s11867_s10 + $0x508] sm:$0xff]  ;;  %v7736_v37 = vld [vmem:[%s11867_s10 + $0x518] sm:$0xff] }
0x175d   : > { %v5793_v55 = vadd.f32 %v5789_v54, %v5785_v53  ;;  %v7640_v54 = vld [vmem:[%s11867_s10 + $0x228] sm:$0xff]  ;;  %v9472_v53 = vpack.c.bf16 %v7731_v48, %v7729_v3  ;;  %v9474_v56 = vpack.c.bf16 %v7736_v37, %v7734_v51  ;;  %v9396_v48 = vpack.c.bf16 %v7653_v46, %v7651_v45  ;;  %v7655_v51 = vld [vmem:[%s11867_s10 + $0x2a0] sm:$0xff]  ;;  %v7791_v45 = vld [vmem:[%s9976_s6 + $0x150] sm:$0xff] }
0x175e   : > { %5794 = vst [vmem:[#allocation7] sm:$0x1e] %v5792_v52  ;;  %v7642_v52 = vld [vmem:[%s11867_s10 + $0x238] sm:$0xff]  ;;  %v6429_v46 = vld [vmem:[%s9976_s6 + $0x20] sm:$0xff] }
0x175f   : > { %5795 = vst.msk [vmem:[#allocation7 + $0x8] sm:$0x1e] %vm2160_vm7, %v5793_v55  ;;  %v9380_v55 = vpack.c.bf16 %v7637_v29, %v7635_v50  ;;  %v9382_v28 = vpack.c.bf16 %v7642_v52, %v7640_v54  ;;  %v7751_v29 = vld [vmem:[%s11867_s10 + $0x590] sm:$0xff]  ;;  %v7754_v52 = vld [vmem:[%s11867_s10 + $0x5a8] sm:$0xff]  ;;  %vm5803_vm7 = vcmask 254976  }
0x1760   : > { %v7657_v54 = vld [vmem:[%s11867_s10 + $0x2b0] sm:$0xff] }
0x1765   : > { %v5796_v58 = vld [vmem:[#allocation7] sm:$0x3f] }
0x1766   : > { %v5797_v60 = vld [vmem:[#allocation7 + $0x8] sm:$0x3f]  ;;  %v11539_v62 = vmax.f32 %v5796_v58, 0.0 }
0x1767   : > { %v5799_v61 = vmax.f32 %v5797_v60, 0.0  ;;  %v7735_v58 = vld [vmem:[%s11867_s10 + $0x510] sm:$0xff] }
0x1768   : > { %v5991_v11 = vrot.slane %v11539_v62, 1  ;;  %v7641_v60 = vld [vmem:[%s11867_s10 + $0x230] sm:$0xff]  ;;  %v9476_v5 = vpack.c.bf16 %v7735_v58, %v7733_v57  ;;  %v9400_v58 = vpack.c.bf16 %v7657_v54, %v7655_v51  ;;  %v7796_v54 = vld [vmem:[%s9976_s6 + $0x178] sm:$0xff] }
0x1769   : > { %7618 = vmatprep.mubr.msk.f32.mxu0 %vm2213_vm8, %v5799_v61  ;;  %v5992_v23 = vrot.slane %v5799_v61, 1  ;;  %v6298_v19 = vrot.slane %v5799_v61, 2  ;;  %v7738_v61 = vld [vmem:[%s11867_s10 + $0x528] sm:$0xff] }
0x176a   : > { %5922 = vmatmul.mubr.f32.vlgmr.msra.gmra.mrb[24].mxu0 %v11539_v62 }
0x176b   : > { %9365 = vmatpush1.bf16.msra.mxu0 %v9364_v63  ;;  %7667 = vmatprep.mubr.msk.f32.mxu0 %vm2213_vm8, %v5992_v23  ;;  %v7740_v63 = vld [vmem:[%s11867_s10 + $0x538] sm:$0xff] }
0x176c   : > { %7716 = vmatprep.mubr.msk.f32.mxu1 %vm2213_vm8, %v5992_v23  ;;  %9367 = vmatprep.subr.bf16.mxu0 %v9366_v6  ;;  %v9384_v6 = vpack.c.bf16 %v7641_v60, %v7639_v59  ;;  %v9478_v47 = vpack.c.bf16 %v7740_v63, %v7738_v61  ;;  %v7643_v23 = vld [vmem:[%s11867_s10 + $0x240] sm:$0xff]  ;;  %v7755_v60 = vld [vmem:[%s11867_s10 + $0x5b0] sm:$0xff] }
0x176d   : > { %6229 = vmatmul.mubr.f32.vlgmr.msra.gmra.mrb[20].mxu1 %v5991_v11  ;;  %v9388_v18 = vpack.c.bf16 %v7645_v10, %v7643_v23  ;;  %v7659_v61 = vld [vmem:[%s11867_s10 + $0x2c0] sm:$0xff]  ;;  %v7759_v10 = vld [vmem:[%s11867_s10 + $0x5d0] sm:$0xff] }
0x176e   : > { %9461 = vmatpush1.bf16.msra.mxu1 %v9460_v12  ;;  %7765 = vmatprep.mubr.msk.f32.mxu1 %vm2213_vm8, %v6298_v19  ;;  %v7742_v12 = vld [vmem:[%s11867_s10 + $0x548] sm:$0xff]  ;;  %v9404_v8 = vpack.c.bf16 %v7661_v2, %v7659_v61  ;;  %v7800_v2 = vld [vmem:[%s9976_s6 + $0x198] sm:$0xff] }
0x176f   : > { %9369 = vmatpush1.bf16.msra.mxu0 %v9368_v20  ;;  %9463 = vmatprep.subr.bf16.mxu1 %v9462_v15  ;;  %v7744_v20 = vld [vmem:[%s11867_s10 + $0x558] sm:$0xff]  ;;  %v7648_v15 = vld [vmem:[%s11867_s10 + $0x268] sm:$0xff] }
0x1770   : > { %9371 = vmatprep.subr.bf16.mxu0 %v9370_v22  ;;  %v9482_v19 = vpack.c.bf16 %v7744_v20, %v7742_v12  ;;  %v7741_v22 = vld [vmem:[%s11867_s10 + $0x540] sm:$0xff]  ;;  %v9390_v26 = vpack.c.bf16 %v7650_v16, %v7648_v15  ;;  %v7665_v15 = vld [vmem:[%s11867_s10 + $0x2f0] sm:$0xff]  ;;  %v7762_v16 = vld [vmem:[%s11867_s10 + $0x5e8] sm:$0xff] }
0x1771   : > { %v9484_v40 = vpack.c.bf16 %v7743_v24, %v7741_v22  ;;  %v7663_v12 = vld [vmem:[%s11867_s10 + $0x2e0] sm:$0xff] }
0x1772   : > { %9465 = vmatpush1.bf16.msra.mxu1 %v9464_v36  ;;  %v7748_v36 = vld [vmem:[%s11867_s10 + $0x578] sm:$0xff]  ;;  %v7761_v24 = vld [vmem:[%s11867_s10 + $0x5e0] sm:$0xff] }
0x1773   : > { %9373 = vmatpush1.bf16.msra.mxu0 %v9372_v38  ;;  %9467 = vmatprep.subr.bf16.mxu1 %v9466_v39  ;;  %v7652_v38 = vld [vmem:[%s11867_s10 + $0x288] sm:$0xff]  ;;  %v7654_v39 = vld [vmem:[%s11867_s10 + $0x298] sm:$0xff]  ;;  %v9486_v42 = vpack.c.bf16 %v7748_v36, %v7746_v35  ;;  %v9504_v35 = vpack.c.bf16 %v7763_v25, %v7761_v24 }
0x1774   : > { %9375 = vmatprep.subr.bf16.mxu0 %v9374_v7  ;;  %v7745_v7 = vld [vmem:[%s11867_s10 + $0x560] sm:$0xff]  ;;  %v9394_v0 = vpack.c.bf16 %v7654_v39, %v7652_v38  ;;  %v7790_v39 = vld [vmem:[%s9976_s6 + $0x148] sm:$0xff] }
0x1775   : > { %v9488_v3 = vpack.c.bf16 %v7747_v44, %v7745_v7  ;;  %v7789_v38 = vld [vmem:[%s9976_s6 + $0x140] sm:$0xff]  ;;  %v6297_v7 = vrot.slane %v11539_v62, 2  ;;  %v7806_v25 = vld [vmem:[%s9976_s6 + $0x1c8] sm:$0xff] }
0x1776   : > { %9469 = vmatpush1.bf16.msra.mxu1 %v9468_v9  ;;  %v7752_v9 = vld [vmem:[%s11867_s10 + $0x598] sm:$0xff]  ;;  %v7793_v62 = vld [vmem:[%s9976_s6 + $0x160] sm:$0xff] }
0x1777   : > { %9377 = vmatpush1.bf16.msra.mxu0 %v9376_v14  ;;  %9471 = vmatprep.subr.bf16.mxu1 %v9470_v13  ;;  %v7656_v14 = vld [vmem:[%s11867_s10 + $0x2a8] sm:$0xff]  ;;  %v7658_v13 = vld [vmem:[%s11867_s10 + $0x2b8] sm:$0xff]  ;;  %v9490_v50 = vpack.c.bf16 %v7752_v9, %v7750_v1 }
0x1778   : > { %9379 = vmatprep.subr.bf16.mxu0 %v9378_v32  ;;  %v7749_v32 = vld [vmem:[%s11867_s10 + $0x580] sm:$0xff]  ;;  %v9398_v37 = vpack.c.bf16 %v7658_v13, %v7656_v14  ;;  %v6430_v1 = vld [vmem:[%s9976_s6 + $0x28] sm:$0xff]  ;;  %v6431_v13 = vld [vmem:[%s9976_s6 + $0x30] sm:$0xff] }
0x1779   : > { %v9492_v57 = vpack.c.bf16 %v7751_v29, %v7749_v32  ;;  %v9513_v9 = vpack.c.bf16 %v6430_v1, %v6429_v46  ;;  %v7794_v14 = vld [vmem:[%s9976_s6 + $0x168] sm:$0xff]  ;;  %v6433_v32 = vld [vmem:[%s9976_s6 + $0x40] sm:$0xff] }
0x177a   : > { %9473 = vmatpush1.bf16.msra.mxu1 %v9472_v53  ;;  %v7756_v53 = vld [vmem:[%s11867_s10 + $0x5b8] sm:$0xff]  ;;  %v6434_v29 = vld [vmem:[%s9976_s6 + $0x48] sm:$0xff] }
0x177b   : > { %9381 = vmatpush1.bf16.msra.mxu0 %v9380_v55  ;;  %9475 = vmatprep.subr.bf16.mxu1 %v9474_v56  ;;  %v7660_v55 = vld [vmem:[%s11867_s10 + $0x2c8] sm:$0xff]  ;;  %v7662_v56 = vld [vmem:[%s11867_s10 + $0x2d8] sm:$0xff]  ;;  %v9494_v59 = vpack.c.bf16 %v7756_v53, %v7754_v52  ;;  %v9519_v51 = vpack.c.bf16 %v6434_v29, %v6433_v32  ;;  %v6435_v53 = vld [vmem:[%s9976_s6 + $0x50] sm:$0xff] }
0x177c   : > { %9383 = vmatprep.subr.bf16.mxu0 %v9382_v28  ;;  %v7753_v28 = vld [vmem:[%s11867_s10 + $0x5a0] sm:$0xff]  ;;  %v9402_v63 = vpack.c.bf16 %v7662_v56, %v7660_v55  ;;  %v6436_v55 = vld [vmem:[%s9976_s6 + $0x58] sm:$0xff] }
0x177d   : > { %v9496_v27 = vpack.c.bf16 %v7755_v60, %v7753_v28  ;;  %v9522_v56 = vpack.c.bf16 %v6436_v55, %v6435_v53  ;;  %v6437_v28 = vld [vmem:[%s9976_s6 + $0x60] sm:$0xff]  ;;  %v6438_v60 = vld [vmem:[%s9976_s6 + $0x68] sm:$0xff] }
0x177e   : > { %9477 = vmatpush1.bf16.msra.mxu1 %v9476_v5  ;;  %v7760_v5 = vld [vmem:[%s11867_s10 + $0x5d8] sm:$0xff]  ;;  %v9525_v61 = vpack.c.bf16 %v6438_v60, %v6437_v28  ;;  %v7769_v28 = vld [vmem:[%s9976_s6 + $0xa8] sm:$0xff] }
0x177f   : > { %9385 = vmatpush1.bf16.msra.mxu0 %v9384_v6  ;;  %9479 = vmatprep.subr.bf16.mxu1 %v9478_v47  ;;  %v7664_v6 = vld [vmem:[%s11867_s10 + $0x2e8] sm:$0xff]  ;;  %v7666_v47 = vld [vmem:[%s11867_s10 + $0x2f8] sm:$0xff]  ;;  %v9498_v23 = vpack.c.bf16 %v7760_v5, %v7758_v4  ;;  %v6439_v5 = vld [vmem:[%s9976_s6 + $0x70] sm:$0xff] }
0x1780   : > { %9387 = vmatprep.subr.bf16.mxu0 %v9386_v21  ;;  %v7757_v21 = vld [vmem:[%s11867_s10 + $0x5c0] sm:$0xff]  ;;  %v9406_v20 = vpack.c.bf16 %v7666_v47, %v7664_v6  ;;  %v6440_v6 = vld [vmem:[%s9976_s6 + $0x78] sm:$0xff] }
0x1781   : > { %v9528_v47 = vpack.c.bf16 %v6440_v6, %v6439_v5  ;;  %v7812_v5 = vld [vmem:[%s9976_s6 + $0x1e8] sm:$0xff] }
0x1782   : > { %9481 = vmatpush1.bf16.msra.mxu1 %v9480_v17  ;;  %v7764_v17 = vld [vmem:[%s11867_s10 + $0x5f8] sm:$0xff] }
0x1783   : > { %9389 = vmatpush1.bf16.msra.mxu0 %v9388_v18  ;;  %9483 = vmatprep.subr.bf16.mxu1 %v9482_v19  ;;  %v9500_v18 = vpack.c.bf16 %v7759_v10, %v7757_v21  ;;  %v9408_v19 = vpack.c.bf16 %v7665_v15, %v7663_v12  ;;  %v9502_v22 = vpack.c.bf16 %v7764_v17, %v7762_v16  ;;  %v6441_v21 = vld [vmem:[%s9976_s6 + $0x80] sm:$0xff]  ;;  %v6442_v10 = vld [vmem:[%s9976_s6 + $0x88] sm:$0xff]  ;;  %v7804_v15 = vld [vmem:[%s9976_s6 + $0x1b8] sm:$0xff] }
0x1784   : > { %9391 = vmatprep.subr.bf16.mxu0 %v9390_v26  ;;  %v6425_v26 = vld [vmem:[%s9976_s6] sm:$0xff]  ;;  %v9531_v12 = vpack.c.bf16 %v6442_v10, %v6441_v21  ;;  %v9748_v16 = vld [vmem:[#allocation8] sm:$0xff] }
0x1785   : > { %v9507_v36 = vpack.c.bf16 %v6426_v30, %v6425_v26  ;;  %5804 = vst.msk [vmem:[#allocation8 + $0x18] sm:$0x3] %vm5803_vm7, %v9748_v16  ;;  %v7807_v30 = vld [vmem:[%s9976_s6 + $0x1d0] sm:$0xff] }
0x1786   : > { %9485 = vmatpush1.bf16.msra.mxu1 %v9484_v40  ;;  %v6427_v40 = vld [vmem:[%s9976_s6 + $0x10] sm:$0xff] }
0x1787   : > { %9393 = vmatpush1.bf16.msra.mxu0 %v9392_v41  ;;  %9487 = vmatprep.subr.bf16.mxu1 %v9486_v42  ;;  %v6428_v41 = vld [vmem:[%s9976_s6 + $0x18] sm:$0xff]  ;;  %v9567_v42 = vpack.c.bf16 %v7790_v39, %v7789_v38  ;;  %v5805_v38 = vld [vmem:[%s11870_s2] sm:$0x3] }
0x1788   : > { %9395 = vmatprep.subr.bf16.mxu0 %v9394_v0  ;;  %v9510_v44 = vpack.c.bf16 %v6428_v41, %v6427_v40  ;;  %v7792_v0 = vld [vmem:[%s9976_s6 + $0x158] sm:$0xff]  ;;  %v5932_v39 = vrot.slane %v5805_v38, %v10160_v31  ;;  %v6114_v40 = vld [vmem:[%s11870_s2] sm:$0x3]  ;;  %v5936_v41 = vrot.slane %v5805_v38, %v10163_v33  ;;  %v7816_v38 = vld [vmem:[%s9976_s6 + $0x208] sm:$0xff] }
0x178a   : > { %9489 = vmatpush1.bf16.msra.mxu1 %v9488_v3  ;;  %v6432_v3 = vld [vmem:[%s9976_s6 + $0x38] sm:$0xff] }
0x178b   : > { %9397 = vmatpush1.bf16.msra.mxu0 %v9396_v48  ;;  %9491 = vmatprep.subr.bf16.mxu1 %v9490_v50  ;;  %v9573_v48 = vpack.c.bf16 %v7794_v14, %v7793_v62  ;;  %v9516_v50 = vpack.c.bf16 %v6432_v3, %v6431_v13 }
0x178c   : > { %9399 = vmatprep.subr.bf16.mxu0 %v9398_v37  ;;  %v7795_v37 = vld [vmem:[%s9976_s6 + $0x170] sm:$0xff] }
0x178d   : > { %v9576_v52 = vpack.c.bf16 %v7796_v54, %v7795_v37 }
0x178e   : > { %9493 = vmatpush1.bf16.msra.mxu1 %v9492_v57  ;;  %v7797_v57 = vld [vmem:[%s9976_s6 + $0x180] sm:$0xff] }
0x178f   : > { %9401 = vmatpush1.bf16.msra.mxu0 %v9400_v58  ;;  %9495 = vmatprep.subr.bf16.mxu1 %v9494_v59  ;;  %v7798_v58 = vld [vmem:[%s9976_s6 + $0x188] sm:$0xff] }
0x1790   : > { %9403 = vmatprep.subr.bf16.mxu0 %v9402_v63  ;;  %v9579_v59 = vpack.c.bf16 %v7798_v58, %v7797_v57  ;;  %v7799_v63 = vld [vmem:[%s9976_s6 + $0x190] sm:$0xff] }
0x1791   : > { %v9582_v4 = vpack.c.bf16 %v7800_v2, %v7799_v63 }
0x1792   : > { %9497 = vmatpush1.bf16.msra.mxu1 %v9496_v27  ;;  %v7801_v27 = vld [vmem:[%s9976_s6 + $0x1a0] sm:$0xff] }
0x1793   : > { %9405 = vmatpush1.bf16.msra.mxu0 %v9404_v8  ;;  %9499 = vmatprep.subr.bf16.mxu1 %v9498_v23  ;;  %v7802_v8 = vld [vmem:[%s9976_s6 + $0x1a8] sm:$0xff] }
0x1794   : > { %9407 = vmatprep.subr.bf16.mxu0 %v9406_v20  ;;  %v9585_v23 = vpack.c.bf16 %v7802_v8, %v7801_v27  ;;  %v7803_v20 = vld [vmem:[%s9976_s6 + $0x1b0] sm:$0xff] }
0x1795   : > { %v9588_v17 = vpack.c.bf16 %v7804_v15, %v7803_v20  ;;  %v7772_v20 = vld [vmem:[%s9976_s6 + $0xc0] sm:$0xff]  ;;  %v7773_v15 = vld [vmem:[%s9976_s6 + $0xc8] sm:$0xff] }
0x1796   : > { %9501 = vmatpush1.bf16.msra.mxu1 %v9500_v18  ;;  %v6443_v18 = vld [vmem:[%s9976_s6 + $0x90] sm:$0xff] }
0x1797   : > { %9409 = vmatpush1.bf16.msra.mxu0 %v9408_v19  ;;  %9503 = vmatprep.subr.bf16.mxu1 %v9502_v22  ;;  %v6444_v19 = vld [vmem:[%s9976_s6 + $0x98] sm:$0xff]  ;;  %v7805_v22 = vld [vmem:[%s9976_s6 + $0x1c0] sm:$0xff] }
0x1798   : > { %9506 = vmatprep.subr.bf16.mxu0 %v9796_v34  ;;  %v9534_v24 = vpack.c.bf16 %v6444_v19, %v6443_v18  ;;  %v9591_v26 = vpack.c.bf16 %v7806_v25, %v7805_v22  ;;  %v7813_v19 = vld [vmem:[%s9976_s6 + $0x1f0] sm:$0xff]  ;;  %v7814_v22 = vld [vmem:[%s9976_s6 + $0x1f8] sm:$0xff]  ;;  %v9543_v25 = vpack.c.bf16 %v7773_v15, %v7772_v20 }
0x179a   : > { %9505 = vmatpush1.bf16.msra.mxu1 %v9504_v35  ;;  %6061 = vmatmul.mubr.f32.vlgmr.msra.gmra.mrb[24].mxu0 %v5991_v11  ;;  %v9570_v11 = vpack.c.bf16 %v7792_v0, %v7791_v45  ;;  %v7808_v35 = vld [vmem:[%s9976_s6 + $0x1d8] sm:$0xff]  ;;  %v6243_v0 = vrot.slane %v6114_v40, %v10163_v33 }
0x179b   : > { %9508 = vmatpush1.bf16.msra.mxu0 %v9507_v36  ;;  %9566 = vmatprep.subr.bf16.mxu1 %v9796_v34  ;;  %v9594_v36 = vpack.c.bf16 %v7808_v35, %v7807_v30  ;;  %v7774_v30 = vld [vmem:[%s9976_s6 + $0xd0] sm:$0xff]  ;;  %v7775_v35 = vld [vmem:[%s9976_s6 + $0xd8] sm:$0xff] }
0x179c   : > { %9509 = vmatprep.subr.bf16.mxu0 %v9796_v34 }
0x179d   : > { %6367 = vmatmul.mubr.f32.vlgmr.msra.gmra.mrb[20].mxu1 %v6297_v7  ;;  %v6239_v7 = vrot.slane %v6114_v40, %v10160_v31 }
0x179e   : > { %9568 = vmatpush1.bf16.msra.mxu1 %v9567_v42 }
0x179f   : > { %9511 = vmatpush1.bf16.msra.mxu0 %v9510_v44  ;;  %9569 = vmatprep.subr.bf16.mxu1 %v9796_v34 }
0x17a0   : > { %9512 = vmatprep.subr.bf16.mxu0 %v9796_v34 }
0x17a2   : > { %9571 = vmatpush1.bf16.msra.mxu1 %v9570_v11 }
0x17a3   : > { %9514 = vmatpush1.bf16.msra.mxu0 %v9513_v9  ;;  %9572 = vmatprep.subr.bf16.mxu1 %v9796_v34 }
0x17a4   : > { %9515 = vmatprep.subr.bf16.mxu0 %v9796_v34 }
0x17a6   : > { %9574 = vmatpush1.bf16.msra.mxu1 %v9573_v48 }
0x17a7   : > { %9517 = vmatpush1.bf16.msra.mxu0 %v9516_v50  ;;  %9575 = vmatprep.subr.bf16.mxu1 %v9796_v34 }
0x17a8   : > { %9518 = vmatprep.subr.bf16.mxu0 %v9796_v34 }
0x17aa   : > { %9577 = vmatpush1.bf16.msra.mxu1 %v9576_v52 }
0x17ab   : > { %9520 = vmatpush1.bf16.msra.mxu0 %v9519_v51  ;;  %9578 = vmatprep.subr.bf16.mxu1 %v9796_v34 }
0x17ac   : > { %9521 = vmatprep.subr.bf16.mxu0 %v9796_v34 }
0x17ae   : > { %9580 = vmatpush1.bf16.msra.mxu1 %v9579_v59  ;;  %v7768_v59 = vld [vmem:[%s9976_s6 + $0xa0] sm:$0xff] }
0x17af   : > { %9523 = vmatpush1.bf16.msra.mxu0 %v9522_v56  ;;  %9581 = vmatprep.subr.bf16.mxu1 %v9796_v34  ;;  %v9537_v60 = vpack.c.bf16 %v7769_v28, %v7768_v59  ;;  %v7786_v28 = vld [vmem:[%s9976_s6 + $0x130] sm:$0xff] }
0x17b0   : > { %9524 = vmatprep.subr.bf16.mxu0 %v9796_v34 }
0x17b2   : > { %9583 = vmatpush1.bf16.msra.mxu1 %v9582_v4  ;;  %v7811_v4 = vld [vmem:[%s9976_s6 + $0x1e0] sm:$0xff] }
0x17b3   : > { %9526 = vmatpush1.bf16.msra.mxu0 %v9525_v61  ;;  %9584 = vmatprep.subr.bf16.mxu1 %v9796_v34  ;;  %v7770_v61 = vld [vmem:[%s9976_s6 + $0xb0] sm:$0xff] }
0x17b4   : > { %9527 = vmatprep.subr.bf16.mxu0 %v9796_v34 }
0x17b6   : > { %9586 = vmatpush1.bf16.msra.mxu1 %v9585_v23 }
0x17b7   : > { %9529 = vmatpush1.bf16.msra.mxu0 %v9528_v47  ;;  %9587 = vmatprep.subr.bf16.mxu1 %v9796_v34 }
0x17b8   : > { %9530 = vmatprep.subr.bf16.mxu0 %v9796_v34 }
0x17ba   : > { %9589 = vmatpush1.bf16.msra.mxu1 %v9588_v17 }
0x17bb   : > { %9532 = vmatpush1.bf16.msra.mxu0 %v9531_v12  ;;  %9590 = vmatprep.subr.bf16.mxu1 %v9796_v34  ;;  %v9597_v12 = vpack.c.bf16 %v7812_v5, %v7811_v4  ;;  %v7829_v5 = vld [vmem:[%s9976_s6 + $0x270] sm:$0xff] }
0x17bc   : > { %9533 = vmatprep.subr.bf16.mxu0 %v9796_v34 }
0x17be   : > { %9592 = vmatpush1.bf16.msra.mxu1 %v9591_v26  ;;  %v9600_v26 = vpack.c.bf16 %v7814_v22, %v7813_v19 }
0x17bf   : > { %9535 = vmatpush1.bf16.msra.mxu0 %v9534_v24  ;;  %9593 = vmatprep.subr.bf16.mxu1 %v9796_v34 }
0x17c0   : > { %9536 = vmatprep.subr.bf16.mxu0 %v9796_v34 }
0x17c2   : > { %9595 = vmatpush1.bf16.msra.mxu1 %v9594_v36  ;;  %v7815_v36 = vld [vmem:[%s9976_s6 + $0x200] sm:$0xff] }
0x17c3   : > { %9596 = vmatprep.subr.bf16.mxu1 %v9796_v34  ;;  %v9603_v40 = vpack.c.bf16 %v7816_v38, %v7815_v36 }
0x186d   : > { %v6062_v42 = vpop.f32.mrb[24].mxu0 }
0x186e   : > { %v9634_v44 = vadd.f32 %v6062_v42, %v5932_v39  ;;  %v6064_v45 = vpop.f32.mrb[25].mxu0  ;;  %v9546_v39 = vpack.c.bf16 %v7775_v35, %v7774_v30  ;;  %v7777_v42 = vld [vmem:[%s9976_s6 + $0xe8] sm:$0xff] }
0x186f   : > { %v9635_v46 = vadd.f32 %v6064_v45, %v5936_v41  ;;  %v7776_v41 = vld [vmem:[%s9976_s6 + $0xe0] sm:$0xff] }
0x1870   : > { %v6069_v1 = vmax.f32 %v9634_v44, 0.0  ;;  %v6368_v11 = vpop.f32.mrb[20].mxu1  ;;  %v7818_v44 = vld [vmem:[%s9976_s6 + $0x218] sm:$0xff]  ;;  %v9549_v45 = vpack.c.bf16 %v7777_v42, %v7776_v41 }
0x1871   : > { %v6070_v9 = vmax.f32 %v9635_v46, 0.0  ;;  %v9636_v62 = vadd.f32 %v6368_v11, %v6239_v7  ;;  %v6370_v14 = vpop.f32.mrb[21].mxu1  ;;  %v7817_v7 = vld [vmem:[%s9976_s6 + $0x210] sm:$0xff]  ;;  %v7819_v11 = vld [vmem:[%s9976_s6 + $0x220] sm:$0xff] }
0x1872   : > { %v9637_v13 = vadd.f32 %v6370_v14, %v6243_v0  ;;  %v9606_v0 = vpack.c.bf16 %v7818_v44, %v7817_v7  ;;  %v7778_v46 = vld [vmem:[%s9976_s6 + $0xf0] sm:$0xff] }
0x1873   : > { %v6073_v3 = vcombine.low %v6069_v1, %v6070_v9  ;;  %v6375_v48 = vmax.f32 %v9636_v62, 0.0  ;;  %v7779_v1 = vld [vmem:[%s9976_s6 + $0xf8] sm:$0xff]  ;;  %v7820_v9 = vld [vmem:[%s9976_s6 + $0x228] sm:$0xff] }
0x1874   : > { %v6376_v50 = vmax.f32 %v9637_v13, 0.0  ;;  %v9552_v62 = vpack.c.bf16 %v7779_v1, %v7778_v46  ;;  %v9609_v14 = vpack.c.bf16 %v7820_v9, %v7819_v11  ;;  %v7780_v13 = vld [vmem:[%s9976_s6 + $0x100] sm:$0xff] }
0x1875   : > { %v6080_v32 = vrot.slane %v6073_v3, %v10167_v43  ;;  %v7781_v3 = vld [vmem:[%s9976_s6 + $0x108] sm:$0xff] }
0x1876   : > { %v6379_v29 = vcombine.low %v6375_v48, %v6376_v50  ;;  %v7821_v48 = vld [vmem:[%s9976_s6 + $0x230] sm:$0xff]  ;;  %v7822_v50 = vld [vmem:[%s9976_s6 + $0x238] sm:$0xff] }
0x1877   : > { %v6087_v51 = vrot.slane %v6080_v32, %v10167_v43  ;;  %v6092_v31 = vcombine.high %v6080_v32, %v6080_v32  ;;  %v9555_v32 = vpack.c.bf16 %v7781_v3, %v7780_v13 }
0x1878   : > { %v6386_v37 = vrot.slane %v6379_v29, %v10167_v43  ;;  %v9612_v29 = vpack.c.bf16 %v7822_v50, %v7821_v48 }
0x1879   : > { %6090 = vst.msk [vmem:[#allocation8 + $0x1] ss:$8 sm:$0x3] %vm10172_vm5, %v6087_v51  ;;  %v6099_v33 = vrot.slane %v6092_v31, %v10167_v43  ;;  %v6104_v54 = vcombine.high %v6087_v51, %v6087_v51  ;;  %v7782_v51 = vld [vmem:[%s9976_s6 + $0x110] sm:$0xff]  ;;  %v7783_v31 = vld [vmem:[%s9976_s6 + $0x118] sm:$0xff] }
0x187a   : > { %v6393_v52 = vrot.slane %v6386_v37, %v10167_v43  ;;  %v6398_v53 = vcombine.high %v6386_v37, %v6386_v37  ;;  %v7823_v37 = vld [vmem:[%s9976_s6 + $0x240] sm:$0xff] }
0x187b   : > { %6102 = vst.msk [vmem:[#allocation8 + $0x3] ss:$8 sm:$0x3] %vm10172_vm5, %v6099_v33  ;;  %6107 = vst.msk [vmem:[#allocation8 + $0x5] ss:$8 sm:$0x3] %vm10172_vm5, %v6104_v54  ;;  %v6109_v55 = vcombine.high %v6099_v33, %v6099_v33  ;;  %v9558_v54 = vpack.c.bf16 %v7783_v31, %v7782_v51 }
0x187c   : > { %6396 = vst.msk [vmem:[#allocation8 + $0x2] ss:$8 sm:$0x3] %vm10172_vm5, %v6393_v52  ;;  %v6405_v56 = vrot.slane %v6398_v53, %v10167_v43  ;;  %v6410_v57 = vcombine.high %v6393_v52, %v6393_v52  ;;  %v7771_v43 = vld [vmem:[%s9976_s6 + $0xb8] sm:$0xff]  ;;  %v7824_v33 = vld [vmem:[%s9976_s6 + $0x248] sm:$0xff]  ;;  %v7784_v53 = vld [vmem:[%s9976_s6 + $0x120] sm:$0xff] }
0x187d   : > { %6112 = vst.msk [vmem:[#allocation8 + $0x7] ss:$8 sm:$0x3] %vm10172_vm5, %v6109_v55  ;;  %v9540_v49 = vpack.c.bf16 %v7771_v43, %v7770_v61  ;;  %v9615_v52 = vpack.c.bf16 %v7824_v33, %v7823_v37  ;;  %v7785_v55 = vld [vmem:[%s9976_s6 + $0x128] sm:$0xff]  ;;  %v7827_v61 = vld [vmem:[%s9976_s6 + $0x260] sm:$0xff] }
0x187e   : > { %6408 = vst.msk [vmem:[#allocation8 + $0x4] ss:$8 sm:$0x3] %vm10172_vm5, %v6405_v56  ;;  %6413 = vst.msk [vmem:[#allocation8 + $0x6] ss:$8 sm:$0x3] %vm10172_vm5, %v6410_v57  ;;  %v6415_v58 = vcombine.high %v6405_v56, %v6405_v56 }
0x187f   : > { %v7825_v56 = vld [vmem:[%s9976_s6 + $0x250] sm:$0xff]  ;;  %v7826_v57 = vld [vmem:[%s9976_s6 + $0x258] sm:$0xff]  ;;  %v7828_v43 = vld [vmem:[%s9976_s6 + $0x268] sm:$0xff] }
0x1880   : > { %6418 = vst.msk [vmem:[#allocation8 + $0x10] ss:$8 sm:$0x3] %vm10172_vm5, %v6415_v58  ;;  %v9561_v58 = vpack.c.bf16 %v7785_v55, %v7784_v53  ;;  %v9618_v59 = vpack.c.bf16 %v7826_v57, %v7825_v56  ;;  %v9621_v4 = vpack.c.bf16 %v7828_v43, %v7827_v61 }
0x1885   : > { %v6421_v63 = vld [vmem:[#allocation8 + $0x8] sm:$0xff]  ;;  %v11734_v2 = vld [vmem:[#allocation8] sm:$0xff] }
0x1886   : > { %7766 = vmatprep.mubr.msk.f32.mxu0 %vm1745_vm4, %v6421_v63  ;;  %v6552_v6 = vrot.slane %v6421_v63, 1  ;;  %v6549_v8 = vrot.slane %v11734_v2, 1  ;;  %v6755_v16 = vrot.slane %v6421_v63, 2 }
0x1887   : > { %6513 = vmatmul.mubr.f32.vlgmr.msra.gmra.mrb[26].mxu0 %v11734_v2  ;;  %v6423_v47 = vld [vmem:[#allocation8 + $0x18] sm:$0x3]  ;;  %v11740_v27 = vld [vmem:[#allocation8 + $0x10] sm:$0x3] }
0x1888   : > { %9538 = vmatpush1.bf16.msra.mxu0 %v9537_v60  ;;  %v6553_v23 = vrot.slane %v6423_v47, 1  ;;  %v6550_v21 = vrot.slane %v11740_v27, 1  ;;  %v6756_v10 = vrot.slane %v6423_v47, 2  ;;  %v7787_v60 = vld [vmem:[%s9976_s6 + $0x138] sm:$0xff]  ;;  %v6753_v47 = vrot.slane %v11740_v27, 2 }
0x1889   : > { %9539 = vmatprep.subr.bf16.mxu0 %v9796_v34  ;;  %v9564_v63 = vpack.c.bf16 %v7787_v60, %v7786_v28 }
0x188a   : > { %v6554_v17 = vsel %vm1367_vm2, %v6552_v6, %v6553_v23  ;;  %v11749_v18 = vsel %vm1367_vm2, %v6549_v8, %v6550_v21  ;;  %v6757_v24 = vsel %vm1193_vm0, %v6755_v16, %v6756_v10  ;;  %v7830_v6 = vld [vmem:[%s9976_s6 + $0x278] sm:$0xff]  ;;  %v6752_v8 = vrot.slane %v11734_v2, 2  ;;  %v7767_v21 = vld [vmem:[%s9981_s20] ss:$0 sm:$0xff] }
0x188b   : > { %7788 = vmatprep.mubr.msk.f32.mxu0 %vm1745_vm4, %v6554_v17  ;;  %7809 = vmatprep.mubr.msk.f32.mxu1 %vm1745_vm4, %v6554_v17  ;;  %vm6630_vm2 = vcmask 392192  }
0x188c   : > { %9541 = vmatpush1.bf16.msra.mxu0 %v9540_v49  ;;  %6719 = vmatmul.mubr.f32.vlgmr.msra.gmra.mrb[22].mxu1 %v11749_v18  ;;  %v9624_v49 = vpack.c.bf16 %v7830_v6, %v7829_v5  ;;  %v6754_v23 = vsel %vm1193_vm0, %v6752_v8, %v6753_v47 }
0x188d   : > { %9598 = vmatpush1.bf16.msra.mxu1 %v9597_v12  ;;  %7831 = vmatprep.mubr.msk.f32.mxu1 %vm1745_vm4, %v6757_v24 }
0x188e   : > { %9542 = vmatprep.subr.bf16.mxu0 %v9796_v34  ;;  %9599 = vmatprep.subr.bf16.mxu1 %v9796_v34 }
0x1890   : > { %9544 = vmatpush1.bf16.msra.mxu0 %v9543_v25 }
0x1891   : > { %9601 = vmatpush1.bf16.msra.mxu1 %v9600_v26  ;;  %9545 = vmatprep.subr.bf16.mxu0 %v9796_v34 }
0x1892   : > { %9602 = vmatprep.subr.bf16.mxu1 %v9796_v34 }
0x1894   : > { %9547 = vmatpush1.bf16.msra.mxu0 %v9546_v39 }
0x1895   : > { %9604 = vmatpush1.bf16.msra.mxu1 %v9603_v40  ;;  %9548 = vmatprep.subr.bf16.mxu0 %v9796_v34 }
0x1896   : > { %9605 = vmatprep.subr.bf16.mxu1 %v9796_v34 }
0x1898   : > { %9550 = vmatpush1.bf16.msra.mxu0 %v9549_v45 }
0x1899   : > { %9607 = vmatpush1.bf16.msra.mxu1 %v9606_v0  ;;  %9551 = vmatprep.subr.bf16.mxu0 %v9796_v34 }
0x189a   : > { %9608 = vmatprep.subr.bf16.mxu1 %v9796_v34 }
0x189c   : > { %9553 = vmatpush1.bf16.msra.mxu0 %v9552_v62 }
0x189d   : > { %9610 = vmatpush1.bf16.msra.mxu1 %v9609_v14  ;;  %9554 = vmatprep.subr.bf16.mxu0 %v9796_v34 }
0x189e   : > { %9611 = vmatprep.subr.bf16.mxu1 %v9796_v34 }
0x18a0   : > { %9556 = vmatpush1.bf16.msra.mxu0 %v9555_v32 }
0x18a1   : > { %9613 = vmatpush1.bf16.msra.mxu1 %v9612_v29  ;;  %9557 = vmatprep.subr.bf16.mxu0 %v9796_v34 }
0x18a2   : > { %9614 = vmatprep.subr.bf16.mxu1 %v9796_v34 }
0x18a4   : > { %9559 = vmatpush1.bf16.msra.mxu0 %v9558_v54 }
0x18a5   : > { %9616 = vmatpush1.bf16.msra.mxu1 %v9615_v52  ;;  %9560 = vmatprep.subr.bf16.mxu0 %v9796_v34 }
0x18a6   : > { %9617 = vmatprep.subr.bf16.mxu1 %v9796_v34 }
0x18a8   : > { %9562 = vmatpush1.bf16.msra.mxu0 %v9561_v58 }
0x18a9   : > { %9619 = vmatpush1.bf16.msra.mxu1 %v9618_v59  ;;  %9563 = vmatprep.subr.bf16.mxu0 %v9796_v34 }
0x18aa   : > { %9620 = vmatprep.subr.bf16.mxu1 %v9796_v34 }
0x18ac   : > { %9565 = vmatpush1.bf16.msra.mxu0 %v9564_v63 }
0x18ad   : > { %9622 = vmatpush1.bf16.msra.mxu1 %v9621_v4 }
0x18ae   : > { %9623 = vmatprep.subr.bf16.mxu1 %v9796_v34 }
0x18af   : > { %6623 = vmatmul.mubr.f32.vlgmr.msra.gmra.mrb[26].mxu0 %v11749_v18 }
0x18b1   : > { %9625 = vmatpush1.bf16.msra.mxu1 %v9624_v49 }
0x18b4   : > { %6826 = vmatmul.mubr.f32.vlgmr.msra.gmra.mrb[22].mxu1 %v6754_v23 }
0x1982   : > { %v6624_v10 = vpop.f32.mrb[26].mxu0 }
0x1983   : > { %v9638_v12 = vadd.f32 %v7767_v21, %v6624_v10  ;;  %v6626_v20 = vpop.f32.mrb[27].mxu0 }
0x1985   : > { %9741 = vtanh.f32 %v9638_v12 }
0x1987   : > { %v6827_v15 = vpop.f32.mrb[22].mxu1 }
0x1988   : > { %v9639_v16 = vadd.f32 %v7767_v21, %v6827_v15  ;;  %v6829_v34 = vpop.f32.mrb[23].mxu1 }
0x198a   : > { %9743 = vtanh.f32 %v9639_v16 }
0x198f   : > { %v9742_v17 = vpop.eup %9741 }
0x1990   : > { %6631 = vst.msk [vmem:[%s1152_s0] sm:$0xff] %vm6630_vm2, %v9742_v17 }
0x1994   : > { %v9744_v27 = vpop.eup %9743 }
0x1995   : > { %7832 = vst.msk [vmem:[%s1152_s0 + $0x8] sm:$0xff] %vm6630_vm2, %v9744_v27 }
0x1996 PF: > { %s86_s7 = sadd.s32 1, %s9755_s7  }
0x1997   : > { %p83_p4 = scmp.ge.s32.totalorder %s86_s7, 4  }
0x1999   :  { %85 = sbr.rel (!%p83_p4) target bundleno = 64 (0x40), region = 295 }

</bundles_post_ra>
